<compile_context>
chip_gen: v7x
topology: tpu7x:2x2x1
jax: 0.10.0
libtpu: 0.0.40
codegen_flags: <defaults>
</compile_context>

<pallas_src>
import jax
import jax.numpy as jnp
from jax.experimental import pallas as pl
from jax.experimental.pallas import tpu as pltpu


# ----------------------------- Pallas kernel ------------------------------- #
def _conv3x3_bn_relu_kernel(x_ref, w_ref, b_ref, o_ref):
    # x_ref: (H+2, W+2, Cin)  zero-padded NHWC image for one batch element
    # w_ref: (9, Cin, Cout)   conv weight, tap-major, BN scale pre-folded
    # b_ref: (1, Cout)        folded conv+BN bias
    # o_ref: (H*W, Cout)      flattened NHWC output (lane dim = Cout)
    Hp, Wp, Cin = x_ref.shape
    H, W = Hp - 2, Wp - 2
    Cout = o_ref.shape[-1]

    x = x_ref[...]                                   # hoist the load once
    acc = jnp.zeros((H * W, Cout), jnp.float32)
    for di in range(3):                              # 9 taps, fully unrolled
        for dj in range(3):
            x_win = x[di:di + H, dj:dj + W, :]       # (H, W, Cin) static slice
            x_mat = x_win.reshape(H * W, Cin)        # merge leading dims only
            acc = acc + jnp.dot(x_mat, w_ref[3 * di + dj],
                                preferred_element_type=jnp.float32)
    y = acc + b_ref[...]                             # (H*W, Cout) + (1, Cout)
    o_ref[...] = jnp.maximum(y, 0.0).astype(o_ref.dtype)


def _conv3x3_bn_relu(x_pad, w9, bias):
    """x_pad: (B, H+2, W+2, Cin) NHWC zero-padded; returns (B, H*W, Cout)."""
    B, Hp, Wp, Cin = x_pad.shape
    H, W = Hp - 2, Wp - 2
    N = H * W
    Cout = w9.shape[-1]
    esize = x_pad.dtype.itemsize

    cost = pl.CostEstimate(
        flops=2 * B * N * 9 * Cin * Cout,
        transcendentals=0,
        bytes_accessed=(x_pad.size + B * N * Cout + w9.size + bias.size) * esize,
    )

    return pl.pallas_call(
        _conv3x3_bn_relu_kernel,
        out_shape=jax.ShapeDtypeStruct((B, N, Cout), x_pad.dtype),
        grid_spec=pltpu.PrefetchScalarGridSpec(
            num_scalar_prefetch=0,
            grid=(B,),
            in_specs=[
                pl.BlockSpec((pl.Squeezed(), Hp, Wp, Cin), lambda b: (b, 0, 0, 0)),
                pl.BlockSpec((9, Cin, Cout), lambda b: (0, 0, 0)),
                pl.BlockSpec((1, Cout), lambda b: (0, 0)),
            ],
            out_specs=pl.BlockSpec((pl.Squeezed(), N, Cout), lambda b: (b, 0, 0)),
        ),
        compiler_params=pltpu.CompilerParams(
            dimension_semantics=("parallel",),
            vmem_limit_bytes=64 * 1024 * 1024,
        ),
        cost_estimate=cost,
    )(x_pad, w9, bias)


# ------------------------------ JAX wrapper -------------------------------- #
def _pixel_shuffle_nhwc(x, r=2):
    B, H, W, C = x.shape
    Co = C // (r * r)
    x = x.reshape(B, H, W, Co, r, r)
    x = jnp.transpose(x, (0, 1, 4, 2, 5, 3))         # (B, H, r, W, r, Co)
    return x.reshape(B, H * r, W * r, Co)


def _fold_bn(w, b, gamma, beta, mean, var, eps=1e-5):
    # w: (Cout, Cin, 3, 3) torch layout -> (9, Cin, Cout) with BN scale folded.
    scale = gamma * jax.lax.rsqrt(var + eps)                     # (Cout,)
    w9 = jnp.transpose(w, (2, 3, 1, 0)).reshape(9, w.shape[1], w.shape[0])
    w9 = w9 * scale[None, None, :]
    bias = ((b - mean) * scale + beta).reshape(1, -1)
    return w9, bias


@jax.jit
def last_conv(x, params):
    """LastConv.forward.  x: (B, in_ch, H, W) NCHW -> (B, in_ch//2, 4H, 4W)."""
    x = jnp.transpose(x, (0, 2, 3, 1))                           # NHWC once
    for (w, b, gamma, beta, mean, var) in params:                # two stages
        x = _pixel_shuffle_nhwc(x, 2)                            # free relayout
        B, H, W, _ = x.shape
        w9, bias = _fold_bn(w, b, gamma, beta, mean, var)
        x_pad = jnp.pad(x, ((0, 0), (1, 1), (1, 1), (0, 0)))     # halo in wrapper
        y = _conv3x3_bn_relu(x_pad, w9, bias)                    # (B, H*W, Cout)
        x = y.reshape(B, H, W, -1)
    return jnp.transpose(x, (0, 3, 1, 2))                        # back to NCHW


# ---------------------------- pure-JAX reference ---------------------------- #
def _pixel_shuffle_nchw(x, r=2):
    B, C, H, W = x.shape
    Co = C // (r * r)
    x = x.reshape(B, Co, r, r, H, W)
    x = jnp.transpose(x, (0, 1, 4, 2, 5, 3))
    return x.reshape(B, Co, H * r, W * r)


def last_conv_ref(x, params, eps=1e-5):
    for (w, b, gamma, beta, mean, var) in params:
        x = _pixel_shuffle_nchw(x, 2)
        y = jax.lax.conv_general_dilated(
            x, w, window_strides=(1, 1), padding=((1, 1), (1, 1)),
            dimension_numbers=("NCHW", "OIHW", "NCHW"),
            precision=jax.lax.Precision.HIGHEST)
        y = y + b[None, :, None, None]
        y = (y - mean[None, :, None, None]) * jax.lax.rsqrt(var + eps)[None, :, None, None]
        y = y * gamma[None, :, None, None] + beta[None, :, None, None]
        x = jnp.maximum(y, 0.0)
    return x


# ----------------------------------- test ----------------------------------- #
if __name__ == "__main__":
    key = jax.random.PRNGKey(0)
    ks = jax.random.split(key, 3)

    B, in_ch, H, W = 2, 32, 8, 8
    x = jax.random.normal(ks[0], (B, in_ch, H, W), jnp.float32)

    def make_stage(k, cin, cout):
        k = jax.random.split(k, 6)
        w = jax.random.normal(k[0], (cout, cin, 3, 3), jnp.float32) * 0.1
        b = jax.random.normal(k[1], (cout,), jnp.float32) * 0.1
        gamma = jax.random.uniform(k[2], (cout,), jnp.float32, 0.5, 1.5)
        beta = jax.random.normal(k[3], (cout,), jnp.float32) * 0.1
        mean = jax.random.normal(k[4], (cout,), jnp.float32) * 0.1
        var = jax.random.uniform(k[5], (cout,), jnp.float32, 0.5, 1.5)
        return (w, b, gamma, beta, mean, var)

    # Stage 1: PixelShuffle(2) -> Conv(in_ch//4 -> in_ch)
    # Stage 2: PixelShuffle(2) -> Conv(in_ch//4 -> in_ch//2)
    p1 = make_stage(ks[1], in_ch // 4, in_ch)
    p2 = make_stage(ks[2], in_ch // 4, in_ch // 2)
    params = (p1, p2)

    y = last_conv(x, params)
    y = jax.block_until_ready(y)

    y_ref = last_conv_ref(x, params)
    assert y.shape == (B, in_ch // 2, 4 * H, 4 * W), y.shape
    assert jnp.allclose(y, y_ref, atol=1e-3, rtol=1e-3), \
        f"mismatch vs reference, max abs diff {jnp.max(jnp.abs(y - y_ref))}"

    print("KERNEL_OK")
</pallas_src>

<mosaic_0001>
module attributes {stable_mosaic.version = 11 : i64} {
  func.func @_conv3x3_bn_relu_kernel(%arg0: i32, %arg1: memref<1x18x18x8xf32, #tpu.memory_space<vmem>>, %arg2: memref<9x8x32xf32, #tpu.memory_space<vmem>>, %arg3: memref<1x32xf32, #tpu.memory_space<vmem>>, %arg4: memref<1x256x32xf32, #tpu.memory_space<vmem>>) attributes {dimension_semantics = [#tpu.dimension_semantics<parallel>], iteration_bounds = array<i64: 2>, scalar_prefetch = 0 : i64, scratch_operands = 0 : i64, tpu.core_type = #tpu.core_type<tc>, window_params = [{transform_indices = @transform_0, window_bounds = array<i64: 1, 18, 18, 8>}, {pipeline_mode = #tpu.pipeline_mode<synchronous>, transform_indices = @transform_1, window_bounds = array<i64: 9, 8, 32>}, {pipeline_mode = #tpu.pipeline_mode<synchronous>, transform_indices = @transform_2, window_bounds = array<i64: 1, 32>}, {transform_indices = @transform_3, window_bounds = array<i64: 1, 256, 32>}]} {
    %c0 = arith.constant 0 : index
    %c0_0 = arith.constant 0 : index
    %c0_1 = arith.constant 0 : index
    %c0_2 = arith.constant 0 : index
    %0 = vector.load %arg1[%c0, %c0_0, %c0_1, %c0_2] : memref<1x18x18x8xf32, #tpu.memory_space<vmem>>, vector<1x18x18x8xf32>
    %1 = vector.shape_cast %0 : vector<1x18x18x8xf32> to vector<18x18x8xf32>
    %cst = arith.constant 0.000000e+00 : f32
    %2 = vector.broadcast %cst : f32 to vector<256x32xf32>
    %3 = vector.extract_strided_slice %1 {offsets = [0, 0, 0], sizes = [16, 16, 8], strides = [1, 1, 1]} : vector<18x18x8xf32> to vector<16x16x8xf32>
    %4 = vector.shape_cast %3 : vector<16x16x8xf32> to vector<256x8xf32>
    %c0_3 = arith.constant 0 : index
    %c0_4 = arith.constant 0 : index
    %c0_5 = arith.constant 0 : index
    %5 = vector.load %arg2[%c0_3, %c0_4, %c0_5] : memref<9x8x32xf32, #tpu.memory_space<vmem>>, vector<1x8x32xf32>
    %6 = vector.shape_cast %5 : vector<1x8x32xf32> to vector<8x32xf32>
    %cst_6 = arith.constant dense<0.000000e+00> : vector<256x32xf32>
    %7 = tpu.matmul %4, %6, %cst_6 {dimension_numbers = #tpu.dot_dimension_numbers<[1], [0], [0], [1], [0, 0, 1, 1], [], []>} : vector<256x8xf32>, vector<8x32xf32>, vector<256x32xf32> -> vector<256x32xf32>
    %8 = arith.addf %2, %7 : vector<256x32xf32>
    %9 = vector.extract_strided_slice %1 {offsets = [0, 1, 0], sizes = [16, 16, 8], strides = [1, 1, 1]} : vector<18x18x8xf32> to vector<16x16x8xf32>
    %10 = vector.shape_cast %9 : vector<16x16x8xf32> to vector<256x8xf32>
    %c1 = arith.constant 1 : index
    %c0_7 = arith.constant 0 : index
    %c0_8 = arith.constant 0 : index
    %11 = vector.load %arg2[%c1, %c0_7, %c0_8] : memref<9x8x32xf32, #tpu.memory_space<vmem>>, vector<1x8x32xf32>
    %12 = vector.shape_cast %11 : vector<1x8x32xf32> to vector<8x32xf32>
    %cst_9 = arith.constant dense<0.000000e+00> : vector<256x32xf32>
    %13 = tpu.matmul %10, %12, %cst_9 {dimension_numbers = #tpu.dot_dimension_numbers<[1], [0], [0], [1], [0, 0, 1, 1], [], []>} : vector<256x8xf32>, vector<8x32xf32>, vector<256x32xf32> -> vector<256x32xf32>
    %14 = arith.addf %8, %13 : vector<256x32xf32>
    %15 = vector.extract_strided_slice %1 {offsets = [0, 2, 0], sizes = [16, 16, 8], strides = [1, 1, 1]} : vector<18x18x8xf32> to vector<16x16x8xf32>
    %16 = vector.shape_cast %15 : vector<16x16x8xf32> to vector<256x8xf32>
    %c2 = arith.constant 2 : index
    %c0_10 = arith.constant 0 : index
    %c0_11 = arith.constant 0 : index
    %17 = vector.load %arg2[%c2, %c0_10, %c0_11] : memref<9x8x32xf32, #tpu.memory_space<vmem>>, vector<1x8x32xf32>
    %18 = vector.shape_cast %17 : vector<1x8x32xf32> to vector<8x32xf32>
    %cst_12 = arith.constant dense<0.000000e+00> : vector<256x32xf32>
    %19 = tpu.matmul %16, %18, %cst_12 {dimension_numbers = #tpu.dot_dimension_numbers<[1], [0], [0], [1], [0, 0, 1, 1], [], []>} : vector<256x8xf32>, vector<8x32xf32>, vector<256x32xf32> -> vector<256x32xf32>
    %20 = arith.addf %14, %19 : vector<256x32xf32>
    %21 = vector.extract_strided_slice %1 {offsets = [1, 0, 0], sizes = [16, 16, 8], strides = [1, 1, 1]} : vector<18x18x8xf32> to vector<16x16x8xf32>
    %22 = vector.shape_cast %21 : vector<16x16x8xf32> to vector<256x8xf32>
    %c3 = arith.constant 3 : index
    %c0_13 = arith.constant 0 : index
    %c0_14 = arith.constant 0 : index
    %23 = vector.load %arg2[%c3, %c0_13, %c0_14] : memref<9x8x32xf32, #tpu.memory_space<vmem>>, vector<1x8x32xf32>
    %24 = vector.shape_cast %23 : vector<1x8x32xf32> to vector<8x32xf32>
    %cst_15 = arith.constant dense<0.000000e+00> : vector<256x32xf32>
    %25 = tpu.matmul %22, %24, %cst_15 {dimension_numbers = #tpu.dot_dimension_numbers<[1], [0], [0], [1], [0, 0, 1, 1], [], []>} : vector<256x8xf32>, vector<8x32xf32>, vector<256x32xf32> -> vector<256x32xf32>
    %26 = arith.addf %20, %25 : vector<256x32xf32>
    %27 = vector.extract_strided_slice %1 {offsets = [1, 1, 0], sizes = [16, 16, 8], strides = [1, 1, 1]} : vector<18x18x8xf32> to vector<16x16x8xf32>
    %28 = vector.shape_cast %27 : vector<16x16x8xf32> to vector<256x8xf32>
    %c4 = arith.constant 4 : index
    %c0_16 = arith.constant 0 : index
    %c0_17 = arith.constant 0 : index
    %29 = vector.load %arg2[%c4, %c0_16, %c0_17] : memref<9x8x32xf32, #tpu.memory_space<vmem>>, vector<1x8x32xf32>
    %30 = vector.shape_cast %29 : vector<1x8x32xf32> to vector<8x32xf32>
    %cst_18 = arith.constant dense<0.000000e+00> : vector<256x32xf32>
    %31 = tpu.matmul %28, %30, %cst_18 {dimension_numbers = #tpu.dot_dimension_numbers<[1], [0], [0], [1], [0, 0, 1, 1], [], []>} : vector<256x8xf32>, vector<8x32xf32>, vector<256x32xf32> -> vector<256x32xf32>
    %32 = arith.addf %26, %31 : vector<256x32xf32>
    %33 = vector.extract_strided_slice %1 {offsets = [1, 2, 0], sizes = [16, 16, 8], strides = [1, 1, 1]} : vector<18x18x8xf32> to vector<16x16x8xf32>
    %34 = vector.shape_cast %33 : vector<16x16x8xf32> to vector<256x8xf32>
    %c5 = arith.constant 5 : index
    %c0_19 = arith.constant 0 : index
    %c0_20 = arith.constant 0 : index
    %35 = vector.load %arg2[%c5, %c0_19, %c0_20] : memref<9x8x32xf32, #tpu.memory_space<vmem>>, vector<1x8x32xf32>
    %36 = vector.shape_cast %35 : vector<1x8x32xf32> to vector<8x32xf32>
    %cst_21 = arith.constant dense<0.000000e+00> : vector<256x32xf32>
    %37 = tpu.matmul %34, %36, %cst_21 {dimension_numbers = #tpu.dot_dimension_numbers<[1], [0], [0], [1], [0, 0, 1, 1], [], []>} : vector<256x8xf32>, vector<8x32xf32>, vector<256x32xf32> -> vector<256x32xf32>
    %38 = arith.addf %32, %37 : vector<256x32xf32>
    %39 = vector.extract_strided_slice %1 {offsets = [2, 0, 0], sizes = [16, 16, 8], strides = [1, 1, 1]} : vector<18x18x8xf32> to vector<16x16x8xf32>
    %40 = vector.shape_cast %39 : vector<16x16x8xf32> to vector<256x8xf32>
    %c6 = arith.constant 6 : index
    %c0_22 = arith.constant 0 : index
    %c0_23 = arith.constant 0 : index
    %41 = vector.load %arg2[%c6, %c0_22, %c0_23] : memref<9x8x32xf32, #tpu.memory_space<vmem>>, vector<1x8x32xf32>
    %42 = vector.shape_cast %41 : vector<1x8x32xf32> to vector<8x32xf32>
    %cst_24 = arith.constant dense<0.000000e+00> : vector<256x32xf32>
    %43 = tpu.matmul %40, %42, %cst_24 {dimension_numbers = #tpu.dot_dimension_numbers<[1], [0], [0], [1], [0, 0, 1, 1], [], []>} : vector<256x8xf32>, vector<8x32xf32>, vector<256x32xf32> -> vector<256x32xf32>
    %44 = arith.addf %38, %43 : vector<256x32xf32>
    %45 = vector.extract_strided_slice %1 {offsets = [2, 1, 0], sizes = [16, 16, 8], strides = [1, 1, 1]} : vector<18x18x8xf32> to vector<16x16x8xf32>
    %46 = vector.shape_cast %45 : vector<16x16x8xf32> to vector<256x8xf32>
    %c7 = arith.constant 7 : index
    %c0_25 = arith.constant 0 : index
    %c0_26 = arith.constant 0 : index
    %47 = vector.load %arg2[%c7, %c0_25, %c0_26] : memref<9x8x32xf32, #tpu.memory_space<vmem>>, vector<1x8x32xf32>
    %48 = vector.shape_cast %47 : vector<1x8x32xf32> to vector<8x32xf32>
    %cst_27 = arith.constant dense<0.000000e+00> : vector<256x32xf32>
    %49 = tpu.matmul %46, %48, %cst_27 {dimension_numbers = #tpu.dot_dimension_numbers<[1], [0], [0], [1], [0, 0, 1, 1], [], []>} : vector<256x8xf32>, vector<8x32xf32>, vector<256x32xf32> -> vector<256x32xf32>
    %50 = arith.addf %44, %49 : vector<256x32xf32>
    %51 = vector.extract_strided_slice %1 {offsets = [2, 2, 0], sizes = [16, 16, 8], strides = [1, 1, 1]} : vector<18x18x8xf32> to vector<16x16x8xf32>
    %52 = vector.shape_cast %51 : vector<16x16x8xf32> to vector<256x8xf32>
    %c8 = arith.constant 8 : index
    %c0_28 = arith.constant 0 : index
    %c0_29 = arith.constant 0 : index
    %53 = vector.load %arg2[%c8, %c0_28, %c0_29] : memref<9x8x32xf32, #tpu.memory_space<vmem>>, vector<1x8x32xf32>
    %54 = vector.shape_cast %53 : vector<1x8x32xf32> to vector<8x32xf32>
    %cst_30 = arith.constant dense<0.000000e+00> : vector<256x32xf32>
    %55 = tpu.matmul %52, %54, %cst_30 {dimension_numbers = #tpu.dot_dimension_numbers<[1], [0], [0], [1], [0, 0, 1, 1], [], []>} : vector<256x8xf32>, vector<8x32xf32>, vector<256x32xf32> -> vector<256x32xf32>
    %56 = arith.addf %50, %55 : vector<256x32xf32>
    %c0_31 = arith.constant 0 : index
    %c0_32 = arith.constant 0 : index
    %57 = vector.load %arg3[%c0_31, %c0_32] : memref<1x32xf32, #tpu.memory_space<vmem>>, vector<1x32xf32>
    %58 = vector.broadcast %57 : vector<1x32xf32> to vector<256x32xf32>
    %59 = arith.addf %56, %58 : vector<256x32xf32>
    %cst_33 = arith.constant 0.000000e+00 : f32
    %60 = vector.broadcast %cst_33 : f32 to vector<256x32xf32>
    %61 = arith.maximumf %59, %60 : vector<256x32xf32>
    %c0_34 = arith.constant 0 : index
    %c0_35 = arith.constant 0 : index
    %c0_36 = arith.constant 0 : index
    %62 = vector.load %arg4[%c0_34, %c0_35, %c0_36] : memref<1x256x32xf32, #tpu.memory_space<vmem>>, vector<1x256x32xf32>
    %63 = vector.shape_cast %62 : vector<1x256x32xf32> to vector<256x32xf32>
    %64 = vector.shape_cast %61 : vector<256x32xf32> to vector<1x256x32xf32>
    tpu.vector_store %arg4[%c0_34, %c0_35, %c0_36], %64 {strides = array<i32>} : memref<1x256x32xf32, #tpu.memory_space<vmem>>, vector<1x256x32xf32>,
    return
  }
  func.func @transform_0(%arg0: i32) -> (i32, i32, i32, i32) {
    %c0_i32 = arith.constant 0 : i32
    %c0_i32_0 = arith.constant 0 : i32
    %c0_i32_1 = arith.constant 0 : i32
    %c0_i32_2 = arith.constant 0 : i32
    return %arg0, %c0_i32, %c0_i32_0, %c0_i32_1 : i32, i32, i32, i32
  }
  func.func @transform_1(%arg0: i32) -> (i32, i32, i32) {
    %c0_i32 = arith.constant 0 : i32
    %c0_i32_0 = arith.constant 0 : i32
    %c0_i32_1 = arith.constant 0 : i32
    %c0_i32_2 = arith.constant 0 : i32
    return %c0_i32, %c0_i32_0, %c0_i32_1 : i32, i32, i32
  }
  func.func @transform_2(%arg0: i32) -> (i32, i32) {
    %c0_i32 = arith.constant 0 : i32
    %c0_i32_0 = arith.constant 0 : i32
    %c0_i32_1 = arith.constant 0 : i32
    return %c0_i32, %c0_i32_0 : i32, i32
  }
  func.func @transform_3(%arg0: i32) -> (i32, i32, i32) {
    %c0_i32 = arith.constant 0 : i32
    %c0_i32_0 = arith.constant 0 : i32
    %c0_i32_1 = arith.constant 0 : i32
    return %arg0, %c0_i32, %c0_i32_0 : i32, i32, i32
  }
}

module attributes {stable_mosaic.version = 11 : i64} {
  func.func @_conv3x3_bn_relu_kernel(%arg0: i32, %arg1: memref<1x34x34x8xf32, #tpu.memory_space<vmem>>, %arg2: memref<9x8x16xf32, #tpu.memory_space<vmem>>, %arg3: memref<1x16xf32, #tpu.memory_space<vmem>>, %arg4: memref<1x1024x16xf32, #tpu.memory_space<vmem>>) attributes {dimension_semantics = [#tpu.dimension_semantics<parallel>], iteration_bounds = array<i64: 2>, scalar_prefetch = 0 : i64, scratch_operands = 0 : i64, tpu.core_type = #tpu.core_type<tc>, window_params = [{transform_indices = @transform_0, window_bounds = array<i64: 1, 34, 34, 8>}, {pipeline_mode = #tpu.pipeline_mode<synchronous>, transform_indices = @transform_1, window_bounds = array<i64: 9, 8, 16>}, {pipeline_mode = #tpu.pipeline_mode<synchronous>, transform_indices = @transform_2, window_bounds = array<i64: 1, 16>}, {transform_indices = @transform_3, window_bounds = array<i64: 1, 1024, 16>}]} {
    %c0 = arith.constant 0 : index
    %c0_0 = arith.constant 0 : index
    %c0_1 = arith.constant 0 : index
    %c0_2 = arith.constant 0 : index
    %0 = vector.load %arg1[%c0, %c0_0, %c0_1, %c0_2] : memref<1x34x34x8xf32, #tpu.memory_space<vmem>>, vector<1x34x34x8xf32>
    %1 = vector.shape_cast %0 : vector<1x34x34x8xf32> to vector<34x34x8xf32>
    %cst = arith.constant 0.000000e+00 : f32
    %2 = vector.broadcast %cst : f32 to vector<1024x16xf32>
    %3 = vector.extract_strided_slice %1 {offsets = [0, 0, 0], sizes = [32, 32, 8], strides = [1, 1, 1]} : vector<34x34x8xf32> to vector<32x32x8xf32>
    %4 = vector.shape_cast %3 : vector<32x32x8xf32> to vector<1024x8xf32>
    %c0_3 = arith.constant 0 : index
    %c0_4 = arith.constant 0 : index
    %c0_5 = arith.constant 0 : index
    %5 = vector.load %arg2[%c0_3, %c0_4, %c0_5] : memref<9x8x16xf32, #tpu.memory_space<vmem>>, vector<1x8x16xf32>
    %6 = vector.shape_cast %5 : vector<1x8x16xf32> to vector<8x16xf32>
    %cst_6 = arith.constant dense<0.000000e+00> : vector<1024x16xf32>
    %7 = tpu.matmul %4, %6, %cst_6 {dimension_numbers = #tpu.dot_dimension_numbers<[1], [0], [0], [1], [0, 0, 1, 1], [], []>} : vector<1024x8xf32>, vector<8x16xf32>, vector<1024x16xf32> -> vector<1024x16xf32>
    %8 = arith.addf %2, %7 : vector<1024x16xf32>
    %9 = vector.extract_strided_slice %1 {offsets = [0, 1, 0], sizes = [32, 32, 8], strides = [1, 1, 1]} : vector<34x34x8xf32> to vector<32x32x8xf32>
    %10 = vector.shape_cast %9 : vector<32x32x8xf32> to vector<1024x8xf32>
    %c1 = arith.constant 1 : index
    %c0_7 = arith.constant 0 : index
    %c0_8 = arith.constant 0 : index
    %11 = vector.load %arg2[%c1, %c0_7, %c0_8] : memref<9x8x16xf32, #tpu.memory_space<vmem>>, vector<1x8x16xf32>
    %12 = vector.shape_cast %11 : vector<1x8x16xf32> to vector<8x16xf32>
    %cst_9 = arith.constant dense<0.000000e+00> : vector<1024x16xf32>
    %13 = tpu.matmul %10, %12, %cst_9 {dimension_numbers = #tpu.dot_dimension_numbers<[1], [0], [0], [1], [0, 0, 1, 1], [], []>} : vector<1024x8xf32>, vector<8x16xf32>, vector<1024x16xf32> -> vector<1024x16xf32>
    %14 = arith.addf %8, %13 : vector<1024x16xf32>
    %15 = vector.extract_strided_slice %1 {offsets = [0, 2, 0], sizes = [32, 32, 8], strides = [1, 1, 1]} : vector<34x34x8xf32> to vector<32x32x8xf32>
    %16 = vector.shape_cast %15 : vector<32x32x8xf32> to vector<1024x8xf32>
    %c2 = arith.constant 2 : index
    %c0_10 = arith.constant 0 : index
    %c0_11 = arith.constant 0 : index
    %17 = vector.load %arg2[%c2, %c0_10, %c0_11] : memref<9x8x16xf32, #tpu.memory_space<vmem>>, vector<1x8x16xf32>
    %18 = vector.shape_cast %17 : vector<1x8x16xf32> to vector<8x16xf32>
    %cst_12 = arith.constant dense<0.000000e+00> : vector<1024x16xf32>
    %19 = tpu.matmul %16, %18, %cst_12 {dimension_numbers = #tpu.dot_dimension_numbers<[1], [0], [0], [1], [0, 0, 1, 1], [], []>} : vector<1024x8xf32>, vector<8x16xf32>, vector<1024x16xf32> -> vector<1024x16xf32>
    %20 = arith.addf %14, %19 : vector<1024x16xf32>
    %21 = vector.extract_strided_slice %1 {offsets = [1, 0, 0], sizes = [32, 32, 8], strides = [1, 1, 1]} : vector<34x34x8xf32> to vector<32x32x8xf32>
    %22 = vector.shape_cast %21 : vector<32x32x8xf32> to vector<1024x8xf32>
    %c3 = arith.constant 3 : index
    %c0_13 = arith.constant 0 : index
    %c0_14 = arith.constant 0 : index
    %23 = vector.load %arg2[%c3, %c0_13, %c0_14] : memref<9x8x16xf32, #tpu.memory_space<vmem>>, vector<1x8x16xf32>
    %24 = vector.shape_cast %23 : vector<1x8x16xf32> to vector<8x16xf32>
    %cst_15 = arith.constant dense<0.000000e+00> : vector<1024x16xf32>
    %25 = tpu.matmul %22, %24, %cst_15 {dimension_numbers = #tpu.dot_dimension_numbers<[1], [0], [0], [1], [0, 0, 1, 1], [], []>} : vector<1024x8xf32>, vector<8x16xf32>, vector<1024x16xf32> -> vector<1024x16xf32>
    %26 = arith.addf %20, %25 : vector<1024x16xf32>
    %27 = vector.extract_strided_slice %1 {offsets = [1, 1, 0], sizes = [32, 32, 8], strides = [1, 1, 1]} : vector<34x34x8xf32> to vector<32x32x8xf32>
    %28 = vector.shape_cast %27 : vector<32x32x8xf32> to vector<1024x8xf32>
    %c4 = arith.constant 4 : index
    %c0_16 = arith.constant 0 : index
    %c0_17 = arith.constant 0 : index
    %29 = vector.load %arg2[%c4, %c0_16, %c0_17] : memref<9x8x16xf32, #tpu.memory_space<vmem>>, vector<1x8x16xf32>
    %30 = vector.shape_cast %29 : vector<1x8x16xf32> to vector<8x16xf32>
    %cst_18 = arith.constant dense<0.000000e+00> : vector<1024x16xf32>
    %31 = tpu.matmul %28, %30, %cst_18 {dimension_numbers = #tpu.dot_dimension_numbers<[1], [0], [0], [1], [0, 0, 1, 1], [], []>} : vector<1024x8xf32>, vector<8x16xf32>, vector<1024x16xf32> -> vector<1024x16xf32>
    %32 = arith.addf %26, %31 : vector<1024x16xf32>
    %33 = vector.extract_strided_slice %1 {offsets = [1, 2, 0], sizes = [32, 32, 8], strides = [1, 1, 1]} : vector<34x34x8xf32> to vector<32x32x8xf32>
    %34 = vector.shape_cast %33 : vector<32x32x8xf32> to vector<1024x8xf32>
    %c5 = arith.constant 5 : index
    %c0_19 = arith.constant 0 : index
    %c0_20 = arith.constant 0 : index
    %35 = vector.load %arg2[%c5, %c0_19, %c0_20] : memref<9x8x16xf32, #tpu.memory_space<vmem>>, vector<1x8x16xf32>
    %36 = vector.shape_cast %35 : vector<1x8x16xf32> to vector<8x16xf32>
    %cst_21 = arith.constant dense<0.000000e+00> : vector<1024x16xf32>
    %37 = tpu.matmul %34, %36, %cst_21 {dimension_numbers = #tpu.dot_dimension_numbers<[1], [0], [0], [1], [0, 0, 1, 1], [], []>} : vector<1024x8xf32>, vector<8x16xf32>, vector<1024x16xf32> -> vector<1024x16xf32>
    %38 = arith.addf %32, %37 : vector<1024x16xf32>
    %39 = vector.extract_strided_slice %1 {offsets = [2, 0, 0], sizes = [32, 32, 8], strides = [1, 1, 1]} : vector<34x34x8xf32> to vector<32x32x8xf32>
    %40 = vector.shape_cast %39 : vector<32x32x8xf32> to vector<1024x8xf32>
    %c6 = arith.constant 6 : index
    %c0_22 = arith.constant 0 : index
    %c0_23 = arith.constant 0 : index
    %41 = vector.load %arg2[%c6, %c0_22, %c0_23] : memref<9x8x16xf32, #tpu.memory_space<vmem>>, vector<1x8x16xf32>
    %42 = vector.shape_cast %41 : vector<1x8x16xf32> to vector<8x16xf32>
    %cst_24 = arith.constant dense<0.000000e+00> : vector<1024x16xf32>
    %43 = tpu.matmul %40, %42, %cst_24 {dimension_numbers = #tpu.dot_dimension_numbers<[1], [0], [0], [1], [0, 0, 1, 1], [], []>} : vector<1024x8xf32>, vector<8x16xf32>, vector<1024x16xf32> -> vector<1024x16xf32>
    %44 = arith.addf %38, %43 : vector<1024x16xf32>
    %45 = vector.extract_strided_slice %1 {offsets = [2, 1, 0], sizes = [32, 32, 8], strides = [1, 1, 1]} : vector<34x34x8xf32> to vector<32x32x8xf32>
    %46 = vector.shape_cast %45 : vector<32x32x8xf32> to vector<1024x8xf32>
    %c7 = arith.constant 7 : index
    %c0_25 = arith.constant 0 : index
    %c0_26 = arith.constant 0 : index
    %47 = vector.load %arg2[%c7, %c0_25, %c0_26] : memref<9x8x16xf32, #tpu.memory_space<vmem>>, vector<1x8x16xf32>
    %48 = vector.shape_cast %47 : vector<1x8x16xf32> to vector<8x16xf32>
    %cst_27 = arith.constant dense<0.000000e+00> : vector<1024x16xf32>
    %49 = tpu.matmul %46, %48, %cst_27 {dimension_numbers = #tpu.dot_dimension_numbers<[1], [0], [0], [1], [0, 0, 1, 1], [], []>} : vector<1024x8xf32>, vector<8x16xf32>, vector<1024x16xf32> -> vector<1024x16xf32>
    %50 = arith.addf %44, %49 : vector<1024x16xf32>
    %51 = vector.extract_strided_slice %1 {offsets = [2, 2, 0], sizes = [32, 32, 8], strides = [1, 1, 1]} : vector<34x34x8xf32> to vector<32x32x8xf32>
    %52 = vector.shape_cast %51 : vector<32x32x8xf32> to vector<1024x8xf32>
    %c8 = arith.constant 8 : index
    %c0_28 = arith.constant 0 : index
    %c0_29 = arith.constant 0 : index
    %53 = vector.load %arg2[%c8, %c0_28, %c0_29] : memref<9x8x16xf32, #tpu.memory_space<vmem>>, vector<1x8x16xf32>
    %54 = vector.shape_cast %53 : vector<1x8x16xf32> to vector<8x16xf32>
    %cst_30 = arith.constant dense<0.000000e+00> : vector<1024x16xf32>
    %55 = tpu.matmul %52, %54, %cst_30 {dimension_numbers = #tpu.dot_dimension_numbers<[1], [0], [0], [1], [0, 0, 1, 1], [], []>} : vector<1024x8xf32>, vector<8x16xf32>, vector<1024x16xf32> -> vector<1024x16xf32>
    %56 = arith.addf %50, %55 : vector<1024x16xf32>
    %c0_31 = arith.constant 0 : index
    %c0_32 = arith.constant 0 : index
    %57 = vector.load %arg3[%c0_31, %c0_32] : memref<1x16xf32, #tpu.memory_space<vmem>>, vector<1x16xf32>
    %58 = vector.broadcast %57 : vector<1x16xf32> to vector<1024x16xf32>
    %59 = arith.addf %56, %58 : vector<1024x16xf32>
    %cst_33 = arith.constant 0.000000e+00 : f32
    %60 = vector.broadcast %cst_33 : f32 to vector<1024x16xf32>
    %61 = arith.maximumf %59, %60 : vector<1024x16xf32>
    %c0_34 = arith.constant 0 : index
    %c0_35 = arith.constant 0 : index
    %c0_36 = arith.constant 0 : index
    %62 = vector.load %arg4[%c0_34, %c0_35, %c0_36] : memref<1x1024x16xf32, #tpu.memory_space<vmem>>, vector<1x1024x16xf32>
    %63 = vector.shape_cast %62 : vector<1x1024x16xf32> to vector<1024x16xf32>
    %64 = vector.shape_cast %61 : vector<1024x16xf32> to vector<1x1024x16xf32>
    tpu.vector_store %arg4[%c0_34, %c0_35, %c0_36], %64 {strides = array<i32>} : memref<1x1024x16xf32, #tpu.memory_space<vmem>>, vector<1x1024x16xf32>,
    return
  }
  func.func @transform_0(%arg0: i32) -> (i32, i32, i32, i32) {
    %c0_i32 = arith.constant 0 : i32
    %c0_i32_0 = arith.constant 0 : i32
    %c0_i32_1 = arith.constant 0 : i32
    %c0_i32_2 = arith.constant 0 : i32
    return %arg0, %c0_i32, %c0_i32_0, %c0_i32_1 : i32, i32, i32, i32
  }
  func.func @transform_1(%arg0: i32) -> (i32, i32, i32) {
    %c0_i32 = arith.constant 0 : i32
    %c0_i32_0 = arith.constant 0 : i32
    %c0_i32_1 = arith.constant 0 : i32
    %c0_i32_2 = arith.constant 0 : i32
    return %c0_i32, %c0_i32_0, %c0_i32_1 : i32, i32, i32
  }
  func.func @transform_2(%arg0: i32) -> (i32, i32) {
    %c0_i32 = arith.constant 0 : i32
    %c0_i32_0 = arith.constant 0 : i32
    %c0_i32_1 = arith.constant 0 : i32
    return %c0_i32, %c0_i32_0 : i32, i32
  }
  func.func @transform_3(%arg0: i32) -> (i32, i32, i32) {
    %c0_i32 = arith.constant 0 : i32
    %c0_i32_0 = arith.constant 0 : i32
    %c0_i32_1 = arith.constant 0 : i32
    return %arg0, %c0_i32, %c0_i32_0 : i32, i32, i32
  }
}

</mosaic_0001>

<bundles_post_ra>
// kernel: last_conv.2
= control target key start
LH: loop header
LB: loop body
LE: loop exit
PB: predicated region body
PF: predicated region fallthrough
CT: control target
= control target key end

     0   :  { %8 = vsyncpa [#allocation3], 0  ;;  %s6182_s0 = inlined_call_operand.hbm [shape: f32[2,18,18,8], index: 0, kind: input, shape index: {}]   ;;  %s6183_s1 = inlined_call_operand.hbm [shape: f32[9,8,32], index: 1, kind: input, shape index: {}]   ;;  %s6184_s2 = inlined_call_operand.hbm [shape: f32[1,32], index: 2, kind: input, shape index: {}]   ;;  %s6185_s3 = inlined_call_operand.hbm [shape: f32[2,256,32], index: 3, kind: output, shape index: {}]  }
   0x1   :  { %10 = vsyncpa [#allocation3 + $0x1], 0 }
   0x2   :  { %11 = vsyncpa [#allocation6], 0 }
   0x3   :  { %12 = vsyncpa [#allocation4], 0 }
   0x4   :  { %14 = vsyncpa [#allocation4 + $0x1], 0  ;;  %s4769_s12 = smov 0   ;;  %s4771_s13 = smov 0  }
   0x5   :  { %s4773_s14 = smov 0   ;;  %s4775_s15 = smov 0  }
   0x6 LB: > { %s4790_s16 = sadd.s32 4294967295, %s4739_s15   ;;  %s3199_s17 = sadd.s32 4294967294, %s4739_s15   ;;  %s4739_s15 = sphi %s4775_s15, %s6379_s15   ;;  %s4735_s14 = sphi %s4773_s14, %s6378_s14   ;;  %s4731_s13 = sphi %s4771_s13, %s6377_s13   ;;  %s4727_s12 = sphi %s4769_s12, %s6376_s12  }
   0x7   : > { %p40_p0 = scmp.ne.s32.totalorder %s4731_s13, %s4727_s12  ;;  %p6186_p1 = scmp.eq.s32.totalorder %s4790_s16, 0 }
   0x8   : > { %p112_p3 = scmp.eq.s32.totalorder %s3199_s17, 1  ;;  %p3200_p5 = scmp.ge.s32.totalorder %s4739_s15, 1 }
   0x9   : > { %p4799_p4 = por %p6186_p1, %p40_p0  ;;  %p119_p7 = scmp.lt.s32.totalorder %s4739_s15, 3 }
   0xa   : > { %p4804_p6 = por %p112_p3, %p40_p0  ;;  %s4741_s21 = smov [#allocation5]  }
   0xb   : > { %s6262_s18 = scalar_select %p4799_p4, 1, 0 }
   0xc   : > { %s6263_s19 = scalar_select %p4804_p6, 1, 0 }
   0xd   : > { %p4809_p8 = pnand %p3200_p5, %p119_p7  ;;  %s131_s22 = sshll.u32 %s4741_s21, 4  ;;  %s4813_s22 = int_to_ptr.vmem [resolvable:$true] %s131_s22 }
   0xe   : > { %s4742_s24 = smov [#allocation7]   ;;  %s4583_s28 = scalar_lea.hbm %s6183_s1, 1152 }
   0xf   : > { %p4524_p9 = pneg %p4809_p8  ;;  %s145_s25 = sshll.u32 %s4742_s24, 4  ;;  %s4824_s25 = int_to_ptr.vmem [resolvable:$true] %s145_s25 }
  0x10   : > { %p4584_p12 = scmp.ne.s32.totalorder %s6183_s1, %s4583_s28  ;;  %p4590_p5 = scmp.lt.u32.totalorder %s4583_s28, %s6183_s1 }
  0x11   : > { %p4820_p11 = pnand %p4524_p9, %p6186_p1 }
  0x13   : > { %p4585_p13 = pneg %p4820_p11 }
  0x15   : > { %p4586_p0 = pnand %p4585_p13, %p4584_p12 }
  0x17   : > { %p4587_p3 = pneg %p4586_p0 }
  0x19   : > { %p4592_p7 = pnand %p4590_p5, %p4587_p3 }
  0x1b   : > { %4595 = shalt.err (!%p4592_p7)
}
  0x1c   : > { %s4596_s6 = scalar_lea.vmem %s4813_s22, 1152  ;;  %p4604_p2 = scmp.lt.s32.totalorder %s4813_s22, %s4813_s22 }
  0x1d   : > { %p4597_p9 = scmp.ne.s32.totalorder %s4813_s22, %s4596_s6  ;;  %p4605_p12 = scmp.lt.s32.totalorder %s4596_s6, %s4596_s6 }
  0x1f   : > { %p4599_p10 = pnand %p4597_p9, %p4585_p13  ;;  %p4606_p0 = por %p4605_p12, %p4604_p2 }
  0x21   : > { %p4600_p1 = pneg %p4599_p10 }
  0x23   : > { %p4607_p6 = pnand %p4606_p0, %p4600_p1 }
  0x25   : > { %4610 = shalt.err (!%p4607_p6)
}
  0x26   : > { %s4743_s7 = smov 128   ;;  %s4744_s8 = smov 8  }
  0x27   : > { %4527 = dma.hbm_to_vmem [thread:$0]  (!%p4820_p11), %s6183_s1, 1152, %s4813_s22, [#allocation6], %s4743_s7, %s4743_s7, %s4744_s8  }
  0x28   : > { %s4611_s21 = scalar_lea.hbm %s6184_s2, 16 }
  0x29   : > { %p4612_p1 = scmp.ne.s32.totalorder %s6184_s2, %s4611_s21  ;;  %p4618_p10 = scmp.lt.u32.totalorder %s4611_s21, %s6184_s2 }
  0x2b   : > { %p4614_p2 = pnand %p4612_p1, %p4585_p13 }
  0x2d   : > { %p4615_p6 = pneg %p4614_p2 }
  0x2f   : > { %p4620_p3 = pnand %p4618_p10, %p4615_p6 }
  0x31   : > { %4623 = shalt.err (!%p4620_p3)
}
  0x32   : > { %s4624_s22 = scalar_lea.vmem %s4824_s25, 16  ;;  %s4631_s29 = scalar_lea.vmem %s4824_s25, 32 }
  0x33   : > { %p4625_p5 = scmp.ne.s32.totalorder %s4824_s25, %s4624_s22  ;;  %p4632_p12 = scmp.lt.s32.totalorder %s4824_s25, %s4824_s25 }
  0x34   : > { %p4633_p0 = scmp.lt.s32.totalorder %s4631_s29, %s4624_s22 }
  0x35   : > { %p4627_p7 = pnand %p4625_p5, %p4585_p13 }
  0x36   : > { %p4634_p1 = por %p4633_p0, %p4632_p12 }
  0x37   : > { %p4628_p9 = pneg %p4627_p7 }
  0x39   : > { %p4635_p2 = pnand %p4634_p1, %p4628_p9 }
  0x3b   : > { %4638 = shalt.err (!%p4635_p2)
}
  0x3c   : > { %4530 = dma.hbm_to_vmem [thread:$0]  (!%p4820_p11), %s6184_s2, 16, %s4824_s25, [#allocation6]  }
  0x3d   : > { %s4883_s5 = sadd.s32 1, %s4739_s15   ;;  %s27_s23 = sadd.s32 1, %s4735_s14 }
  0x3e   : > { %s24_s6 = ssub.s32 %s4739_s15, %s4883_s5  ;;  %p34_p13 = scmp.ne.s32.totalorder %s4735_s14, %s4731_s13 }
  0x3f   : > { %p25_p6 = scmp.eq.s32.totalorder %s24_s6, 0  ;;  %p35_p10 = scmp.eq.s32.totalorder %s4739_s15, 0 }
  0x40   : > { %p6266_p3 = scmp.eq.s32.totalorder %s4790_s16, 1  ;;  %p4541_p7 = scmp.lt.s32.totalorder %s4739_s15, 2 }
  0x41   : > { %s4899_s10 = scalar_select %p25_p6, %s4735_s14, %s27_s23  }
  0x42   : > { %p4893_p5 = por %p6266_p3, %p34_p13  ;;  %p36_p9 = por %p35_p10, %p34_p13 }
  0x43   : > { %s156_s11 = sand.u32 1, %s4735_s14   ;;  %s4510_s25 = smul.u32 6912, %s4739_s15 }
  0x44   : > { %s6267_s9 = scalar_select %p4893_p5, 1, 0 }
  0x45   : > { %s4509_s17 = smul.u32 432, %s156_s11  ;;  %p4903_p11 = pnand %p4541_p7, %p36_p9 }
  0x46   : > { %s4910_s27 = scalar_lea.hbm %s6182_s0, %s4510_s25  ;;  %s4914_s29 = scalar_lea.sflag [#allocation3], %s156_s11 }
  0x47   : > { %s160_s28 = scalar_lea.vmem [#allocation2], %s4509_s17  ;;  %s4639_s30 = scalar_lea.hbm %s4910_s27, 6912 }
  0x48   : > { %s167_s22 = sshll.u32 %s160_s28, 4  ;;  %p4640_p12 = scmp.ne.s32.totalorder %s4910_s27, %s4639_s30  ;;  %s4912_s22 = int_to_ptr.vmem [resolvable:$true] %s167_s22 }
  0x49   : > { %p4641_p0 = pneg %p4903_p11  ;;  %s4644_s6 = scalar_lea.hbm %s6182_s0, 13824 }
  0x4a   : > { %p4645_p13 = scmp.lt.u32.totalorder %s4910_s27, %s6182_s0  ;;  %p4646_p6 = scmp.lt.u32.totalorder %s4644_s6, %s4639_s30 }
  0x4b   : > { %p4642_p1 = pnand %p4641_p0, %p4640_p12  ;;  %p4648_p3 = scmp.lt.u32.totalorder %s4639_s30, %s4910_s27 }
  0x4c   : > { %p4647_p10 = por %p4646_p6, %p4645_p13 }
  0x4d   : > { %p4643_p2 = pneg %p4642_p1 }
  0x4e   : > { %p4649_p7 = por %p4648_p3, %p4647_p10 }
  0x50   : > { %p4650_p9 = pnand %p4649_p7, %p4643_p2 }
  0x52   : > { %4653 = shalt.err (!%p4650_p9)
}
  0x53   : > { %s4654_s11 = scalar_lea.vmem %s4912_s22, 6912  ;;  %s4745_s17 = smov [#allocation2]  }
  0x54   : > { %p4655_p12 = scmp.ne.s32.totalorder %s4912_s22, %s4654_s11  ;;  %s4659_s26 = sshll.u32 %s4745_s17, 4  ;;  %s4660_s26 = int_to_ptr.vmem [resolvable:$false] %s4659_s26 }
  0x55   : > { %s4661_s28 = scalar_lea.vmem %s4660_s26, 13824  ;;  %p4662_p4 = scmp.lt.s32.totalorder %s4912_s22, %s4660_s26 }
  0x56   : > { %p4657_p1 = pnand %p4655_p12, %p4641_p0  ;;  %p4663_p13 = scmp.lt.s32.totalorder %s4661_s28, %s4654_s11 }
  0x58   : > { %p4658_p5 = pneg %p4657_p1  ;;  %p4664_p6 = por %p4663_p13, %p4662_p4 }
  0x5a   : > { %p4665_p10 = pnand %p4664_p6, %p4658_p5 }
  0x5c   : > { %4668 = shalt.err (!%p4665_p10)
}
  0x5d   : > { %4534 = dma.hbm_to_vmem [thread:$0]  (!%p4903_p11), %s4910_s27, 6912, %s4912_s22, %s4914_s29, %s4743_s7, %s4743_s7, %s4744_s8  }
  0x5e   : > { %179 = sbr.rel (%p4809_p8) target bundleno = 635 (0x27b), region = 32 }
  0x65   : > { %s4948_s30 = sand.u32 1, %s4731_s13   ;;  %p6269_p4 = scmp.ne.s32.totalorder %s6262_s18, 0 }
  0x66   : > { %s4511_s4 = smul.u32 432, %s4948_s30  ;;  %s182_s23 = scalar_lea.sflag [#allocation3], %s4948_s30 }
  0x68   : > { %s4952_s6 = scalar_lea.vmem [#allocation2], %s4511_s4 }
  0x69   : > { %4714 = dma.done.wait (%p6269_p4), %s182_s23, 6912  }
  0x6a   : > { %4716 = vsyncadd (%p6269_p4), %s182_s23, 4294960384  ;;  %p6270_p5 = scmp.eq.s32.totalorder %s4790_s16, 0 }
  0x6c   : > { %4718 = dma.done.wait (%p6270_p5), [#allocation6], 1168   ;;  %p6271_p8 = pmov %p6270_p5 }
  0x6d   : > { %v401_v0 = vld [vmem:[#allocation5 + $0x8] sm:$0xff]  ;;  %v4962_v1 = vld [vmem:[#allocation5 + $0x20] sm:$0xff]  ;;  %vm319_vm0 = vcmask 1046528   ;;  %vm402_vm1 = vcmask 64512   ;;  %v5056_v42 = vld [vmem:[#allocation5 + $0x30] sm:$0xff]  ;;  %vm981_vm2 = vcmask 1045504  }
  0x6e   : > { %4720 = vsyncadd (%p6271_p8), [#allocation6], 4294966128  ;;  %v4965_v2 = vld [vmem:[%s4952_s6] sm:$0xff]  ;;  %3801 = vmatprep.subr.mxu1 %v401_v0  ;;  %4001 = vmatprep.subr.mxu0 %v4962_v1  ;;  %v4969_v3 = vld [vmem:[%s4952_s6 + $0x8] sm:$0xff]  ;;  %s3208_s18 = sshll.u32 %s4948_s30, 8  ;;  %vm3060_vm3 = vcmask 261120  }
  0x6f   : > { %v320_v4 = vrot.slane %v4965_v2, 1  ;;  %v270_v5 = vld [vmem:[#allocation5] sm:$0xff]  ;;  %v4973_v6 = vld [vmem:[%s4952_s6 + $0x18] sm:$0xff]  ;;  %3802 = vmatpush3.msra.mxu1 %v401_v0  ;;  %4002 = vmatpush3.msra.mxu0 %v4962_v1  ;;  %v321_v7 = vrot.slane %v4969_v3, 1  ;;  %v4987_v14 = vld [vmem:[%s4952_s6 + $0x28] sm:$0x3] }
  0x70   : > { %6272 = vst [vmem:[#allocation12_spill] sm:$0xff] %v4973_v6  ;;  %v4978_v8 = vld [vmem:[%s4952_s6 + $0x20] sm:$0xff]  ;;  %v325_v9 = vrot.slane %v4973_v6, 1  ;;  %v1925_v10 = vld [vmem:[#allocation5 + $0x28] sm:$0xff]  ;;  %v4982_v11 = vld [vmem:[%s4952_s6 + $0x10] sm:$0x3]  ;;  %3851 = vmatprep.subr.mxu1 %v270_v5 }
  0x71   : > { %6273 = vst [vmem:[#allocation13_spill] sm:$0xff] %v4978_v8  ;;  %v326_v12 = vrot.slane %v4978_v8, 1  ;;  %4051 = vmatprep.subr.mxu0 %v1925_v10  ;;  %v323_v13 = vrot.slane %v4982_v11, 1  ;;  %v4990_v15 = vld [vmem:[%s4952_s6 + $0x30] sm:$0xff]  ;;  %v322_v16 = vsel %vm319_vm0, %v320_v4, %v321_v7  ;;  %v328_v17 = vrot.slane %v4987_v14, 1  ;;  %v4995_v18 = vld [vmem:[%s4952_s6 + $0x38] sm:$0xff] }
  0x72   : > { %v330_v19 = vrot.slane %v4990_v15, 1  ;;  %v4999_v20 = vld [vmem:[%s4952_s6 + $0x40] sm:$0x3]  ;;  %3803 = vmatprep.mubr.msk.f32.mxu1 %vm402_vm1, %v322_v16  ;;  %v331_v23 = vrot.slane %v4995_v18, 1  ;;  %v5007_v25 = vld [vmem:[%s4952_s6 + $0x48] sm:$0xff]  ;;  %v5010_v26 = vld [vmem:[%s4952_s6 + $0x50] sm:$0xff] }
  0x73   : > { %v327_v21 = vsel %vm319_vm0, %v325_v9, %v326_v12  ;;  %v324_v22 = vsel %vm319_vm0, %v321_v7, %v323_v13  ;;  %v333_v24 = vrot.slane %v4999_v20, 1  ;;  %v5013_v27 = vld [vmem:[%s4952_s6 + $0x58] sm:$0x3]  ;;  %v329_v28 = vsel %vm319_vm0, %v326_v12, %v328_v17  ;;  %v5021_v31 = vld [vmem:[%s4952_s6 + $0x60] sm:$0xff]  ;;  %v5024_v32 = vld [vmem:[%s4952_s6 + $0x68] sm:$0xff]  ;;  %s6031_s20 = scalar_lea.vmem [#allocation8], %s3208_s18 }
  0x74   : > { %4003 = vmatprep.mubr.msk.f32.mxu0 %vm402_vm1, %v327_v21  ;;  %3804 = vmatmul.mubr.msk.f32.vlgmr.msra.gmra.mrb[0].mxu1 %vm402_vm1, %v324_v22  ;;  %v335_v29 = vrot.slane %v5007_v25, 1  ;;  %v336_v30 = vrot.slane %v5010_v26, 1  ;;  %v5028_v33 = vsel %vm319_vm0, %v330_v19, %v331_v23  ;;  %v338_v35 = vrot.slane %v5013_v27, 1  ;;  %v5043_v39 = vld [vmem:[%s4952_s6 + $0x70] sm:$0x3]  ;;  %v5047_v40 = vld [vmem:[%s4952_s6 + $0x78] sm:$0xff] }
  0x75   : > { %3852 = vmatpush3.msra.mxu1 %v270_v5  ;;  %4004 = vmatmul.mubr.msk.f32.vlgmr.msra.gmra.mrb[0].mxu0 %vm402_vm1, %v329_v28  ;;  %6274 = vst [vmem:[#allocation14_spill] sm:$0xff] %v5028_v33  ;;  %v5032_v34 = vsel %vm319_vm0, %v331_v23, %v333_v24  ;;  %v340_v37 = vrot.slane %v5021_v31, 1  ;;  %v341_v38 = vrot.slane %v5024_v32, 1  ;;  %v5050_v41 = vld [vmem:[%s4952_s6 + $0x80] sm:$0xff]  ;;  %v343_v44 = vrot.slane %v5043_v39, 1  ;;  %v5076_v49 = vld [vmem:[%s4952_s6 + $0x90] sm:$0xff] }
  0x76   : > { %4052 = vmatpush3.msra.mxu0 %v1925_v10  ;;  %3806 = vmatprep.mubr.msk.f32.mxu1 %vm402_vm1, %v327_v21  ;;  %6275 = vst [vmem:[#allocation15_spill] sm:$0xff] %v5032_v34  ;;  %v5038_v36 = vsel %vm319_vm0, %v335_v29, %v336_v30  ;;  %v5061_v43 = vsel %vm319_vm0, %v336_v30, %v338_v35  ;;  %v345_v46 = vrot.slane %v5047_v40, 1  ;;  %v346_v47 = vrot.slane %v5050_v41, 1  ;;  %v5071_v48 = vld [vmem:[%s4952_s6 + $0x88] sm:$0x3]  ;;  %v5079_v50 = vld [vmem:[%s4952_s6 + $0x98] sm:$0xff] }
  0x77   : > { %4006 = vmatprep.mubr.msk.f32.mxu0 %vm402_vm1, %v5028_v33  ;;  %6276 = vst [vmem:[#allocation16_spill] sm:$0xff] %v5038_v36  ;;  %6277 = vst [vmem:[#allocation17_spill] sm:$0xff] %v5061_v43  ;;  %4101 = vmatprep.subr.mxu0 %v5056_v42  ;;  %v5066_v45 = vsel %vm319_vm0, %v340_v37, %v341_v38  ;;  %v5088_v51 = vsel %vm319_vm0, %v341_v38, %v343_v44  ;;  %v348_v52 = vrot.slane %v5071_v48, 1  ;;  %v5097_v56 = vld [vmem:[%s4952_s6 + $0xa0] sm:$0x3]  ;;  %v5102_v57 = vld [vmem:[%s4952_s6 + $0xa8] sm:$0xff] }
  0x78   : > { %3807 = vmatmul.mubr.msk.f32.gmra.mrb[2].mxu1 %vm402_vm1, %v329_v28  ;;  %6278 = vst [vmem:[#allocation18_spill] sm:$0xff] %v5066_v45  ;;  %6279 = vst [vmem:[#allocation19_spill] sm:$0xff] %v5088_v51  ;;  %v5092_v53 = vsel %vm319_vm0, %v345_v46, %v346_v47  ;;  %v350_v54 = vrot.slane %v5076_v49, 1  ;;  %v351_v55 = vrot.slane %v5079_v50, 1  ;;  %v5105_v58 = vld [vmem:[%s4952_s6 + $0xb0] sm:$0xff]  ;;  %v353_v60 = vrot.slane %v5097_v56, 1 }
  0x79   : > { %4007 = vmatmul.mubr.msk.f32.gmra.mrb[2].mxu0 %vm402_vm1, %v5032_v34  ;;  %3809 = vmatprep.mubr.msk.f32.mxu1 %vm402_vm1, %v5028_v33  ;;  %6280 = vst [vmem:[#allocation20_spill] sm:$0xff] %v5092_v53  ;;  %v5114_v59 = vsel %vm319_vm0, %v346_v47, %v348_v52  ;;  %v5117_v61 = vld [vmem:[#allocation5 + $0x10] sm:$0xff]  ;;  %v355_v63 = vrot.slane %v5102_v57, 1  ;;  %v356_v0 = vrot.slane %v5105_v58, 1  ;;  %v5125_v4 = vld [vmem:[%s4952_s6 + $0xb8] sm:$0x3] }
  0x7a   : > { %4009 = vmatprep.mubr.msk.f32.mxu0 %vm402_vm1, %v5038_v36  ;;  %6281 = vst [vmem:[#allocation21_spill] sm:$0xff] %v5114_v59  ;;  %v5120_v62 = vsel %vm319_vm0, %v350_v54, %v351_v55  ;;  %3901 = vmatprep.subr.mxu1 %v5117_v61  ;;  %v5131_v5 = vld [vmem:[%s4952_s6 + $0xc0] sm:$0xff]  ;;  %v5134_v7 = vld [vmem:[%s4952_s6 + $0xc8] sm:$0xff]  ;;  %v5143_v9 = vsel %vm319_vm0, %v351_v55, %v353_v60  ;;  %v358_v10 = vrot.slane %v5125_v4, 1  ;;  %v5152_v17 = vld [vmem:[%s4952_s6 + $0xd0] sm:$0x3] }
  0x7b   : > { %6282 = vst [vmem:[#allocation22_spill] sm:$0xff] %v5120_v62  ;;  %6283 = vst [vmem:[#allocation23_spill] sm:$0xff] %v5143_v9  ;;  %v5147_v12 = vsel %vm319_vm0, %v355_v63, %v356_v0  ;;  %v360_v13 = vrot.slane %v5131_v5, 1  ;;  %v361_v16 = vrot.slane %v5134_v7, 1  ;;  %v363_v21 = vrot.slane %v5152_v17, 1  ;;  %v5172_v28 = vld [vmem:[%s4952_s6 + $0xd8] sm:$0xff] }
  0x7c   : > { %3810 = vmatmul.mubr.msk.f32.gmra.mrb[4].mxu1 %vm402_vm1, %v5032_v34  ;;  %6284 = vst [vmem:[#allocation24_spill] sm:$0xff] %v5147_v12  ;;  %v5163_v19 = vsel %vm319_vm0, %v356_v0, %v358_v10  ;;  %v987_v23 = vrot.slane %v4973_v6, 2  ;;  %v988_v24 = vrot.slane %v4978_v8, 2  ;;  %v5175_v29 = vld [vmem:[%s4952_s6 + $0xe0] sm:$0xff]  ;;  %v990_v30 = vrot.slane %v4987_v14, 2  ;;  %v5200_v52 = vld [vmem:[%s4952_s6 + $0xf0] sm:$0xff] }
  0x7d   : > { %4010 = vmatmul.mubr.msk.f32.gmra.mrb[4].mxu0 %vm402_vm1, %v5061_v43  ;;  %3812 = vmatprep.mubr.msk.f32.mxu1 %vm402_vm1, %v5038_v36  ;;  %6285 = vst [vmem:[#allocation25_spill] sm:$0xff] %v5163_v19  ;;  %v5167_v22 = vsel %vm319_vm0, %v360_v13, %v361_v16  ;;  %v5187_v35 = vsel %vm319_vm0, %v361_v16, %v363_v21  ;;  %v365_v37 = vrot.slane %v5172_v28, 1  ;;  %v366_v38 = vrot.slane %v5175_v29, 1  ;;  %v5192_v44 = vld [vmem:[%s4952_s6 + $0xe8] sm:$0x3]  ;;  %v5203_v54 = vld [vmem:[%s4952_s6 + $0xf8] sm:$0xff] }
  0x7e   : > { %4012 = vmatprep.mubr.msk.f32.mxu0 %vm402_vm1, %v5066_v45  ;;  %6286 = vst [vmem:[#allocation26_spill] sm:$0xff] %v5167_v22  ;;  %6287 = vst [vmem:[#allocation27_spill] sm:$0xff] %v5187_v35  ;;  %v5195_v46 = vsel %vm981_vm2, %v987_v23, %v988_v24  ;;  %v992_v47 = vrot.slane %v4990_v15, 2  ;;  %v993_v14 = vrot.slane %v4995_v18, 2  ;;  %v368_v55 = vrot.slane %v5192_v44, 1  ;;  %s3503_s7 = sshll.u32 %s4790_s16, 12 }
  0x7f   : > { %v995_v60 = vrot.slane %v4999_v20, 2  ;;  %v5216_v63 = vsel %vm981_vm2, %v988_v24, %v990_v30  ;;  %v5219_v0 = vsel %vm319_vm0, %v365_v37, %v366_v38  ;;  %v370_v10 = vrot.slane %v5200_v52, 1  ;;  %v5224_v16 = vld [vmem:[%s4952_s6 + $0x100] sm:$0x3]  ;;  %v5235_v24 = vld [vmem:[%s4952_s6 + $0x110] sm:$0xff]  ;;  %v5239_v30 = vld [vmem:[#allocation5 + $0x38] sm:$0xff]  ;;  %s6132_s22 = scalar_lea.hbm %s6185_s3, %s3503_s7 }
  0x80   : > { %3813 = vmatmul.mubr.msk.f32.gmra.mrb[6].mxu1 %vm402_vm1, %v5061_v43  ;;  %6288 = vst [vmem:[#allocation28_spill] sm:$0xff] %v5219_v0  ;;  %v371_v13 = vrot.slane %v5203_v54, 1  ;;  %v5227_v21 = vsel %vm981_vm2, %v992_v47, %v993_v14  ;;  %v997_v20 = vrot.slane %v5007_v25, 2  ;;  %v998_v23 = vrot.slane %v5010_v26, 2  ;;  %v5333_v34 = vld [vmem:[%s4952_s6 + $0x148] sm:$0x3] }
  0x81   : > { %4013 = vmatmul.mubr.msk.f32.gmra.mrb[6].mxu0 %vm402_vm1, %v5088_v51  ;;  %3815 = vmatprep.mubr.msk.f32.mxu1 %vm402_vm1, %v5066_v45  ;;  %v5246_v37 = vsel %vm319_vm0, %v366_v38, %v368_v55  ;;  %v5249_v47 = vsel %vm981_vm2, %v993_v14, %v995_v60  ;;  %v376_v38 = vrot.slane %v5235_v24, 1  ;;  %v5262_v55 = vld [vmem:[%s4952_s6 + $0x118] sm:$0x3]  ;;  %v1002_v60 = vrot.slane %v5021_v31, 2  ;;  %s3107_s8 = sshll.u32 %s6031_s20, 4  ;;  %s3094_s16 = scalar_lea.sflag [#allocation4], %s4948_s30  ;;  %s6134_s8 = int_to_ptr.vmem [resolvable:$true] %s3107_s8 }
  0x82   : > { %4015 = vmatprep.mubr.msk.f32.mxu0 %vm402_vm1, %v5092_v53  ;;  %6289 = vst [vmem:[#allocation29_spill] sm:$0xff] %v5246_v37  ;;  %6290 = vst [vmem:[#allocation30_spill] sm:$0xff] %v5249_v47  ;;  %v5265_v14 = vsel %vm981_vm2, %v997_v20, %v998_v23  ;;  %v378_v20 = vrot.slane %v5262_v55, 1  ;;  %v5306_v45 = vld [vmem:[%s4952_s6 + $0x138] sm:$0xff]  ;;  %v1010_v43 = vrot.slane %v5071_v48, 2  ;;  %v1015_v33 = vrot.slane %v5097_v56, 2 }
  0x83   : > { %6292 = vst [vmem:[#allocation32_spill] sm:$0xff] %v5265_v14  ;;  %v385_v36 = vrot.slane %v5306_v45, 1  ;;  %v1017_v56 = vrot.slane %v5102_v57, 2  ;;  %s4669_s29 = scalar_lea.vmem %s6134_s8, 4096  ;;  %p6373_p0 = scmp.ne.s32.totalorder %s6267_s9, 0 }
  0x84   : > { %3816 = vmatmul.mubr.msk.f32.gmra.mrb[8].mxu1 %vm402_vm1, %v5088_v51  ;;  %v5298_v51 = vld [vmem:[%s4952_s6 + $0x130] sm:$0x3]  ;;  %p4670_p11 = scmp.ne.s32.totalorder %s6134_s8, %s4669_s29  ;;  %s4746_s25 = smov [#allocation8]  }
  0x85   : > { %4016 = vmatmul.mubr.msk.f32.gmra.mrb[8].mxu0 %vm402_vm1, %v5114_v59  ;;  %3818 = vmatprep.mubr.msk.f32.mxu1 %vm402_vm1, %v5092_v53  ;;  %s4673_s24 = sshll.u32 %s4746_s25, 4  ;;  %s4674_s24 = int_to_ptr.vmem [resolvable:$false] %s4673_s24 }
  0x86   : > { %4018 = vmatprep.mubr.msk.f32.mxu0 %vm402_vm1, %v5120_v62  ;;  %p4671_p2 = pnand %p4670_p11, %p6373_p0  ;;  %s4675_s11 = scalar_lea.vmem %s4674_s24, 8192 }
  0x87   : > { %p4676_p7 = scmp.lt.s32.totalorder %s6134_s8, %s4674_s24  ;;  %p4677_p9 = scmp.lt.s32.totalorder %s4675_s11, %s4669_s29 }
  0x88   : > { %3819 = vmatmul.mubr.msk.f32.gmra.mrb[10].mxu1 %vm402_vm1, %v5114_v59  ;;  %p4672_p3 = pneg %p4671_p2 }
  0x89   : > { %4019 = vmatmul.mubr.msk.f32.gmra.mrb[10].mxu0 %vm402_vm1, %v5143_v9  ;;  %3821 = vmatprep.mubr.msk.f32.mxu1 %vm402_vm1, %v5120_v62  ;;  %v1005_v62 = vrot.slane %v5043_v39, 2  ;;  %v1007_v39 = vrot.slane %v5047_v40, 2  ;;  %p4678_p12 = por %p4677_p9, %p4676_p7 }
  0x8a   : > { %4021 = vmatprep.mubr.msk.f32.mxu0 %vm402_vm1, %v5147_v12 }
  0x8b   : > { %p4679_p1 = pnand %p4678_p12, %p4672_p3 }
  0x8c   : > { %3822 = vmatmul.mubr.msk.f32.gmra.mrb[12].mxu1 %vm402_vm1, %v5143_v9  ;;  %v5270_v9 = vld [vmem:[%s4952_s6 + $0x120] sm:$0xff] }
  0x8d   : > { %4022 = vmatmul.mubr.msk.f32.gmra.mrb[12].mxu0 %vm402_vm1, %v5163_v19  ;;  %3824 = vmatprep.mubr.msk.f32.mxu1 %vm402_vm1, %v5147_v12  ;;  %v1000_v12 = vrot.slane %v5013_v27, 2  ;;  %v380_v53 = vrot.slane %v5270_v9, 1 }
  0x8e   : > { %4024 = vmatprep.mubr.msk.f32.mxu0 %vm402_vm1, %v5167_v22 }
  0x8f   : > { %v5290_v59 = vsel %vm981_vm2, %v998_v23, %v1000_v12  ;;  %v5309_v12 = vld [vmem:[%s4952_s6 + $0x140] sm:$0xff] }
  0x90   : > { %3825 = vmatmul.mubr.msk.f32.gmra.mrb[14].mxu1 %vm402_vm1, %v5163_v19  ;;  %v373_v19 = vrot.slane %v5224_v16, 1  ;;  %6294 = vst [vmem:[#allocation34_spill] sm:$0xff] %v5290_v59 }
  0x91   : > { %4025 = vmatmul.mubr.msk.f32.gmra.mrb[14].mxu0 %vm402_vm1, %v5187_v35  ;;  %3827 = vmatprep.mubr.msk.f32.mxu1 %vm402_vm1, %v5167_v22  ;;  %v5232_v22 = vld [vmem:[%s4952_s6 + $0x108] sm:$0xff] }
  0x92   : > { %4053 = vmatprep.mubr.msk.f32.mxu0 %vm402_vm1, %v5195_v46  ;;  %v5283_v27 = vsel %vm319_vm0, %v371_v13, %v373_v19 }
  0x93   : > { %6293 = vst [vmem:[#allocation33_spill] sm:$0xff] %v5283_v27 }
  0x94   : > { %3828 = vmatmul.mubr.msk.f32.gmra.mrb[16].mxu1 %vm402_vm1, %v5187_v35  ;;  %v5256_v35 = vsel %vm319_vm0, %v370_v10, %v371_v13  ;;  %v5273_v10 = vld [vmem:[%s4952_s6 + $0x128] sm:$0xff]  ;;  %v1008_v13 = vrot.slane %v5050_v41, 2 }
  0x95   : > { %4054 = vmatmul.mubr.msk.f32.vlgmr.msra.gmra.mrb[0].mxu0 %vm402_vm1, %v5216_v63  ;;  %3830 = vmatprep.mubr.msk.f32.mxu1 %vm402_vm1, %v5219_v0  ;;  %6291 = vst [vmem:[#allocation31_spill] sm:$0xff] %v5256_v35  ;;  %v375_v0 = vrot.slane %v5232_v22, 1 }
  0x96   : > { %4102 = vmatpush3.msra.mxu0 %v5056_v42  ;;  %4056 = vmatprep.mubr.msk.f32.mxu0 %vm402_vm1, %v5227_v21  ;;  %v1003_v42 = vrot.slane %v5024_v32, 2 }
  0x97   : > { %4151 = vmatprep.subr.mxu0 %v5239_v30 }
  0x98   : > { %3831 = vmatmul.mubr.msk.f32.gmra.mrb[18].mxu1 %vm402_vm1, %v5246_v37  ;;  %v5293_v37 = vsel %vm319_vm0, %v375_v0, %v376_v38  ;;  %v5301_v19 = vsel %vm981_vm2, %v1002_v60, %v1003_v42  ;;  %v5318_v0 = vsel %vm319_vm0, %v376_v38, %v378_v20  ;;  %v5321_v23 = vsel %vm981_vm2, %v1003_v42, %v1005_v62  ;;  %v5341_v20 = vld [vmem:[%s4952_s6 + $0x150] sm:$0xff] }
  0x99   : > { %4057 = vmatmul.mubr.msk.f32.gmra.mrb[2].mxu0 %vm402_vm1, %v5249_v47  ;;  %3833 = vmatprep.mubr.msk.f32.mxu1 %vm402_vm1, %v5256_v35  ;;  %6295 = vst [vmem:[#allocation35_spill] sm:$0xff] %v5293_v37  ;;  %v381_v35 = vrot.slane %v5273_v10, 1  ;;  %6296 = vst [vmem:[#allocation36_spill] sm:$0xff] %v5301_v19  ;;  %v383_v60 = vrot.slane %v5298_v51, 1  ;;  %v5336_v38 = vsel %vm981_vm2, %v1007_v39, %v1008_v13  ;;  %v1012_v62 = vrot.slane %v5076_v49, 2 }
  0x9a   : > { %4059 = vmatprep.mubr.msk.f32.mxu0 %vm402_vm1, %v5265_v14  ;;  %6297 = vst [vmem:[#allocation37_spill] sm:$0xff] %v5318_v0  ;;  %6298 = vst [vmem:[#allocation38_spill] sm:$0xff] %v5321_v23  ;;  %v1013_v42 = vrot.slane %v5079_v50, 2  ;;  %v388_v39 = vrot.slane %v5333_v34, 1  ;;  %v5403_v47 = vld [vmem:[%s4952_s6 + $0x178] sm:$0x3] }
  0x9b   : > { %6300 = vst [vmem:[#allocation40_spill] sm:$0xff] %v5336_v38  ;;  %v5353_v48 = vsel %vm319_vm0, %v381_v35, %v383_v60  ;;  %v1018_v60 = vrot.slane %v5105_v58, 2 }
  0x9c   : > { %3834 = vmatmul.mubr.msk.f32.gmra.mrb[20].mxu1 %vm402_vm1, %v5283_v27  ;;  %v5327_v27 = vsel %vm319_vm0, %v380_v53, %v381_v35  ;;  %v5344_v53 = vld [vmem:[%s4952_s6 + $0x158] sm:$0xff]  ;;  %6301 = vst [vmem:[#allocation41_spill] sm:$0xff] %v5353_v48  ;;  %v5371_v35 = vsel %vm981_vm2, %v1012_v62, %v1013_v42 }
  0x9d   : > { %4060 = vmatmul.mubr.msk.f32.gmra.mrb[4].mxu0 %vm402_vm1, %v5290_v59  ;;  %3836 = vmatprep.mubr.msk.f32.mxu1 %vm402_vm1, %v5293_v37  ;;  %6299 = vst [vmem:[#allocation39_spill] sm:$0xff] %v5327_v27  ;;  %v386_v37 = vrot.slane %v5309_v12, 1  ;;  %v5368_v59 = vld [vmem:[%s4952_s6 + $0x160] sm:$0x3] }
  0x9e   : > { %4062 = vmatprep.mubr.msk.f32.mxu0 %vm402_vm1, %v5301_v19  ;;  %v5360_v19 = vsel %vm981_vm2, %v1008_v13, %v1010_v43  ;;  %v5379_v43 = vld [vmem:[%s4952_s6 + $0x170] sm:$0xff]  ;;  %v5391_v13 = vsel %vm981_vm2, %v1013_v42, %v1015_v33  ;;  %v393_v62 = vrot.slane %v5368_v59, 1  ;;  %v1022_v33 = vrot.slane %v5131_v5, 2 }
  0x9f   : > { %6302 = vst [vmem:[#allocation42_spill] sm:$0xff] %v5360_v19  ;;  %6304 = vst [vmem:[#allocation44_spill] sm:$0xff] %v5379_v43  ;;  %v1023_v42 = vrot.slane %v5134_v7, 2 }
  0xa0   : > { %3837 = vmatmul.mubr.msk.f32.gmra.mrb[22].mxu1 %vm402_vm1, %v5318_v0  ;;  %v5363_v0 = vsel %vm319_vm0, %v385_v36, %v386_v37  ;;  %v5388_v36 = vsel %vm319_vm0, %v386_v37, %v388_v39  ;;  %6306 = vst [vmem:[#allocation46_spill] sm:$0xff] %v5391_v13  ;;  %v5406_v37 = vsel %vm981_vm2, %v1017_v56, %v1018_v60 }
  0xa1   : > { %4063 = vmatmul.mubr.msk.f32.gmra.mrb[6].mxu0 %vm402_vm1, %v5321_v23  ;;  %3839 = vmatprep.mubr.msk.f32.mxu1 %vm402_vm1, %v5327_v27  ;;  %6303 = vst [vmem:[#allocation43_spill] sm:$0xff] %v5363_v0  ;;  %v390_v23 = vrot.slane %v5341_v20, 1  ;;  %v391_v27 = vrot.slane %v5344_v53, 1  ;;  %6305 = vst [vmem:[#allocation45_spill] sm:$0xff] %v5388_v36 }
  0xa2   : > { %4065 = vmatprep.mubr.msk.f32.mxu0 %vm402_vm1, %v5336_v38  ;;  %v5376_v38 = vld [vmem:[%s4952_s6 + $0x168] sm:$0xff] }
  0xa3   : > { %v5397_v14 = vsel %vm319_vm0, %v390_v23, %v391_v27  ;;  %v398_v23 = vrot.slane %v5403_v47, 1 }
  0xa4   : > { %3840 = vmatmul.mubr.msk.f32.gmra.mrb[24].mxu1 %vm402_vm1, %v5353_v48  ;;  %6307 = vst [vmem:[#allocation47_spill] sm:$0xff] %v5397_v14  ;;  %v1020_v48 = vrot.slane %v5125_v4, 2  ;;  %v5417_v4 = vsel %vm319_vm0, %v391_v27, %v393_v62  ;;  %v1028_v27 = vrot.slane %v5175_v29, 2  ;;  %v1032_v62 = vrot.slane %v5200_v52, 2 }
  0xa5   : > { %4066 = vmatmul.mubr.msk.f32.gmra.mrb[8].mxu0 %vm402_vm1, %v5360_v19  ;;  %3842 = vmatprep.mubr.msk.f32.mxu1 %vm402_vm1, %v5363_v0  ;;  %v395_v19 = vrot.slane %v5376_v38, 1  ;;  %v396_v0 = vrot.slane %v5379_v43, 1  ;;  %6308 = vst [vmem:[#allocation48_spill] sm:$0xff] %v5417_v4 }
  0xa6   : > { %4068 = vmatprep.mubr.msk.f32.mxu0 %vm402_vm1, %v5371_v35  ;;  %v5423_v39 = vsel %vm981_vm2, %v1018_v60, %v1020_v48  ;;  %v1030_v48 = vrot.slane %v5192_v44, 2 }
  0xa7   : > { %v5426_v56 = vsel %vm319_vm0, %v395_v19, %v396_v0  ;;  %v5441_v19 = vsel %vm319_vm0, %v396_v0, %v398_v23  ;;  %v5473_v23 = vld [vmem:[#allocation5 + $0x18] sm:$0xff] }
  0xa8   : > { %3843 = vmatmul.mubr.msk.f32.gmra.mrb[26].mxu1 %vm402_vm1, %v5388_v36  ;;  %6309 = vst [vmem:[#allocation49_spill] sm:$0xff] %v5426_v56  ;;  %v1025_v36 = vrot.slane %v5152_v17, 2  ;;  %6310 = vst [vmem:[#allocation50_spill] sm:$0xff] %v5441_v19  ;;  %v5463_v44 = vsel %vm981_vm2, %v1028_v27, %v1030_v48 }
  0xa9   : > { %4069 = vmatmul.mubr.msk.f32.gmra.mrb[10].mxu0 %vm402_vm1, %v5391_v13  ;;  %3845 = vmatprep.mubr.msk.f32.mxu1 %vm402_vm1, %v5397_v14  ;;  %v5430_v13 = vsel %vm981_vm2, %v1022_v33, %v1023_v42  ;;  %v1027_v14 = vrot.slane %v5172_v28, 2  ;;  %v1033_v33 = vrot.slane %v5203_v54, 2 }
  0xaa   : > { %4071 = vmatprep.mubr.msk.f32.mxu0 %vm402_vm1, %v5406_v37  ;;  %v5446_v17 = vsel %vm981_vm2, %v1023_v42, %v1025_v36  ;;  %v1037_v36 = vrot.slane %v5232_v22, 2  ;;  %v1038_v42 = vrot.slane %v5235_v24, 2 }
  0xab   : > { %v5450_v60 = vsel %vm981_vm2, %v1027_v14, %v1028_v27  ;;  %v1035_v14 = vrot.slane %v5224_v16, 2  ;;  %v5467_v0 = vsel %vm981_vm2, %v1032_v62, %v1033_v33  ;;  %v1040_v27 = vrot.slane %v5262_v55, 2 }
  0xac   : > { %3846 = vmatmul.mubr.msk.f32.gmra.mrb[28].mxu1 %vm402_vm1, %v5417_v4  ;;  %v5487_v48 = vsel %vm981_vm2, %v1037_v36, %v1038_v42  ;;  %v1042_v62 = vrot.slane %v5270_v9, 2  ;;  %v1047_v36 = vrot.slane %v5306_v45, 2  ;;  %v1058_v4 = vrot.slane %v5379_v43, 2 }
  0xad   : > { %4072 = vmatmul.mubr.msk.f32.gmra.mrb[12].mxu0 %vm402_vm1, %v5423_v39  ;;  %3848 = vmatprep.mubr.msk.f32.mxu1 %vm402_vm1, %v5426_v56  ;;  %v5483_v16 = vsel %vm981_vm2, %v1033_v33, %v1035_v14  ;;  %6311 = vst [vmem:[#allocation51_spill] sm:$0xff] %v5487_v48  ;;  %v5501_v55 = vsel %vm981_vm2, %v1038_v42, %v1040_v27  ;;  %v1045_v33 = vrot.slane %v5298_v51, 2  ;;  %v1050_v42 = vrot.slane %v5333_v34, 2 }
  0xae   : > { %4074 = vmatprep.mubr.msk.f32.mxu0 %vm402_vm1, %v5430_v13  ;;  %v1053_v56 = vrot.slane %v5344_v53, 2 }
  0xb0   : > { %3849 = vmatmul.mubr.msk.f32.gmra.mrb[30].mxu1 %vm402_vm1, %v5441_v19  ;;  %v1048_v19 = vrot.slane %v5309_v12, 2 }
  0xb1   : > { %4075 = vmatmul.mubr.msk.f32.gmra.mrb[14].mxu0 %vm402_vm1, %v5446_v17  ;;  %3853 = vmatprep.mubr.msk.f32.mxu1 %vm402_vm1, %v4965_v2 }
  0xb2   : > { %4077 = vmatprep.mubr.msk.f32.mxu0 %vm402_vm1, %v5450_v60  ;;  %v5522_v27 = vsel %vm981_vm2, %v1047_v36, %v1048_v19  ;;  %v5535_v34 = vsel %vm981_vm2, %v1048_v19, %v1050_v42  ;;  %v1057_v36 = vrot.slane %v5376_v38, 2  ;;  %v1060_v19 = vrot.slane %v5403_v47, 2 }
  0xb3   : > { %6313 = vst [vmem:[#allocation53_spill] sm:$0xff] %v5522_v27  ;;  %6314 = vst [vmem:[#allocation54_spill] sm:$0xff] %v5535_v34 }
  0xb4   : > { %3854 = vmatmul.mubr.msk.f32.vlgmr.msra.gmra.mrb[0].mxu1 %vm402_vm1, %v4969_v3  ;;  %v5562_v42 = vsel %vm981_vm2, %v1057_v36, %v1058_v4  ;;  %v5578_v47 = vsel %vm981_vm2, %v1058_v4, %v1060_v19  ;;  %v5605_v36 = vld [vmem:[#allocation5 + $0x40] sm:$0xff]  ;;  %v985_v19 = vrot.slane %v4982_v11, 2  ;;  %v6322_v11 = vld [vmem:[#allocation32_spill] sm:$0xff] }
  0xb5   : > { %3902 = vmatpush3.msra.mxu1 %v5117_v61  ;;  %4078 = vmatmul.mubr.msk.f32.gmra.mrb[16].mxu0 %vm402_vm1, %v5463_v44  ;;  %v1043_v61 = vrot.slane %v5273_v10, 2  ;;  %6317 = vst [vmem:[#allocation57_spill] sm:$0xff] %v5562_v42  ;;  %6318 = vst [vmem:[#allocation58_spill] sm:$0xff] %v5578_v47 }
  0xb6   : > { %3856 = vmatprep.mubr.msk.f32.mxu1 %vm402_vm1, %v4973_v6  ;;  %4080 = vmatprep.mubr.msk.f32.mxu0 %vm402_vm1, %v5467_v0  ;;  %v5549_v6 = vld [vmem:[%s4952_s6 + $0x188] sm:$0xff] }
  0xb7   : > { %3951 = vmatprep.subr.mxu1 %v5473_v23  ;;  %v5505_v14 = vsel %vm981_vm2, %v1042_v62, %v1043_v61  ;;  %v5518_v51 = vsel %vm981_vm2, %v1043_v61, %v1045_v33  ;;  %v1052_v62 = vrot.slane %v5341_v20, 2  ;;  %v1055_v61 = vrot.slane %v5368_v59, 2 }
  0xb8   : > { %3857 = vmatmul.mubr.msk.f32.gmra.mrb[2].mxu1 %vm402_vm1, %v4978_v8  ;;  %6312 = vst [vmem:[#allocation52_spill] sm:$0xff] %v5518_v51  ;;  %v5546_v8 = vld [vmem:[%s4952_s6 + $0x180] sm:$0xff] }
  0xb9   : > { %4081 = vmatmul.mubr.msk.f32.gmra.mrb[18].mxu0 %vm402_vm1, %v5483_v16  ;;  %3859 = vmatprep.mubr.msk.f32.mxu1 %vm402_vm1, %v4990_v15  ;;  %v5539_v33 = vsel %vm981_vm2, %v1052_v62, %v1053_v56  ;;  %v5558_v59 = vsel %vm981_vm2, %v1053_v56, %v1055_v61  ;;  %v1919_v62 = vrot.slane %v5546_v8, 2 }
  0xba   : > { %4083 = vmatprep.mubr.msk.f32.mxu0 %vm402_vm1, %v5487_v48  ;;  %6315 = vst [vmem:[#allocation55_spill] sm:$0xff] %v5539_v33  ;;  %6316 = vst [vmem:[#allocation56_spill] sm:$0xff] %v5558_v59 }
  0xbc   : > { %3860 = vmatmul.mubr.msk.f32.gmra.mrb[4].mxu1 %vm402_vm1, %v4995_v18 }
  0xbd   : > { %4084 = vmatmul.mubr.msk.f32.gmra.mrb[20].mxu0 %vm402_vm1, %v5501_v55  ;;  %3862 = vmatprep.mubr.msk.f32.mxu1 %vm402_vm1, %v5007_v25 }
  0xbe   : > { %4086 = vmatprep.mubr.msk.f32.mxu0 %vm402_vm1, %v5505_v14 }
  0xc0   : > { %3863 = vmatmul.mubr.msk.f32.gmra.mrb[6].mxu1 %vm402_vm1, %v5010_v26 }
  0xc1   : > { %4087 = vmatmul.mubr.msk.f32.gmra.mrb[22].mxu0 %vm402_vm1, %v5518_v51  ;;  %3865 = vmatprep.mubr.msk.f32.mxu1 %vm402_vm1, %v5021_v31  ;;  %v5567_v51 = vld [vmem:[%s4952_s6 + $0x190] sm:$0x3] }
  0xc2   : > { %4089 = vmatprep.mubr.msk.f32.mxu0 %vm402_vm1, %v5522_v27  ;;  %v1920_v27 = vrot.slane %v5549_v6, 2  ;;  %v1922_v56 = vrot.slane %v5567_v51, 2 }
  0xc4   : > { %3866 = vmatmul.mubr.msk.f32.gmra.mrb[8].mxu1 %vm402_vm1, %v5024_v32  ;;  %v5582_v61 = vsel %vm981_vm2, %v1919_v62, %v1920_v27  ;;  %v5593_v4 = vsel %vm981_vm2, %v1920_v27, %v1922_v56  ;;  %v983_v27 = vrot.slane %v4969_v3, 2  ;;  %v6321_v3 = vld [vmem:[#allocation30_spill] sm:$0xff]  ;;  %v6326_v56 = vld [vmem:[#allocation40_spill] sm:$0xff] }
  0xc5   : > { %4090 = vmatmul.mubr.msk.f32.gmra.mrb[24].mxu0 %vm402_vm1, %v5535_v34  ;;  %3868 = vmatprep.mubr.msk.f32.mxu1 %vm402_vm1, %v5047_v40  ;;  %6319 = vst [vmem:[#allocation59_spill] sm:$0xff] %v5582_v61  ;;  %6320 = vst [vmem:[#allocation60_spill] sm:$0xff] %v5593_v4 }
  0xc6   : > { %4092 = vmatprep.mubr.msk.f32.mxu0 %vm402_vm1, %v5539_v33 }
  0xc8   : > { %3869 = vmatmul.mubr.msk.f32.gmra.mrb[10].mxu1 %vm402_vm1, %v5050_v41 }
  0xc9   : > { %4093 = vmatmul.mubr.msk.f32.gmra.mrb[26].mxu0 %vm402_vm1, %v5558_v59  ;;  %3871 = vmatprep.mubr.msk.f32.mxu1 %vm402_vm1, %v5076_v49 }
  0xca   : > { %4095 = vmatprep.mubr.msk.f32.mxu0 %vm402_vm1, %v5562_v42 }
  0xcc   : > { %3872 = vmatmul.mubr.msk.f32.gmra.mrb[12].mxu1 %vm402_vm1, %v5079_v50 }
  0xcd   : > { %4096 = vmatmul.mubr.msk.f32.gmra.mrb[28].mxu0 %vm402_vm1, %v5578_v47  ;;  %3874 = vmatprep.mubr.msk.f32.mxu1 %vm402_vm1, %v5102_v57 }
  0xce   : > { %4098 = vmatprep.mubr.msk.f32.mxu0 %vm402_vm1, %v5582_v61  ;;  %v6331_v61 = vld [vmem:[#allocation16_spill] sm:$0xff] }
  0xd0   : > { %3875 = vmatmul.mubr.msk.f32.gmra.mrb[14].mxu1 %vm402_vm1, %v5105_v58 }
  0xd1   : > { %4099 = vmatmul.mubr.msk.f32.gmra.mrb[30].mxu0 %vm402_vm1, %v5593_v4  ;;  %3877 = vmatprep.mubr.msk.f32.mxu1 %vm402_vm1, %v5131_v5  ;;  %v6330_v4 = vld [vmem:[#allocation15_spill] sm:$0xff] }
  0xd2   : > { %4103 = vmatprep.mubr.msk.f32.mxu0 %vm402_vm1, %v4990_v15 }
  0xd4   : > { %3878 = vmatmul.mubr.msk.f32.gmra.mrb[16].mxu1 %vm402_vm1, %v5134_v7 }
  0xd5   : > { %4104 = vmatmul.mubr.msk.f32.vlgmr.msra.gmra.mrb[0].mxu0 %vm402_vm1, %v4995_v18  ;;  %3880 = vmatprep.mubr.msk.f32.mxu1 %vm402_vm1, %v5172_v28 }
  0xd6   : > { %4152 = vmatpush3.msra.mxu0 %v5239_v30  ;;  %4106 = vmatprep.mubr.msk.f32.mxu0 %vm402_vm1, %v5007_v25  ;;  %v982_v30 = vrot.slane %v4965_v2, 2  ;;  %v986_v2 = vsel %vm981_vm2, %v983_v27, %v985_v19  ;;  %v6328_v19 = vld [vmem:[#allocation46_spill] sm:$0xff] }
  0xd7   : > { %4201 = vmatprep.subr.mxu0 %v5605_v36 }
  0xd8   : > { %3881 = vmatmul.mubr.msk.f32.gmra.mrb[18].mxu1 %vm402_vm1, %v5175_v29  ;;  %v984_v62 = vsel %vm981_vm2, %v982_v30, %v983_v27  ;;  %v6327_v30 = vld [vmem:[#allocation42_spill] sm:$0xff] }
  0xd9   : > { %4107 = vmatmul.mubr.msk.f32.gmra.mrb[2].mxu0 %vm402_vm1, %v5010_v26  ;;  %3883 = vmatprep.mubr.msk.f32.mxu1 %vm402_vm1, %v5200_v52  ;;  %v5725_v27 = vld [vmem:[%s4952_s6 + $0x198] sm:$0xff] }
  0xda   : > { %4109 = vmatprep.mubr.msk.f32.mxu0 %vm402_vm1, %v5021_v31 }
  0xdc   : > { %3884 = vmatmul.mubr.msk.f32.gmra.mrb[20].mxu1 %vm402_vm1, %v5203_v54 }
  0xdd   : > { %4110 = vmatmul.mubr.msk.f32.gmra.mrb[4].mxu0 %vm402_vm1, %v5024_v32  ;;  %3886 = vmatprep.mubr.msk.f32.mxu1 %vm402_vm1, %v5232_v22 }
  0xde   : > { %4112 = vmatprep.mubr.msk.f32.mxu0 %vm402_vm1, %v5047_v40 }
  0xe0   : > { %3887 = vmatmul.mubr.msk.f32.gmra.mrb[22].mxu1 %vm402_vm1, %v5235_v24 }
  0xe1   : > { %4113 = vmatmul.mubr.msk.f32.gmra.mrb[6].mxu0 %vm402_vm1, %v5050_v41  ;;  %3889 = vmatprep.mubr.msk.f32.mxu1 %vm402_vm1, %v5270_v9 }
  0xe2   : > { %4115 = vmatprep.mubr.msk.f32.mxu0 %vm402_vm1, %v5076_v49 }
  0xe4   : > { %3890 = vmatmul.mubr.msk.f32.gmra.mrb[24].mxu1 %vm402_vm1, %v5273_v10 }
  0xe5   : > { %4116 = vmatmul.mubr.msk.f32.gmra.mrb[8].mxu0 %vm402_vm1, %v5079_v50  ;;  %3892 = vmatprep.mubr.msk.f32.mxu1 %vm402_vm1, %v5306_v45 }
  0xe6   : > { %4118 = vmatprep.mubr.msk.f32.mxu0 %vm402_vm1, %v5102_v57 }
  0xe8   : > { %3893 = vmatmul.mubr.msk.f32.gmra.mrb[26].mxu1 %vm402_vm1, %v5309_v12 }
  0xe9   : > { %4119 = vmatmul.mubr.msk.f32.gmra.mrb[10].mxu0 %vm402_vm1, %v5105_v58  ;;  %3895 = vmatprep.mubr.msk.f32.mxu1 %vm402_vm1, %v5341_v20 }
  0xea   : > { %4121 = vmatprep.mubr.msk.f32.mxu0 %vm402_vm1, %v5131_v5 }
  0xec   : > { %3896 = vmatmul.mubr.msk.f32.gmra.mrb[28].mxu1 %vm402_vm1, %v5344_v53 }
  0xed   : > { %4122 = vmatmul.mubr.msk.f32.gmra.mrb[12].mxu0 %vm402_vm1, %v5134_v7  ;;  %3898 = vmatprep.mubr.msk.f32.mxu1 %vm402_vm1, %v5376_v38 }
  0xee   : > { %4124 = vmatprep.mubr.msk.f32.mxu0 %vm402_vm1, %v5172_v28 }
  0xf0   : > { %3899 = vmatmul.mubr.msk.f32.gmra.mrb[30].mxu1 %vm402_vm1, %v5379_v43 }
  0xf1   : > { %4125 = vmatmul.mubr.msk.f32.gmra.mrb[14].mxu0 %vm402_vm1, %v5175_v29  ;;  %3903 = vmatprep.mubr.msk.f32.mxu1 %vm402_vm1, %v984_v62  ;;  %v5736_v62 = vld [vmem:[%s4952_s6 + $0x1a0] sm:$0xff] }
  0xf2   : > { %4127 = vmatprep.mubr.msk.f32.mxu0 %vm402_vm1, %v5200_v52 }
  0xf4   : > { %3904 = vmatmul.mubr.msk.f32.vlgmr.msra.gmra.mrb[0].mxu1 %vm402_vm1, %v986_v2  ;;  %v6329_v2 = vld [vmem:[#allocation14_spill] sm:$0xff] }
  0xf5   : > { %3952 = vmatpush3.msra.mxu1 %v5473_v23  ;;  %4128 = vmatmul.mubr.msk.f32.gmra.mrb[16].mxu0 %vm402_vm1, %v5203_v54  ;;  %v6325_v23 = vld [vmem:[#allocation38_spill] sm:$0xff] }
  0xf6   : > { %3906 = vmatprep.mubr.msk.f32.mxu1 %vm402_vm1, %v5195_v46  ;;  %4130 = vmatprep.mubr.msk.f32.mxu0 %vm402_vm1, %v5232_v22  ;;  %v6323_v46 = vld [vmem:[#allocation34_spill] sm:$0xff] }
  0xf7   : > { %4251 = vmatprep.subr.mxu1 %v4962_v1 }
  0xf8   : > { %3907 = vmatmul.mubr.msk.f32.gmra.mrb[2].mxu1 %vm402_vm1, %v5216_v63  ;;  %v6324_v63 = vld [vmem:[#allocation36_spill] sm:$0xff] }
  0xf9   : > { %4131 = vmatmul.mubr.msk.f32.gmra.mrb[18].mxu0 %vm402_vm1, %v5235_v24  ;;  %3909 = vmatprep.mubr.msk.f32.mxu1 %vm402_vm1, %v5227_v21 }
  0xfa   : > { %4133 = vmatprep.mubr.msk.f32.mxu0 %vm402_vm1, %v5270_v9 }
  0xfc   : > { %3910 = vmatmul.mubr.msk.f32.gmra.mrb[4].mxu1 %vm402_vm1, %v6321_v3 }
  0xfd   : > { %4134 = vmatmul.mubr.msk.f32.gmra.mrb[20].mxu0 %vm402_vm1, %v5273_v10  ;;  %3912 = vmatprep.mubr.msk.f32.mxu1 %vm402_vm1, %v6322_v11 }
  0xfe   : > { %4136 = vmatprep.mubr.msk.f32.mxu0 %vm402_vm1, %v5306_v45 }
 0x100   : > { %3913 = vmatmul.mubr.msk.f32.gmra.mrb[6].mxu1 %vm402_vm1, %v6323_v46 }
 0x101   : > { %4137 = vmatmul.mubr.msk.f32.gmra.mrb[22].mxu0 %vm402_vm1, %v5309_v12  ;;  %3915 = vmatprep.mubr.msk.f32.mxu1 %vm402_vm1, %v6324_v63 }
 0x102   : > { %4139 = vmatprep.mubr.msk.f32.mxu0 %vm402_vm1, %v5341_v20 }
 0x104   : > { %3916 = vmatmul.mubr.msk.f32.gmra.mrb[8].mxu1 %vm402_vm1, %v6325_v23 }
 0x105   : > { %4140 = vmatmul.mubr.msk.f32.gmra.mrb[24].mxu0 %vm402_vm1, %v5344_v53  ;;  %3918 = vmatprep.mubr.msk.f32.mxu1 %vm402_vm1, %v6326_v56 }
 0x106   : > { %4142 = vmatprep.mubr.msk.f32.mxu0 %vm402_vm1, %v5376_v38 }
 0x108   : > { %3919 = vmatmul.mubr.msk.f32.gmra.mrb[10].mxu1 %vm402_vm1, %v6327_v30 }
 0x109   : > { %4143 = vmatmul.mubr.msk.f32.gmra.mrb[26].mxu0 %vm402_vm1, %v5379_v43  ;;  %3921 = vmatprep.mubr.msk.f32.mxu1 %vm402_vm1, %v5371_v35  ;;  %v6332_v43 = vld [vmem:[#allocation17_spill] sm:$0xff] }
 0x10a   : > { %4145 = vmatprep.mubr.msk.f32.mxu0 %vm402_vm1, %v5546_v8 }
 0x10c   : > { %3922 = vmatmul.mubr.msk.f32.gmra.mrb[12].mxu1 %vm402_vm1, %v6328_v19 }
 0x10d   : > { %4146 = vmatmul.mubr.msk.f32.gmra.mrb[28].mxu0 %vm402_vm1, %v5549_v6  ;;  %3924 = vmatprep.mubr.msk.f32.mxu1 %vm402_vm1, %v5406_v37 }
 0x10e   : > { %4148 = vmatprep.mubr.msk.f32.mxu0 %vm402_vm1, %v5725_v27 }
 0x110   : > { %3925 = vmatmul.mubr.msk.f32.gmra.mrb[14].mxu1 %vm402_vm1, %v5423_v39 }
 0x111   : > { %4149 = vmatmul.mubr.msk.f32.gmra.mrb[30].mxu0 %vm402_vm1, %v5736_v62  ;;  %3927 = vmatprep.mubr.msk.f32.mxu1 %vm402_vm1, %v5430_v13 }
 0x112   : > { %4153 = vmatprep.mubr.msk.f32.mxu0 %vm402_vm1, %v6329_v2  ;;  %v6333_v2 = vld [vmem:[#allocation18_spill] sm:$0xff] }
 0x114   : > { %3928 = vmatmul.mubr.msk.f32.gmra.mrb[16].mxu1 %vm402_vm1, %v5446_v17 }
 0x115   : > { %4154 = vmatmul.mubr.msk.f32.vlgmr.msra.gmra.mrb[0].mxu0 %vm402_vm1, %v6330_v4  ;;  %3930 = vmatprep.mubr.msk.f32.mxu1 %vm402_vm1, %v5450_v60  ;;  %v6334_v4 = vld [vmem:[#allocation19_spill] sm:$0xff] }
 0x116   : > { %4202 = vmatpush3.msra.mxu0 %v5605_v36  ;;  %4156 = vmatprep.mubr.msk.f32.mxu0 %vm402_vm1, %v6331_v61  ;;  %v6335_v61 = vld [vmem:[#allocation20_spill] sm:$0xff]  ;;  %v6337_v36 = vld [vmem:[#allocation22_spill] sm:$0xff] }
 0x118   : > { %3931 = vmatmul.mubr.msk.f32.gmra.mrb[18].mxu1 %vm402_vm1, %v5463_v44 }
 0x119   : > { %4157 = vmatmul.mubr.msk.f32.gmra.mrb[2].mxu0 %vm402_vm1, %v6332_v43  ;;  %3933 = vmatprep.mubr.msk.f32.mxu1 %vm402_vm1, %v5467_v0  ;;  %v6336_v43 = vld [vmem:[#allocation21_spill] sm:$0xff] }
 0x11a   : > { %4159 = vmatprep.mubr.msk.f32.mxu0 %vm402_vm1, %v6333_v2  ;;  %v6338_v2 = vld [vmem:[#allocation52_spill] sm:$0xff] }
 0x11c   : > { %3934 = vmatmul.mubr.msk.f32.gmra.mrb[20].mxu1 %vm402_vm1, %v5483_v16 }
 0x11d   : > { %4160 = vmatmul.mubr.msk.f32.gmra.mrb[4].mxu0 %vm402_vm1, %v6334_v4  ;;  %3936 = vmatprep.mubr.msk.f32.mxu1 %vm402_vm1, %v5487_v48  ;;  %v6339_v4 = vld [vmem:[#allocation23_spill] sm:$0xff]  ;;  %v6340_v48 = vld [vmem:[#allocation53_spill] sm:$0xff] }
 0x11e   : > { %4162 = vmatprep.mubr.msk.f32.mxu0 %vm402_vm1, %v6335_v61  ;;  %v6341_v61 = vld [vmem:[#allocation24_spill] sm:$0xff] }
 0x120   : > { %3937 = vmatmul.mubr.msk.f32.gmra.mrb[22].mxu1 %vm402_vm1, %v5501_v55 }
 0x121   : > { %4163 = vmatmul.mubr.msk.f32.gmra.mrb[6].mxu0 %vm402_vm1, %v6336_v43  ;;  %3939 = vmatprep.mubr.msk.f32.mxu1 %vm402_vm1, %v5505_v14  ;;  %v6342_v43 = vld [vmem:[#allocation25_spill] sm:$0xff] }
 0x122   : > { %4165 = vmatprep.mubr.msk.f32.mxu0 %vm402_vm1, %v6337_v36  ;;  %v6343_v36 = vld [vmem:[#allocation26_spill] sm:$0xff] }
 0x124   : > { %3940 = vmatmul.mubr.msk.f32.gmra.mrb[24].mxu1 %vm402_vm1, %v6338_v2 }
 0x125   : > { %4166 = vmatmul.mubr.msk.f32.gmra.mrb[8].mxu0 %vm402_vm1, %v6339_v4  ;;  %3942 = vmatprep.mubr.msk.f32.mxu1 %vm402_vm1, %v6340_v48  ;;  %v6344_v4 = vld [vmem:[#allocation27_spill] sm:$0xff] }
 0x126   : > { %4168 = vmatprep.mubr.msk.f32.mxu0 %vm402_vm1, %v6341_v61  ;;  %v6345_v61 = vld [vmem:[#allocation28_spill] sm:$0xff] }
 0x128   : > { %3943 = vmatmul.mubr.msk.f32.gmra.mrb[26].mxu1 %vm402_vm1, %v5535_v34  ;;  %v5861_v34 = vld [vmem:[%s4952_s6 + $0x1a8] sm:$0x3] }
 0x129   : > { %4169 = vmatmul.mubr.msk.f32.gmra.mrb[10].mxu0 %vm402_vm1, %v6342_v43  ;;  %3945 = vmatprep.mubr.msk.f32.mxu1 %vm402_vm1, %v5539_v33  ;;  %v6346_v43 = vld [vmem:[#allocation29_spill] sm:$0xff]  ;;  %v6347_v33 = vld [vmem:[#allocation12_spill] sm:$0xff] }
 0x12a   : > { %4171 = vmatprep.mubr.msk.f32.mxu0 %vm402_vm1, %v6343_v36  ;;  %v6348_v36 = vld [vmem:[#allocation31_spill] sm:$0xff] }
 0x12c   : > { %3946 = vmatmul.mubr.msk.f32.gmra.mrb[28].mxu1 %vm402_vm1, %v5558_v59  ;;  %v6349_v59 = vld [vmem:[#allocation13_spill] sm:$0xff] }
 0x12d   : > { %4172 = vmatmul.mubr.msk.f32.gmra.mrb[12].mxu0 %vm402_vm1, %v6344_v4  ;;  %3948 = vmatprep.mubr.msk.f32.mxu1 %vm402_vm1, %v5562_v42  ;;  %v6350_v4 = vld [vmem:[#allocation33_spill] sm:$0xff]  ;;  %v6358_v42 = vld [vmem:[#allocation48_spill] sm:$0xff] }
 0x12e   : > { %4174 = vmatprep.mubr.msk.f32.mxu0 %vm402_vm1, %v6345_v61 }
 0x130   : > { %3949 = vmatmul.mubr.msk.f32.gmra.mrb[30].mxu1 %vm402_vm1, %v5578_v47  ;;  %v6351_v47 = vld [vmem:[#allocation35_spill] sm:$0xff] }
 0x131   : > { %4175 = vmatmul.mubr.msk.f32.gmra.mrb[14].mxu0 %vm402_vm1, %v6346_v43  ;;  %3953 = vmatprep.mubr.msk.f32.mxu1 %vm402_vm1, %v6347_v33  ;;  %v6352_v33 = vld [vmem:[#allocation37_spill] sm:$0xff] }
 0x132   : > { %4177 = vmatprep.mubr.msk.f32.mxu0 %vm402_vm1, %v6348_v36 }
 0x134   : > { %3954 = vmatmul.mubr.msk.f32.vlgmr.msra.gmra.mrb[0].mxu1 %vm402_vm1, %v6349_v59  ;;  %v6353_v59 = vld [vmem:[#allocation39_spill] sm:$0xff] }
 0x135   : > { %4252 = vmatpush3.msra.mxu1 %v4962_v1  ;;  %4178 = vmatmul.mubr.msk.f32.gmra.mrb[16].mxu0 %vm402_vm1, %v6350_v4  ;;  %v6354_v1 = vld [vmem:[#allocation41_spill] sm:$0xff] }
 0x136   : > { %3956 = vmatprep.mubr.msk.f32.mxu1 %vm402_vm1, %v4990_v15  ;;  %4180 = vmatprep.mubr.msk.f32.mxu0 %vm402_vm1, %v6351_v47  ;;  %v6355_v15 = vld [vmem:[#allocation43_spill] sm:$0xff] }
 0x138   : > { %3957 = vmatmul.mubr.msk.f32.gmra.mrb[2].mxu1 %vm402_vm1, %v4995_v18  ;;  %v6356_v18 = vld [vmem:[#allocation45_spill] sm:$0xff] }
 0x139   : > { %4181 = vmatmul.mubr.msk.f32.gmra.mrb[18].mxu0 %vm402_vm1, %v6352_v33  ;;  %3959 = vmatprep.mubr.msk.f32.mxu1 %vm402_vm1, %v5007_v25  ;;  %v6357_v25 = vld [vmem:[#allocation47_spill] sm:$0xff] }
 0x13a   : > { %4183 = vmatprep.mubr.msk.f32.mxu0 %vm402_vm1, %v6353_v59 }
 0x13c   : > { %3960 = vmatmul.mubr.msk.f32.gmra.mrb[4].mxu1 %vm402_vm1, %v5010_v26  ;;  %v1651_v26 = vrot.slane %v5546_v8, 1 }
 0x13d   : > { %4184 = vmatmul.mubr.msk.f32.gmra.mrb[20].mxu0 %vm402_vm1, %v6354_v1  ;;  %3962 = vmatprep.mubr.msk.f32.mxu1 %vm402_vm1, %v5021_v31  ;;  %v1652_v31 = vrot.slane %v5549_v6, 1 }
 0x13e   : > { %4186 = vmatprep.mubr.msk.f32.mxu0 %vm402_vm1, %v6355_v15 }
 0x13f   : > { %v5858_v15 = vsel %vm319_vm0, %v1651_v26, %v1652_v31 }
 0x140   : > { %3963 = vmatmul.mubr.msk.f32.gmra.mrb[6].mxu1 %vm402_vm1, %v5024_v32  ;;  %v6359_v32 = vld [vmem:[#allocation49_spill] sm:$0xff] }
 0x141   : > { %4187 = vmatmul.mubr.msk.f32.gmra.mrb[22].mxu0 %vm402_vm1, %v6356_v18  ;;  %3965 = vmatprep.mubr.msk.f32.mxu1 %vm402_vm1, %v5047_v40  ;;  %v1654_v40 = vrot.slane %v5567_v51, 1  ;;  %v2454_v18 = vrot.slane %v5736_v62, 1  ;;  %v2456_v51 = vrot.slane %v5861_v34, 1 }
 0x142   : > { %4189 = vmatprep.mubr.msk.f32.mxu0 %vm402_vm1, %v6357_v25  ;;  %v2453_v25 = vrot.slane %v5725_v27, 1 }
 0x144   : > { %3966 = vmatmul.mubr.msk.f32.gmra.mrb[8].mxu1 %vm402_vm1, %v5050_v41  ;;  %v6360_v41 = vld [vmem:[#allocation50_spill] sm:$0xff]  ;;  %v2455_v26 = vsel %vm319_vm0, %v2453_v25, %v2454_v18 }
 0x145   : > { %4190 = vmatmul.mubr.msk.f32.gmra.mrb[24].mxu0 %vm402_vm1, %v6358_v42  ;;  %3968 = vmatprep.mubr.msk.f32.mxu1 %vm402_vm1, %v5076_v49  ;;  %v5872_v49 = vsel %vm319_vm0, %v1652_v31, %v1654_v40 }
 0x146   : > { %4192 = vmatprep.mubr.msk.f32.mxu0 %vm402_vm1, %v6359_v32 }
 0x148   : > { %3969 = vmatmul.mubr.msk.f32.gmra.mrb[10].mxu1 %vm402_vm1, %v5079_v50  ;;  %v2457_v50 = vsel %vm319_vm0, %v2454_v18, %v2456_v51 }
 0x149   : > { %4193 = vmatmul.mubr.msk.f32.gmra.mrb[26].mxu0 %vm402_vm1, %v6360_v41  ;;  %3971 = vmatprep.mubr.msk.f32.mxu1 %vm402_vm1, %v5102_v57  ;;  %v6364_v57 = vld [vmem:[#allocation43_spill] sm:$0xff] }
 0x14a   : > { %4195 = vmatprep.mubr.msk.f32.mxu0 %vm402_vm1, %v5858_v15 }
 0x14c   : > { %3972 = vmatmul.mubr.msk.f32.gmra.mrb[12].mxu1 %vm402_vm1, %v5105_v58  ;;  %v6365_v58 = vld [vmem:[#allocation55_spill] sm:$0xff] }
 0x14d   : > { %4196 = vmatmul.mubr.msk.f32.gmra.mrb[28].mxu0 %vm402_vm1, %v5872_v49  ;;  %3974 = vmatprep.mubr.msk.f32.mxu1 %vm402_vm1, %v5131_v5  ;;  %v6366_v5 = vld [vmem:[#allocation45_spill] sm:$0xff] }
 0x14e   : > { %4198 = vmatprep.mubr.msk.f32.mxu0 %vm402_vm1, %v2455_v26 }
 0x150   : > { %3975 = vmatmul.mubr.msk.f32.gmra.mrb[14].mxu1 %vm402_vm1, %v5134_v7  ;;  %v6367_v7 = vld [vmem:[#allocation56_spill] sm:$0xff] }
 0x151   : > { %4199 = vmatmul.mubr.msk.f32.gmra.mrb[30].mxu0 %vm402_vm1, %v2457_v50  ;;  %3977 = vmatprep.mubr.msk.f32.mxu1 %vm402_vm1, %v5172_v28  ;;  %v2721_v28 = vrot.slane %v5725_v27, 2 }
 0x152   : > { %4203 = vmatprep.mubr.msk.f32.mxu0 %vm402_vm1, %v5227_v21  ;;  %v2724_v21 = vrot.slane %v5861_v34, 2 }
 0x154   : > { %3978 = vmatmul.mubr.msk.f32.gmra.mrb[16].mxu1 %vm402_vm1, %v5175_v29  ;;  %v2722_v29 = vrot.slane %v5736_v62, 2 }
 0x155   : > { %4204 = vmatmul.mubr.msk.f32.vlgmr.msra.gmra.mrb[0].mxu0 %vm402_vm1, %v6321_v3  ;;  %3980 = vmatprep.mubr.msk.f32.mxu1 %vm402_vm1, %v5200_v52  ;;  %v6370_v52 = vld [vmem:[#allocation58_spill] sm:$0xff] }
 0x156   : > { %4206 = vmatprep.mubr.msk.f32.mxu0 %vm402_vm1, %v6322_v11 }
 0x158   : > { %3981 = vmatmul.mubr.msk.f32.gmra.mrb[18].mxu1 %vm402_vm1, %v5203_v54  ;;  %v6371_v54 = vld [vmem:[#allocation59_spill] sm:$0xff] }
 0x159   : > { %4207 = vmatmul.mubr.msk.f32.gmra.mrb[2].mxu0 %vm402_vm1, %v6323_v46  ;;  %3983 = vmatprep.mubr.msk.f32.mxu1 %vm402_vm1, %v5232_v22  ;;  %v6369_v22 = vld [vmem:[#allocation57_spill] sm:$0xff] }
 0x15a   : > { %4209 = vmatprep.mubr.msk.f32.mxu0 %vm402_vm1, %v6324_v63 }
 0x15c   : > { %3984 = vmatmul.mubr.msk.f32.gmra.mrb[20].mxu1 %vm402_vm1, %v5235_v24  ;;  %v2723_v24 = vsel %vm981_vm2, %v2721_v28, %v2722_v29 }
 0x15d   : > { %4210 = vmatmul.mubr.msk.f32.gmra.mrb[4].mxu0 %vm402_vm1, %v6325_v23  ;;  %3986 = vmatprep.mubr.msk.f32.mxu1 %vm402_vm1, %v5270_v9  ;;  %v6368_v9 = vld [vmem:[#allocation47_spill] sm:$0xff] }
 0x15e   : > { %4212 = vmatprep.mubr.msk.f32.mxu0 %vm402_vm1, %v6326_v56 }
 0x160   : > { %3987 = vmatmul.mubr.msk.f32.gmra.mrb[22].mxu1 %vm402_vm1, %v5273_v10  ;;  %v6372_v10 = vld [vmem:[#allocation60_spill] sm:$0xff] }
 0x161   : > { %4213 = vmatmul.mubr.msk.f32.gmra.mrb[6].mxu0 %vm402_vm1, %v6327_v30  ;;  %3989 = vmatprep.mubr.msk.f32.mxu1 %vm402_vm1, %v5306_v45  ;;  %v6361_v45 = vld [vmem:[#allocation44_spill] sm:$0xff] }
 0x162   : > { %4215 = vmatprep.mubr.msk.f32.mxu0 %vm402_vm1, %v5371_v35 }
 0x164   : > { %3990 = vmatmul.mubr.msk.f32.gmra.mrb[24].mxu1 %vm402_vm1, %v5309_v12  ;;  %v2725_v12 = vsel %vm981_vm2, %v2722_v29, %v2724_v21 }
 0x165   : > { %4216 = vmatmul.mubr.msk.f32.gmra.mrb[8].mxu0 %vm402_vm1, %v6328_v19  ;;  %3992 = vmatprep.mubr.msk.f32.mxu1 %vm402_vm1, %v5341_v20 }
 0x166   : > { %4218 = vmatprep.mubr.msk.f32.mxu0 %vm402_vm1, %v5406_v37 }
 0x168   : > { %3993 = vmatmul.mubr.msk.f32.gmra.mrb[26].mxu1 %vm402_vm1, %v5344_v53 }
 0x169   : > { %4219 = vmatmul.mubr.msk.f32.gmra.mrb[10].mxu0 %vm402_vm1, %v5423_v39  ;;  %3995 = vmatprep.mubr.msk.f32.mxu1 %vm402_vm1, %v5376_v38 }
 0x16a   : > { %4221 = vmatprep.mubr.msk.f32.mxu0 %vm402_vm1, %v5430_v13 }
 0x16c   : > { %3996 = vmatmul.mubr.msk.f32.gmra.mrb[28].mxu1 %vm402_vm1, %v6361_v45 }
 0x16d   : > { %4222 = vmatmul.mubr.msk.f32.gmra.mrb[12].mxu0 %vm402_vm1, %v5446_v17  ;;  %3998 = vmatprep.mubr.msk.f32.mxu1 %vm402_vm1, %v5546_v8  ;;  %v6362_v8 = vld [vmem:[#allocation51_spill] sm:$0xff] }
 0x16e   : > { %4224 = vmatprep.mubr.msk.f32.mxu0 %vm402_vm1, %v5450_v60 }
 0x170   : > { %3999 = vmatmul.mubr.msk.f32.gmra.mrb[30].mxu1 %vm402_vm1, %v5549_v6  ;;  %v6363_v6 = vld [vmem:[#allocation54_spill] sm:$0xff] }
 0x171   : > { %4225 = vmatmul.mubr.msk.f32.gmra.mrb[14].mxu0 %vm402_vm1, %v5463_v44  ;;  %4027 = vmatprep.mubr.msk.f32.mxu1 %vm402_vm1, %v6345_v61 }
 0x172   : > { %4227 = vmatprep.mubr.msk.f32.mxu0 %vm402_vm1, %v5467_v0 }
 0x174   : > { %4028 = vmatmul.mubr.msk.f32.vlgmr.msra.gmra.mrb[16].mxu1 %vm402_vm1, %v6346_v43 }
 0x175   : > { %4228 = vmatmul.mubr.msk.f32.gmra.mrb[16].mxu0 %vm402_vm1, %v5483_v16  ;;  %4030 = vmatprep.mubr.msk.f32.mxu1 %vm402_vm1, %v6348_v36 }
 0x176   : > { %4230 = vmatprep.mubr.msk.f32.mxu0 %vm402_vm1, %v6362_v8 }
 0x178   : > { %4031 = vmatmul.mubr.msk.f32.gmra.mrb[18].mxu1 %vm402_vm1, %v6350_v4 }
 0x179   : > { %4231 = vmatmul.mubr.msk.f32.gmra.mrb[18].mxu0 %vm402_vm1, %v5501_v55  ;;  %4033 = vmatprep.mubr.msk.f32.mxu1 %vm402_vm1, %v6351_v47  ;;  %v6026_v47 = vld [vmem:[#allocation7] ss:$0 sm:$0xff] }
 0x17a   : > { %4233 = vmatprep.mubr.msk.f32.mxu0 %vm402_vm1, %v5505_v14 }
 0x17c   : > { %4034 = vmatmul.mubr.msk.f32.gmra.mrb[20].mxu1 %vm402_vm1, %v6352_v33 }
 0x17d   : > { %4234 = vmatmul.mubr.msk.f32.gmra.mrb[20].mxu0 %vm402_vm1, %v6338_v2  ;;  %4036 = vmatprep.mubr.msk.f32.mxu1 %vm402_vm1, %v6353_v59 }
 0x17e   : > { %4236 = vmatprep.mubr.msk.f32.mxu0 %vm402_vm1, %v6340_v48 }
 0x180   : > { %4037 = vmatmul.mubr.msk.f32.gmra.mrb[22].mxu1 %vm402_vm1, %v6354_v1 }
 0x181   : > { %4237 = vmatmul.mubr.msk.f32.gmra.mrb[22].mxu0 %vm402_vm1, %v6363_v6  ;;  %4039 = vmatprep.mubr.msk.f32.mxu1 %vm402_vm1, %v6364_v57 }
 0x182   : > { %4239 = vmatprep.mubr.msk.f32.mxu0 %vm402_vm1, %v6365_v58 }
 0x184   : > { %4040 = vmatmul.mubr.msk.f32.gmra.mrb[24].mxu1 %vm402_vm1, %v6366_v5 }
 0x185   : > { %4240 = vmatmul.mubr.msk.f32.gmra.mrb[24].mxu0 %vm402_vm1, %v6367_v7  ;;  %4042 = vmatprep.mubr.msk.f32.mxu1 %vm402_vm1, %v6368_v9 }
 0x186   : > { %4242 = vmatprep.mubr.msk.f32.mxu0 %vm402_vm1, %v6369_v22 }
 0x188   : > { %4043 = vmatmul.mubr.msk.f32.gmra.mrb[26].mxu1 %vm402_vm1, %v6358_v42 }
 0x189   : > { %4243 = vmatmul.mubr.msk.f32.gmra.mrb[26].mxu0 %vm402_vm1, %v6370_v52  ;;  %4045 = vmatprep.mubr.msk.f32.mxu1 %vm402_vm1, %v6359_v32 }
 0x18a   : > { %4245 = vmatprep.mubr.msk.f32.mxu0 %vm402_vm1, %v6371_v54 }
 0x18c   : > { %4046 = vmatmul.mubr.msk.f32.gmra.mrb[28].mxu1 %vm402_vm1, %v6360_v41 }
 0x18d   : > { %4246 = vmatmul.mubr.msk.f32.gmra.mrb[28].mxu0 %vm402_vm1, %v6372_v10  ;;  %4048 = vmatprep.mubr.msk.f32.mxu1 %vm402_vm1, %v5858_v15 }
 0x18e   : > { %4248 = vmatprep.mubr.msk.f32.mxu0 %vm402_vm1, %v2723_v24 }
 0x190   : > { %4049 = vmatmul.mubr.msk.f32.gmra.mrb[30].mxu1 %vm402_vm1, %v5872_v49 }
 0x191   : > { %4249 = vmatmul.mubr.msk.f32.gmra.mrb[30].mxu0 %vm402_vm1, %v2725_v12 }
 0x207   : > { %v3955_v38 = vpop.f32.mrb[0].mxu1 }
 0x208   : > { %v1459_v20 = vpop.f32.mrb[1].mxu1 }
 0x20b   : > { %v3958_v53 = vpop.f32.mrb[2].mxu1 }
 0x20c   : > { %v1469_v35 = vpop.f32.mrb[3].mxu1 }
 0x20f   : > { %v3961_v13 = vpop.f32.mrb[4].mxu1 }
 0x210   : > { %v1479_v37 = vpop.f32.mrb[5].mxu1 }
 0x213   : > { %v3964_v39 = vpop.f32.mrb[6].mxu1 }
 0x214   : > { %v1489_v17 = vpop.f32.mrb[7].mxu1 }
 0x217   : > { %v3967_v60 = vpop.f32.mrb[8].mxu1 }
 0x218   : > { %v1499_v44 = vpop.f32.mrb[9].mxu1 }
 0x21b   : > { %v3970_v0 = vpop.f32.mrb[10].mxu1 }
 0x21c   : > { %v1509_v16 = vpop.f32.mrb[11].mxu1 }
 0x21f   : > { %v6018_v48 = vpop.f32.mrb[12].mxu1 }
 0x220   : > { %v6020_v55 = vpop.f32.mrb[13].mxu1 }
 0x223   : > { %v6022_v14 = vpop.f32.mrb[14].mxu1 }
 0x224   : > { %v6024_v34 = vpop.f32.mrb[15].mxu1 }
 0x228   : > { %v4205_v42 = vpop.f32.mrb[0].mxu0 }
 0x229   : > { %v4253_v3 = vadd.f32 %v4205_v42, %v3955_v38  ;;  %v2798_v11 = vpop.f32.mrb[1].mxu0 }
 0x22a   : > { %v4254_v46 = vadd.f32 %v2798_v11, %v1459_v20 }
 0x22b   : > { %v2997_v63 = vadd.f32 %v4253_v3, %v6026_v47 }
 0x22c   : > { %v2996_v23 = vadd.f32 %v4254_v46, %v6026_v47  ;;  %v4208_v56 = vpop.f32.mrb[2].mxu0 }
 0x22d   : > { %v3029_v30 = vmax.f32 %v2997_v63, 0.0  ;;  %v4255_v27 = vadd.f32 %v4208_v56, %v3958_v53  ;;  %v2808_v19 = vpop.f32.mrb[3].mxu0 }
 0x22e   : > { %v3028_v62 = vmax.f32 %v2996_v23, 0.0  ;;  %v4256_v2 = vadd.f32 %v2808_v19, %v1469_v35 }
 0x22f   : > { %3062 = vst.msk [vmem:[%s6031_s20 + $0x8] sm:$0xff] %vm3060_vm3, %v3029_v30  ;;  %v2999_v61 = vadd.f32 %v4255_v27, %v6026_v47 }
 0x230   : > { %3061 = vst.msk [vmem:[%s6031_s20] sm:$0xff] %vm3060_vm3, %v3028_v62  ;;  %v2998_v43 = vadd.f32 %v4256_v2, %v6026_v47  ;;  %v4211_v36 = vpop.f32.mrb[4].mxu0 }
 0x231   : > { %v3031_v4 = vmax.f32 %v2999_v61, 0.0  ;;  %v4257_v33 = vadd.f32 %v4211_v36, %v3961_v13  ;;  %v2818_v59 = vpop.f32.mrb[5].mxu0 }
 0x232   : > { %v3030_v1 = vmax.f32 %v2998_v43, 0.0  ;;  %v4258_v15 = vadd.f32 %v2818_v59, %v1479_v37 }
 0x233   : > { %3064 = vst.msk [vmem:[%s6031_s20 + $0x18] sm:$0xff] %vm3060_vm3, %v3031_v4  ;;  %v3001_v18 = vadd.f32 %v4257_v33, %v6026_v47 }
 0x234   : > { %3063 = vst.msk [vmem:[%s6031_s20 + $0x10] sm:$0xff] %vm3060_vm3, %v3030_v1  ;;  %v3000_v25 = vadd.f32 %v4258_v15, %v6026_v47  ;;  %v4214_v31 = vpop.f32.mrb[6].mxu0 }
 0x235   : > { %v3033_v32 = vmax.f32 %v3001_v18, 0.0  ;;  %v4259_v40 = vadd.f32 %v4214_v31, %v3964_v39  ;;  %v2828_v41 = vpop.f32.mrb[7].mxu0 }
 0x236   : > { %v3032_v49 = vmax.f32 %v3000_v25, 0.0  ;;  %v4260_v51 = vadd.f32 %v2828_v41, %v1489_v17 }
 0x237   : > { %3066 = vst.msk [vmem:[%s6031_s20 + $0x28] sm:$0xff] %vm3060_vm3, %v3033_v32  ;;  %v3003_v26 = vadd.f32 %v4259_v40, %v6026_v47 }
 0x238   : > { %3065 = vst.msk [vmem:[%s6031_s20 + $0x20] sm:$0xff] %vm3060_vm3, %v3032_v49  ;;  %v3002_v50 = vadd.f32 %v4260_v51, %v6026_v47  ;;  %v4217_v45 = vpop.f32.mrb[8].mxu0 }
 0x239   : > { %v3035_v8 = vmax.f32 %v3003_v26, 0.0  ;;  %v4261_v6 = vadd.f32 %v4217_v45, %v3967_v60  ;;  %v2838_v57 = vpop.f32.mrb[9].mxu0 }
 0x23a   : > { %v3034_v58 = vmax.f32 %v3002_v50, 0.0  ;;  %v4262_v5 = vadd.f32 %v2838_v57, %v1499_v44 }
 0x23b   : > { %3068 = vst.msk [vmem:[%s6031_s20 + $0x38] sm:$0xff] %vm3060_vm3, %v3035_v8  ;;  %v3005_v7 = vadd.f32 %v4261_v6, %v6026_v47 }
 0x23c   : > { %3067 = vst.msk [vmem:[%s6031_s20 + $0x30] sm:$0xff] %vm3060_vm3, %v3034_v58  ;;  %v3004_v9 = vadd.f32 %v4262_v5, %v6026_v47  ;;  %v4220_v22 = vpop.f32.mrb[10].mxu0 }
 0x23d   : > { %v3037_v28 = vmax.f32 %v3005_v7, 0.0  ;;  %v4263_v29 = vadd.f32 %v4220_v22, %v3970_v0  ;;  %v2848_v52 = vpop.f32.mrb[11].mxu0 }
 0x23e   : > { %v3036_v54 = vmax.f32 %v3004_v9, 0.0  ;;  %v4264_v21 = vadd.f32 %v2848_v52, %v1509_v16 }
 0x23f   : > { %3070 = vst.msk [vmem:[%s6031_s20 + $0x48] sm:$0xff] %vm3060_vm3, %v3037_v28  ;;  %v3007_v24 = vadd.f32 %v4263_v29, %v6026_v47 }
 0x240   : > { %3069 = vst.msk [vmem:[%s6031_s20 + $0x40] sm:$0xff] %vm3060_vm3, %v3036_v54  ;;  %v3006_v10 = vadd.f32 %v4264_v21, %v6026_v47  ;;  %v4223_v12 = vpop.f32.mrb[12].mxu0 }
 0x241   : > { %v3039_v38 = vmax.f32 %v3007_v24, 0.0  ;;  %v4265_v20 = vadd.f32 %v4223_v12, %v6018_v48  ;;  %v2858_v53 = vpop.f32.mrb[13].mxu0 }
 0x242   : > { %v3038_v35 = vmax.f32 %v3006_v10, 0.0  ;;  %v4266_v13 = vadd.f32 %v2858_v53, %v6020_v55 }
 0x243   : > { %3072 = vst.msk [vmem:[%s6031_s20 + $0x58] sm:$0xff] %vm3060_vm3, %v3039_v38  ;;  %v3009_v37 = vadd.f32 %v4265_v20, %v6026_v47 }
 0x244   : > { %3071 = vst.msk [vmem:[%s6031_s20 + $0x50] sm:$0xff] %vm3060_vm3, %v3038_v35  ;;  %v3008_v39 = vadd.f32 %v4266_v13, %v6026_v47  ;;  %v4226_v17 = vpop.f32.mrb[14].mxu0 }
 0x245   : > { %v3041_v60 = vmax.f32 %v3009_v37, 0.0  ;;  %v4267_v44 = vadd.f32 %v4226_v17, %v6022_v14  ;;  %v2868_v0 = vpop.f32.mrb[15].mxu0 }
 0x246   : > { %v3040_v16 = vmax.f32 %v3008_v39, 0.0  ;;  %v4268_v48 = vadd.f32 %v2868_v0, %v6024_v34 }
 0x247   : > { %3074 = vst.msk [vmem:[%s6031_s20 + $0x68] sm:$0xff] %vm3060_vm3, %v3041_v60  ;;  %v3011_v55 = vadd.f32 %v4267_v44, %v6026_v47  ;;  %v4029_v42 = vpop.f32.mrb[16].mxu1 }
 0x248   : > { %3073 = vst.msk [vmem:[%s6031_s20 + $0x60] sm:$0xff] %vm3060_vm3, %v3040_v16  ;;  %v3010_v3 = vadd.f32 %v4268_v48, %v6026_v47  ;;  %v4229_v11 = vpop.f32.mrb[16].mxu0  ;;  %v1808_v46 = vpop.f32.mrb[17].mxu1 }
 0x249   : > { %v3043_v63 = vmax.f32 %v3011_v55, 0.0  ;;  %v4269_v23 = vadd.f32 %v4229_v11, %v4029_v42  ;;  %v2878_v14 = vpop.f32.mrb[17].mxu0 }
 0x24a   : > { %v3042_v56 = vmax.f32 %v3010_v3, 0.0  ;;  %v4270_v30 = vadd.f32 %v2878_v14, %v1808_v46 }
 0x24b   : > { %3076 = vst.msk [vmem:[%s6031_s20 + $0x78] sm:$0xff] %vm3060_vm3, %v3043_v63  ;;  %v3013_v34 = vadd.f32 %v4269_v23, %v6026_v47  ;;  %v4032_v27 = vpop.f32.mrb[18].mxu1 }
 0x24c   : > { %3075 = vst.msk [vmem:[%s6031_s20 + $0x70] sm:$0xff] %vm3060_vm3, %v3042_v56  ;;  %v3012_v19 = vadd.f32 %v4270_v30, %v6026_v47  ;;  %v4232_v62 = vpop.f32.mrb[18].mxu0  ;;  %v1818_v2 = vpop.f32.mrb[19].mxu1 }
 0x24d   : > { %v3045_v61 = vmax.f32 %v3013_v34, 0.0  ;;  %v4271_v43 = vadd.f32 %v4232_v62, %v4032_v27  ;;  %v2888_v36 = vpop.f32.mrb[19].mxu0 }
 0x24e   : > { %v3044_v4 = vmax.f32 %v3012_v19, 0.0  ;;  %v4272_v33 = vadd.f32 %v2888_v36, %v1818_v2 }
 0x24f   : > { %3078 = vst.msk [vmem:[%s6031_s20 + $0x88] sm:$0xff] %vm3060_vm3, %v3045_v61  ;;  %v3015_v59 = vadd.f32 %v4271_v43, %v6026_v47  ;;  %v4035_v1 = vpop.f32.mrb[20].mxu1 }
 0x250   : > { %3077 = vst.msk [vmem:[%s6031_s20 + $0x80] sm:$0xff] %vm3060_vm3, %v3044_v4  ;;  %v3014_v15 = vadd.f32 %v4272_v33, %v6026_v47  ;;  %v4235_v18 = vpop.f32.mrb[20].mxu0  ;;  %v1828_v25 = vpop.f32.mrb[21].mxu1 }
 0x251   : > { %v3047_v31 = vmax.f32 %v3015_v59, 0.0  ;;  %v4273_v32 = vadd.f32 %v4235_v18, %v4035_v1  ;;  %v2898_v40 = vpop.f32.mrb[21].mxu0 }
 0x252   : > { %v3046_v41 = vmax.f32 %v3014_v15, 0.0  ;;  %v4274_v49 = vadd.f32 %v2898_v40, %v1828_v25 }
 0x253   : > { %3080 = vst.msk [vmem:[%s6031_s20 + $0x98] sm:$0xff] %vm3060_vm3, %v3047_v31  ;;  %v3017_v51 = vadd.f32 %v4273_v32, %v6026_v47  ;;  %v4038_v26 = vpop.f32.mrb[22].mxu1 }
 0x254   : > { %3079 = vst.msk [vmem:[%s6031_s20 + $0x90] sm:$0xff] %vm3060_vm3, %v3046_v41  ;;  %v3016_v50 = vadd.f32 %v4274_v49, %v6026_v47  ;;  %v4238_v45 = vpop.f32.mrb[22].mxu0  ;;  %v1838_v8 = vpop.f32.mrb[23].mxu1 }
 0x255   : > { %v3049_v6 = vmax.f32 %v3017_v51, 0.0  ;;  %v4275_v57 = vadd.f32 %v4238_v45, %v4038_v26  ;;  %v2908_v58 = vpop.f32.mrb[23].mxu0 }
 0x256   : > { %v3048_v5 = vmax.f32 %v3016_v50, 0.0  ;;  %v4276_v7 = vadd.f32 %v2908_v58, %v1838_v8 }
 0x257   : > { %3082 = vst.msk [vmem:[%s6031_s20 + $0xa8] sm:$0xff] %vm3060_vm3, %v3049_v6  ;;  %v3019_v9 = vadd.f32 %v4275_v57, %v6026_v47  ;;  %v4041_v22 = vpop.f32.mrb[24].mxu1 }
 0x258   : > { %3081 = vst.msk [vmem:[%s6031_s20 + $0xa0] sm:$0xff] %vm3060_vm3, %v3048_v5  ;;  %v3018_v28 = vadd.f32 %v4276_v7, %v6026_v47  ;;  %v4241_v29 = vpop.f32.mrb[24].mxu0  ;;  %v1848_v52 = vpop.f32.mrb[25].mxu1 }
 0x259   : > { %v3051_v54 = vmax.f32 %v3019_v9, 0.0  ;;  %v4277_v21 = vadd.f32 %v4241_v29, %v4041_v22  ;;  %v2918_v24 = vpop.f32.mrb[25].mxu0 }
 0x25a   : > { %v3050_v10 = vmax.f32 %v3018_v28, 0.0  ;;  %v4278_v12 = vadd.f32 %v2918_v24, %v1848_v52 }
 0x25b   : > { %3084 = vst.msk [vmem:[%s6031_s20 + $0xb8] sm:$0xff] %vm3060_vm3, %v3051_v54  ;;  %v3021_v38 = vadd.f32 %v4277_v21, %v6026_v47  ;;  %v4044_v20 = vpop.f32.mrb[26].mxu1 }
 0x25c   : > { %3083 = vst.msk [vmem:[%s6031_s20 + $0xb0] sm:$0xff] %vm3060_vm3, %v3050_v10  ;;  %v3020_v53 = vadd.f32 %v4278_v12, %v6026_v47  ;;  %v4244_v35 = vpop.f32.mrb[26].mxu0  ;;  %v1858_v13 = vpop.f32.mrb[27].mxu1 }
 0x25d   : > { %v3053_v37 = vmax.f32 %v3021_v38, 0.0  ;;  %v4279_v39 = vadd.f32 %v4244_v35, %v4044_v20  ;;  %v2928_v17 = vpop.f32.mrb[27].mxu0 }
 0x25e   : > { %v3052_v60 = vmax.f32 %v3020_v53, 0.0  ;;  %v4280_v44 = vadd.f32 %v2928_v17, %v1858_v13 }
 0x25f   : > { %3086 = vst.msk [vmem:[%s6031_s20 + $0xc8] sm:$0xff] %vm3060_vm3, %v3053_v37  ;;  %v3023_v0 = vadd.f32 %v4279_v39, %v6026_v47  ;;  %v4047_v16 = vpop.f32.mrb[28].mxu1 }
 0x260   : > { %3085 = vst.msk [vmem:[%s6031_s20 + $0xc0] sm:$0xff] %vm3060_vm3, %v3052_v60  ;;  %v3022_v48 = vadd.f32 %v4280_v44, %v6026_v47  ;;  %v4247_v55 = vpop.f32.mrb[28].mxu0  ;;  %v1868_v42 = vpop.f32.mrb[29].mxu1 }
 0x261   : > { %v3055_v3 = vmax.f32 %v3023_v0, 0.0  ;;  %v4281_v11 = vadd.f32 %v4247_v55, %v4047_v16  ;;  %v2938_v46 = vpop.f32.mrb[29].mxu0 }
 0x262   : > { %v3054_v63 = vmax.f32 %v3022_v48, 0.0  ;;  %v4282_v23 = vadd.f32 %v2938_v46, %v1868_v42 }
 0x263   : > { %3088 = vst.msk [vmem:[%s6031_s20 + $0xd8] sm:$0xff] %vm3060_vm3, %v3055_v3  ;;  %v3025_v14 = vadd.f32 %v4281_v11, %v6026_v47  ;;  %v4050_v56 = vpop.f32.mrb[30].mxu1 }
 0x264   : > { %3087 = vst.msk [vmem:[%s6031_s20 + $0xd0] sm:$0xff] %vm3060_vm3, %v3054_v63  ;;  %v3024_v30 = vadd.f32 %v4282_v23, %v6026_v47  ;;  %v4250_v34 = vpop.f32.mrb[30].mxu0  ;;  %v1878_v27 = vpop.f32.mrb[31].mxu1 }
 0x265   : > { %v3057_v19 = vmax.f32 %v3025_v14, 0.0  ;;  %v4283_v62 = vadd.f32 %v4250_v34, %v4050_v56  ;;  %v2948_v2 = vpop.f32.mrb[31].mxu0 }
 0x266   : > { %v3056_v61 = vmax.f32 %v3024_v30, 0.0  ;;  %v4284_v43 = vadd.f32 %v2948_v2, %v1878_v27 }
 0x267   : > { %3090 = vst.msk [vmem:[%s6031_s20 + $0xe8] sm:$0xff] %vm3060_vm3, %v3057_v19  ;;  %v3027_v36 = vadd.f32 %v4283_v62, %v6026_v47 }
 0x268   : > { %3089 = vst.msk [vmem:[%s6031_s20 + $0xe0] sm:$0xff] %vm3060_vm3, %v3056_v61  ;;  %v3026_v4 = vadd.f32 %v4284_v43, %v6026_v47 }
 0x269   : > { %v3059_v33 = vmax.f32 %v3027_v36, 0.0 }
 0x26a   : > { %v3058_v59 = vmax.f32 %v3026_v4, 0.0 }
 0x26b   : > { %3092 = vst.msk [vmem:[%s6031_s20 + $0xf8] sm:$0xff] %vm3060_vm3, %v3059_v33 }
 0x26c   : > { %3091 = vst.msk [vmem:[%s6031_s20 + $0xf0] sm:$0xff] %vm3060_vm3, %v3058_v59 }
 0x26d   : > { %4682 = shalt.err (!%p4679_p1)
}
 0x26e   : > { %s4683_s17 = scalar_lea.hbm %s6132_s22, 4096  ;;  %s4687_s4 = scalar_lea.hbm %s6185_s3, 8192 }
 0x26f   : > { %p4684_p13 = scmp.ne.s32.totalorder %s6132_s22, %s4683_s17  ;;  %p4688_p4 = scmp.lt.u32.totalorder %s6132_s22, %s6185_s3 }
 0x270   : > { %p4689_p5 = scmp.lt.u32.totalorder %s4687_s4, %s4683_s17  ;;  %p4691_p11 = scmp.lt.u32.totalorder %s4683_s17, %s6132_s22 }
 0x271   : > { %p4685_p6 = pnand %p4684_p13, %p6373_p0 }
 0x272   : > { %p4690_p8 = por %p4689_p5, %p4688_p4 }
 0x273   : > { %p4686_p10 = pneg %p4685_p6 }
 0x274   : > { %p4692_p2 = por %p4691_p11, %p4690_p8 }
 0x276   : > { %p4693_p3 = pnand %p4692_p2, %p4686_p10 }
 0x278   : > { %4696 = shalt.err (!%p4693_p3)
}
 0x279   : > { %s4747_s18 = smov 128   ;;  %s4748_s20 = smov 8  }
 0x27a   : > { %4522 = dma.vmem_to_hbm [thread:$0]  (%p6373_p0), %s6134_s8, 4096, %s6132_s22, %s3094_s16, %s4747_s18, %s4747_s18, %s4748_s20  }
 0x27b PF: > { %s3122_s7 = sand.u32 1, %s4727_s12   ;;  %p6374_p7 = scmp.ne.s32.totalorder %s6263_s19, 0 }
 0x27c   : > { %p6375_p9 = scmp.ge.s32.totalorder %s4739_s15, 2  ;;  %s3123_s21 = scalar_lea.sflag [#allocation4], %s3122_s7 }
 0x27e   : > { %p4536_p12 = pnand %p6375_p9, %p6374_p7 }
 0x280   : > { %4722 = dma.done.wait (!%p4536_p12), %s3123_s21, 4096  }
 0x281   : > { %4724 = vsyncadd (!%p4536_p12), %s3123_s21, 4294963200  ;;  %p17_p1 = scmp.ge.s32.totalorder %s4883_s5, 4   ;;  %s6376_s12 = smov %s4731_s13 }
 0x282   : > { %s6377_s13 = smov %s4735_s14  ;;  %s6378_s14 = smov %s4899_s10 }
 0x283   : > { %s6379_s15 = smov %s4883_s5  ;;  %19 = sbr.rel (!%p17_p1) target bundleno = 6 (0x6), region = 93 }
 0x28a   :  { %3128 = vsyncpa [#allocation3], 1 }
 0x28b   :  { %3130 = vsyncpa [#allocation3 + $0x1], 1 }
 0x28c   :  { %3131 = vsyncpa [#allocation6], 1 }
 0x28d   :  { %3132 = vsyncpa [#allocation4], 1 }
 0x28e   :  { %3134 = vsyncpa [#allocation4 + $0x1], 1 }

// kernel: last_conv.3
= control target key start
LH: loop header
LB: loop body
LE: loop exit
PB: predicated region body
PF: predicated region fallthrough
CT: control target
= control target key end

     0   :  { %8 = vsyncpa [#allocation3], 0  ;;  %s20479_s0 = inlined_call_operand.hbm [shape: f32[2,34,34,8], index: 0, kind: input, shape index: {}]   ;;  %s20480_s1 = inlined_call_operand.hbm [shape: f32[9,8,16], index: 1, kind: input, shape index: {}]   ;;  %s20481_s2 = inlined_call_operand.hbm [shape: f32[1,16], index: 2, kind: input, shape index: {}]   ;;  %s20482_s3 = inlined_call_operand.hbm [shape: f32[2,1024,16], index: 3, kind: output, shape index: {}]  }
   0x1   :  { %10 = vsyncpa [#allocation3 + $0x1], 0 }
   0x2   :  { %11 = vsyncpa [#allocation6], 0 }
   0x3   :  { %12 = vsyncpa [#allocation4], 0 }
   0x4   :  { %14 = vsyncpa [#allocation4 + $0x1], 0  ;;  %s15356_s12 = smov 0   ;;  %s15358_s13 = smov 0  }
   0x5   :  { %s15360_s14 = smov 0   ;;  %s15362_s15 = smov 0  }
   0x6 LB: > { %s15377_s16 = sadd.s32 4294967295, %s15326_s15   ;;  %s9743_s17 = sadd.s32 4294967294, %s15326_s15   ;;  %s15326_s15 = sphi %s15362_s15, %s21880_s15   ;;  %s15322_s14 = sphi %s15360_s14, %s21879_s14   ;;  %s15318_s13 = sphi %s15358_s13, %s21878_s13   ;;  %s15314_s12 = sphi %s15356_s12, %s21877_s12  }
   0x7   : > { %p40_p0 = scmp.ne.s32.totalorder %s15318_s13, %s15314_s12  ;;  %p20483_p1 = scmp.eq.s32.totalorder %s15377_s16, 0 }
   0x8   : > { %p112_p3 = scmp.eq.s32.totalorder %s9743_s17, 1  ;;  %p9744_p5 = scmp.ge.s32.totalorder %s15326_s15, 1 }
   0x9   : > { %p15386_p4 = por %p20483_p1, %p40_p0  ;;  %p119_p7 = scmp.lt.s32.totalorder %s15326_s15, 3 }
   0xa   : > { %p15391_p6 = por %p112_p3, %p40_p0  ;;  %s15328_s21 = smov [#allocation5]  }
   0xb   : > { %s21012_s18 = scalar_select %p15386_p4, 1, 0 }
   0xc   : > { %s21013_s19 = scalar_select %p15391_p6, 1, 0 }
   0xd   : > { %p15396_p8 = pnand %p9744_p5, %p119_p7  ;;  %s131_s22 = sshll.u32 %s15328_s21, 4  ;;  %s15400_s22 = int_to_ptr.vmem [resolvable:$true] %s131_s22 }
   0xe   : > { %s15329_s24 = smov [#allocation7]   ;;  %s15170_s28 = scalar_lea.hbm %s20480_s1, 1152 }
   0xf   : > { %p14860_p9 = pneg %p15396_p8  ;;  %s145_s25 = sshll.u32 %s15329_s24, 4  ;;  %s15411_s25 = int_to_ptr.vmem [resolvable:$true] %s145_s25 }
  0x10   : > { %p15171_p12 = scmp.ne.s32.totalorder %s20480_s1, %s15170_s28  ;;  %p15177_p5 = scmp.lt.u32.totalorder %s15170_s28, %s20480_s1 }
  0x11   : > { %p15407_p11 = pnand %p14860_p9, %p20483_p1 }
  0x13   : > { %p15172_p13 = pneg %p15407_p11 }
  0x15   : > { %p15173_p0 = pnand %p15172_p13, %p15171_p12 }
  0x17   : > { %p15174_p3 = pneg %p15173_p0 }
  0x19   : > { %p15179_p7 = pnand %p15177_p5, %p15174_p3 }
  0x1b   : > { %15182 = shalt.err (!%p15179_p7)
}
  0x1c   : > { %s15183_s6 = scalar_lea.vmem %s15400_s22, 1152  ;;  %p15191_p2 = scmp.lt.s32.totalorder %s15400_s22, %s15400_s22 }
  0x1d   : > { %p15184_p9 = scmp.ne.s32.totalorder %s15400_s22, %s15183_s6  ;;  %p15192_p12 = scmp.lt.s32.totalorder %s15183_s6, %s15183_s6 }
  0x1f   : > { %p15186_p10 = pnand %p15184_p9, %p15172_p13  ;;  %p15193_p0 = por %p15192_p12, %p15191_p2 }
  0x21   : > { %p15187_p1 = pneg %p15186_p10 }
  0x23   : > { %p15194_p6 = pnand %p15193_p0, %p15187_p1 }
  0x25   : > { %15197 = shalt.err (!%p15194_p6)
}
  0x26   : > { %s15330_s7 = smov 128   ;;  %s15331_s8 = smov 8  }
  0x27   : > { %14863 = dma.hbm_to_vmem [thread:$0]  (!%p15407_p11), %s20480_s1, 1152, %s15400_s22, [#allocation6], %s15330_s7, %s15330_s7, %s15331_s8  }
  0x28   : > { %s15198_s21 = scalar_lea.hbm %s20481_s2, 16 }
  0x29   : > { %p15199_p1 = scmp.ne.s32.totalorder %s20481_s2, %s15198_s21  ;;  %p15205_p10 = scmp.lt.u32.totalorder %s15198_s21, %s20481_s2 }
  0x2b   : > { %p15201_p2 = pnand %p15199_p1, %p15172_p13 }
  0x2d   : > { %p15202_p6 = pneg %p15201_p2 }
  0x2f   : > { %p15207_p3 = pnand %p15205_p10, %p15202_p6 }
  0x31   : > { %15210 = shalt.err (!%p15207_p3)
}
  0x32   : > { %s15211_s22 = scalar_lea.vmem %s15411_s25, 16  ;;  %s15218_s29 = scalar_lea.vmem %s15411_s25, 32 }
  0x33   : > { %p15212_p5 = scmp.ne.s32.totalorder %s15411_s25, %s15211_s22  ;;  %p15219_p12 = scmp.lt.s32.totalorder %s15411_s25, %s15411_s25 }
  0x34   : > { %p15220_p0 = scmp.lt.s32.totalorder %s15218_s29, %s15211_s22 }
  0x35   : > { %p15214_p7 = pnand %p15212_p5, %p15172_p13 }
  0x36   : > { %p15221_p1 = por %p15220_p0, %p15219_p12 }
  0x37   : > { %p15215_p9 = pneg %p15214_p7 }
  0x39   : > { %p15222_p2 = pnand %p15221_p1, %p15215_p9 }
  0x3b   : > { %15225 = shalt.err (!%p15222_p2)
}
  0x3c   : > { %14866 = dma.hbm_to_vmem [thread:$0]  (!%p15407_p11), %s20481_s2, 16, %s15411_s25, [#allocation6]  }
  0x3d   : > { %s15470_s5 = sadd.s32 1, %s15326_s15   ;;  %s27_s23 = sadd.s32 1, %s15322_s14 }
  0x3e   : > { %s24_s6 = ssub.s32 %s15326_s15, %s15470_s5  ;;  %p34_p13 = scmp.ne.s32.totalorder %s15322_s14, %s15318_s13 }
  0x3f   : > { %p25_p6 = scmp.eq.s32.totalorder %s24_s6, 0  ;;  %p35_p10 = scmp.eq.s32.totalorder %s15326_s15, 0 }
  0x40   : > { %p21016_p3 = scmp.eq.s32.totalorder %s15377_s16, 1  ;;  %p14877_p7 = scmp.lt.s32.totalorder %s15326_s15, 2 }
  0x41   : > { %s15486_s10 = scalar_select %p25_p6, %s15322_s14, %s27_s23  }
  0x42   : > { %p15480_p5 = por %p21016_p3, %p34_p13  ;;  %p36_p9 = por %p35_p10, %p34_p13 }
  0x43   : > { %s156_s11 = sand.u32 1, %s15322_s14   ;;  %s14846_s25 = smul.u32 21760, %s15326_s15 }
  0x44   : > { %s21017_s9 = scalar_select %p15480_p5, 1, 0 }
  0x45   : > { %s14845_s17 = smul.u32 1360, %s156_s11  ;;  %p15490_p11 = pnand %p14877_p7, %p36_p9 }
  0x46   : > { %s15497_s27 = scalar_lea.hbm %s20479_s0, %s14846_s25  ;;  %s15501_s29 = scalar_lea.sflag [#allocation3], %s156_s11 }
  0x47   : > { %s160_s28 = scalar_lea.vmem [#allocation2], %s14845_s17  ;;  %s15226_s30 = scalar_lea.hbm %s15497_s27, 21760 }
  0x48   : > { %s167_s22 = sshll.u32 %s160_s28, 4  ;;  %p15227_p12 = scmp.ne.s32.totalorder %s15497_s27, %s15226_s30  ;;  %s15499_s22 = int_to_ptr.vmem [resolvable:$true] %s167_s22 }
  0x49   : > { %p15228_p0 = pneg %p15490_p11  ;;  %s15231_s6 = scalar_lea.hbm %s20479_s0, 43520 }
  0x4a   : > { %p15232_p13 = scmp.lt.u32.totalorder %s15497_s27, %s20479_s0  ;;  %p15233_p6 = scmp.lt.u32.totalorder %s15231_s6, %s15226_s30 }
  0x4b   : > { %p15229_p1 = pnand %p15228_p0, %p15227_p12  ;;  %p15235_p3 = scmp.lt.u32.totalorder %s15226_s30, %s15497_s27 }
  0x4c   : > { %p15234_p10 = por %p15233_p6, %p15232_p13 }
  0x4d   : > { %p15230_p2 = pneg %p15229_p1 }
  0x4e   : > { %p15236_p7 = por %p15235_p3, %p15234_p10 }
  0x50   : > { %p15237_p9 = pnand %p15236_p7, %p15230_p2 }
  0x52   : > { %15240 = shalt.err (!%p15237_p9)
}
  0x53   : > { %s15241_s11 = scalar_lea.vmem %s15499_s22, 21760  ;;  %s15332_s17 = smov [#allocation2]  }
  0x54   : > { %p15242_p12 = scmp.ne.s32.totalorder %s15499_s22, %s15241_s11  ;;  %s15246_s26 = sshll.u32 %s15332_s17, 4  ;;  %s15247_s26 = int_to_ptr.vmem [resolvable:$false] %s15246_s26 }
  0x55   : > { %s15248_s28 = scalar_lea.vmem %s15247_s26, 43520  ;;  %p15249_p4 = scmp.lt.s32.totalorder %s15499_s22, %s15247_s26 }
  0x56   : > { %p15244_p1 = pnand %p15242_p12, %p15228_p0  ;;  %p15250_p13 = scmp.lt.s32.totalorder %s15248_s28, %s15241_s11 }
  0x58   : > { %p15245_p5 = pneg %p15244_p1  ;;  %p15251_p6 = por %p15250_p13, %p15249_p4 }
  0x5a   : > { %p15252_p10 = pnand %p15251_p6, %p15245_p5 }
  0x5c   : > { %15255 = shalt.err (!%p15252_p10)
}
  0x5d   : > { %14870 = dma.hbm_to_vmem [thread:$0]  (!%p15490_p11), %s15497_s27, 21760, %s15499_s22, %s15501_s29, %s15330_s7, %s15330_s7, %s15331_s8  }
  0x5e   : > { %179 = sbr.rel (%p15396_p8) target bundleno = 1499 (0x5db), region = 32 }
  0x65   : > { %s15535_s30 = sand.u32 1, %s15318_s13   ;;  %p21019_p4 = scmp.ne.s32.totalorder %s21012_s18, 0 }
  0x66   : > { %s14847_s4 = smul.u32 1360, %s15535_s30  ;;  %s182_s23 = scalar_lea.sflag [#allocation3], %s15535_s30 }
  0x68   : > { %s15539_s6 = scalar_lea.vmem [#allocation2], %s14847_s4 }
  0x69   : > { %15301 = dma.done.wait (%p21019_p4), %s182_s23, 21760  }
  0x6a   : > { %15303 = vsyncadd (%p21019_p4), %s182_s23, 4294945536  ;;  %p21020_p5 = scmp.eq.s32.totalorder %s15377_s16, 0 }
  0x6c   : > { %15305 = dma.done.wait (%p21020_p5), [#allocation6], 1168   ;;  %p21021_p8 = pmov %p21020_p5 }
  0x6d   : > { %v837_v0 = vld [vmem:[#allocation5 + $0x8] sm:$0xff]  ;;  %v4999_v1 = vld [vmem:[#allocation5 + $0x20] sm:$0xff]  ;;  %vm547_vm0 = vcmask 1046528   ;;  %vm838_vm1 = vcmask 64512   ;;  %vm2761_vm2 = vcmask 1045504   ;;  %s9752_s18 = sshll.u32 %s15535_s30, 10 }
  0x6e   : > { %15307 = vsyncadd (%p21021_p8), [#allocation6], 4294966128  ;;  %v216_v2 = vld [vmem:[%s15539_s6] sm:$0xff]  ;;  %12073 = vmatprep.subr.mxu1 %v837_v0  ;;  %12849 = vmatprep.subr.mxu0 %v4999_v1  ;;  %v217_v3 = vld [vmem:[%s15539_s6 + $0x8] sm:$0xff]  ;;  %vm9508_vm3 = vcmask 130048   ;;  %s19909_s20 = scalar_lea.vmem [#allocation8], %s9752_s18 }
  0x6f   : > { %v548_v4 = vrot.slane %v216_v2, 1  ;;  %v386_v5 = vld [vmem:[#allocation5] sm:$0xff]  ;;  %v15552_v6 = vld [vmem:[%s15539_s6 + $0x28] sm:$0xff]  ;;  %12074 = vmatpush3.msra.mxu1 %v837_v0  ;;  %12850 = vmatpush3.msra.mxu0 %v4999_v1  ;;  %v549_v7 = vrot.slane %v217_v3, 1  ;;  %v15561_v14 = vld [vmem:[%s15539_s6 + $0x38] sm:$0xff]  ;;  %s10911_s7 = sshll.u32 %s15377_s16, 14 }
  0x70   : > { %v15555_v8 = vld [vmem:[%s15539_s6 + $0x30] sm:$0xff]  ;;  %v557_v9 = vrot.slane %v15552_v6, 1  ;;  %v5851_v10 = vld [vmem:[#allocation5 + $0x28] sm:$0xff]  ;;  %12267 = vmatprep.subr.mxu1 %v386_v5  ;;  %v15565_v16 = vld [vmem:[%s15539_s6 + $0x40] sm:$0xff]  ;;  %v560_v18 = vrot.slane %v15561_v14, 1  ;;  %s9651_s8 = sshll.u32 %s19909_s20, 4  ;;  %s20429_s22 = scalar_lea.hbm %s20482_s3, %s10911_s7  ;;  %s20431_s8 = int_to_ptr.vmem [resolvable:$true] %s9651_s8 }
  0x71   : > { %v218_v11 = vld [vmem:[%s15539_s6 + $0x10] sm:$0xff]  ;;  %v558_v12 = vrot.slane %v15555_v8, 1  ;;  %13043 = vmatprep.subr.mxu0 %v5851_v10  ;;  %v219_v15 = vld [vmem:[%s15539_s6 + $0x18] sm:$0xff]  ;;  %v550_v17 = vsel %vm547_vm0, %v548_v4, %v549_v7  ;;  %v562_v20 = vrot.slane %v15565_v16, 1  ;;  %v220_v21 = vld [vmem:[%s15539_s6 + $0x20] sm:$0x3] }
  0x72   : > { %v551_v13 = vrot.slane %v218_v11, 1  ;;  %v553_v19 = vrot.slane %v219_v15, 1  ;;  %v15572_v22 = vld [vmem:[%s15539_s6 + $0x50] sm:$0xff]  ;;  %12075 = vmatprep.mubr.msk.f32.mxu1 %vm838_vm1, %v550_v17  ;;  %v555_v25 = vrot.slane %v220_v21, 1  ;;  %v15578_v26 = vld [vmem:[%s15539_s6 + $0x48] sm:$0x3] }
  0x73   : > { %v559_v23 = vsel %vm547_vm0, %v557_v9, %v558_v12  ;;  %v15581_v27 = vld [vmem:[%s15539_s6 + $0x58] sm:$0xff]  ;;  %v566_v28 = vrot.slane %v15572_v22, 1  ;;  %v15585_v29 = vld [vmem:[%s15539_s6 + $0x60] sm:$0xff]  ;;  %v561_v30 = vsel %vm547_vm0, %v558_v12, %v560_v18  ;;  %v563_v32 = vsel %vm547_vm0, %v560_v18, %v562_v20  ;;  %v15594_v34 = vld [vmem:[%s15539_s6 + $0x68] sm:$0xff]  ;;  %s9638_s16 = scalar_lea.sflag [#allocation4], %s15535_s30  ;;  %s15256_s29 = scalar_lea.vmem %s20431_s8, 16384 }
  0x74   : > { %v552_v24 = vsel %vm547_vm0, %v549_v7, %v551_v13  ;;  %12851 = vmatprep.mubr.msk.f32.mxu0 %vm838_vm1, %v559_v23  ;;  %v554_v31 = vsel %vm547_vm0, %v551_v13, %v553_v19  ;;  %v564_v33 = vrot.slane %v15578_v26, 1  ;;  %v556_v35 = vsel %vm547_vm0, %v553_v19, %v555_v25  ;;  %v15608_v41 = vld [vmem:[%s15539_s6 + $0x70] sm:$0x3]  ;;  %v15612_v42 = vld [vmem:[%s15539_s6 + $0x78] sm:$0xff]  ;;  %v15615_v43 = vld [vmem:[%s15539_s6 + $0x80] sm:$0xff]  ;;  %p15257_p11 = scmp.ne.s32.totalorder %s20431_s8, %s15256_s29  ;;  %p21874_p0 = scmp.ne.s32.totalorder %s21017_s9, 0 }
  0x75   : > { %12076 = vmatmul.mubr.msk.f32.vlgmr.msra.gmra.mrb[0].mxu1 %vm838_vm1, %v552_v24  ;;  %12852 = vmatmul.mubr.msk.f32.vlgmr.msra.gmra.mrb[0].mxu0 %vm838_vm1, %v561_v30  ;;  %v567_v36 = vrot.slane %v15581_v27, 1  ;;  %v569_v38 = vrot.slane %v15585_v29, 1  ;;  %v571_v40 = vrot.slane %v15594_v34, 1  ;;  %v573_v45 = vrot.slane %v15608_v41, 1  ;;  %v15631_v49 = vld [vmem:[%s15539_s6 + $0x88] sm:$0xff]  ;;  %v15635_v50 = vld [vmem:[%s15539_s6 + $0x90] sm:$0xff] }
  0x76   : > { %12268 = vmatpush3.msra.mxu1 %v386_v5  ;;  %13044 = vmatpush3.msra.mxu0 %v5851_v10  ;;  %v565_v37 = vsel %vm547_vm0, %v562_v20, %v564_v33  ;;  %v575_v47 = vrot.slane %v15612_v42, 1  ;;  %v576_v48 = vrot.slane %v15615_v43, 1  ;;  %v578_v52 = vrot.slane %v15631_v49, 1  ;;  %v15651_v55 = vld [vmem:[%s15539_s6 + $0x98] sm:$0x3]  ;;  %v15655_v56 = vld [vmem:[%s15539_s6 + $0xa0] sm:$0xff]  ;;  %p15258_p2 = pnand %p15257_p11, %p21874_p0 }
  0x77   : > { %12078 = vmatprep.mubr.msk.f32.mxu1 %vm838_vm1, %v554_v31  ;;  %12854 = vmatprep.mubr.msk.f32.mxu0 %vm838_vm1, %v563_v32  ;;  %v15604_v39 = vsel %vm547_vm0, %v566_v28, %v567_v36  ;;  %v15622_v44 = vsel %vm547_vm0, %v567_v36, %v569_v38  ;;  %v15626_v46 = vsel %vm547_vm0, %v569_v38, %v571_v40  ;;  %v580_v54 = vrot.slane %v15635_v50, 1  ;;  %v15658_v57 = vld [vmem:[%s15539_s6 + $0xa8] sm:$0xff]  ;;  %v15676_v63 = vld [vmem:[%s15539_s6 + $0xb0] sm:$0xff]  ;;  %v15681_v0 = vld [vmem:[%s15539_s6 + $0xb8] sm:$0xff]  ;;  %s15333_s25 = smov [#allocation8]  }
  0x78   : > { %21022 = vst [vmem:[#allocation12_spill] sm:$0xff] %v15604_v39  ;;  %21023 = vst [vmem:[#allocation13_spill] sm:$0xff] %v15622_v44  ;;  %v15643_v51 = vsel %vm547_vm0, %v571_v40, %v573_v45  ;;  %v15647_v53 = vsel %vm547_vm0, %v575_v47, %v576_v48  ;;  %v15667_v58 = vsel %vm547_vm0, %v576_v48, %v578_v52  ;;  %v582_v59 = vrot.slane %v15651_v55, 1  ;;  %v15698_v5 = vld [vmem:[%s15539_s6 + $0xc0] sm:$0x3]  ;;  %v15703_v7 = vld [vmem:[%s15539_s6 + $0xc8] sm:$0xff]  ;;  %p15259_p3 = pneg %p15258_p2 }
  0x79   : > { %12079 = vmatmul.mubr.msk.f32.gmra.mrb[2].mxu1 %vm838_vm1, %v556_v35  ;;  %12855 = vmatmul.mubr.msk.f32.gmra.mrb[2].mxu0 %vm838_vm1, %v565_v37  ;;  %21024 = vst [vmem:[#allocation14_spill] sm:$0xff] %v15626_v46  ;;  %21025 = vst [vmem:[#allocation15_spill] sm:$0xff] %v15643_v51  ;;  %v15671_v60 = vsel %vm547_vm0, %v578_v52, %v580_v54  ;;  %v584_v61 = vrot.slane %v15655_v56, 1  ;;  %v585_v62 = vrot.slane %v15658_v57, 1  ;;  %v587_v2 = vrot.slane %v15676_v63, 1  ;;  %v15706_v9 = vld [vmem:[%s15539_s6 + $0xd0] sm:$0xff] }
  0x7a   : > { %12081 = vmatprep.mubr.msk.f32.mxu1 %vm838_vm1, %v559_v23  ;;  %12857 = vmatprep.mubr.msk.f32.mxu0 %vm838_vm1, %v15604_v39  ;;  %21026 = vst [vmem:[#allocation16_spill] sm:$0xff] %v15647_v53  ;;  %21027 = vst [vmem:[#allocation17_spill] sm:$0xff] %v15667_v58  ;;  %v15690_v1 = vsel %vm547_vm0, %v580_v54, %v582_v59  ;;  %v589_v4 = vrot.slane %v15681_v0, 1  ;;  %v591_v11 = vrot.slane %v15698_v5, 1  ;;  %v593_v13 = vrot.slane %v15703_v7, 1  ;;  %v15724_v17 = vld [vmem:[%s15539_s6 + $0xd8] sm:$0xff] }
  0x7b   : > { %21028 = vst [vmem:[#allocation18_spill] sm:$0xff] %v15671_v60  ;;  %21029 = vst [vmem:[#allocation19_spill] sm:$0xff] %v15690_v1  ;;  %v15694_v3 = vsel %vm547_vm0, %v584_v61, %v585_v62  ;;  %v15715_v10 = vsel %vm547_vm0, %v585_v62, %v587_v2  ;;  %v594_v15 = vrot.slane %v15706_v9, 1  ;;  %v15729_v18 = vld [vmem:[%s15539_s6 + $0xe0] sm:$0xff]  ;;  %v596_v21 = vrot.slane %v15724_v17, 1  ;;  %v15754_v28 = vld [vmem:[%s15539_s6 + $0xf0] sm:$0xff] }
  0x7c   : > { %21030 = vst [vmem:[#allocation20_spill] sm:$0xff] %v15694_v3  ;;  %21031 = vst [vmem:[#allocation21_spill] sm:$0xff] %v15715_v10  ;;  %v15719_v12 = vsel %vm547_vm0, %v587_v2, %v589_v4  ;;  %v15731_v19 = vld [vmem:[#allocation5 + $0x30] sm:$0xff]  ;;  %v15740_v20 = vsel %vm547_vm0, %v589_v4, %v591_v11  ;;  %v598_v24 = vrot.slane %v15729_v18, 1  ;;  %v15749_v25 = vld [vmem:[%s15539_s6 + $0xe8] sm:$0x3] }
  0x7d   : > { %12082 = vmatmul.mubr.msk.f32.gmra.mrb[4].mxu1 %vm838_vm1, %v561_v30  ;;  %12858 = vmatmul.mubr.msk.f32.gmra.mrb[4].mxu0 %vm838_vm1, %v15622_v44  ;;  %21032 = vst [vmem:[#allocation22_spill] sm:$0xff] %v15719_v12  ;;  %21033 = vst [vmem:[#allocation23_spill] sm:$0xff] %v15740_v20  ;;  %v15745_v23 = vsel %vm547_vm0, %v593_v13, %v594_v15  ;;  %v15757_v30 = vld [vmem:[%s15539_s6 + $0xf8] sm:$0xff]  ;;  %v15766_v31 = vsel %vm547_vm0, %v594_v15, %v596_v21  ;;  %v602_v35 = vrot.slane %v15754_v28, 1  ;;  %v15780_v38 = vld [vmem:[%s15539_s6 + $0x108] sm:$0xff]  ;;  %s15260_s24 = sshll.u32 %s15333_s25, 4  ;;  %s15261_s24 = int_to_ptr.vmem [resolvable:$false] %s15260_s24 }
  0x7e   : > { %12084 = vmatprep.mubr.msk.f32.mxu1 %vm838_vm1, %v563_v32  ;;  %12860 = vmatprep.mubr.msk.f32.mxu0 %vm838_vm1, %v15626_v46  ;;  %21034 = vst [vmem:[#allocation24_spill] sm:$0xff] %v15745_v23  ;;  %21035 = vst [vmem:[#allocation25_spill] sm:$0xff] %v15766_v31  ;;  %v600_v32 = vrot.slane %v15749_v25, 1  ;;  %v15770_v33 = vsel %vm547_vm0, %v596_v21, %v598_v24  ;;  %v603_v36 = vrot.slane %v15757_v30, 1  ;;  %v607_v48 = vrot.slane %v15780_v38, 1  ;;  %v15802_v54 = vld [vmem:[%s15539_s6 + $0x118] sm:$0xff]  ;;  %p15263_p7 = scmp.lt.s32.totalorder %s20431_s8, %s15261_s24 }
  0x7f   : > { %13237 = vmatprep.subr.mxu0 %v15731_v19  ;;  %21036 = vst [vmem:[#allocation26_spill] sm:$0xff] %v15770_v33  ;;  %v15797_v52 = vld [vmem:[%s15539_s6 + $0x110] sm:$0x3]  ;;  %v15805_v59 = vld [vmem:[%s15539_s6 + $0x120] sm:$0xff]  ;;  %v611_v4 = vrot.slane %v15802_v54, 1  ;;  %v15823_v13 = vld [vmem:[%s15539_s6 + $0x128] sm:$0xff] }
  0x80   : > { %v15789_v40 = vsel %vm547_vm0, %v598_v24, %v600_v32  ;;  %v15793_v47 = vsel %vm547_vm0, %v602_v35, %v603_v36  ;;  %v609_v62 = vrot.slane %v15797_v52, 1  ;;  %v612_v11 = vrot.slane %v15805_v59, 1  ;;  %v15828_v15 = vld [vmem:[%s15539_s6 + $0x130] sm:$0xff]  ;;  %s15262_s11 = scalar_lea.vmem %s15261_s24, 32768 }
  0x81   : > { %12085 = vmatmul.mubr.msk.f32.gmra.mrb[6].mxu1 %vm838_vm1, %v565_v37  ;;  %12861 = vmatmul.mubr.msk.f32.gmra.mrb[6].mxu0 %vm838_vm1, %v15643_v51  ;;  %v15775_v37 = vld [vmem:[%s15539_s6 + $0x100] sm:$0xff]  ;;  %21037 = vst [vmem:[#allocation27_spill] sm:$0xff] %v15789_v40  ;;  %21038 = vst [vmem:[#allocation28_spill] sm:$0xff] %v15793_v47  ;;  %v614_v24 = vrot.slane %v15823_v13, 1  ;;  %v616_v35 = vrot.slane %v15828_v15, 1  ;;  %p15264_p9 = scmp.lt.s32.totalorder %s15262_s11, %s15256_s29 }
  0x82   : > { %12087 = vmatprep.mubr.msk.f32.mxu1 %vm838_vm1, %v15604_v39  ;;  %12863 = vmatprep.mubr.msk.f32.mxu0 %vm838_vm1, %v15647_v53  ;;  %v605_v45 = vrot.slane %v15775_v37, 1  ;;  %v15837_v21 = vsel %vm547_vm0, %v607_v48, %v609_v62  ;;  %v15841_v32 = vsel %vm547_vm0, %v611_v4, %v612_v11  ;;  %v15989_v39 = vld [vmem:[%s15539_s6 + $0x1b0] sm:$0x3] }
  0x83   : > { %21041 = vst [vmem:[#allocation31_spill] sm:$0xff] %v15837_v21  ;;  %21042 = vst [vmem:[#allocation32_spill] sm:$0xff] %v15841_v32  ;;  %v15866_v4 = vsel %vm547_vm0, %v614_v24, %v616_v35  ;;  %p15265_p12 = por %p15264_p9, %p15263_p7 }
  0x84   : > { %v15814_v61 = vsel %vm547_vm0, %v603_v36, %v605_v45  ;;  %v15818_v2 = vsel %vm547_vm0, %v605_v45, %v607_v48  ;;  %v15845_v36 = vld [vmem:[%s15539_s6 + $0x138] sm:$0x3]  ;;  %v15850_v45 = vld [vmem:[%s15539_s6 + $0x140] sm:$0xff]  ;;  %v15862_v48 = vsel %vm547_vm0, %v612_v11, %v614_v24  ;;  %21044 = vst [vmem:[#allocation34_spill] sm:$0xff] %v15866_v4  ;;  %21058 = vst [vmem:[#allocation48_spill] sm:$0xff] %v15989_v39 }
  0x85   : > { %12088 = vmatmul.mubr.msk.f32.gmra.mrb[8].mxu1 %vm838_vm1, %v15622_v44  ;;  %12864 = vmatmul.mubr.msk.f32.gmra.mrb[8].mxu0 %vm838_vm1, %v15667_v58  ;;  %21039 = vst [vmem:[#allocation29_spill] sm:$0xff] %v15814_v61  ;;  %21040 = vst [vmem:[#allocation30_spill] sm:$0xff] %v15818_v2  ;;  %v618_v62 = vrot.slane %v15845_v36, 1  ;;  %p15266_p1 = pnand %p15265_p12, %p15259_p3 }
  0x86   : > { %12090 = vmatprep.mubr.msk.f32.mxu1 %vm838_vm1, %v15626_v46  ;;  %12866 = vmatprep.mubr.msk.f32.mxu0 %vm838_vm1, %v15671_v60  ;;  %21043 = vst [vmem:[#allocation33_spill] sm:$0xff] %v15862_v48  ;;  %v15967_v46 = vld [vmem:[%s15539_s6 + $0x1a0] sm:$0xff] }
  0x87   : > { %v15885_v11 = vsel %vm547_vm0, %v616_v35, %v618_v62  ;;  %21054 = vst [vmem:[#allocation44_spill] sm:$0xff] %v15967_v46 }
  0x88   : > { %21045 = vst [vmem:[#allocation35_spill] sm:$0xff] %v15885_v11 }
  0x89   : > { %12091 = vmatmul.mubr.msk.f32.gmra.mrb[10].mxu1 %vm838_vm1, %v15643_v51  ;;  %12867 = vmatmul.mubr.msk.f32.gmra.mrb[10].mxu0 %vm838_vm1, %v15690_v1 }
  0x8a   : > { %12093 = vmatprep.mubr.msk.f32.mxu1 %vm838_vm1, %v15647_v53  ;;  %12869 = vmatprep.mubr.msk.f32.mxu0 %vm838_vm1, %v15694_v3  ;;  %v15949_v53 = vld [vmem:[%s15539_s6 + $0x198] sm:$0xff] }
  0x8b   : > { %21051 = vst [vmem:[#allocation41_spill] sm:$0xff] %v15949_v53  ;;  %v639_v51 = vrot.slane %v15949_v53, 1  ;;  %v15997_v53 = vld [vmem:[%s15539_s6 + $0x1c0] sm:$0xff] }
  0x8c   : > { %21060 = vst [vmem:[#allocation50_spill] sm:$0xff] %v15997_v53 }
  0x8d   : > { %12094 = vmatmul.mubr.msk.f32.gmra.mrb[12].mxu1 %vm838_vm1, %v15667_v58  ;;  %12870 = vmatmul.mubr.msk.f32.gmra.mrb[12].mxu0 %vm838_vm1, %v15715_v10  ;;  %v15941_v58 = vld [vmem:[%s15539_s6 + $0x188] sm:$0x3] }
  0x8e   : > { %12096 = vmatprep.mubr.msk.f32.mxu1 %vm838_vm1, %v15671_v60  ;;  %12872 = vmatprep.mubr.msk.f32.mxu0 %vm838_vm1, %v15719_v12 }
  0x91   : > { %12097 = vmatmul.mubr.msk.f32.gmra.mrb[14].mxu1 %vm838_vm1, %v15690_v1  ;;  %12873 = vmatmul.mubr.msk.f32.gmra.mrb[14].mxu0 %vm838_vm1, %v15740_v20  ;;  %v15919_v1 = vld [vmem:[%s15539_s6 + $0x178] sm:$0xff] }
  0x92   : > { %12099 = vmatprep.mubr.msk.f32.mxu1 %vm838_vm1, %v15694_v3  ;;  %12875 = vmatprep.mubr.msk.f32.mxu0 %vm838_vm1, %v15745_v23 }
  0x95   : > { %12100 = vmatmul.mubr.msk.f32.gmra.mrb[16].mxu1 %vm838_vm1, %v15715_v10  ;;  %12876 = vmatmul.mubr.msk.f32.gmra.mrb[16].mxu0 %vm838_vm1, %v15766_v31  ;;  %v15901_v10 = vld [vmem:[%s15539_s6 + $0x170] sm:$0xff] }
  0x96   : > { %12102 = vmatprep.mubr.msk.f32.mxu1 %vm838_vm1, %v15719_v12  ;;  %12878 = vmatprep.mubr.msk.f32.mxu0 %vm838_vm1, %v15770_v33  ;;  %v15893_v12 = vld [vmem:[%s15539_s6 + $0x160] sm:$0x3]  ;;  %v630_v3 = vrot.slane %v15901_v10, 1 }
  0x97   : > { %v627_v35 = vrot.slane %v15893_v12, 1 }
  0x99   : > { %12103 = vmatmul.mubr.msk.f32.gmra.mrb[18].mxu1 %vm838_vm1, %v15740_v20  ;;  %12879 = vmatmul.mubr.msk.f32.gmra.mrb[18].mxu0 %vm838_vm1, %v15789_v40 }
  0x9a   : > { %12105 = vmatprep.mubr.msk.f32.mxu1 %vm838_vm1, %v15745_v23  ;;  %12881 = vmatprep.mubr.msk.f32.mxu0 %vm838_vm1, %v15793_v47  ;;  %v15871_v23 = vld [vmem:[%s15539_s6 + $0x150] sm:$0xff] }
  0x9b   : > { %v623_v24 = vrot.slane %v15871_v23, 1 }
  0x9d   : > { %12106 = vmatmul.mubr.msk.f32.gmra.mrb[20].mxu1 %vm838_vm1, %v15766_v31  ;;  %12882 = vmatmul.mubr.msk.f32.gmra.mrb[20].mxu0 %vm838_vm1, %v15814_v61 }
  0x9e   : > { %12108 = vmatprep.mubr.msk.f32.mxu1 %vm838_vm1, %v15770_v33  ;;  %12884 = vmatprep.mubr.msk.f32.mxu0 %vm838_vm1, %v15818_v2  ;;  %v15853_v33 = vld [vmem:[%s15539_s6 + $0x148] sm:$0xff] }
  0x9f   : > { %v621_v31 = vrot.slane %v15853_v33, 1 }
  0xa1   : > { %12109 = vmatmul.mubr.msk.f32.gmra.mrb[22].mxu1 %vm838_vm1, %v15789_v40  ;;  %12885 = vmatmul.mubr.msk.f32.gmra.mrb[22].mxu0 %vm838_vm1, %v15837_v21  ;;  %v620_v40 = vrot.slane %v15850_v45, 1 }
  0xa2   : > { %12111 = vmatprep.mubr.msk.f32.mxu1 %vm838_vm1, %v15793_v47  ;;  %12887 = vmatprep.mubr.msk.f32.mxu0 %vm838_vm1, %v15841_v32  ;;  %v15876_v47 = vld [vmem:[%s15539_s6 + $0x158] sm:$0xff] }
  0xa3   : > { %v15889_v20 = vsel %vm547_vm0, %v620_v40, %v621_v31  ;;  %v15910_v40 = vsel %vm547_vm0, %v621_v31, %v623_v24 }
  0xa4   : > { %21046 = vst [vmem:[#allocation36_spill] sm:$0xff] %v15889_v20  ;;  %21047 = vst [vmem:[#allocation37_spill] sm:$0xff] %v15910_v40 }
  0xa5   : > { %12112 = vmatmul.mubr.msk.f32.gmra.mrb[24].mxu1 %vm838_vm1, %v15814_v61  ;;  %12888 = vmatmul.mubr.msk.f32.gmra.mrb[24].mxu0 %vm838_vm1, %v15862_v48  ;;  %v625_v61 = vrot.slane %v15876_v47, 1 }
  0xa6   : > { %12114 = vmatprep.mubr.msk.f32.mxu1 %vm838_vm1, %v15818_v2  ;;  %12890 = vmatprep.mubr.msk.f32.mxu0 %vm838_vm1, %v15866_v4  ;;  %v15898_v2 = vld [vmem:[%s15539_s6 + $0x168] sm:$0xff] }
  0xa7   : > { %v15914_v62 = vsel %vm547_vm0, %v623_v24, %v625_v61  ;;  %v15933_v31 = vsel %vm547_vm0, %v625_v61, %v627_v35  ;;  %v632_v24 = vrot.slane %v15919_v1, 1 }
  0xa8   : > { %21048 = vst [vmem:[#allocation38_spill] sm:$0xff] %v15914_v62  ;;  %21049 = vst [vmem:[#allocation39_spill] sm:$0xff] %v15933_v31 }
  0xa9   : > { %12115 = vmatmul.mubr.msk.f32.gmra.mrb[26].mxu1 %vm838_vm1, %v15837_v21  ;;  %12891 = vmatmul.mubr.msk.f32.gmra.mrb[26].mxu0 %vm838_vm1, %v15885_v11  ;;  %v629_v21 = vrot.slane %v15898_v2, 1  ;;  %v15958_v61 = vsel %vm547_vm0, %v630_v3, %v632_v24 }
  0xaa   : > { %12117 = vmatprep.mubr.msk.f32.mxu1 %vm838_vm1, %v15841_v32  ;;  %12893 = vmatprep.mubr.msk.f32.mxu0 %vm838_vm1, %v15889_v20  ;;  %v15924_v32 = vld [vmem:[%s15539_s6 + $0x180] sm:$0xff]  ;;  %21052 = vst [vmem:[#allocation42_spill] sm:$0xff] %v15958_v61 }
  0xab   : > { %v15937_v60 = vsel %vm547_vm0, %v629_v21, %v630_v3  ;;  %v636_v21 = vrot.slane %v15941_v58, 1 }
  0xac   : > { %21050 = vst [vmem:[#allocation40_spill] sm:$0xff] %v15937_v60 }
  0xad   : > { %12118 = vmatmul.mubr.msk.f32.gmra.mrb[28].mxu1 %vm838_vm1, %v15862_v48  ;;  %12894 = vmatmul.mubr.msk.f32.gmra.mrb[28].mxu0 %vm838_vm1, %v15910_v40  ;;  %v634_v48 = vrot.slane %v15924_v32, 1 }
  0xae   : > { %12120 = vmatprep.mubr.msk.f32.mxu1 %vm838_vm1, %v15866_v4  ;;  %12896 = vmatprep.mubr.msk.f32.mxu0 %vm838_vm1, %v15914_v62  ;;  %v15946_v4 = vld [vmem:[%s15539_s6 + $0x190] sm:$0xff] }
  0xaf   : > { %v15962_v35 = vsel %vm547_vm0, %v632_v24, %v634_v48  ;;  %v15981_v3 = vsel %vm547_vm0, %v634_v48, %v636_v21  ;;  %v641_v24 = vrot.slane %v15967_v46, 1  ;;  %v16015_v46 = vld [vmem:[%s15539_s6 + $0x1c8] sm:$0xff] }
  0xb0   : > { %21053 = vst [vmem:[#allocation43_spill] sm:$0xff] %v15962_v35  ;;  %21056 = vst [vmem:[#allocation46_spill] sm:$0xff] %v15981_v3 }
  0xb1   : > { %12121 = vmatmul.mubr.msk.f32.gmra.mrb[30].mxu1 %vm838_vm1, %v15885_v11  ;;  %12897 = vmatmul.mubr.msk.f32.gmra.mrb[30].mxu0 %vm838_vm1, %v15933_v31  ;;  %v638_v11 = vrot.slane %v15946_v4, 1  ;;  %v16006_v48 = vsel %vm547_vm0, %v639_v51, %v641_v24  ;;  %21063 = vst [vmem:[#allocation53_spill] sm:$0xff] %v16015_v46 }
  0xb2   : > { %12123 = vmatprep.mubr.msk.f32.mxu1 %vm838_vm1, %v15889_v20  ;;  %12899 = vmatprep.mubr.msk.f32.mxu0 %vm838_vm1, %v15937_v60  ;;  %v15972_v20 = vld [vmem:[%s15539_s6 + $0x1a8] sm:$0xff]  ;;  %21061 = vst [vmem:[#allocation51_spill] sm:$0xff] %v16006_v48 }
  0xb3   : > { %21055 = vst [vmem:[#allocation45_spill] sm:$0xff] %v15972_v20  ;;  %v15985_v44 = vsel %vm547_vm0, %v638_v11, %v639_v51  ;;  %v645_v11 = vrot.slane %v15989_v39, 1  ;;  %v16045_v39 = vld [vmem:[%s15539_s6 + $0x1e8] sm:$0xff] }
  0xb4   : > { %21057 = vst [vmem:[#allocation47_spill] sm:$0xff] %v15985_v44  ;;  %21069 = vst [vmem:[#allocation59_spill] sm:$0xff] %v16045_v39 }
  0xb5   : > { %12124 = vmatmul.mubr.msk.f32.gmra.mrb[32].mxu1 %vm838_vm1, %v15910_v40  ;;  %12900 = vmatmul.mubr.msk.f32.gmra.mrb[32].mxu0 %vm838_vm1, %v15958_v61  ;;  %v643_v40 = vrot.slane %v15972_v20, 1  ;;  %v648_v20 = vrot.slane %v15997_v53, 1 }
  0xb6   : > { %12126 = vmatprep.mubr.msk.f32.mxu1 %vm838_vm1, %v15914_v62  ;;  %12902 = vmatprep.mubr.msk.f32.mxu0 %vm838_vm1, %v15962_v35  ;;  %v15994_v62 = vld [vmem:[%s15539_s6 + $0x1b8] sm:$0xff] }
  0xb7   : > { %21059 = vst [vmem:[#allocation49_spill] sm:$0xff] %v15994_v62  ;;  %v16010_v21 = vsel %vm547_vm0, %v641_v24, %v643_v40  ;;  %v16029_v51 = vsel %vm547_vm0, %v643_v40, %v645_v11  ;;  %v650_v24 = vrot.slane %v16015_v46, 1  ;;  %v16063_v46 = vld [vmem:[%s15539_s6 + $0x1f0] sm:$0xff] }
  0xb8   : > { %21062 = vst [vmem:[#allocation52_spill] sm:$0xff] %v16010_v21  ;;  %21065 = vst [vmem:[#allocation55_spill] sm:$0xff] %v16029_v51 }
  0xb9   : > { %12127 = vmatmul.mubr.msk.f32.gmra.mrb[34].mxu1 %vm838_vm1, %v15933_v31  ;;  %12903 = vmatmul.mubr.msk.f32.gmra.mrb[34].mxu0 %vm838_vm1, %v15981_v3  ;;  %v647_v31 = vrot.slane %v15994_v62, 1  ;;  %v16037_v62 = vld [vmem:[%s15539_s6 + $0x1d8] sm:$0x3]  ;;  %v16054_v40 = vsel %vm547_vm0, %v648_v20, %v650_v24  ;;  %21072 = vst [vmem:[#allocation62_spill] sm:$0xff] %v16063_v46 }
  0xba   : > { %12129 = vmatprep.mubr.msk.f32.mxu1 %vm838_vm1, %v15937_v60  ;;  %12905 = vmatprep.mubr.msk.f32.mxu0 %vm838_vm1, %v15985_v44  ;;  %v16020_v60 = vld [vmem:[%s15539_s6 + $0x1d0] sm:$0xff]  ;;  %21067 = vst [vmem:[#allocation57_spill] sm:$0xff] %v16037_v62  ;;  %21070 = vst [vmem:[#allocation60_spill] sm:$0xff] %v16054_v40 }
  0xbb   : > { %21064 = vst [vmem:[#allocation54_spill] sm:$0xff] %v16020_v60  ;;  %v16033_v53 = vsel %vm547_vm0, %v647_v31, %v648_v20  ;;  %v654_v31 = vrot.slane %v16037_v62, 1  ;;  %v16093_v62 = vld [vmem:[%s15539_s6 + $0x210] sm:$0xff] }
  0xbc   : > { %21066 = vst [vmem:[#allocation56_spill] sm:$0xff] %v16033_v53  ;;  %21078 = vst [vmem:[#allocation68_spill] sm:$0xff] %v16093_v62 }
  0xbd   : > { %12130 = vmatmul.mubr.msk.f32.gmra.mrb[36].mxu1 %vm838_vm1, %v15958_v61  ;;  %12906 = vmatmul.mubr.msk.f32.gmra.mrb[36].mxu0 %vm838_vm1, %v16006_v48  ;;  %v652_v61 = vrot.slane %v16020_v60, 1  ;;  %v657_v60 = vrot.slane %v16045_v39, 1 }
  0xbe   : > { %12132 = vmatprep.mubr.msk.f32.mxu1 %vm838_vm1, %v15962_v35  ;;  %12908 = vmatprep.mubr.msk.f32.mxu0 %vm838_vm1, %v16010_v21  ;;  %v16042_v35 = vld [vmem:[%s15539_s6 + $0x1e0] sm:$0xff] }
  0xbf   : > { %21068 = vst [vmem:[#allocation58_spill] sm:$0xff] %v16042_v35  ;;  %v16058_v11 = vsel %vm547_vm0, %v650_v24, %v652_v61  ;;  %v16077_v20 = vsel %vm547_vm0, %v652_v61, %v654_v31  ;;  %v659_v24 = vrot.slane %v16063_v46, 1  ;;  %v16111_v46 = vld [vmem:[%s15539_s6 + $0x218] sm:$0xff] }
  0xc0   : > { %21071 = vst [vmem:[#allocation61_spill] sm:$0xff] %v16058_v11  ;;  %21074 = vst [vmem:[#allocation64_spill] sm:$0xff] %v16077_v20 }
  0xc1   : > { %12133 = vmatmul.mubr.msk.f32.gmra.mrb[38].mxu1 %vm838_vm1, %v15981_v3  ;;  %12909 = vmatmul.mubr.msk.f32.gmra.mrb[38].mxu0 %vm838_vm1, %v16029_v51  ;;  %v656_v3 = vrot.slane %v16042_v35, 1  ;;  %v16085_v35 = vld [vmem:[%s15539_s6 + $0x200] sm:$0x3]  ;;  %v16102_v61 = vsel %vm547_vm0, %v657_v60, %v659_v24  ;;  %21081 = vst [vmem:[#allocation71_spill] sm:$0xff] %v16111_v46 }
  0xc2   : > { %12135 = vmatprep.mubr.msk.f32.mxu1 %vm838_vm1, %v15985_v44  ;;  %12911 = vmatprep.mubr.msk.f32.mxu0 %vm838_vm1, %v16033_v53  ;;  %v16068_v44 = vld [vmem:[%s15539_s6 + $0x1f8] sm:$0xff]  ;;  %21076 = vst [vmem:[#allocation66_spill] sm:$0xff] %v16085_v35  ;;  %21079 = vst [vmem:[#allocation69_spill] sm:$0xff] %v16102_v61 }
  0xc3   : > { %21073 = vst [vmem:[#allocation63_spill] sm:$0xff] %v16068_v44  ;;  %v16081_v39 = vsel %vm547_vm0, %v656_v3, %v657_v60  ;;  %v663_v3 = vrot.slane %v16085_v35, 1  ;;  %v16141_v35 = vld [vmem:[%s15539_s6 + $0x238] sm:$0xff] }
  0xc4   : > { %21075 = vst [vmem:[#allocation65_spill] sm:$0xff] %v16081_v39  ;;  %21087 = vst [vmem:[#allocation77_spill] sm:$0xff] %v16141_v35 }
  0xc5   : > { %12136 = vmatmul.mubr.msk.f32.gmra.mrb[40].mxu1 %vm838_vm1, %v16006_v48  ;;  %12912 = vmatmul.mubr.msk.f32.gmra.mrb[40].mxu0 %vm838_vm1, %v16054_v40  ;;  %v661_v48 = vrot.slane %v16068_v44, 1  ;;  %v666_v44 = vrot.slane %v16093_v62, 1 }
  0xc6   : > { %12138 = vmatprep.mubr.msk.f32.mxu1 %vm838_vm1, %v16010_v21  ;;  %12914 = vmatprep.mubr.msk.f32.mxu0 %vm838_vm1, %v16058_v11  ;;  %v16090_v21 = vld [vmem:[%s15539_s6 + $0x208] sm:$0xff] }
  0xc7   : > { %21077 = vst [vmem:[#allocation67_spill] sm:$0xff] %v16090_v21  ;;  %v16106_v31 = vsel %vm547_vm0, %v659_v24, %v661_v48  ;;  %v16125_v60 = vsel %vm547_vm0, %v661_v48, %v663_v3  ;;  %v668_v24 = vrot.slane %v16111_v46, 1  ;;  %v16159_v46 = vld [vmem:[%s15539_s6 + $0x240] sm:$0xff] }
  0xc8   : > { %21080 = vst [vmem:[#allocation70_spill] sm:$0xff] %v16106_v31  ;;  %21083 = vst [vmem:[#allocation73_spill] sm:$0xff] %v16125_v60 }
  0xc9   : > { %12139 = vmatmul.mubr.msk.f32.gmra.mrb[42].mxu1 %vm838_vm1, %v16029_v51  ;;  %12915 = vmatmul.mubr.msk.f32.gmra.mrb[42].mxu0 %vm838_vm1, %v16077_v20  ;;  %v665_v51 = vrot.slane %v16090_v21, 1  ;;  %v16133_v21 = vld [vmem:[%s15539_s6 + $0x228] sm:$0x3]  ;;  %v16150_v48 = vsel %vm547_vm0, %v666_v44, %v668_v24  ;;  %21090 = vst [vmem:[#allocation80_spill] sm:$0xff] %v16159_v46 }
  0xca   : > { %12141 = vmatprep.mubr.msk.f32.mxu1 %vm838_vm1, %v16033_v53  ;;  %12917 = vmatprep.mubr.msk.f32.mxu0 %vm838_vm1, %v16081_v39  ;;  %v16116_v53 = vld [vmem:[%s15539_s6 + $0x220] sm:$0xff]  ;;  %21085 = vst [vmem:[#allocation75_spill] sm:$0xff] %v16133_v21  ;;  %21088 = vst [vmem:[#allocation78_spill] sm:$0xff] %v16150_v48 }
  0xcb   : > { %21082 = vst [vmem:[#allocation72_spill] sm:$0xff] %v16116_v53  ;;  %v16129_v62 = vsel %vm547_vm0, %v665_v51, %v666_v44  ;;  %v672_v51 = vrot.slane %v16133_v21, 1  ;;  %v16189_v21 = vld [vmem:[%s15539_s6 + $0x260] sm:$0xff] }
  0xcc   : > { %21084 = vst [vmem:[#allocation74_spill] sm:$0xff] %v16129_v62  ;;  %21096 = vst [vmem:[#allocation86_spill] sm:$0xff] %v16189_v21 }
  0xcd   : > { %12142 = vmatmul.mubr.msk.f32.gmra.mrb[44].mxu1 %vm838_vm1, %v16054_v40  ;;  %12918 = vmatmul.mubr.msk.f32.gmra.mrb[44].mxu0 %vm838_vm1, %v16102_v61  ;;  %v670_v40 = vrot.slane %v16116_v53, 1  ;;  %v675_v53 = vrot.slane %v16141_v35, 1 }
  0xce   : > { %12144 = vmatprep.mubr.msk.f32.mxu1 %vm838_vm1, %v16058_v11  ;;  %12920 = vmatprep.mubr.msk.f32.mxu0 %vm838_vm1, %v16106_v31  ;;  %v16138_v11 = vld [vmem:[%s15539_s6 + $0x230] sm:$0xff] }
  0xcf   : > { %21086 = vst [vmem:[#allocation76_spill] sm:$0xff] %v16138_v11  ;;  %v16154_v3 = vsel %vm547_vm0, %v668_v24, %v670_v40  ;;  %v16173_v44 = vsel %vm547_vm0, %v670_v40, %v672_v51  ;;  %v677_v24 = vrot.slane %v16159_v46, 1  ;;  %v16207_v46 = vld [vmem:[%s15539_s6 + $0x268] sm:$0xff] }
  0xd0   : > { %21089 = vst [vmem:[#allocation79_spill] sm:$0xff] %v16154_v3  ;;  %21092 = vst [vmem:[#allocation82_spill] sm:$0xff] %v16173_v44 }
  0xd1   : > { %12145 = vmatmul.mubr.msk.f32.gmra.mrb[46].mxu1 %vm838_vm1, %v16077_v20  ;;  %12921 = vmatmul.mubr.msk.f32.gmra.mrb[46].mxu0 %vm838_vm1, %v16125_v60  ;;  %v674_v20 = vrot.slane %v16138_v11, 1  ;;  %v16181_v11 = vld [vmem:[%s15539_s6 + $0x250] sm:$0x3]  ;;  %v16198_v40 = vsel %vm547_vm0, %v675_v53, %v677_v24  ;;  %21099 = vst [vmem:[#allocation89_spill] sm:$0xff] %v16207_v46 }
  0xd2   : > { %12147 = vmatprep.mubr.msk.f32.mxu1 %vm838_vm1, %v16081_v39  ;;  %12923 = vmatprep.mubr.msk.f32.mxu0 %vm838_vm1, %v16129_v62  ;;  %v16164_v39 = vld [vmem:[%s15539_s6 + $0x248] sm:$0xff]  ;;  %21094 = vst [vmem:[#allocation84_spill] sm:$0xff] %v16181_v11  ;;  %21097 = vst [vmem:[#allocation87_spill] sm:$0xff] %v16198_v40 }
  0xd3   : > { %21091 = vst [vmem:[#allocation81_spill] sm:$0xff] %v16164_v39  ;;  %v16177_v35 = vsel %vm547_vm0, %v674_v20, %v675_v53  ;;  %v681_v20 = vrot.slane %v16181_v11, 1  ;;  %v16237_v11 = vld [vmem:[%s15539_s6 + $0x288] sm:$0xff] }
  0xd4   : > { %21093 = vst [vmem:[#allocation83_spill] sm:$0xff] %v16177_v35  ;;  %21104 = vst [vmem:[#allocation94_spill] sm:$0xff] %v16237_v11 }
  0xd5   : > { %12148 = vmatmul.mubr.msk.f32.gmra.mrb[48].mxu1 %vm838_vm1, %v16102_v61  ;;  %12924 = vmatmul.mubr.msk.f32.gmra.mrb[48].mxu0 %vm838_vm1, %v16150_v48  ;;  %v679_v61 = vrot.slane %v16164_v39, 1  ;;  %v684_v39 = vrot.slane %v16189_v21, 1 }
  0xd6   : > { %12150 = vmatprep.mubr.msk.f32.mxu1 %vm838_vm1, %v16106_v31  ;;  %12926 = vmatprep.mubr.msk.f32.mxu0 %vm838_vm1, %v16154_v3  ;;  %v16186_v31 = vld [vmem:[%s15539_s6 + $0x258] sm:$0xff] }
  0xd7   : > { %21095 = vst [vmem:[#allocation85_spill] sm:$0xff] %v16186_v31  ;;  %v16202_v51 = vsel %vm547_vm0, %v677_v24, %v679_v61  ;;  %v16221_v53 = vsel %vm547_vm0, %v679_v61, %v681_v20  ;;  %v686_v24 = vrot.slane %v16207_v46, 1  ;;  %v16255_v46 = vld [vmem:[%s15539_s6 + $0x290] sm:$0xff] }
  0xd8   : > { %21098 = vst [vmem:[#allocation88_spill] sm:$0xff] %v16202_v51  ;;  %21101 = vst [vmem:[#allocation91_spill] sm:$0xff] %v16221_v53 }
  0xd9   : > { %12151 = vmatmul.mubr.msk.f32.gmra.mrb[50].mxu1 %vm838_vm1, %v16125_v60  ;;  %12927 = vmatmul.mubr.msk.f32.gmra.mrb[50].mxu0 %vm838_vm1, %v16173_v44  ;;  %v683_v60 = vrot.slane %v16186_v31, 1  ;;  %v16229_v31 = vld [vmem:[%s15539_s6 + $0x278] sm:$0x3]  ;;  %v16246_v61 = vsel %vm547_vm0, %v684_v39, %v686_v24 }
  0xda   : > { %12153 = vmatprep.mubr.msk.f32.mxu1 %vm838_vm1, %v16129_v62  ;;  %12929 = vmatprep.mubr.msk.f32.mxu0 %vm838_vm1, %v16177_v35  ;;  %v16212_v62 = vld [vmem:[%s15539_s6 + $0x270] sm:$0xff]  ;;  %21105 = vst [vmem:[#allocation95_spill] sm:$0xff] %v16246_v61 }
  0xdb   : > { %21100 = vst [vmem:[#allocation90_spill] sm:$0xff] %v16212_v62  ;;  %v16225_v21 = vsel %vm547_vm0, %v683_v60, %v684_v39  ;;  %v690_v60 = vrot.slane %v16229_v31, 1 }
  0xdc   : > { %21102 = vst [vmem:[#allocation92_spill] sm:$0xff] %v16225_v21 }
  0xdd   : > { %12154 = vmatmul.mubr.msk.f32.gmra.mrb[52].mxu1 %vm838_vm1, %v16150_v48  ;;  %12930 = vmatmul.mubr.msk.f32.gmra.mrb[52].mxu0 %vm838_vm1, %v16198_v40  ;;  %v688_v48 = vrot.slane %v16212_v62, 1  ;;  %v693_v62 = vrot.slane %v16237_v11, 1 }
  0xde   : > { %12156 = vmatprep.mubr.msk.f32.mxu1 %vm838_vm1, %v16154_v3  ;;  %12932 = vmatprep.mubr.msk.f32.mxu0 %vm838_vm1, %v16202_v51  ;;  %v16234_v3 = vld [vmem:[%s15539_s6 + $0x280] sm:$0xff] }
  0xdf   : > { %21103 = vst [vmem:[#allocation93_spill] sm:$0xff] %v16234_v3  ;;  %v16250_v20 = vsel %vm547_vm0, %v686_v24, %v688_v48  ;;  %v16269_v39 = vsel %vm547_vm0, %v688_v48, %v690_v60  ;;  %v695_v24 = vrot.slane %v16255_v46, 1 }
  0xe0   : > { %21106 = vst [vmem:[#allocation96_spill] sm:$0xff] %v16250_v20  ;;  %21107 = vst [vmem:[#allocation97_spill] sm:$0xff] %v16269_v39 }
  0xe1   : > { %12157 = vmatmul.mubr.msk.f32.gmra.mrb[54].mxu1 %vm838_vm1, %v16173_v44  ;;  %12933 = vmatmul.mubr.msk.f32.gmra.mrb[54].mxu0 %vm838_vm1, %v16221_v53  ;;  %v692_v44 = vrot.slane %v16234_v3, 1  ;;  %v16277_v3 = vld [vmem:[%s15539_s6 + $0x2a0] sm:$0x3]  ;;  %v16288_v48 = vsel %vm547_vm0, %v693_v62, %v695_v24 }
  0xe2   : > { %12159 = vmatprep.mubr.msk.f32.mxu1 %vm838_vm1, %v16177_v35  ;;  %12935 = vmatprep.mubr.msk.f32.mxu0 %vm838_vm1, %v16225_v21  ;;  %v16260_v35 = vld [vmem:[%s15539_s6 + $0x298] sm:$0xff]  ;;  %21109 = vst [vmem:[#allocation99_spill] sm:$0xff] %v16288_v48 }
  0xe3   : > { %v16273_v11 = vsel %vm547_vm0, %v692_v44, %v693_v62  ;;  %v699_v44 = vrot.slane %v16277_v3, 1 }
  0xe4   : > { %21108 = vst [vmem:[#allocation98_spill] sm:$0xff] %v16273_v11 }
  0xe5   : > { %12160 = vmatmul.mubr.msk.f32.gmra.mrb[56].mxu1 %vm838_vm1, %v16198_v40  ;;  %12936 = vmatmul.mubr.msk.f32.gmra.mrb[56].mxu0 %vm838_vm1, %v16246_v61  ;;  %v697_v40 = vrot.slane %v16260_v35, 1 }
  0xe6   : > { %12162 = vmatprep.mubr.msk.f32.mxu1 %vm838_vm1, %v16202_v51  ;;  %12938 = vmatprep.mubr.msk.f32.mxu0 %vm838_vm1, %v16250_v20  ;;  %v2772_v51 = vrot.slane %v15555_v8, 2 }
  0xe7   : > { %v16292_v60 = vsel %vm547_vm0, %v695_v24, %v697_v40  ;;  %v16305_v62 = vsel %vm547_vm0, %v697_v40, %v699_v44  ;;  %v2776_v24 = vrot.slane %v15565_v16, 2  ;;  %v2778_v40 = vrot.slane %v15578_v26, 2 }
  0xe8   : > { %21110 = vst [vmem:[#allocation100_spill] sm:$0xff] %v16292_v60  ;;  %21111 = vst [vmem:[#allocation101_spill] sm:$0xff] %v16305_v62 }
  0xe9   : > { %12163 = vmatmul.mubr.msk.f32.gmra.mrb[58].mxu1 %vm838_vm1, %v16221_v53  ;;  %12939 = vmatmul.mubr.msk.f32.gmra.mrb[58].mxu0 %vm838_vm1, %v16269_v39  ;;  %v2771_v53 = vrot.slane %v15552_v6, 2  ;;  %v2774_v6 = vrot.slane %v15561_v14, 2  ;;  %v16324_v14 = vld [vmem:[#allocation5 + $0x10] sm:$0xff] }
  0xea   : > { %12165 = vmatprep.mubr.msk.f32.mxu1 %vm838_vm1, %v16225_v21  ;;  %12941 = vmatprep.mubr.msk.f32.mxu0 %vm838_vm1, %v16273_v11  ;;  %v16316_v21 = vld [vmem:[%s15539_s6 + $0x2b0] sm:$0xff]  ;;  %21113 = vst [vmem:[#allocation103_spill] sm:$0xff] %v16324_v14 }
  0xeb   : > { %v16309_v8 = vsel %vm2761_vm2, %v2771_v53, %v2772_v51  ;;  %v16329_v16 = vsel %vm2761_vm2, %v2772_v51, %v2774_v6  ;;  %v702_v44 = vrot.slane %v16316_v21, 1  ;;  %12461 = vmatprep.subr.mxu1 %v16324_v14  ;;  %v2781_v51 = vrot.slane %v15581_v27, 2  ;;  %v16372_v14 = vld [vmem:[%s15539_s6 + $0x2d0] sm:$0xff] }
  0xec   : > { %21112 = vst [vmem:[#allocation102_spill] sm:$0xff] %v16309_v8  ;;  %21114 = vst [vmem:[#allocation104_spill] sm:$0xff] %v16329_v16 }
  0xed   : > { %12166 = vmatmul.mubr.msk.f32.gmra.mrb[60].mxu1 %vm838_vm1, %v16246_v61  ;;  %12942 = vmatmul.mubr.msk.f32.gmra.mrb[60].mxu0 %vm838_vm1, %v16288_v48  ;;  %v16313_v61 = vld [vmem:[%s15539_s6 + $0x2a8] sm:$0xff] }
  0xee   : > { %12168 = vmatprep.mubr.msk.f32.mxu1 %vm838_vm1, %v16250_v20  ;;  %12944 = vmatprep.mubr.msk.f32.mxu0 %vm838_vm1, %v16292_v60  ;;  %v701_v53 = vrot.slane %v16313_v61, 1  ;;  %v2780_v20 = vrot.slane %v15572_v22, 2  ;;  %v16357_v22 = vsel %vm2761_vm2, %v2776_v24, %v2778_v40 }
  0xef   : > { %21116 = vst [vmem:[#allocation106_spill] sm:$0xff] %v16357_v22 }
  0xf0   : > { %v16360_v27 = vsel %vm547_vm0, %v701_v53, %v702_v44  ;;  %v710_v53 = vrot.slane %v16372_v14, 1 }
  0xf1   : > { %12169 = vmatmul.mubr.msk.f32.gmra.mrb[62].mxu1 %vm838_vm1, %v16269_v39  ;;  %12945 = vmatmul.mubr.msk.f32.gmra.mrb[62].mxu0 %vm838_vm1, %v16305_v62  ;;  %v16335_v39 = vld [vmem:[%s15539_s6 + $0x2b8] sm:$0xff]  ;;  %21117 = vst [vmem:[#allocation107_spill] sm:$0xff] %v16360_v27 }
  0xf2   : > { %12171 = vmatprep.mubr.msk.f32.mxu1 %vm838_vm1, %v16273_v11  ;;  %13045 = vmatprep.mubr.msk.f32.mxu0 %vm838_vm1, %v16309_v8  ;;  %v16339_v11 = vsel %vm2761_vm2, %v2774_v6, %v2776_v24  ;;  %v16344_v8 = vld [vmem:[%s15539_s6 + $0x2c0] sm:$0xff]  ;;  %v704_v26 = vrot.slane %v16335_v39, 1  ;;  %v2783_v6 = vrot.slane %v15585_v29, 2 }
  0xf3   : > { %21115 = vst [vmem:[#allocation105_spill] sm:$0xff] %v16339_v11 }
  0xf4   : > { %v16384_v29 = vsel %vm547_vm0, %v702_v44, %v704_v26  ;;  %v16391_v24 = vsel %vm2761_vm2, %v2781_v51, %v2783_v6  ;;  %v16399_v44 = vld [vmem:[%s15539_s6 + $0x2e0] sm:$0xff] }
  0xf5   : > { %12172 = vmatmul.mubr.msk.f32.gmra.mrb[64].mxu1 %vm838_vm1, %v16288_v48  ;;  %13046 = vmatmul.mubr.msk.f32.vlgmr.msra.gmra.mrb[0].mxu0 %vm838_vm1, %v16329_v16  ;;  %v706_v48 = vrot.slane %v16344_v8, 1  ;;  %v16365_v16 = vld [vmem:[%s15539_s6 + $0x2c8] sm:$0x3]  ;;  %21119 = vst [vmem:[#allocation109_spill] sm:$0xff] %v16384_v29  ;;  %21120 = vst [vmem:[#allocation110_spill] sm:$0xff] %v16391_v24 }
  0xf6   : > { %12174 = vmatprep.mubr.msk.f32.mxu1 %vm838_vm1, %v16292_v60  ;;  %13238 = vmatpush3.msra.mxu0 %v15731_v19  ;;  %v16368_v60 = vsel %vm2761_vm2, %v2780_v20, %v2781_v51  ;;  %v2785_v19 = vrot.slane %v15594_v34, 2  ;;  %v708_v20 = vrot.slane %v16365_v16, 1  ;;  %v2787_v34 = vrot.slane %v15608_v41, 2  ;;  %v16407_v51 = vld [vmem:[%s15539_s6 + $0x2e8] sm:$0xff] }
  0xf7   : > { %13048 = vmatprep.mubr.msk.f32.mxu0 %vm838_vm1, %v16339_v11  ;;  %21118 = vst [vmem:[#allocation108_spill] sm:$0xff] %v16368_v60  ;;  %v16375_v11 = vld [vmem:[%s15539_s6 + $0x2d8] sm:$0xff]  ;;  %v16394_v40 = vsel %vm547_vm0, %v704_v26, %v706_v48  ;;  %v2789_v41 = vrot.slane %v15612_v42, 2  ;;  %v713_v42 = vrot.slane %v16399_v44, 1 }
  0xf8   : > { %21121 = vst [vmem:[#allocation111_spill] sm:$0xff] %v16394_v40  ;;  %v16416_v26 = vsel %vm547_vm0, %v706_v48, %v708_v20  ;;  %v2794_v20 = vrot.slane %v15635_v50, 2  ;;  %v2796_v50 = vrot.slane %v15651_v55, 2  ;;  %v2798_v55 = vrot.slane %v15655_v56, 2 }
  0xf9   : > { %12175 = vmatmul.mubr.msk.f32.gmra.mrb[66].mxu1 %vm838_vm1, %v16305_v62  ;;  %13049 = vmatmul.mubr.msk.f32.gmra.mrb[2].mxu0 %vm838_vm1, %v16357_v22  ;;  %v16402_v62 = vsel %vm2761_vm2, %v2783_v6, %v2785_v19  ;;  %21123 = vst [vmem:[#allocation113_spill] sm:$0xff] %v16416_v26  ;;  %v16430_v22 = vld [vmem:[%s15539_s6 + $0x2f0] sm:$0x3] }
  0xfa   : > { %12177 = vmatprep.mubr.msk.f32.mxu1 %vm838_vm1, %v16360_v27  ;;  %13051 = vmatprep.mubr.msk.f32.mxu0 %vm838_vm1, %v16368_v60  ;;  %v711_v27 = vrot.slane %v16375_v11, 1  ;;  %21122 = vst [vmem:[#allocation112_spill] sm:$0xff] %v16402_v62  ;;  %v2790_v60 = vrot.slane %v15615_v43, 2  ;;  %v16422_v43 = vsel %vm2761_vm2, %v2785_v19, %v2787_v34  ;;  %v717_v19 = vrot.slane %v16430_v22, 1 }
  0xfb   : > { %21124 = vst [vmem:[#allocation114_spill] sm:$0xff] %v16422_v43 }
  0xfc   : > { %v16425_v6 = vsel %vm547_vm0, %v710_v53, %v711_v27  ;;  %v16433_v48 = vsel %vm2761_vm2, %v2789_v41, %v2790_v60 }
  0xfd   : > { %12178 = vmatmul.mubr.msk.f32.gmra.mrb[68].mxu1 %vm838_vm1, %v16384_v29  ;;  %13052 = vmatmul.mubr.msk.f32.gmra.mrb[4].mxu0 %vm838_vm1, %v16391_v24  ;;  %21125 = vst [vmem:[#allocation115_spill] sm:$0xff] %v16425_v6  ;;  %v2792_v29 = vrot.slane %v15631_v49, 2  ;;  %v715_v24 = vrot.slane %v16407_v51, 1  ;;  %21126 = vst [vmem:[#allocation116_spill] sm:$0xff] %v16433_v48  ;;  %v16449_v49 = vsel %vm547_vm0, %v711_v27, %v713_v42  ;;  %v16464_v27 = vld [vmem:[%s15539_s6 + $0x308] sm:$0xff] }
  0xfe   : > { %12180 = vmatprep.mubr.msk.f32.mxu1 %vm838_vm1, %v16394_v40  ;;  %13054 = vmatprep.mubr.msk.f32.mxu0 %vm838_vm1, %v16402_v62  ;;  %v16437_v40 = vld [vmem:[%s15539_s6 + $0x2f8] sm:$0xff]  ;;  %v16440_v62 = vld [vmem:[%s15539_s6 + $0x300] sm:$0xff]  ;;  %21127 = vst [vmem:[#allocation117_spill] sm:$0xff] %v16449_v49  ;;  %v722_v56 = vrot.slane %v16464_v27, 1 }
  0xff   : > { %v16456_v34 = vsel %vm2761_vm2, %v2790_v60, %v2792_v29  ;;  %v16459_v53 = vsel %vm547_vm0, %v713_v42, %v715_v24  ;;  %v719_v41 = vrot.slane %v16437_v40, 1  ;;  %v16472_v60 = vld [vmem:[%s15539_s6 + $0x310] sm:$0xff]  ;;  %v2801_v42 = vrot.slane %v15676_v63, 2  ;;  %v16502_v63 = vld [vmem:[%s15539_s6 + $0x320] sm:$0xff] }
 0x100   : > { %21128 = vst [vmem:[#allocation118_spill] sm:$0xff] %v16456_v34  ;;  %21129 = vst [vmem:[#allocation119_spill] sm:$0xff] %v16459_v53 }
 0x101   : > { %12181 = vmatmul.mubr.msk.f32.gmra.mrb[70].mxu1 %vm838_vm1, %v16416_v26  ;;  %13055 = vmatmul.mubr.msk.f32.gmra.mrb[6].mxu0 %vm838_vm1, %v16422_v43  ;;  %v16467_v26 = vsel %vm2761_vm2, %v2792_v29, %v2794_v20  ;;  %v16481_v29 = vsel %vm547_vm0, %v715_v24, %v717_v19  ;;  %v16495_v43 = vld [vmem:[%s15539_s6 + $0x318] sm:$0x3]  ;;  %v2803_v19 = vrot.slane %v15681_v0, 2 }
 0x102   : > { %12183 = vmatprep.mubr.msk.f32.mxu1 %vm838_vm1, %v16425_v6  ;;  %13057 = vmatprep.mubr.msk.f32.mxu0 %vm838_vm1, %v16433_v48  ;;  %v720_v6 = vrot.slane %v16440_v62, 1  ;;  %21130 = vst [vmem:[#allocation120_spill] sm:$0xff] %v16467_v26  ;;  %v2799_v48 = vrot.slane %v15658_v57, 2  ;;  %21131 = vst [vmem:[#allocation121_spill] sm:$0xff] %v16481_v29  ;;  %v16488_v57 = vsel %vm2761_vm2, %v2794_v20, %v2796_v50  ;;  %v726_v0 = vrot.slane %v16495_v43, 1 }
 0x103   : > { %21132 = vst [vmem:[#allocation122_spill] sm:$0xff] %v16488_v57 }
 0x104   : > { %v16498_v24 = vsel %vm2761_vm2, %v2798_v55, %v2799_v48  ;;  %v16514_v20 = vsel %vm547_vm0, %v720_v6, %v722_v56  ;;  %v16517_v50 = vsel %vm2761_vm2, %v2799_v48, %v2801_v42  ;;  %v2805_v55 = vrot.slane %v15698_v5, 2 }
 0x105   : > { %12184 = vmatmul.mubr.msk.f32.gmra.mrb[72].mxu1 %vm838_vm1, %v16449_v49  ;;  %13058 = vmatmul.mubr.msk.f32.gmra.mrb[8].mxu0 %vm838_vm1, %v16456_v34  ;;  %v16491_v49 = vsel %vm547_vm0, %v719_v41, %v720_v6  ;;  %v724_v34 = vrot.slane %v16472_v60, 1  ;;  %21134 = vst [vmem:[#allocation124_spill] sm:$0xff] %v16498_v24  ;;  %21135 = vst [vmem:[#allocation125_spill] sm:$0xff] %v16514_v20  ;;  %v16529_v6 = vld [vmem:[%s15539_s6 + $0x330] sm:$0xff]  ;;  %v16532_v48 = vsel %vm2761_vm2, %v2801_v42, %v2803_v19 }
 0x106   : > { %12186 = vmatprep.mubr.msk.f32.mxu1 %vm838_vm1, %v16459_v53  ;;  %13060 = vmatprep.mubr.msk.f32.mxu0 %vm838_vm1, %v16467_v26  ;;  %21133 = vst [vmem:[#allocation123_spill] sm:$0xff] %v16491_v49  ;;  %v16505_v53 = vld [vmem:[%s15539_s6 + $0x328] sm:$0xff]  ;;  %21136 = vst [vmem:[#allocation126_spill] sm:$0xff] %v16517_v50  ;;  %v16560_v26 = vld [vmem:[%s15539_s6 + $0x340] sm:$0x3] }
 0x107   : > { %v16523_v41 = vsel %vm547_vm0, %v722_v56, %v724_v34  ;;  %21138 = vst [vmem:[#allocation128_spill] sm:$0xff] %v16532_v48  ;;  %v16537_v56 = vld [vmem:[%s15539_s6 + $0x338] sm:$0xff]  ;;  %v16546_v5 = vsel %vm547_vm0, %v724_v34, %v726_v0  ;;  %v2812_v0 = vrot.slane %v15729_v18, 2  ;;  %v2814_v18 = vrot.slane %v15749_v25, 2 }
 0x108   : > { %21137 = vst [vmem:[#allocation127_spill] sm:$0xff] %v16523_v41  ;;  %21139 = vst [vmem:[#allocation129_spill] sm:$0xff] %v16546_v5  ;;  %v2816_v25 = vrot.slane %v15754_v28, 2 }
 0x109   : > { %12187 = vmatmul.mubr.msk.f32.gmra.mrb[74].mxu1 %vm838_vm1, %v16481_v29  ;;  %13061 = vmatmul.mubr.msk.f32.gmra.mrb[10].mxu0 %vm838_vm1, %v16488_v57  ;;  %v728_v29 = vrot.slane %v16502_v63, 1  ;;  %v2807_v57 = vrot.slane %v15703_v7, 2  ;;  %v731_v7 = vrot.slane %v16529_v6, 1 }
 0x10a   : > { %12189 = vmatprep.mubr.msk.f32.mxu1 %vm838_vm1, %v16491_v49  ;;  %13063 = vmatprep.mubr.msk.f32.mxu0 %vm838_vm1, %v16498_v24  ;;  %v729_v49 = vrot.slane %v16505_v53, 1  ;;  %v2808_v24 = vrot.slane %v15706_v9, 2  ;;  %v16552_v9 = vsel %vm2761_vm2, %v2803_v19, %v2805_v55 }
 0x10b   : > { %21140 = vst [vmem:[#allocation130_spill] sm:$0xff] %v16552_v9 }
 0x10c   : > { %v16555_v42 = vsel %vm547_vm0, %v728_v29, %v729_v49  ;;  %v16563_v34 = vsel %vm2761_vm2, %v2807_v57, %v2808_v24  ;;  %v735_v29 = vrot.slane %v16560_v26, 1 }
 0x10d   : > { %12190 = vmatmul.mubr.msk.f32.gmra.mrb[76].mxu1 %vm838_vm1, %v16514_v20  ;;  %13064 = vmatmul.mubr.msk.f32.gmra.mrb[12].mxu0 %vm838_vm1, %v16517_v50  ;;  %21141 = vst [vmem:[#allocation131_spill] sm:$0xff] %v16555_v42  ;;  %v2810_v20 = vrot.slane %v15724_v17, 2  ;;  %v733_v50 = vrot.slane %v16537_v56, 1  ;;  %21142 = vst [vmem:[#allocation132_spill] sm:$0xff] %v16563_v34  ;;  %v16579_v17 = vsel %vm547_vm0, %v729_v49, %v731_v7  ;;  %v16594_v49 = vld [vmem:[%s15539_s6 + $0x358] sm:$0xff] }
 0x10e   : > { %12192 = vmatprep.mubr.msk.f32.mxu1 %vm838_vm1, %v16523_v41  ;;  %13066 = vmatprep.mubr.msk.f32.mxu0 %vm838_vm1, %v16532_v48  ;;  %v16567_v41 = vld [vmem:[%s15539_s6 + $0x348] sm:$0xff]  ;;  %v16570_v48 = vld [vmem:[%s15539_s6 + $0x350] sm:$0xff]  ;;  %21143 = vst [vmem:[#allocation133_spill] sm:$0xff] %v16579_v17  ;;  %v740_v28 = vrot.slane %v16594_v49, 1 }
 0x10f   : > { %v16586_v57 = vsel %vm2761_vm2, %v2808_v24, %v2810_v20  ;;  %v16589_v19 = vsel %vm547_vm0, %v731_v7, %v733_v50  ;;  %v737_v55 = vrot.slane %v16567_v41, 1  ;;  %v16602_v24 = vld [vmem:[%s15539_s6 + $0x360] sm:$0xff]  ;;  %v2819_v7 = vrot.slane %v15775_v37, 2  ;;  %v16632_v37 = vld [vmem:[%s15539_s6 + $0x370] sm:$0xff] }
 0x110   : > { %21144 = vst [vmem:[#allocation134_spill] sm:$0xff] %v16586_v57  ;;  %21145 = vst [vmem:[#allocation135_spill] sm:$0xff] %v16589_v19 }
 0x111   : > { %12193 = vmatmul.mubr.msk.f32.gmra.mrb[78].mxu1 %vm838_vm1, %v16546_v5  ;;  %13067 = vmatmul.mubr.msk.f32.gmra.mrb[14].mxu0 %vm838_vm1, %v16552_v9  ;;  %v16597_v5 = vsel %vm2761_vm2, %v2810_v20, %v2812_v0  ;;  %v16611_v20 = vsel %vm547_vm0, %v733_v50, %v735_v29  ;;  %v16625_v9 = vld [vmem:[%s15539_s6 + $0x368] sm:$0x3]  ;;  %v2821_v29 = vrot.slane %v15780_v38, 2 }
 0x112   : > { %12195 = vmatprep.mubr.msk.f32.mxu1 %vm838_vm1, %v16555_v42  ;;  %13069 = vmatprep.mubr.msk.f32.mxu0 %vm838_vm1, %v16563_v34  ;;  %v738_v42 = vrot.slane %v16570_v48, 1  ;;  %21146 = vst [vmem:[#allocation136_spill] sm:$0xff] %v16597_v5  ;;  %v2817_v34 = vrot.slane %v15757_v30, 2  ;;  %21147 = vst [vmem:[#allocation137_spill] sm:$0xff] %v16611_v20  ;;  %v16618_v30 = vsel %vm2761_vm2, %v2812_v0, %v2814_v18  ;;  %v744_v38 = vrot.slane %v16625_v9, 1 }
 0x113   : > { %21148 = vst [vmem:[#allocation138_spill] sm:$0xff] %v16618_v30 }
 0x114   : > { %v16628_v50 = vsel %vm2761_vm2, %v2816_v25, %v2817_v34  ;;  %v16644_v0 = vsel %vm547_vm0, %v738_v42, %v740_v28  ;;  %v16647_v18 = vsel %vm2761_vm2, %v2817_v34, %v2819_v7  ;;  %v2823_v25 = vrot.slane %v15797_v52, 2 }
 0x115   : > { %12196 = vmatmul.mubr.msk.f32.gmra.mrb[80].mxu1 %vm838_vm1, %v16579_v17  ;;  %13070 = vmatmul.mubr.msk.f32.gmra.mrb[16].mxu0 %vm838_vm1, %v16586_v57  ;;  %v16621_v17 = vsel %vm547_vm0, %v737_v55, %v738_v42  ;;  %v742_v57 = vrot.slane %v16602_v24, 1  ;;  %21150 = vst [vmem:[#allocation140_spill] sm:$0xff] %v16628_v50  ;;  %21151 = vst [vmem:[#allocation141_spill] sm:$0xff] %v16644_v0  ;;  %v16659_v42 = vld [vmem:[%s15539_s6 + $0x380] sm:$0xff]  ;;  %v16662_v34 = vsel %vm2761_vm2, %v2819_v7, %v2821_v29 }
 0x116   : > { %12198 = vmatprep.mubr.msk.f32.mxu1 %vm838_vm1, %v16589_v19  ;;  %13072 = vmatprep.mubr.msk.f32.mxu0 %vm838_vm1, %v16597_v5  ;;  %21149 = vst [vmem:[#allocation139_spill] sm:$0xff] %v16621_v17  ;;  %v16635_v19 = vld [vmem:[%s15539_s6 + $0x378] sm:$0xff]  ;;  %21152 = vst [vmem:[#allocation142_spill] sm:$0xff] %v16647_v18  ;;  %v16690_v5 = vld [vmem:[%s15539_s6 + $0x390] sm:$0x3] }
 0x117   : > { %v16653_v55 = vsel %vm547_vm0, %v740_v28, %v742_v57  ;;  %21154 = vst [vmem:[#allocation144_spill] sm:$0xff] %v16662_v34  ;;  %v16667_v28 = vld [vmem:[%s15539_s6 + $0x388] sm:$0xff]  ;;  %v16676_v52 = vsel %vm547_vm0, %v742_v57, %v744_v38  ;;  %v2830_v38 = vrot.slane %v15828_v15, 2  ;;  %v2832_v15 = vrot.slane %v15845_v36, 2 }
 0x118   : > { %21153 = vst [vmem:[#allocation143_spill] sm:$0xff] %v16653_v55  ;;  %21155 = vst [vmem:[#allocation145_spill] sm:$0xff] %v16676_v52  ;;  %v2834_v36 = vrot.slane %v15850_v45, 2 }
 0x119   : > { %12199 = vmatmul.mubr.msk.f32.gmra.mrb[82].mxu1 %vm838_vm1, %v16611_v20  ;;  %13073 = vmatmul.mubr.msk.f32.gmra.mrb[18].mxu0 %vm838_vm1, %v16618_v30  ;;  %v746_v20 = vrot.slane %v16632_v37, 1  ;;  %v2825_v30 = vrot.slane %v15802_v54, 2  ;;  %v749_v54 = vrot.slane %v16659_v42, 1 }
 0x11a   : > { %12201 = vmatprep.mubr.msk.f32.mxu1 %vm838_vm1, %v16621_v17  ;;  %13075 = vmatprep.mubr.msk.f32.mxu0 %vm838_vm1, %v16628_v50  ;;  %v747_v17 = vrot.slane %v16635_v19, 1  ;;  %v2826_v50 = vrot.slane %v15805_v59, 2  ;;  %v16682_v59 = vsel %vm2761_vm2, %v2821_v29, %v2823_v25 }
 0x11b   : > { %21156 = vst [vmem:[#allocation146_spill] sm:$0xff] %v16682_v59 }
 0x11c   : > { %v16685_v7 = vsel %vm547_vm0, %v746_v20, %v747_v17  ;;  %v16693_v57 = vsel %vm2761_vm2, %v2825_v30, %v2826_v50  ;;  %v753_v20 = vrot.slane %v16690_v5, 1 }
 0x11d   : > { %12202 = vmatmul.mubr.msk.f32.gmra.mrb[84].mxu1 %vm838_vm1, %v16644_v0  ;;  %13076 = vmatmul.mubr.msk.f32.gmra.mrb[20].mxu0 %vm838_vm1, %v16647_v18  ;;  %21157 = vst [vmem:[#allocation147_spill] sm:$0xff] %v16685_v7  ;;  %v2828_v0 = vrot.slane %v15823_v13, 2  ;;  %v751_v18 = vrot.slane %v16667_v28, 1  ;;  %21158 = vst [vmem:[#allocation148_spill] sm:$0xff] %v16693_v57  ;;  %v16709_v13 = vsel %vm547_vm0, %v747_v17, %v749_v54  ;;  %v16724_v17 = vld [vmem:[%s15539_s6 + $0x3a8] sm:$0xff] }
 0x11e   : > { %12204 = vmatprep.mubr.msk.f32.mxu1 %vm838_vm1, %v16653_v55  ;;  %13078 = vmatprep.mubr.msk.f32.mxu0 %vm838_vm1, %v16662_v34  ;;  %v16697_v55 = vld [vmem:[%s15539_s6 + $0x398] sm:$0xff]  ;;  %v16700_v34 = vld [vmem:[%s15539_s6 + $0x3a0] sm:$0xff]  ;;  %21159 = vst [vmem:[#allocation149_spill] sm:$0xff] %v16709_v13  ;;  %v758_v45 = vrot.slane %v16724_v17, 1 }
 0x11f   : > { %v16716_v30 = vsel %vm2761_vm2, %v2826_v50, %v2828_v0  ;;  %v16719_v29 = vsel %vm547_vm0, %v749_v54, %v751_v18  ;;  %v755_v25 = vrot.slane %v16697_v55, 1  ;;  %v16732_v50 = vld [vmem:[%s15539_s6 + $0x3b0] sm:$0xff]  ;;  %v2837_v54 = vrot.slane %v15871_v23, 2  ;;  %v16762_v23 = vld [vmem:[%s15539_s6 + $0x3c0] sm:$0xff] }
 0x120   : > { %21160 = vst [vmem:[#allocation150_spill] sm:$0xff] %v16716_v30  ;;  %21161 = vst [vmem:[#allocation151_spill] sm:$0xff] %v16719_v29 }
 0x121   : > { %12205 = vmatmul.mubr.msk.f32.gmra.mrb[86].mxu1 %vm838_vm1, %v16676_v52  ;;  %13079 = vmatmul.mubr.msk.f32.gmra.mrb[22].mxu0 %vm838_vm1, %v16682_v59  ;;  %v16727_v52 = vsel %vm2761_vm2, %v2828_v0, %v2830_v38  ;;  %v16741_v0 = vsel %vm547_vm0, %v751_v18, %v753_v20  ;;  %v16755_v59 = vld [vmem:[%s15539_s6 + $0x3b8] sm:$0x3]  ;;  %v2839_v20 = vrot.slane %v15876_v47, 2 }
 0x122   : > { %12207 = vmatprep.mubr.msk.f32.mxu1 %vm838_vm1, %v16685_v7  ;;  %13081 = vmatprep.mubr.msk.f32.mxu0 %vm838_vm1, %v16693_v57  ;;  %v756_v7 = vrot.slane %v16700_v34, 1  ;;  %21162 = vst [vmem:[#allocation152_spill] sm:$0xff] %v16727_v52  ;;  %v2835_v57 = vrot.slane %v15853_v33, 2  ;;  %21163 = vst [vmem:[#allocation153_spill] sm:$0xff] %v16741_v0  ;;  %v16748_v33 = vsel %vm2761_vm2, %v2830_v38, %v2832_v15  ;;  %v762_v47 = vrot.slane %v16755_v59, 1 }
 0x123   : > { %21164 = vst [vmem:[#allocation154_spill] sm:$0xff] %v16748_v33 }
 0x124   : > { %v16758_v18 = vsel %vm2761_vm2, %v2834_v36, %v2835_v57  ;;  %v16774_v38 = vsel %vm547_vm0, %v756_v7, %v758_v45  ;;  %v16777_v15 = vsel %vm2761_vm2, %v2835_v57, %v2837_v54  ;;  %v2841_v36 = vrot.slane %v15893_v12, 2 }
 0x125   : > { %12208 = vmatmul.mubr.msk.f32.gmra.mrb[88].mxu1 %vm838_vm1, %v16709_v13  ;;  %13082 = vmatmul.mubr.msk.f32.gmra.mrb[24].mxu0 %vm838_vm1, %v16716_v30  ;;  %v16751_v13 = vsel %vm547_vm0, %v755_v25, %v756_v7  ;;  %v760_v30 = vrot.slane %v16732_v50, 1  ;;  %21166 = vst [vmem:[#allocation156_spill] sm:$0xff] %v16758_v18  ;;  %21167 = vst [vmem:[#allocation157_spill] sm:$0xff] %v16774_v38  ;;  %v16789_v7 = vld [vmem:[%s15539_s6 + $0x3d0] sm:$0xff]  ;;  %v16792_v57 = vsel %vm2761_vm2, %v2837_v54, %v2839_v20 }
 0x126   : > { %12210 = vmatprep.mubr.msk.f32.mxu1 %vm838_vm1, %v16719_v29  ;;  %13084 = vmatprep.mubr.msk.f32.mxu0 %vm838_vm1, %v16727_v52  ;;  %21165 = vst [vmem:[#allocation155_spill] sm:$0xff] %v16751_v13  ;;  %v16765_v29 = vld [vmem:[%s15539_s6 + $0x3c8] sm:$0xff]  ;;  %21168 = vst [vmem:[#allocation158_spill] sm:$0xff] %v16777_v15  ;;  %v16820_v52 = vld [vmem:[%s15539_s6 + $0x3e0] sm:$0x3] }
 0x127   : > { %v16783_v25 = vsel %vm547_vm0, %v758_v45, %v760_v30  ;;  %21170 = vst [vmem:[#allocation160_spill] sm:$0xff] %v16792_v57  ;;  %v16797_v45 = vld [vmem:[%s15539_s6 + $0x3d8] sm:$0xff]  ;;  %v16806_v12 = vsel %vm547_vm0, %v760_v30, %v762_v47  ;;  %v2848_v47 = vrot.slane %v15924_v32, 2  ;;  %v2850_v32 = vrot.slane %v15941_v58, 2 }
 0x128   : > { %21169 = vst [vmem:[#allocation159_spill] sm:$0xff] %v16783_v25  ;;  %21171 = vst [vmem:[#allocation161_spill] sm:$0xff] %v16806_v12  ;;  %v2852_v58 = vrot.slane %v15946_v4, 2 }
 0x129   : > { %12211 = vmatmul.mubr.msk.f32.gmra.mrb[90].mxu1 %vm838_vm1, %v16741_v0  ;;  %13085 = vmatmul.mubr.msk.f32.gmra.mrb[26].mxu0 %vm838_vm1, %v16748_v33  ;;  %v764_v0 = vrot.slane %v16762_v23, 1  ;;  %v2843_v33 = vrot.slane %v15898_v2, 2  ;;  %v767_v2 = vrot.slane %v16789_v7, 1 }
 0x12a   : > { %12213 = vmatprep.mubr.msk.f32.mxu1 %vm838_vm1, %v16751_v13  ;;  %13087 = vmatprep.mubr.msk.f32.mxu0 %vm838_vm1, %v16758_v18  ;;  %v765_v13 = vrot.slane %v16765_v29, 1  ;;  %v2844_v18 = vrot.slane %v15901_v10, 2  ;;  %v16812_v10 = vsel %vm2761_vm2, %v2839_v20, %v2841_v36 }
 0x12b   : > { %21172 = vst [vmem:[#allocation162_spill] sm:$0xff] %v16812_v10 }
 0x12c   : > { %v16815_v54 = vsel %vm547_vm0, %v764_v0, %v765_v13  ;;  %v16823_v30 = vsel %vm2761_vm2, %v2843_v33, %v2844_v18  ;;  %v771_v0 = vrot.slane %v16820_v52, 1 }
 0x12d   : > { %12214 = vmatmul.mubr.msk.f32.gmra.mrb[92].mxu1 %vm838_vm1, %v16774_v38  ;;  %13088 = vmatmul.mubr.msk.f32.gmra.mrb[28].mxu0 %vm838_vm1, %v16777_v15  ;;  %21173 = vst [vmem:[#allocation163_spill] sm:$0xff] %v16815_v54  ;;  %v2846_v38 = vrot.slane %v15919_v1, 2  ;;  %v769_v15 = vrot.slane %v16797_v45, 1  ;;  %21174 = vst [vmem:[#allocation164_spill] sm:$0xff] %v16823_v30  ;;  %v16839_v1 = vsel %vm547_vm0, %v765_v13, %v767_v2  ;;  %v16854_v13 = vld [vmem:[%s15539_s6 + $0x3f8] sm:$0xff] }
 0x12e   : > { %12216 = vmatprep.mubr.msk.f32.mxu1 %vm838_vm1, %v16783_v25  ;;  %13090 = vmatprep.mubr.msk.f32.mxu0 %vm838_vm1, %v16792_v57  ;;  %v16827_v25 = vld [vmem:[%s15539_s6 + $0x3e8] sm:$0xff]  ;;  %v16830_v57 = vld [vmem:[%s15539_s6 + $0x3f0] sm:$0xff]  ;;  %21177 = vst [vmem:[#allocation167_spill] sm:$0xff] %v16839_v1  ;;  %21180 = vst [vmem:[#allocation170_spill] sm:$0xff] %v16854_v13  ;;  %v776_v4 = vrot.slane %v16854_v13, 1 }
 0x12f   : > { %21175 = vst [vmem:[#allocation165_spill] sm:$0xff] %v16827_v25  ;;  %21176 = vst [vmem:[#allocation166_spill] sm:$0xff] %v16830_v57  ;;  %v16846_v33 = vsel %vm2761_vm2, %v2844_v18, %v2846_v38  ;;  %v16849_v20 = vsel %vm547_vm0, %v767_v2, %v769_v15  ;;  %v773_v36 = vrot.slane %v16827_v25, 1  ;;  %v16862_v18 = vld [vmem:[%s15539_s6 + $0x400] sm:$0xff]  ;;  %v16885_v25 = vld [vmem:[%s15539_s6 + $0x408] sm:$0x3] }
 0x130   : > { %21178 = vst [vmem:[#allocation168_spill] sm:$0xff] %v16846_v33  ;;  %21179 = vst [vmem:[#allocation169_spill] sm:$0xff] %v16849_v20  ;;  %v21185_v2 = vld [vmem:[#allocation44_spill] sm:$0xff] }
 0x131   : > { %12217 = vmatmul.mubr.msk.f32.gmra.mrb[94].mxu1 %vm838_vm1, %v16806_v12  ;;  %13091 = vmatmul.mubr.msk.f32.gmra.mrb[30].mxu0 %vm838_vm1, %v16812_v10  ;;  %v16857_v12 = vsel %vm2761_vm2, %v2846_v38, %v2848_v47  ;;  %v21182_v10 = vld [vmem:[#allocation41_spill] sm:$0xff]  ;;  %v16871_v38 = vsel %vm547_vm0, %v769_v15, %v771_v0  ;;  %21188 = vst [vmem:[#allocation174_spill] sm:$0xff] %v16885_v25 }
 0x132   : > { %12219 = vmatprep.mubr.msk.f32.mxu1 %vm838_vm1, %v16815_v54  ;;  %13093 = vmatprep.mubr.msk.f32.mxu0 %vm838_vm1, %v16823_v30  ;;  %v774_v54 = vrot.slane %v16830_v57, 1  ;;  %21181 = vst [vmem:[#allocation171_spill] sm:$0xff] %v16857_v12  ;;  %v2853_v30 = vrot.slane %v21182_v10, 2  ;;  %21183 = vst [vmem:[#allocation41_spill] sm:$0xff] %v16862_v18  ;;  %v2855_v57 = vrot.slane %v21185_v2, 2  ;;  %v16878_v10 = vsel %vm2761_vm2, %v2848_v47, %v2850_v32  ;;  %v21190_v0 = vld [vmem:[#allocation45_spill] sm:$0xff] }
 0x133   : > { %21184 = vst [vmem:[#allocation172_spill] sm:$0xff] %v16871_v38  ;;  %21186 = vst [vmem:[#allocation44_spill] sm:$0xff] %v16878_v10  ;;  %v16892_v2 = vld [vmem:[%s15539_s6 + $0x410] sm:$0xff]  ;;  %v16895_v13 = vld [vmem:[%s15539_s6 + $0x418] sm:$0xff] }
 0x134   : > { %v16888_v15 = vsel %vm2761_vm2, %v2852_v58, %v2853_v30  ;;  %21191 = vst [vmem:[#allocation45_spill] sm:$0xff] %v16892_v2  ;;  %21192 = vst [vmem:[#allocation176_spill] sm:$0xff] %v16895_v13  ;;  %v16904_v47 = vsel %vm547_vm0, %v774_v54, %v776_v4  ;;  %v16907_v32 = vsel %vm2761_vm2, %v2853_v30, %v2855_v57 }
 0x135   : > { %12220 = vmatmul.mubr.msk.f32.gmra.mrb[96].mxu1 %vm838_vm1, %v16839_v1  ;;  %13094 = vmatmul.mubr.msk.f32.gmra.mrb[32].mxu0 %vm838_vm1, %v16846_v33  ;;  %v16881_v1 = vsel %vm547_vm0, %v773_v36, %v774_v54  ;;  %v778_v33 = vrot.slane %v16862_v18, 1  ;;  %21189 = vst [vmem:[#allocation175_spill] sm:$0xff] %v16888_v15  ;;  %21193 = vst [vmem:[#allocation177_spill] sm:$0xff] %v16904_v47  ;;  %v780_v36 = vrot.slane %v16885_v25, 1  ;;  %v16919_v54 = vld [vmem:[%s15539_s6 + $0x420] sm:$0xff] }
 0x136   : > { %12222 = vmatprep.mubr.msk.f32.mxu1 %vm838_vm1, %v16849_v20  ;;  %13096 = vmatprep.mubr.msk.f32.mxu0 %vm838_vm1, %v16857_v12  ;;  %21187 = vst [vmem:[#allocation173_spill] sm:$0xff] %v16881_v1  ;;  %v2857_v20 = vrot.slane %v21190_v0, 2  ;;  %21194 = vst [vmem:[#allocation178_spill] sm:$0xff] %v16907_v32  ;;  %v21196_v0 = vld [vmem:[#allocation48_spill] sm:$0xff]  ;;  %v21199_v12 = vld [vmem:[#allocation49_spill] sm:$0xff] }
 0x137   : > { %v16913_v58 = vsel %vm547_vm0, %v776_v4, %v778_v33  ;;  %21197 = vst [vmem:[#allocation48_spill] sm:$0xff] %v16919_v54  ;;  %v2861_v25 = vrot.slane %v21199_v12, 2  ;;  %v21200_v18 = vld [vmem:[#allocation50_spill] sm:$0xff]  ;;  %v785_v12 = vrot.slane %v16919_v54, 1 }
 0x138   : > { %21195 = vst [vmem:[#allocation179_spill] sm:$0xff] %v16913_v58  ;;  %v16922_v30 = vsel %vm2761_vm2, %v2855_v57, %v2857_v20  ;;  %v16927_v4 = vld [vmem:[%s15539_s6 + $0x428] sm:$0xff]  ;;  %v16936_v57 = vsel %vm547_vm0, %v778_v33, %v780_v36  ;;  %v16960_v54 = vld [vmem:[%s15539_s6 + $0x440] sm:$0xff] }
 0x139   : > { %12223 = vmatmul.mubr.msk.f32.gmra.mrb[98].mxu1 %vm838_vm1, %v16871_v38  ;;  %13097 = vmatmul.mubr.msk.f32.gmra.mrb[34].mxu0 %vm838_vm1, %v16878_v10  ;;  %v2859_v38 = vrot.slane %v21196_v0, 2  ;;  %v782_v10 = vrot.slane %v16892_v2, 1  ;;  %21198 = vst [vmem:[#allocation180_spill] sm:$0xff] %v16922_v30  ;;  %21201 = vst [vmem:[#allocation49_spill] sm:$0xff] %v16927_v4  ;;  %v21203_v0 = vld [vmem:[#allocation53_spill] sm:$0xff]  ;;  %v21208_v36 = vld [vmem:[#allocation54_spill] sm:$0xff] }
 0x13a   : > { %12225 = vmatprep.mubr.msk.f32.mxu1 %vm838_vm1, %v16881_v1  ;;  %13099 = vmatprep.mubr.msk.f32.mxu0 %vm838_vm1, %v16888_v15  ;;  %v783_v1 = vrot.slane %v16895_v13, 1  ;;  %v2862_v15 = vrot.slane %v21200_v18, 2  ;;  %21202 = vst [vmem:[#allocation50_spill] sm:$0xff] %v16936_v57  ;;  %v2864_v13 = vrot.slane %v21203_v0, 2  ;;  %v16950_v2 = vld [vmem:[%s15539_s6 + $0x430] sm:$0x3] }
 0x13b   : > { %v16943_v18 = vsel %vm2761_vm2, %v2857_v20, %v2859_v38  ;;  %21206 = vst [vmem:[#allocation182_spill] sm:$0xff] %v16950_v2  ;;  %v16957_v0 = vld [vmem:[%s15539_s6 + $0x438] sm:$0xff]  ;;  %21210 = vst [vmem:[#allocation184_spill] sm:$0xff] %v16960_v54  ;;  %v789_v38 = vrot.slane %v16950_v2, 1 }
 0x13c   : > { %21204 = vst [vmem:[#allocation53_spill] sm:$0xff] %v16943_v18  ;;  %v16953_v33 = vsel %vm2761_vm2, %v2861_v25, %v2862_v15  ;;  %21209 = vst [vmem:[#allocation54_spill] sm:$0xff] %v16957_v0  ;;  %v16969_v20 = vsel %vm547_vm0, %v783_v1, %v785_v12  ;;  %v16972_v25 = vsel %vm2761_vm2, %v2862_v15, %v2864_v13 }
 0x13d   : > { %12226 = vmatmul.mubr.msk.f32.gmra.mrb[100].mxu1 %vm838_vm1, %v16904_v47  ;;  %13100 = vmatmul.mubr.msk.f32.gmra.mrb[36].mxu0 %vm838_vm1, %v16907_v32  ;;  %v16946_v47 = vsel %vm547_vm0, %v782_v10, %v783_v1  ;;  %v787_v32 = vrot.slane %v16927_v4, 1  ;;  %21207 = vst [vmem:[#allocation183_spill] sm:$0xff] %v16953_v33  ;;  %21211 = vst [vmem:[#allocation185_spill] sm:$0xff] %v16969_v20  ;;  %v16984_v1 = vld [vmem:[%s15539_s6 + $0x448] sm:$0xff] }
 0x13e   : > { %12228 = vmatprep.mubr.msk.f32.mxu1 %vm838_vm1, %v16913_v58  ;;  %13102 = vmatprep.mubr.msk.f32.mxu0 %vm838_vm1, %v16922_v30  ;;  %21205 = vst [vmem:[#allocation181_spill] sm:$0xff] %v16946_v47  ;;  %v2866_v58 = vrot.slane %v21208_v36, 2  ;;  %21212 = vst [vmem:[#allocation186_spill] sm:$0xff] %v16972_v25  ;;  %v21214_v36 = vld [vmem:[#allocation57_spill] sm:$0xff]  ;;  %v21217_v30 = vld [vmem:[#allocation58_spill] sm:$0xff] }
 0x13f   : > { %v16978_v10 = vsel %vm547_vm0, %v785_v12, %v787_v32  ;;  %21215 = vst [vmem:[#allocation57_spill] sm:$0xff] %v16984_v1  ;;  %v2870_v2 = vrot.slane %v21217_v30, 2  ;;  %v21218_v4 = vld [vmem:[#allocation59_spill] sm:$0xff]  ;;  %v794_v30 = vrot.slane %v16984_v1, 1 }
 0x140   : > { %21213 = vst [vmem:[#allocation187_spill] sm:$0xff] %v16978_v10  ;;  %v16987_v15 = vsel %vm2761_vm2, %v2864_v13, %v2866_v58  ;;  %v16992_v12 = vld [vmem:[%s15539_s6 + $0x450] sm:$0xff]  ;;  %v17001_v13 = vsel %vm547_vm0, %v787_v32, %v789_v38  ;;  %v17025_v1 = vld [vmem:[%s15539_s6 + $0x468] sm:$0xff] }
 0x141   : > { %12229 = vmatmul.mubr.msk.f32.gmra.mrb[102].mxu1 %vm838_vm1, %v16936_v57  ;;  %13103 = vmatmul.mubr.msk.f32.gmra.mrb[38].mxu0 %vm838_vm1, %v16943_v18  ;;  %v2868_v57 = vrot.slane %v21214_v36, 2  ;;  %v791_v18 = vrot.slane %v16957_v0, 1  ;;  %21216 = vst [vmem:[#allocation188_spill] sm:$0xff] %v16987_v15  ;;  %21219 = vst [vmem:[#allocation58_spill] sm:$0xff] %v16992_v12  ;;  %v21221_v36 = vld [vmem:[#allocation62_spill] sm:$0xff]  ;;  %v21226_v38 = vld [vmem:[#allocation63_spill] sm:$0xff] }
 0x142   : > { %12231 = vmatprep.mubr.msk.f32.mxu1 %vm838_vm1, %v16946_v47  ;;  %13105 = vmatprep.mubr.msk.f32.mxu0 %vm838_vm1, %v16953_v33  ;;  %v792_v47 = vrot.slane %v16960_v54, 1  ;;  %v2871_v33 = vrot.slane %v21218_v4, 2  ;;  %21220 = vst [vmem:[#allocation59_spill] sm:$0xff] %v17001_v13  ;;  %v2873_v54 = vrot.slane %v21221_v36, 2  ;;  %v17015_v0 = vld [vmem:[%s15539_s6 + $0x458] sm:$0x3] }
 0x143   : > { %v17008_v4 = vsel %vm2761_vm2, %v2866_v58, %v2868_v57  ;;  %21224 = vst [vmem:[#allocation190_spill] sm:$0xff] %v17015_v0  ;;  %v17022_v36 = vld [vmem:[%s15539_s6 + $0x460] sm:$0xff]  ;;  %21228 = vst [vmem:[#allocation192_spill] sm:$0xff] %v17025_v1  ;;  %v798_v57 = vrot.slane %v17015_v0, 1 }
 0x144   : > { %21222 = vst [vmem:[#allocation62_spill] sm:$0xff] %v17008_v4  ;;  %v17018_v32 = vsel %vm2761_vm2, %v2870_v2, %v2871_v33  ;;  %21227 = vst [vmem:[#allocation63_spill] sm:$0xff] %v17022_v36  ;;  %v17034_v58 = vsel %vm547_vm0, %v792_v47, %v794_v30  ;;  %v17037_v2 = vsel %vm2761_vm2, %v2871_v33, %v2873_v54 }
 0x145   : > { %12232 = vmatmul.mubr.msk.f32.gmra.mrb[104].mxu1 %vm838_vm1, %v16969_v20  ;;  %13106 = vmatmul.mubr.msk.f32.gmra.mrb[40].mxu0 %vm838_vm1, %v16972_v25  ;;  %v17011_v20 = vsel %vm547_vm0, %v791_v18, %v792_v47  ;;  %v796_v25 = vrot.slane %v16992_v12, 1  ;;  %21225 = vst [vmem:[#allocation191_spill] sm:$0xff] %v17018_v32  ;;  %21229 = vst [vmem:[#allocation193_spill] sm:$0xff] %v17034_v58  ;;  %v17049_v47 = vld [vmem:[%s15539_s6 + $0x470] sm:$0xff] }
 0x146   : > { %12234 = vmatprep.mubr.msk.f32.mxu1 %vm838_vm1, %v16978_v10  ;;  %13108 = vmatprep.mubr.msk.f32.mxu0 %vm838_vm1, %v16987_v15  ;;  %21223 = vst [vmem:[#allocation189_spill] sm:$0xff] %v17011_v20  ;;  %v2875_v10 = vrot.slane %v21226_v38, 2  ;;  %21230 = vst [vmem:[#allocation194_spill] sm:$0xff] %v17037_v2  ;;  %v21232_v38 = vld [vmem:[#allocation66_spill] sm:$0xff]  ;;  %v21235_v15 = vld [vmem:[#allocation67_spill] sm:$0xff] }
 0x147   : > { %v17043_v18 = vsel %vm547_vm0, %v794_v30, %v796_v25  ;;  %21233 = vst [vmem:[#allocation66_spill] sm:$0xff] %v17049_v47  ;;  %v2879_v0 = vrot.slane %v21235_v15, 2  ;;  %v21236_v12 = vld [vmem:[#allocation68_spill] sm:$0xff]  ;;  %v803_v15 = vrot.slane %v17049_v47, 1 }
 0x148   : > { %21231 = vst [vmem:[#allocation195_spill] sm:$0xff] %v17043_v18  ;;  %v17052_v33 = vsel %vm2761_vm2, %v2873_v54, %v2875_v10  ;;  %v17057_v30 = vld [vmem:[%s15539_s6 + $0x478] sm:$0xff]  ;;  %v17066_v54 = vsel %vm547_vm0, %v796_v25, %v798_v57  ;;  %v17090_v47 = vld [vmem:[%s15539_s6 + $0x490] sm:$0xff] }
 0x149   : > { %12235 = vmatmul.mubr.msk.f32.gmra.mrb[106].mxu1 %vm838_vm1, %v17001_v13  ;;  %13109 = vmatmul.mubr.msk.f32.gmra.mrb[42].mxu0 %vm838_vm1, %v17008_v4  ;;  %v2877_v13 = vrot.slane %v21232_v38, 2  ;;  %v800_v4 = vrot.slane %v17022_v36, 1  ;;  %21234 = vst [vmem:[#allocation196_spill] sm:$0xff] %v17052_v33  ;;  %21237 = vst [vmem:[#allocation67_spill] sm:$0xff] %v17057_v30  ;;  %v21239_v38 = vld [vmem:[#allocation71_spill] sm:$0xff]  ;;  %v21244_v57 = vld [vmem:[#allocation72_spill] sm:$0xff] }
 0x14a   : > { %12237 = vmatprep.mubr.msk.f32.mxu1 %vm838_vm1, %v17011_v20  ;;  %13111 = vmatprep.mubr.msk.f32.mxu0 %vm838_vm1, %v17018_v32  ;;  %v801_v20 = vrot.slane %v17025_v1, 1  ;;  %v2880_v32 = vrot.slane %v21236_v12, 2  ;;  %21238 = vst [vmem:[#allocation68_spill] sm:$0xff] %v17066_v54  ;;  %v2882_v1 = vrot.slane %v21239_v38, 2  ;;  %v17080_v36 = vld [vmem:[%s15539_s6 + $0x480] sm:$0x3] }
 0x14b   : > { %v17073_v12 = vsel %vm2761_vm2, %v2875_v10, %v2877_v13  ;;  %21242 = vst [vmem:[#allocation198_spill] sm:$0xff] %v17080_v36  ;;  %v17087_v38 = vld [vmem:[%s15539_s6 + $0x488] sm:$0xff]  ;;  %21246 = vst [vmem:[#allocation200_spill] sm:$0xff] %v17090_v47  ;;  %v807_v13 = vrot.slane %v17080_v36, 1 }
 0x14c   : > { %21240 = vst [vmem:[#allocation71_spill] sm:$0xff] %v17073_v12  ;;  %v17083_v25 = vsel %vm2761_vm2, %v2879_v0, %v2880_v32  ;;  %21245 = vst [vmem:[#allocation72_spill] sm:$0xff] %v17087_v38  ;;  %v17099_v10 = vsel %vm547_vm0, %v801_v20, %v803_v15  ;;  %v17102_v0 = vsel %vm2761_vm2, %v2880_v32, %v2882_v1 }
 0x14d   : > { %12238 = vmatmul.mubr.msk.f32.gmra.mrb[108].mxu1 %vm838_vm1, %v17034_v58  ;;  %13112 = vmatmul.mubr.msk.f32.gmra.mrb[44].mxu0 %vm838_vm1, %v17037_v2  ;;  %v17076_v58 = vsel %vm547_vm0, %v800_v4, %v801_v20  ;;  %v805_v2 = vrot.slane %v17057_v30, 1  ;;  %21243 = vst [vmem:[#allocation199_spill] sm:$0xff] %v17083_v25  ;;  %21247 = vst [vmem:[#allocation201_spill] sm:$0xff] %v17099_v10  ;;  %v17114_v20 = vld [vmem:[%s15539_s6 + $0x498] sm:$0xff] }
 0x14e   : > { %12240 = vmatprep.mubr.msk.f32.mxu1 %vm838_vm1, %v17043_v18  ;;  %13114 = vmatprep.mubr.msk.f32.mxu0 %vm838_vm1, %v17052_v33  ;;  %21241 = vst [vmem:[#allocation197_spill] sm:$0xff] %v17076_v58  ;;  %v2884_v18 = vrot.slane %v21244_v57, 2  ;;  %21248 = vst [vmem:[#allocation202_spill] sm:$0xff] %v17102_v0  ;;  %v21250_v57 = vld [vmem:[#allocation75_spill] sm:$0xff]  ;;  %v21253_v33 = vld [vmem:[#allocation76_spill] sm:$0xff] }
 0x14f   : > { %v17108_v4 = vsel %vm547_vm0, %v803_v15, %v805_v2  ;;  %21251 = vst [vmem:[#allocation75_spill] sm:$0xff] %v17114_v20  ;;  %v2888_v36 = vrot.slane %v21253_v33, 2  ;;  %v21254_v30 = vld [vmem:[#allocation77_spill] sm:$0xff]  ;;  %v812_v33 = vrot.slane %v17114_v20, 1 }
 0x150   : > { %21249 = vst [vmem:[#allocation203_spill] sm:$0xff] %v17108_v4  ;;  %v17117_v32 = vsel %vm2761_vm2, %v2882_v1, %v2884_v18  ;;  %v17122_v15 = vld [vmem:[%s15539_s6 + $0x4a0] sm:$0xff]  ;;  %v17131_v1 = vsel %vm547_vm0, %v805_v2, %v807_v13  ;;  %v17155_v20 = vld [vmem:[%s15539_s6 + $0x4b8] sm:$0xff] }
 0x151   : > { %12241 = vmatmul.mubr.msk.f32.gmra.mrb[110].mxu1 %vm838_vm1, %v17066_v54  ;;  %13115 = vmatmul.mubr.msk.f32.gmra.mrb[46].mxu0 %vm838_vm1, %v17073_v12  ;;  %v2886_v54 = vrot.slane %v21250_v57, 2  ;;  %v809_v12 = vrot.slane %v17087_v38, 1  ;;  %21252 = vst [vmem:[#allocation204_spill] sm:$0xff] %v17117_v32  ;;  %21255 = vst [vmem:[#allocation76_spill] sm:$0xff] %v17122_v15  ;;  %v21257_v57 = vld [vmem:[#allocation80_spill] sm:$0xff]  ;;  %v21262_v13 = vld [vmem:[#allocation81_spill] sm:$0xff] }
 0x152   : > { %12243 = vmatprep.mubr.msk.f32.mxu1 %vm838_vm1, %v17076_v58  ;;  %13117 = vmatprep.mubr.msk.f32.mxu0 %vm838_vm1, %v17083_v25  ;;  %v810_v58 = vrot.slane %v17090_v47, 1  ;;  %v2889_v25 = vrot.slane %v21254_v30, 2  ;;  %21256 = vst [vmem:[#allocation77_spill] sm:$0xff] %v17131_v1  ;;  %v2891_v47 = vrot.slane %v21257_v57, 2  ;;  %v17145_v38 = vld [vmem:[%s15539_s6 + $0x4a8] sm:$0x3] }
 0x153   : > { %v17138_v30 = vsel %vm2761_vm2, %v2884_v18, %v2886_v54  ;;  %21260 = vst [vmem:[#allocation206_spill] sm:$0xff] %v17145_v38  ;;  %v17152_v57 = vld [vmem:[%s15539_s6 + $0x4b0] sm:$0xff]  ;;  %21264 = vst [vmem:[#allocation208_spill] sm:$0xff] %v17155_v20  ;;  %v816_v54 = vrot.slane %v17145_v38, 1 }
 0x154   : > { %21258 = vst [vmem:[#allocation80_spill] sm:$0xff] %v17138_v30  ;;  %v17148_v2 = vsel %vm2761_vm2, %v2888_v36, %v2889_v25  ;;  %21263 = vst [vmem:[#allocation81_spill] sm:$0xff] %v17152_v57  ;;  %v17164_v18 = vsel %vm547_vm0, %v810_v58, %v812_v33  ;;  %v17167_v36 = vsel %vm2761_vm2, %v2889_v25, %v2891_v47 }
 0x155   : > { %12244 = vmatmul.mubr.msk.f32.gmra.mrb[112].mxu1 %vm838_vm1, %v17099_v10  ;;  %13118 = vmatmul.mubr.msk.f32.gmra.mrb[48].mxu0 %vm838_vm1, %v17102_v0  ;;  %v17141_v10 = vsel %vm547_vm0, %v809_v12, %v810_v58  ;;  %v814_v0 = vrot.slane %v17122_v15, 1  ;;  %21261 = vst [vmem:[#allocation207_spill] sm:$0xff] %v17148_v2  ;;  %21265 = vst [vmem:[#allocation209_spill] sm:$0xff] %v17164_v18  ;;  %v17179_v58 = vld [vmem:[%s15539_s6 + $0x4c0] sm:$0xff] }
 0x156   : > { %12246 = vmatprep.mubr.msk.f32.mxu1 %vm838_vm1, %v17108_v4  ;;  %13120 = vmatprep.mubr.msk.f32.mxu0 %vm838_vm1, %v17117_v32  ;;  %21259 = vst [vmem:[#allocation205_spill] sm:$0xff] %v17141_v10  ;;  %v2893_v4 = vrot.slane %v21262_v13, 2  ;;  %21266 = vst [vmem:[#allocation210_spill] sm:$0xff] %v17167_v36  ;;  %v21268_v13 = vld [vmem:[#allocation84_spill] sm:$0xff]  ;;  %v21271_v32 = vld [vmem:[#allocation85_spill] sm:$0xff] }
 0x157   : > { %v17173_v12 = vsel %vm547_vm0, %v812_v33, %v814_v0  ;;  %21269 = vst [vmem:[#allocation84_spill] sm:$0xff] %v17179_v58  ;;  %v2897_v38 = vrot.slane %v21271_v32, 2  ;;  %v21272_v15 = vld [vmem:[#allocation86_spill] sm:$0xff]  ;;  %v821_v32 = vrot.slane %v17179_v58, 1 }
 0x158   : > { %21267 = vst [vmem:[#allocation211_spill] sm:$0xff] %v17173_v12  ;;  %v17182_v25 = vsel %vm2761_vm2, %v2891_v47, %v2893_v4  ;;  %v17187_v33 = vld [vmem:[%s15539_s6 + $0x4c8] sm:$0xff]  ;;  %v17196_v47 = vsel %vm547_vm0, %v814_v0, %v816_v54  ;;  %v17220_v58 = vld [vmem:[%s15539_s6 + $0x4e0] sm:$0xff] }
 0x159   : > { %12247 = vmatmul.mubr.msk.f32.gmra.mrb[114].mxu1 %vm838_vm1, %v17131_v1  ;;  %13121 = vmatmul.mubr.msk.f32.gmra.mrb[50].mxu0 %vm838_vm1, %v17138_v30  ;;  %v2895_v1 = vrot.slane %v21268_v13, 2  ;;  %v818_v30 = vrot.slane %v17152_v57, 1  ;;  %21270 = vst [vmem:[#allocation212_spill] sm:$0xff] %v17182_v25  ;;  %21273 = vst [vmem:[#allocation85_spill] sm:$0xff] %v17187_v33  ;;  %v21275_v13 = vld [vmem:[#allocation89_spill] sm:$0xff]  ;;  %v21280_v54 = vld [vmem:[#allocation90_spill] sm:$0xff] }
 0x15a   : > { %12249 = vmatprep.mubr.msk.f32.mxu1 %vm838_vm1, %v17141_v10  ;;  %13123 = vmatprep.mubr.msk.f32.mxu0 %vm838_vm1, %v17148_v2  ;;  %v819_v10 = vrot.slane %v17155_v20, 1  ;;  %v2898_v2 = vrot.slane %v21272_v15, 2  ;;  %21274 = vst [vmem:[#allocation86_spill] sm:$0xff] %v17196_v47  ;;  %v2900_v20 = vrot.slane %v21275_v13, 2  ;;  %v17210_v57 = vld [vmem:[%s15539_s6 + $0x4d0] sm:$0x3] }
 0x15b   : > { %v17203_v15 = vsel %vm2761_vm2, %v2893_v4, %v2895_v1  ;;  %21278 = vst [vmem:[#allocation214_spill] sm:$0xff] %v17210_v57  ;;  %v17217_v13 = vld [vmem:[%s15539_s6 + $0x4d8] sm:$0xff]  ;;  %21282 = vst [vmem:[#allocation216_spill] sm:$0xff] %v17220_v58  ;;  %v825_v1 = vrot.slane %v17210_v57, 1 }
 0x15c   : > { %21276 = vst [vmem:[#allocation89_spill] sm:$0xff] %v17203_v15  ;;  %v17213_v0 = vsel %vm2761_vm2, %v2897_v38, %v2898_v2  ;;  %21281 = vst [vmem:[#allocation90_spill] sm:$0xff] %v17217_v13  ;;  %v17229_v4 = vsel %vm547_vm0, %v819_v10, %v821_v32  ;;  %v17232_v38 = vsel %vm2761_vm2, %v2898_v2, %v2900_v20  ;;  %v21289_v57 = vld [vmem:[#allocation94_spill] sm:$0xff] }
 0x15d   : > { %12250 = vmatmul.mubr.msk.f32.gmra.mrb[116].mxu1 %vm838_vm1, %v17164_v18  ;;  %13124 = vmatmul.mubr.msk.f32.gmra.mrb[52].mxu0 %vm838_vm1, %v17167_v36  ;;  %v17206_v18 = vsel %vm547_vm0, %v818_v30, %v819_v10  ;;  %v823_v36 = vrot.slane %v17187_v33, 1  ;;  %21279 = vst [vmem:[#allocation215_spill] sm:$0xff] %v17213_v0  ;;  %21283 = vst [vmem:[#allocation217_spill] sm:$0xff] %v17229_v4  ;;  %v17244_v10 = vld [vmem:[%s15539_s6 + $0x4e8] sm:$0xff]  ;;  %v2907_v33 = vrot.slane %v21289_v57, 2 }
 0x15e   : > { %12252 = vmatprep.mubr.msk.f32.mxu1 %vm838_vm1, %v17173_v12  ;;  %13126 = vmatprep.mubr.msk.f32.mxu0 %vm838_vm1, %v17182_v25  ;;  %21277 = vst [vmem:[#allocation213_spill] sm:$0xff] %v17206_v18  ;;  %v2902_v12 = vrot.slane %v21280_v54, 2  ;;  %21284 = vst [vmem:[#allocation218_spill] sm:$0xff] %v17232_v38  ;;  %v2904_v54 = vrot.slane %v16229_v31, 2 }
 0x15f   : > { %v17238_v30 = vsel %vm547_vm0, %v821_v32, %v823_v36  ;;  %21286 = vst [vmem:[#allocation220_spill] sm:$0xff] %v17244_v10  ;;  %v17261_v31 = vsel %vm547_vm0, %v823_v36, %v825_v1  ;;  %v2911_v1 = vrot.slane %v16260_v35, 2 }
 0x160   : > { %21285 = vst [vmem:[#allocation219_spill] sm:$0xff] %v17238_v30  ;;  %v17247_v2 = vsel %vm2761_vm2, %v2900_v20, %v2902_v12  ;;  %21291 = vst [vmem:[#allocation94_spill] sm:$0xff] %v17261_v31  ;;  %v830_v20 = vrot.slane %v17244_v10, 1  ;;  %v17267_v57 = vsel %vm2761_vm2, %v2902_v12, %v2904_v54 }
 0x161   : > { %12253 = vmatmul.mubr.msk.f32.gmra.mrb[118].mxu1 %vm838_vm1, %v17196_v47  ;;  %13127 = vmatmul.mubr.msk.f32.gmra.mrb[54].mxu0 %vm838_vm1, %v17203_v15  ;;  %v827_v47 = vrot.slane %v17217_v13, 1  ;;  %21287 = vst [vmem:[#allocation221_spill] sm:$0xff] %v17247_v2  ;;  %v21288_v15 = vld [vmem:[#allocation93_spill] sm:$0xff]  ;;  %21292 = vst [vmem:[#allocation222_spill] sm:$0xff] %v17267_v57 }
 0x162   : > { %12255 = vmatprep.mubr.msk.f32.mxu1 %vm838_vm1, %v17206_v18  ;;  %13129 = vmatprep.mubr.msk.f32.mxu0 %vm838_vm1, %v17213_v0  ;;  %v828_v18 = vrot.slane %v17220_v58, 1  ;;  %v2906_v25 = vrot.slane %v21288_v15, 2  ;;  %v17252_v0 = vld [vmem:[%s15539_s6 + $0x4f0] sm:$0xff]  ;;  %v2909_v15 = vrot.slane %v16255_v46, 2 }
 0x163   : > { %21290 = vst [vmem:[#allocation93_spill] sm:$0xff] %v17252_v0 }
 0x164   : > { %v17270_v32 = vsel %vm547_vm0, %v827_v47, %v828_v18  ;;  %v17278_v36 = vsel %vm2761_vm2, %v2906_v25, %v2907_v33  ;;  %v17288_v46 = vsel %vm547_vm0, %v828_v18, %v830_v20  ;;  %v17294_v25 = vsel %vm2761_vm2, %v2907_v33, %v2909_v15 }
 0x165   : > { %12256 = vmatmul.mubr.msk.f32.gmra.mrb[120].mxu1 %vm838_vm1, %v17229_v4  ;;  %13130 = vmatmul.mubr.msk.f32.gmra.mrb[56].mxu0 %vm838_vm1, %v17232_v38  ;;  %21293 = vst [vmem:[#allocation223_spill] sm:$0xff] %v17270_v32  ;;  %v832_v4 = vrot.slane %v17252_v0, 1  ;;  %v17275_v38 = vld [vmem:[%s15539_s6 + $0x4f8] sm:$0x3]  ;;  %21294 = vst [vmem:[#allocation224_spill] sm:$0xff] %v17278_v36  ;;  %v2913_v47 = vrot.slane %v16277_v3, 2  ;;  %v17301_v54 = vsel %vm2761_vm2, %v2909_v15, %v2911_v1 }
 0x166   : > { %12258 = vmatprep.mubr.msk.f32.mxu1 %vm838_vm1, %v17238_v30  ;;  %13132 = vmatprep.mubr.msk.f32.mxu0 %vm838_vm1, %v17247_v2  ;;  %21295 = vst [vmem:[#allocation225_spill] sm:$0xff] %v17288_v46  ;;  %v834_v12 = vrot.slane %v17275_v38, 1  ;;  %21296 = vst [vmem:[#allocation226_spill] sm:$0xff] %v17294_v25  ;;  %v2915_v18 = vrot.slane %v16313_v61, 2  ;;  %v17339_v15 = vld [vmem:[#allocation5 + $0x38] sm:$0xff]  ;;  %v17472_v30 = vld [vmem:[%s15539_s6 + $0x80] sm:$0xff] }
 0x167   : > { %v17297_v35 = vsel %vm547_vm0, %v830_v20, %v832_v4  ;;  %21298 = vst [vmem:[#allocation228_spill] sm:$0xff] %v17301_v54  ;;  %v17317_v3 = vsel %vm2761_vm2, %v2911_v1, %v2913_v47  ;;  %v2920_v20 = vrot.slane %v16344_v8, 2  ;;  %v2922_v8 = vrot.slane %v16365_v16, 2  ;;  %13431 = vmatprep.subr.mxu0 %v17339_v15  ;;  %v17356_v16 = vld [vmem:[%s15539_s6 + $0x10] sm:$0xff] }
 0x168   : > { %21297 = vst [vmem:[#allocation227_spill] sm:$0xff] %v17297_v35  ;;  %v17312_v33 = vsel %vm547_vm0, %v832_v4, %v834_v12  ;;  %21300 = vst [vmem:[#allocation230_spill] sm:$0xff] %v17317_v3  ;;  %v17329_v4 = vld [vmem:[%s15539_s6] sm:$0xff]  ;;  %v2924_v12 = vrot.slane %v16372_v14, 2  ;;  %v2925_v47 = vrot.slane %v16375_v11, 2  ;;  %v2927_v14 = vrot.slane %v16399_v44, 2 }
 0x169   : > { %12259 = vmatmul.mubr.msk.f32.gmra.mrb[122].mxu1 %vm838_vm1, %v17261_v31  ;;  %13133 = vmatmul.mubr.msk.f32.gmra.mrb[58].mxu0 %vm838_vm1, %v17267_v57  ;;  %21299 = vst [vmem:[#allocation229_spill] sm:$0xff] %v17312_v33  ;;  %21302 = vst [vmem:[#allocation232_spill] sm:$0xff] %v17329_v4  ;;  %v17363_v11 = vsel %vm2761_vm2, %v2920_v20, %v2922_v8  ;;  %v2933_v8 = vrot.slane %v16437_v40, 2  ;;  %v2936_v40 = vrot.slane %v16464_v27, 2  ;;  %v17456_v31 = vld [vmem:[%s15539_s6 + $0x78] sm:$0xff]  ;;  %v17854_v2 = vld [vmem:[%s15539_s6 + $0x1d0] sm:$0xff] }
 0x16a   : > { %12261 = vmatprep.mubr.msk.f32.mxu1 %vm838_vm1, %v17270_v32  ;;  %13135 = vmatprep.mubr.msk.f32.mxu0 %vm838_vm1, %v17278_v36  ;;  %v2916_v32 = vrot.slane %v16316_v21, 2  ;;  %v2918_v21 = vrot.slane %v16335_v39, 2  ;;  %21308 = vst [vmem:[#allocation236_spill] sm:$0xff] %v17363_v11  ;;  %v17382_v44 = vsel %vm2761_vm2, %v2925_v47, %v2927_v14  ;;  %v21378_v57 = vld [vmem:[#allocation76_spill] sm:$0xff] }
 0x16b   : > { %21311 = vst [vmem:[#allocation239_spill] sm:$0xff] %v17382_v44 }
 0x16c   : > { %v17321_v61 = vsel %vm2761_vm2, %v2915_v18, %v2916_v32  ;;  %v17336_v39 = vsel %vm2761_vm2, %v2916_v32, %v2918_v21  ;;  %v17342_v1 = vsel %vm2761_vm2, %v2918_v21, %v2920_v20  ;;  %v17348_v18 = vld [vmem:[%s15539_s6 + $0x8] sm:$0xff]  ;;  %v17367_v21 = vsel %vm2761_vm2, %v2924_v12, %v2925_v47  ;;  %v14926_v47 = vld [vmem:[%s15539_s6 + $0x40] sm:$0xff] }
 0x16d   : > { %12262 = vmatmul.mubr.msk.f32.gmra.mrb[124].mxu1 %vm838_vm1, %v17288_v46  ;;  %13136 = vmatmul.mubr.msk.f32.gmra.mrb[60].mxu0 %vm838_vm1, %v17294_v25  ;;  %21301 = vst [vmem:[#allocation231_spill] sm:$0xff] %v17321_v61  ;;  %21303 = vst [vmem:[#allocation233_spill] sm:$0xff] %v17336_v39  ;;  %v21306_v32 = vld [vmem:[#allocation103_spill] sm:$0xff]  ;;  %v2934_v12 = vrot.slane %v16440_v62, 2 }
 0x16e   : > { %12264 = vmatprep.mubr.msk.f32.mxu1 %vm838_vm1, %v17297_v35  ;;  %13138 = vmatprep.mubr.msk.f32.mxu0 %vm838_vm1, %v17301_v54  ;;  %21304 = vst [vmem:[#allocation234_spill] sm:$0xff] %v17342_v1  ;;  %21305 = vst [vmem:[#allocation235_spill] sm:$0xff] %v17348_v18  ;;  %v14923_v35 = vld [vmem:[%s15539_s6 + $0x28] sm:$0xff]  ;;  %v14924_v46 = vld [vmem:[%s15539_s6 + $0x30] sm:$0xff] }
 0x16f   : > { %21307 = vst [vmem:[#allocation103_spill] sm:$0xff] %v17356_v16  ;;  %21309 = vst [vmem:[#allocation237_spill] sm:$0xff] %v17367_v21  ;;  %v17403_v62 = vsel %vm2761_vm2, %v2933_v8, %v2934_v12  ;;  %v17418_v27 = vsel %vm2761_vm2, %v2934_v12, %v2936_v40  ;;  %v2943_v8 = vrot.slane %v16505_v53, 2  ;;  %v17434_v12 = vld [vmem:[%s15539_s6 + $0x60] sm:$0xff]  ;;  %v2945_v53 = vrot.slane %v16529_v6, 2 }
 0x170   : > { %21314 = vst [vmem:[#allocation242_spill] sm:$0xff] %v17403_v62  ;;  %21315 = vst [vmem:[#allocation243_spill] sm:$0xff] %v17418_v27  ;;  %v17832_v25 = vld [vmem:[%s15539_s6 + $0x1c0] sm:$0xff] }
 0x171   : > { %12265 = vmatmul.mubr.msk.f32.gmra.mrb[126].mxu1 %vm838_vm1, %v17312_v33  ;;  %13139 = vmatmul.mubr.msk.f32.gmra.mrb[62].mxu0 %vm838_vm1, %v17317_v3  ;;  %v17371_v33 = vld [vmem:[%s15539_s6 + $0x18] sm:$0xff]  ;;  %v17463_v6 = vsel %vm2761_vm2, %v2943_v8, %v2945_v53 }
 0x172   : > { %12269 = vmatprep.mubr.msk.f32.mxu1 %vm838_vm1, %v17329_v4  ;;  %13141 = vmatprep.mubr.msk.f32.mxu0 %vm838_vm1, %v17321_v61  ;;  %21310 = vst [vmem:[#allocation238_spill] sm:$0xff] %v17371_v33  ;;  %21319 = vst [vmem:[#allocation247_spill] sm:$0xff] %v17463_v6  ;;  %v21373_v61 = vld [vmem:[#allocation72_spill] sm:$0xff] }
 0x173   : > { %v21374_v3 = vld [vmem:[#allocation200_spill] sm:$0xff] }
 0x174   : > { %v3024_v54 = vrot.slane %v21374_v3, 2  ;;  %v17922_v3 = vld [vmem:[%s15539_s6 + $0x210] sm:$0xff] }
 0x175   : > { %12270 = vmatmul.mubr.msk.f32.vlgmr.msra.gmra.mrb[0].mxu1 %vm838_vm1, %v17348_v18  ;;  %13142 = vmatmul.mubr.msk.f32.gmra.mrb[64].mxu0 %vm838_vm1, %v17336_v39  ;;  %v17809_v39 = vld [vmem:[%s15539_s6 + $0x1a8] sm:$0xff] }
 0x176   : > { %12462 = vmatpush3.msra.mxu1 %v21306_v32  ;;  %12272 = vmatprep.mubr.msk.f32.mxu1 %vm838_vm1, %v17356_v16  ;;  %v2929_v32 = vrot.slane %v16407_v51, 2  ;;  %v2931_v51 = vrot.slane %v16430_v22, 2  ;;  %v21382_v16 = vld [vmem:[#allocation81_spill] sm:$0xff]  ;;  %v21383_v18 = vld [vmem:[#allocation208_spill] sm:$0xff] }
 0x177   : > { %13144 = vmatprep.mubr.msk.f32.mxu0 %vm838_vm1, %v17342_v1  ;;  %v17787_v1 = vld [vmem:[%s15539_s6 + $0x198] sm:$0xff]  ;;  %v3033_v4 = vrot.slane %v21383_v18, 2 }
 0x178   : > { %v17386_v20 = vsel %vm2761_vm2, %v2927_v14, %v2929_v32  ;;  %v17399_v22 = vsel %vm2761_vm2, %v2929_v32, %v2931_v51  ;;  %v17411_v14 = vld [vmem:[%s15539_s6 + $0x50] sm:$0xff]  ;;  %v2942_v51 = vrot.slane %v16502_v63, 2 }
 0x179   : > { %12273 = vmatmul.mubr.msk.f32.gmra.mrb[2].mxu1 %vm838_vm1, %v17371_v33  ;;  %13145 = vmatmul.mubr.msk.f32.gmra.mrb[66].mxu0 %vm838_vm1, %v17363_v11  ;;  %21312 = vst [vmem:[#allocation240_spill] sm:$0xff] %v17386_v20  ;;  %21313 = vst [vmem:[#allocation241_spill] sm:$0xff] %v17399_v22 }
 0x17a   : > { %12275 = vmatprep.mubr.msk.f32.mxu1 %vm838_vm1, %v14923_v35  ;;  %13147 = vmatprep.mubr.msk.f32.mxu0 %vm838_vm1, %v17367_v21  ;;  %v14925_v35 = vld [vmem:[%s15539_s6 + $0x38] sm:$0xff]  ;;  %v17445_v63 = vsel %vm2761_vm2, %v2942_v51, %v2943_v8  ;;  %v2952_v51 = vrot.slane %v16570_v48, 2  ;;  %v17479_v8 = vld [vmem:[%s15539_s6 + $0x88] sm:$0xff] }
 0x17b   : > { %21318 = vst [vmem:[#allocation246_spill] sm:$0xff] %v17445_v63  ;;  %v21365_v21 = vld [vmem:[#allocation192_spill] sm:$0xff] }
 0x17c   : > { %v3015_v11 = vrot.slane %v21365_v21, 2  ;;  %v21367_v21 = vld [vmem:[#allocation66_spill] sm:$0xff] }
 0x17d   : > { %12276 = vmatmul.mubr.msk.f32.gmra.mrb[4].mxu1 %vm838_vm1, %v14924_v46  ;;  %13148 = vmatmul.mubr.msk.f32.gmra.mrb[68].mxu0 %vm838_vm1, %v17382_v44  ;;  %v2938_v46 = vrot.slane %v16472_v60, 2  ;;  %v2940_v60 = vrot.slane %v16495_v43, 2  ;;  %v17764_v44 = vld [vmem:[%s15539_s6 + $0x180] sm:$0xff] }
 0x17e   : > { %12278 = vmatprep.mubr.msk.f32.mxu1 %vm838_vm1, %v14925_v35  ;;  %13150 = vmatprep.mubr.msk.f32.mxu0 %vm838_vm1, %v17386_v20  ;;  %v17427_v35 = vld [vmem:[%s15539_s6 + $0x58] sm:$0xff]  ;;  %v17742_v20 = vld [vmem:[%s15539_s6 + $0x170] sm:$0xff] }
 0x17f   : > { %v17422_v32 = vsel %vm2761_vm2, %v2936_v40, %v2938_v46  ;;  %v17441_v43 = vsel %vm2761_vm2, %v2938_v46, %v2940_v60  ;;  %v2947_v40 = vrot.slane %v16537_v56, 2  ;;  %v2949_v56 = vrot.slane %v16560_v26, 2 }
 0x180   : > { %21316 = vst [vmem:[#allocation244_spill] sm:$0xff] %v17422_v32  ;;  %21317 = vst [vmem:[#allocation245_spill] sm:$0xff] %v17441_v43  ;;  %v2951_v60 = vrot.slane %v16567_v41, 2  ;;  %v2954_v41 = vrot.slane %v16594_v49, 2 }
 0x181   : > { %12279 = vmatmul.mubr.msk.f32.gmra.mrb[6].mxu1 %vm838_vm1, %v14926_v47  ;;  %13151 = vmatmul.mubr.msk.f32.gmra.mrb[70].mxu0 %vm838_vm1, %v17399_v22  ;;  %v17449_v47 = vld [vmem:[%s15539_s6 + $0x68] sm:$0xff]  ;;  %v17467_v46 = vsel %vm2761_vm2, %v2945_v53, %v2947_v40  ;;  %v17486_v26 = vsel %vm2761_vm2, %v2947_v40, %v2949_v56  ;;  %v2956_v53 = vrot.slane %v16602_v24, 2  ;;  %v2958_v24 = vrot.slane %v16625_v9, 2 }
 0x182   : > { %12281 = vmatprep.mubr.msk.f32.mxu1 %vm838_vm1, %v17411_v14  ;;  %13153 = vmatprep.mubr.msk.f32.mxu0 %vm838_vm1, %v17403_v62  ;;  %21320 = vst [vmem:[#allocation248_spill] sm:$0xff] %v17467_v46  ;;  %21321 = vst [vmem:[#allocation249_spill] sm:$0xff] %v17486_v26  ;;  %v17490_v48 = vsel %vm2761_vm2, %v2951_v60, %v2952_v51  ;;  %v17508_v49 = vsel %vm2761_vm2, %v2952_v51, %v2954_v41  ;;  %v2960_v56 = vrot.slane %v16632_v37, 2  ;;  %v17524_v51 = vld [vmem:[%s15539_s6 + $0xb0] sm:$0xff] }
 0x183   : > { %21322 = vst [vmem:[#allocation250_spill] sm:$0xff] %v17490_v48  ;;  %21323 = vst [vmem:[#allocation251_spill] sm:$0xff] %v17508_v49  ;;  %v17512_v40 = vsel %vm2761_vm2, %v2954_v41, %v2956_v53  ;;  %v2961_v60 = vrot.slane %v16635_v19, 2  ;;  %v17531_v9 = vsel %vm2761_vm2, %v2956_v53, %v2958_v24  ;;  %v2963_v19 = vrot.slane %v16659_v42, 2  ;;  %v21356_v62 = vld [vmem:[#allocation184_spill] sm:$0xff] }
 0x184   : > { %21324 = vst [vmem:[#allocation252_spill] sm:$0xff] %v17512_v40  ;;  %21325 = vst [vmem:[#allocation253_spill] sm:$0xff] %v17531_v9  ;;  %v2965_v41 = vrot.slane %v16667_v28, 2  ;;  %v2967_v28 = vrot.slane %v16690_v5, 2  ;;  %v2969_v24 = vrot.slane %v16697_v55, 2  ;;  %v2972_v55 = vrot.slane %v16724_v17, 2 }
 0x185   : > { %12282 = vmatmul.mubr.msk.f32.gmra.mrb[8].mxu1 %vm838_vm1, %v17427_v35  ;;  %13154 = vmatmul.mubr.msk.f32.gmra.mrb[72].mxu0 %vm838_vm1, %v17418_v27  ;;  %v17535_v37 = vsel %vm2761_vm2, %v2960_v56, %v2961_v60  ;;  %v17553_v42 = vsel %vm2761_vm2, %v2961_v60, %v2963_v19  ;;  %v2970_v56 = vrot.slane %v16700_v34, 2  ;;  %v17569_v60 = vld [vmem:[%s15539_s6 + $0xd8] sm:$0xff]  ;;  %v3006_v22 = vrot.slane %v21356_v62, 2 }
 0x186   : > { %12284 = vmatprep.mubr.msk.f32.mxu1 %vm838_vm1, %v17434_v12  ;;  %13156 = vmatprep.mubr.msk.f32.mxu0 %vm838_vm1, %v17422_v32  ;;  %21326 = vst [vmem:[#allocation254_spill] sm:$0xff] %v17535_v37  ;;  %21327 = vst [vmem:[#allocation255_spill] sm:$0xff] %v17553_v42  ;;  %v17557_v53 = vsel %vm2761_vm2, %v2963_v19, %v2965_v41  ;;  %v17576_v5 = vsel %vm2761_vm2, %v2965_v41, %v2967_v28  ;;  %v2974_v19 = vrot.slane %v16732_v50, 2  ;;  %v17697_v32 = vld [vmem:[%s15539_s6 + $0x148] sm:$0xff]  ;;  %v17719_v27 = vld [vmem:[%s15539_s6 + $0x158] sm:$0xff] }
 0x187   : > { %21328 = vst [vmem:[#allocation256_spill] sm:$0xff] %v17557_v53  ;;  %21329 = vst [vmem:[#allocation257_spill] sm:$0xff] %v17576_v5  ;;  %v17580_v34 = vsel %vm2761_vm2, %v2969_v24, %v2970_v56  ;;  %v17598_v17 = vsel %vm2761_vm2, %v2970_v56, %v2972_v55  ;;  %v2976_v50 = vrot.slane %v16755_v59, 2  ;;  %v2978_v28 = vrot.slane %v16762_v23, 2  ;;  %v17614_v56 = vld [vmem:[%s15539_s6 + $0x100] sm:$0xff] }
 0x188   : > { %21330 = vst [vmem:[#allocation258_spill] sm:$0xff] %v17580_v34  ;;  %21331 = vst [vmem:[#allocation259_spill] sm:$0xff] %v17598_v17  ;;  %v17602_v41 = vsel %vm2761_vm2, %v2972_v55, %v2974_v19  ;;  %v2979_v24 = vrot.slane %v16765_v29, 2  ;;  %v2981_v29 = vrot.slane %v16789_v7, 2  ;;  %v2983_v55 = vrot.slane %v16797_v45, 2  ;;  %v21358_v62 = vld [vmem:[#allocation57_spill] sm:$0xff] }
 0x189   : > { %12285 = vmatmul.mubr.msk.f32.gmra.mrb[10].mxu1 %vm838_vm1, %v17449_v47  ;;  %13157 = vmatmul.mubr.msk.f32.gmra.mrb[74].mxu0 %vm838_vm1, %v17441_v43  ;;  %21332 = vst [vmem:[#allocation260_spill] sm:$0xff] %v17602_v41  ;;  %v17621_v59 = vsel %vm2761_vm2, %v2974_v19, %v2976_v50  ;;  %v2985_v45 = vrot.slane %v16820_v52, 2  ;;  %v21337_v50 = vld [vmem:[#allocation165_spill] sm:$0xff] }
 0x18a   : > { %12287 = vmatprep.mubr.msk.f32.mxu1 %vm838_vm1, %v17456_v31  ;;  %13159 = vmatprep.mubr.msk.f32.mxu0 %vm838_vm1, %v17445_v63  ;;  %21333 = vst [vmem:[#allocation261_spill] sm:$0xff] %v17621_v59  ;;  %v17625_v23 = vsel %vm2761_vm2, %v2978_v28, %v2979_v24  ;;  %v17643_v7 = vsel %vm2761_vm2, %v2979_v24, %v2981_v29  ;;  %v2987_v28 = vrot.slane %v21337_v50, 2  ;;  %v17659_v24 = vld [vmem:[%s15539_s6 + $0x128] sm:$0xff] }
 0x18b   : > { %21334 = vst [vmem:[#allocation262_spill] sm:$0xff] %v17625_v23  ;;  %21335 = vst [vmem:[#allocation263_spill] sm:$0xff] %v17643_v7  ;;  %v17647_v19 = vsel %vm2761_vm2, %v2981_v29, %v2983_v55  ;;  %v17666_v52 = vsel %vm2761_vm2, %v2983_v55, %v2985_v45  ;;  %v21347_v63 = vld [vmem:[#allocation176_spill] sm:$0xff] }
 0x18c   : > { %21336 = vst [vmem:[#allocation264_spill] sm:$0xff] %v17647_v19  ;;  %21339 = vst [vmem:[#allocation165_spill] sm:$0xff] %v17666_v52  ;;  %v2997_v43 = vrot.slane %v21347_v63, 2  ;;  %v21349_v63 = vld [vmem:[#allocation48_spill] sm:$0xff] }
 0x18d   : > { %12288 = vmatmul.mubr.msk.f32.gmra.mrb[12].mxu1 %vm838_vm1, %v17472_v30  ;;  %13160 = vmatmul.mubr.msk.f32.gmra.mrb[76].mxu0 %vm838_vm1, %v17463_v6  ;;  %v17494_v6 = vld [vmem:[%s15539_s6 + $0x90] sm:$0xff] }
 0x18e   : > { %12290 = vmatprep.mubr.msk.f32.mxu1 %vm838_vm1, %v17479_v8  ;;  %13162 = vmatprep.mubr.msk.f32.mxu0 %vm838_vm1, %v17467_v46  ;;  %v17501_v46 = vld [vmem:[%s15539_s6 + $0xa0] sm:$0xff] }
 0x191   : > { %12291 = vmatmul.mubr.msk.f32.gmra.mrb[14].mxu1 %vm838_vm1, %v17494_v6  ;;  %13163 = vmatmul.mubr.msk.f32.gmra.mrb[78].mxu0 %vm838_vm1, %v17486_v26  ;;  %v17517_v26 = vld [vmem:[%s15539_s6 + $0xa8] sm:$0xff] }
 0x192   : > { %12293 = vmatprep.mubr.msk.f32.mxu1 %vm838_vm1, %v17501_v46  ;;  %13165 = vmatprep.mubr.msk.f32.mxu0 %vm838_vm1, %v17490_v48  ;;  %v17674_v48 = vld [vmem:[%s15539_s6 + $0x130] sm:$0xff] }
 0x195   : > { %12294 = vmatmul.mubr.msk.f32.gmra.mrb[16].mxu1 %vm838_vm1, %v17517_v26  ;;  %13166 = vmatmul.mubr.msk.f32.gmra.mrb[80].mxu0 %vm838_vm1, %v17508_v49  ;;  %v17539_v49 = vld [vmem:[%s15539_s6 + $0xb8] sm:$0xff] }
 0x196   : > { %12296 = vmatprep.mubr.msk.f32.mxu1 %vm838_vm1, %v17524_v51  ;;  %13168 = vmatprep.mubr.msk.f32.mxu0 %vm838_vm1, %v17512_v40  ;;  %v17546_v40 = vld [vmem:[%s15539_s6 + $0xc8] sm:$0xff] }
 0x199   : > { %12297 = vmatmul.mubr.msk.f32.gmra.mrb[18].mxu1 %vm838_vm1, %v17539_v49  ;;  %13169 = vmatmul.mubr.msk.f32.gmra.mrb[82].mxu0 %vm838_vm1, %v17531_v9  ;;  %v17562_v9 = vld [vmem:[%s15539_s6 + $0xd0] sm:$0xff] }
 0x19a   : > { %12299 = vmatprep.mubr.msk.f32.mxu1 %vm838_vm1, %v17546_v40  ;;  %13171 = vmatprep.mubr.msk.f32.mxu0 %vm838_vm1, %v17535_v37  ;;  %v17652_v37 = vld [vmem:[%s15539_s6 + $0x120] sm:$0xff] }
 0x19d   : > { %12300 = vmatmul.mubr.msk.f32.gmra.mrb[20].mxu1 %vm838_vm1, %v17562_v9  ;;  %13172 = vmatmul.mubr.msk.f32.gmra.mrb[84].mxu0 %vm838_vm1, %v17553_v42  ;;  %v17584_v42 = vld [vmem:[%s15539_s6 + $0xe0] sm:$0xff] }
 0x19e   : > { %12302 = vmatprep.mubr.msk.f32.mxu1 %vm838_vm1, %v17569_v60  ;;  %13174 = vmatprep.mubr.msk.f32.mxu0 %vm838_vm1, %v17557_v53  ;;  %v17591_v53 = vld [vmem:[%s15539_s6 + $0xf0] sm:$0xff] }
 0x1a1   : > { %12303 = vmatmul.mubr.msk.f32.gmra.mrb[22].mxu1 %vm838_vm1, %v17584_v42  ;;  %13175 = vmatmul.mubr.msk.f32.gmra.mrb[86].mxu0 %vm838_vm1, %v17576_v5  ;;  %v17607_v5 = vld [vmem:[%s15539_s6 + $0xf8] sm:$0xff] }
 0x1a2   : > { %12305 = vmatprep.mubr.msk.f32.mxu1 %vm838_vm1, %v17591_v53  ;;  %13177 = vmatprep.mubr.msk.f32.mxu0 %vm838_vm1, %v17580_v34 }
 0x1a5   : > { %12306 = vmatmul.mubr.msk.f32.gmra.mrb[24].mxu1 %vm838_vm1, %v17607_v5  ;;  %13178 = vmatmul.mubr.msk.f32.gmra.mrb[88].mxu0 %vm838_vm1, %v17598_v17  ;;  %v17629_v17 = vld [vmem:[%s15539_s6 + $0x108] sm:$0xff] }
 0x1a6   : > { %12308 = vmatprep.mubr.msk.f32.mxu1 %vm838_vm1, %v17614_v56  ;;  %13180 = vmatprep.mubr.msk.f32.mxu0 %vm838_vm1, %v17602_v41  ;;  %v17636_v41 = vld [vmem:[%s15539_s6 + $0x118] sm:$0xff] }
 0x1a9   : > { %12309 = vmatmul.mubr.msk.f32.gmra.mrb[26].mxu1 %vm838_vm1, %v17629_v17  ;;  %13181 = vmatmul.mubr.msk.f32.gmra.mrb[90].mxu0 %vm838_vm1, %v17621_v59  ;;  %v21338_v59 = vld [vmem:[#allocation166_spill] sm:$0xff] }
 0x1aa   : > { %12311 = vmatprep.mubr.msk.f32.mxu1 %vm838_vm1, %v17636_v41  ;;  %13183 = vmatprep.mubr.msk.f32.mxu0 %vm838_vm1, %v17625_v23  ;;  %v2988_v34 = vrot.slane %v21338_v59, 2  ;;  %v21340_v59 = vld [vmem:[#allocation170_spill] sm:$0xff]  ;;  %v21342_v23 = vld [vmem:[#allocation41_spill] sm:$0xff] }
 0x1ab   : > { %v2990_v29 = vrot.slane %v21340_v59, 2  ;;  %v21346_v59 = vld [vmem:[#allocation45_spill] sm:$0xff] }
 0x1ac   : > { %v17670_v50 = vsel %vm2761_vm2, %v2987_v28, %v2988_v34 }
 0x1ad   : > { %12312 = vmatmul.mubr.msk.f32.gmra.mrb[28].mxu1 %vm838_vm1, %v17652_v37  ;;  %13184 = vmatmul.mubr.msk.f32.gmra.mrb[92].mxu0 %vm838_vm1, %v17643_v7  ;;  %21341 = vst [vmem:[#allocation166_spill] sm:$0xff] %v17670_v50  ;;  %v2992_v7 = vrot.slane %v21342_v23, 2  ;;  %v17688_v55 = vsel %vm2761_vm2, %v2988_v34, %v2990_v29  ;;  %v21344_v23 = vld [vmem:[#allocation174_spill] sm:$0xff] }
 0x1ae   : > { %12314 = vmatprep.mubr.msk.f32.mxu1 %vm838_vm1, %v17659_v24  ;;  %13186 = vmatprep.mubr.msk.f32.mxu0 %vm838_vm1, %v17647_v19  ;;  %v17681_v19 = vld [vmem:[%s15539_s6 + $0x140] sm:$0xff]  ;;  %21343 = vst [vmem:[#allocation170_spill] sm:$0xff] %v17688_v55  ;;  %v2994_v45 = vrot.slane %v21344_v23, 2  ;;  %v17704_v34 = vld [vmem:[%s15539_s6 + $0x150] sm:$0xff]  ;;  %v2999_v23 = vrot.slane %v21349_v63, 2 }
 0x1af   : > { %v17692_v28 = vsel %vm2761_vm2, %v2990_v29, %v2992_v7  ;;  %v21355_v63 = vld [vmem:[#allocation54_spill] sm:$0xff] }
 0x1b0   : > { %21345 = vst [vmem:[#allocation41_spill] sm:$0xff] %v17692_v28  ;;  %v17711_v29 = vsel %vm2761_vm2, %v2992_v7, %v2994_v45  ;;  %v17733_v7 = vsel %vm2761_vm2, %v2997_v43, %v2999_v23 }
 0x1b1   : > { %12315 = vmatmul.mubr.msk.f32.gmra.mrb[30].mxu1 %vm838_vm1, %v17674_v48  ;;  %13187 = vmatmul.mubr.msk.f32.gmra.mrb[94].mxu0 %vm838_vm1, %v17666_v52  ;;  %v2996_v52 = vrot.slane %v21346_v59, 2  ;;  %21348 = vst [vmem:[#allocation174_spill] sm:$0xff] %v17711_v29  ;;  %21352 = vst [vmem:[#allocation176_spill] sm:$0xff] %v17733_v7 }
 0x1b2   : > { %12317 = vmatprep.mubr.msk.f32.mxu1 %vm838_vm1, %v17681_v19  ;;  %13189 = vmatprep.mubr.msk.f32.mxu0 %vm838_vm1, %v17670_v50  ;;  %v21351_v50 = vld [vmem:[#allocation49_spill] sm:$0xff] }
 0x1b3   : > { %v17715_v59 = vsel %vm2761_vm2, %v2996_v52, %v2997_v43  ;;  %v21353_v52 = vld [vmem:[#allocation182_spill] sm:$0xff] }
 0x1b4   : > { %21350 = vst [vmem:[#allocation45_spill] sm:$0xff] %v17715_v59  ;;  %v17749_v43 = vld [vmem:[%s15539_s6 + $0x178] sm:$0xff] }
 0x1b5   : > { %12318 = vmatmul.mubr.msk.f32.gmra.mrb[32].mxu1 %vm838_vm1, %v17697_v32  ;;  %13190 = vmatmul.mubr.msk.f32.gmra.mrb[96].mxu0 %vm838_vm1, %v17688_v55  ;;  %v3001_v55 = vrot.slane %v21351_v50, 2  ;;  %v3003_v50 = vrot.slane %v21353_v52, 2  ;;  %v3008_v52 = vrot.slane %v21358_v62, 2  ;;  %v21364_v62 = vld [vmem:[#allocation63_spill] sm:$0xff] }
 0x1b6   : > { %12320 = vmatprep.mubr.msk.f32.mxu1 %vm838_vm1, %v17704_v34  ;;  %13192 = vmatprep.mubr.msk.f32.mxu0 %vm838_vm1, %v17692_v28  ;;  %v17726_v28 = vld [vmem:[%s15539_s6 + $0x168] sm:$0xff] }
 0x1b7   : > { %v17737_v45 = vsel %vm2761_vm2, %v2999_v23, %v3001_v55  ;;  %v17756_v23 = vsel %vm2761_vm2, %v3001_v55, %v3003_v50  ;;  %v17778_v55 = vsel %vm2761_vm2, %v3006_v22, %v3008_v52 }
 0x1b8   : > { %21354 = vst [vmem:[#allocation48_spill] sm:$0xff] %v17737_v45  ;;  %21357 = vst [vmem:[#allocation49_spill] sm:$0xff] %v17756_v23 }
 0x1b9   : > { %12321 = vmatmul.mubr.msk.f32.gmra.mrb[34].mxu1 %vm838_vm1, %v17719_v27  ;;  %13193 = vmatmul.mubr.msk.f32.gmra.mrb[98].mxu0 %vm838_vm1, %v17711_v29  ;;  %v3005_v29 = vrot.slane %v21355_v63, 2  ;;  %21361 = vst [vmem:[#allocation54_spill] sm:$0xff] %v17778_v55 }
 0x1ba   : > { %12323 = vmatprep.mubr.msk.f32.mxu1 %vm838_vm1, %v17726_v28  ;;  %13195 = vmatprep.mubr.msk.f32.mxu0 %vm838_vm1, %v17715_v59  ;;  %v21360_v59 = vld [vmem:[#allocation58_spill] sm:$0xff] }
 0x1bb   : > { %v17760_v63 = vsel %vm2761_vm2, %v3005_v29, %v3006_v22  ;;  %v21362_v29 = vld [vmem:[#allocation190_spill] sm:$0xff] }
 0x1bc   : > { %21359 = vst [vmem:[#allocation182_spill] sm:$0xff] %v17760_v63  ;;  %v17794_v22 = vld [vmem:[%s15539_s6 + $0x1a0] sm:$0xff] }
 0x1bd   : > { %12324 = vmatmul.mubr.msk.f32.gmra.mrb[36].mxu1 %vm838_vm1, %v17742_v20  ;;  %13196 = vmatmul.mubr.msk.f32.gmra.mrb[100].mxu0 %vm838_vm1, %v17733_v7  ;;  %v3010_v7 = vrot.slane %v21360_v59, 2  ;;  %v3012_v59 = vrot.slane %v21362_v29, 2  ;;  %v3017_v29 = vrot.slane %v21367_v21, 2 }
 0x1be   : > { %12326 = vmatprep.mubr.msk.f32.mxu1 %vm838_vm1, %v17749_v43  ;;  %13198 = vmatprep.mubr.msk.f32.mxu0 %vm838_vm1, %v17737_v45  ;;  %v17771_v45 = vld [vmem:[%s15539_s6 + $0x190] sm:$0xff] }
 0x1bf   : > { %v17782_v50 = vsel %vm2761_vm2, %v3008_v52, %v3010_v7  ;;  %v17801_v52 = vsel %vm2761_vm2, %v3010_v7, %v3012_v59  ;;  %v17823_v7 = vsel %vm2761_vm2, %v3015_v11, %v3017_v29 }
 0x1c0   : > { %21363 = vst [vmem:[#allocation184_spill] sm:$0xff] %v17782_v50  ;;  %21366 = vst [vmem:[#allocation57_spill] sm:$0xff] %v17801_v52 }
 0x1c1   : > { %12327 = vmatmul.mubr.msk.f32.gmra.mrb[38].mxu1 %vm838_vm1, %v17764_v44  ;;  %13199 = vmatmul.mubr.msk.f32.gmra.mrb[102].mxu0 %vm838_vm1, %v17756_v23  ;;  %v3014_v23 = vrot.slane %v21364_v62, 2  ;;  %21370 = vst [vmem:[#allocation190_spill] sm:$0xff] %v17823_v7 }
 0x1c2   : > { %12329 = vmatprep.mubr.msk.f32.mxu1 %vm838_vm1, %v17771_v45  ;;  %13201 = vmatprep.mubr.msk.f32.mxu0 %vm838_vm1, %v17760_v63  ;;  %v21369_v63 = vld [vmem:[#allocation67_spill] sm:$0xff] }
 0x1c3   : > { %v17805_v62 = vsel %vm2761_vm2, %v3014_v23, %v3015_v11  ;;  %v21371_v23 = vld [vmem:[#allocation198_spill] sm:$0xff] }
 0x1c4   : > { %21368 = vst [vmem:[#allocation58_spill] sm:$0xff] %v17805_v62  ;;  %v3021_v59 = vrot.slane %v21371_v23, 2  ;;  %v17839_v11 = vld [vmem:[%s15539_s6 + $0x1c8] sm:$0xff] }
 0x1c5   : > { %12330 = vmatmul.mubr.msk.f32.gmra.mrb[40].mxu1 %vm838_vm1, %v17787_v1  ;;  %13202 = vmatmul.mubr.msk.f32.gmra.mrb[104].mxu0 %vm838_vm1, %v17778_v55  ;;  %v3019_v55 = vrot.slane %v21369_v63, 2  ;;  %v21376_v23 = vld [vmem:[#allocation75_spill] sm:$0xff] }
 0x1c6   : > { %12332 = vmatprep.mubr.msk.f32.mxu1 %vm838_vm1, %v17794_v22  ;;  %13204 = vmatprep.mubr.msk.f32.mxu0 %vm838_vm1, %v17782_v50  ;;  %v17816_v50 = vld [vmem:[%s15539_s6 + $0x1b8] sm:$0xff] }
 0x1c7   : > { %v17827_v21 = vsel %vm2761_vm2, %v3017_v29, %v3019_v55  ;;  %v17846_v29 = vsel %vm2761_vm2, %v3019_v55, %v3021_v59  ;;  %v17976_v63 = vld [vmem:[%s15539_s6 + $0x238] sm:$0xff] }
 0x1c8   : > { %21372 = vst [vmem:[#allocation63_spill] sm:$0xff] %v17827_v21  ;;  %21375 = vst [vmem:[#allocation192_spill] sm:$0xff] %v17846_v29 }
 0x1c9   : > { %12333 = vmatmul.mubr.msk.f32.gmra.mrb[42].mxu1 %vm838_vm1, %v17809_v39  ;;  %13205 = vmatmul.mubr.msk.f32.gmra.mrb[106].mxu0 %vm838_vm1, %v17801_v52  ;;  %v3023_v52 = vrot.slane %v21373_v61, 2  ;;  %v17973_v61 = vld [vmem:[%s15539_s6 + $0x510] sm:$0xff]  ;;  %21397 = vst [vmem:[#allocation274_spill] sm:$0xff] %v17976_v63 }
 0x1ca   : > { %12335 = vmatprep.mubr.msk.f32.mxu1 %vm838_vm1, %v17816_v50  ;;  %13207 = vmatprep.mubr.msk.f32.mxu0 %vm838_vm1, %v17805_v62  ;;  %v3026_v62 = vrot.slane %v21376_v23, 2  ;;  %v17899_v23 = vld [vmem:[%s15539_s6 + $0x1f8] sm:$0xff] }
 0x1cb   : > { %v17850_v36 = vsel %vm2761_vm2, %v3023_v52, %v3024_v54  ;;  %v21380_v52 = vld [vmem:[#allocation206_spill] sm:$0xff] }
 0x1cc   : > { %21377 = vst [vmem:[#allocation66_spill] sm:$0xff] %v17850_v36  ;;  %v17868_v55 = vsel %vm2761_vm2, %v3024_v54, %v3026_v62  ;;  %v3030_v59 = vrot.slane %v21380_v52, 2  ;;  %v17884_v54 = vld [vmem:[%s15539_s6 + $0x1f0] sm:$0xff] }
 0x1cd   : > { %12336 = vmatmul.mubr.msk.f32.gmra.mrb[44].mxu1 %vm838_vm1, %v17832_v25  ;;  %13208 = vmatmul.mubr.msk.f32.gmra.mrb[108].mxu0 %vm838_vm1, %v17823_v7  ;;  %v3028_v7 = vrot.slane %v21378_v57, 2  ;;  %21379 = vst [vmem:[#allocation198_spill] sm:$0xff] %v17868_v55  ;;  %v17877_v57 = vld [vmem:[%s15539_s6 + $0x1e8] sm:$0xff] }
 0x1ce   : > { %12338 = vmatprep.mubr.msk.f32.mxu1 %vm838_vm1, %v17839_v11  ;;  %13210 = vmatprep.mubr.msk.f32.mxu0 %vm838_vm1, %v17827_v21  ;;  %v17861_v21 = vld [vmem:[%s15539_s6 + $0x1e0] sm:$0xff] }
 0x1cf   : > { %v17872_v33 = vsel %vm2761_vm2, %v3026_v62, %v3028_v7  ;;  %v17891_v62 = vsel %vm2761_vm2, %v3028_v7, %v3030_v59  ;;  %v21385_v52 = vld [vmem:[#allocation84_spill] sm:$0xff] }
 0x1d0   : > { %21381 = vst [vmem:[#allocation206_spill] sm:$0xff] %v17872_v33  ;;  %21384 = vst [vmem:[#allocation265_spill] sm:$0xff] %v17891_v62 }
 0x1d1   : > { %12339 = vmatmul.mubr.msk.f32.gmra.mrb[46].mxu1 %vm838_vm1, %v17854_v2  ;;  %13211 = vmatmul.mubr.msk.f32.gmra.mrb[110].mxu0 %vm838_vm1, %v17846_v29  ;;  %v3032_v29 = vrot.slane %v21382_v16, 2  ;;  %v21387_v16 = vld [vmem:[#allocation85_spill] sm:$0xff] }
 0x1d2   : > { %12341 = vmatprep.mubr.msk.f32.mxu1 %vm838_vm1, %v17861_v21  ;;  %13213 = vmatprep.mubr.msk.f32.mxu0 %vm838_vm1, %v17850_v36  ;;  %v3035_v36 = vrot.slane %v21385_v52, 2  ;;  %v3042_v52 = vrot.slane %v17220_v58, 2  ;;  %v17944_v58 = vld [vmem:[%s15539_s6 + $0x220] sm:$0xff] }
 0x1d3   : > { %v17895_v18 = vsel %vm2761_vm2, %v3032_v29, %v3033_v4  ;;  %v21389_v29 = vld [vmem:[#allocation214_spill] sm:$0xff] }
 0x1d4   : > { %21386 = vst [vmem:[#allocation266_spill] sm:$0xff] %v17895_v18  ;;  %v17913_v7 = vsel %vm2761_vm2, %v3033_v4, %v3035_v36  ;;  %v3039_v59 = vrot.slane %v21389_v29, 2  ;;  %v17929_v4 = vld [vmem:[%s15539_s6 + $0x218] sm:$0xff]  ;;  %v3044_v29 = vrot.slane %v17244_v10, 2 }
 0x1d5   : > { %12342 = vmatmul.mubr.msk.f32.gmra.mrb[48].mxu1 %vm838_vm1, %v17877_v57  ;;  %13214 = vmatmul.mubr.msk.f32.gmra.mrb[112].mxu0 %vm838_vm1, %v17868_v55  ;;  %v3037_v55 = vrot.slane %v21387_v16, 2  ;;  %21388 = vst [vmem:[#allocation267_spill] sm:$0xff] %v17913_v7 }
 0x1d6   : > { %12344 = vmatprep.mubr.msk.f32.mxu1 %vm838_vm1, %v17884_v54  ;;  %13216 = vmatprep.mubr.msk.f32.mxu0 %vm838_vm1, %v17872_v33  ;;  %v17906_v33 = vld [vmem:[%s15539_s6 + $0x208] sm:$0xff] }
 0x1d7   : > { %v17917_v16 = vsel %vm2761_vm2, %v3035_v36, %v3037_v55  ;;  %v17936_v36 = vsel %vm2761_vm2, %v3037_v55, %v3039_v59  ;;  %v17952_v55 = vld [vmem:[%s15539_s6 + $0x508] sm:$0xff]  ;;  %v17957_v59 = vld [vmem:[%s15539_s6 + $0x230] sm:$0xff] }
 0x1d8   : > { %21390 = vst [vmem:[#allocation214_spill] sm:$0xff] %v17917_v16  ;;  %21391 = vst [vmem:[#allocation268_spill] sm:$0xff] %v17936_v36  ;;  %v5842_v10 = vrot.slane %v17952_v55, 2 }
 0x1d9   : > { %12345 = vmatmul.mubr.msk.f32.gmra.mrb[50].mxu1 %vm838_vm1, %v17899_v23  ;;  %13217 = vmatmul.mubr.msk.f32.gmra.mrb[114].mxu0 %vm838_vm1, %v17891_v62  ;;  %v3041_v62 = vrot.slane %v17217_v13, 2  ;;  %v17949_v13 = vld [vmem:[%s15539_s6 + $0x500] sm:$0xff]  ;;  %21394 = vst [vmem:[#allocation271_spill] sm:$0xff] %v17952_v55 }
 0x1da   : > { %12347 = vmatprep.mubr.msk.f32.mxu1 %vm838_vm1, %v17906_v33  ;;  %13219 = vmatprep.mubr.msk.f32.mxu0 %vm838_vm1, %v17895_v18  ;;  %21393 = vst [vmem:[#allocation270_spill] sm:$0xff] %v17949_v13 }
 0x1db   : > { %v17940_v18 = vsel %vm2761_vm2, %v3041_v62, %v3042_v52  ;;  %v17964_v62 = vsel %vm2761_vm2, %v3042_v52, %v3044_v29  ;;  %v17981_v52 = vld [vmem:[%s15539_s6 + $0x518] sm:$0xff] }
 0x1dc   : > { %21392 = vst [vmem:[#allocation269_spill] sm:$0xff] %v17940_v18  ;;  %21395 = vst [vmem:[#allocation272_spill] sm:$0xff] %v17964_v62 }
 0x1dd   : > { %12348 = vmatmul.mubr.msk.f32.gmra.mrb[52].mxu1 %vm838_vm1, %v17922_v3  ;;  %13220 = vmatmul.mubr.msk.f32.gmra.mrb[116].mxu0 %vm838_vm1, %v17913_v7  ;;  %v3046_v7 = vrot.slane %v17252_v0, 2  ;;  %21398 = vst [vmem:[#allocation275_spill] sm:$0xff] %v17981_v52 }
 0x1de   : > { %12350 = vmatprep.mubr.msk.f32.mxu1 %vm838_vm1, %v17929_v4  ;;  %13222 = vmatprep.mubr.msk.f32.mxu0 %vm838_vm1, %v17917_v16  ;;  %v3048_v16 = vrot.slane %v17275_v38, 2  ;;  %v17986_v38 = vld [vmem:[%s15539_s6 + $0x240] sm:$0xff] }
 0x1df   : > { %v17968_v0 = vsel %vm2761_vm2, %v3044_v29, %v3046_v7 }
 0x1e0   : > { %21396 = vst [vmem:[#allocation273_spill] sm:$0xff] %v17968_v0  ;;  %v17993_v29 = vsel %vm2761_vm2, %v3046_v7, %v3048_v16  ;;  %v18009_v16 = vld [vmem:[%s15539_s6 + $0x258] sm:$0xff] }
 0x1e1   : > { %12351 = vmatmul.mubr.msk.f32.gmra.mrb[54].mxu1 %vm838_vm1, %v17944_v58  ;;  %13223 = vmatmul.mubr.msk.f32.gmra.mrb[118].mxu0 %vm838_vm1, %v17936_v36  ;;  %v5841_v36 = vrot.slane %v17949_v13, 2  ;;  %21399 = vst [vmem:[#allocation276_spill] sm:$0xff] %v17993_v29  ;;  %v380_v13 = vld [vmem:[%s15539_s6 + $0x520] sm:$0x3] }
 0x1e2   : > { %12353 = vmatprep.mubr.msk.f32.mxu1 %vm838_vm1, %v17957_v59  ;;  %13225 = vmatprep.mubr.msk.f32.mxu0 %vm838_vm1, %v17940_v18  ;;  %v5844_v18 = vrot.slane %v17973_v61, 2 }
 0x1e3   : > { %v17997_v55 = vsel %vm2761_vm2, %v5841_v36, %v5842_v10  ;;  %v5848_v36 = vrot.slane %v380_v13, 2 }
 0x1e4   : > { %21400 = vst [vmem:[#allocation277_spill] sm:$0xff] %v17997_v55  ;;  %v18016_v7 = vsel %vm2761_vm2, %v5842_v10, %v5844_v18  ;;  %v18039_v10 = vld [vmem:[%s15539_s6 + $0x270] sm:$0xff] }
 0x1e5   : > { %12354 = vmatmul.mubr.msk.f32.gmra.mrb[56].mxu1 %vm838_vm1, %v17976_v63  ;;  %13226 = vmatmul.mubr.msk.f32.gmra.mrb[120].mxu0 %vm838_vm1, %v17964_v62  ;;  %v5846_v62 = vrot.slane %v17981_v52, 2  ;;  %v18002_v63 = vld [vmem:[%s15539_s6 + $0x248] sm:$0xff]  ;;  %21401 = vst [vmem:[#allocation278_spill] sm:$0xff] %v18016_v7  ;;  %v18022_v52 = vld [vmem:[%s15539_s6 + $0x260] sm:$0xff] }
 0x1e6   : > { %12356 = vmatprep.mubr.msk.f32.mxu1 %vm838_vm1, %v17986_v38  ;;  %13228 = vmatprep.mubr.msk.f32.mxu0 %vm838_vm1, %v17968_v0 }
 0x1e7   : > { %v18019_v0 = vsel %vm2761_vm2, %v5844_v18, %v5846_v62  ;;  %v18036_v13 = vsel %vm2761_vm2, %v5846_v62, %v5848_v36  ;;  %v18046_v18 = vld [vmem:[%s15539_s6 + $0x280] sm:$0xff]  ;;  %v18056_v62 = vld [vmem:[%s15539_s6 + $0x288] sm:$0xff]  ;;  %v18063_v36 = vld [vmem:[%s15539_s6 + $0x290] sm:$0xff] }
 0x1e8   : > { %21402 = vst [vmem:[#allocation279_spill] sm:$0xff] %v18019_v0  ;;  %21403 = vst [vmem:[#allocation280_spill] sm:$0xff] %v18036_v13 }
 0x1e9   : > { %12357 = vmatmul.mubr.msk.f32.gmra.mrb[58].mxu1 %vm838_vm1, %v18002_v63  ;;  %13229 = vmatmul.mubr.msk.f32.gmra.mrb[122].mxu0 %vm838_vm1, %v17993_v29  ;;  %v18029_v29 = vld [vmem:[%s15539_s6 + $0x268] sm:$0xff] }
 0x1ea   : > { %12359 = vmatprep.mubr.msk.f32.mxu1 %vm838_vm1, %v18009_v16  ;;  %13231 = vmatprep.mubr.msk.f32.mxu0 %vm838_vm1, %v17997_v55  ;;  %v18729_v55 = vld [vmem:[%s15539_s6 + $0x4f0] sm:$0xff] }
 0x1ed   : > { %12360 = vmatmul.mubr.msk.f32.gmra.mrb[60].mxu1 %vm838_vm1, %v18022_v52  ;;  %13232 = vmatmul.mubr.msk.f32.gmra.mrb[124].mxu0 %vm838_vm1, %v18016_v7  ;;  %v18050_v7 = vld [vmem:[#allocation5 + $0x18] sm:$0xff] }
 0x1ee   : > { %12362 = vmatprep.mubr.msk.f32.mxu1 %vm838_vm1, %v18029_v29  ;;  %13234 = vmatprep.mubr.msk.f32.mxu0 %vm838_vm1, %v18019_v0  ;;  %v21408_v0 = vld [vmem:[#allocation75_spill] sm:$0xff] }
 0x1ef   : > { %12655 = vmatprep.subr.mxu1 %v18050_v7 }
 0x1f1   : > { %12363 = vmatmul.mubr.msk.f32.gmra.mrb[62].mxu1 %vm838_vm1, %v18039_v10  ;;  %13235 = vmatmul.mubr.msk.f32.gmra.mrb[126].mxu0 %vm838_vm1, %v18036_v13  ;;  %v18400_v13 = vld [vmem:[%s15539_s6 + $0x470] sm:$0xff] }
 0x1f2   : > { %12365 = vmatprep.mubr.msk.f32.mxu1 %vm838_vm1, %v18046_v18  ;;  %13239 = vmatprep.mubr.msk.f32.mxu0 %vm838_vm1, %v17411_v14  ;;  %v18071_v14 = vld [vmem:[%s15539_s6 + $0x298] sm:$0xff] }
 0x1f5   : > { %12366 = vmatmul.mubr.msk.f32.gmra.mrb[64].mxu1 %vm838_vm1, %v18056_v62  ;;  %13240 = vmatmul.mubr.msk.f32.vlgmr.msra.gmra.mrb[0].mxu0 %vm838_vm1, %v17427_v35  ;;  %v18078_v35 = vld [vmem:[%s15539_s6 + $0x2a8] sm:$0xff] }
 0x1f6   : > { %12368 = vmatprep.mubr.msk.f32.mxu1 %vm838_vm1, %v18063_v36  ;;  %13432 = vmatpush3.msra.mxu0 %v17339_v15  ;;  %v18085_v15 = vld [vmem:[%s15539_s6 + $0x2b0] sm:$0xff] }
 0x1f7   : > { %13242 = vmatprep.mubr.msk.f32.mxu0 %vm838_vm1, %v17434_v12  ;;  %v18092_v12 = vld [vmem:[%s15539_s6 + $0x2b8] sm:$0xff] }
 0x1f9   : > { %12369 = vmatmul.mubr.msk.f32.gmra.mrb[66].mxu1 %vm838_vm1, %v18071_v14  ;;  %13243 = vmatmul.mubr.msk.f32.gmra.mrb[2].mxu0 %vm838_vm1, %v17449_v47  ;;  %v18113_v47 = vld [vmem:[%s15539_s6 + $0x2d8] sm:$0xff] }
 0x1fa   : > { %12371 = vmatprep.mubr.msk.f32.mxu1 %vm838_vm1, %v18078_v35  ;;  %13245 = vmatprep.mubr.msk.f32.mxu0 %vm838_vm1, %v17456_v31  ;;  %v18099_v31 = vld [vmem:[%s15539_s6 + $0x2c0] sm:$0xff] }
 0x1fd   : > { %12372 = vmatmul.mubr.msk.f32.gmra.mrb[68].mxu1 %vm838_vm1, %v18085_v15  ;;  %13246 = vmatmul.mubr.msk.f32.gmra.mrb[4].mxu0 %vm838_vm1, %v17472_v30  ;;  %v18106_v30 = vld [vmem:[%s15539_s6 + $0x2d0] sm:$0xff] }
 0x1fe   : > { %12374 = vmatprep.mubr.msk.f32.mxu1 %vm838_vm1, %v18092_v12  ;;  %13248 = vmatprep.mubr.msk.f32.mxu0 %vm838_vm1, %v17479_v8  ;;  %v18134_v8 = vld [vmem:[%s15539_s6 + $0x2f8] sm:$0xff] }
 0x201   : > { %12375 = vmatmul.mubr.msk.f32.gmra.mrb[70].mxu1 %vm838_vm1, %v18099_v31  ;;  %13249 = vmatmul.mubr.msk.f32.gmra.mrb[6].mxu0 %vm838_vm1, %v17494_v6  ;;  %v18120_v6 = vld [vmem:[%s15539_s6 + $0x2e0] sm:$0xff] }
 0x202   : > { %12377 = vmatprep.mubr.msk.f32.mxu1 %vm838_vm1, %v18106_v30  ;;  %13251 = vmatprep.mubr.msk.f32.mxu0 %vm838_vm1, %v17501_v46  ;;  %v18127_v46 = vld [vmem:[%s15539_s6 + $0x2e8] sm:$0xff] }
 0x205   : > { %12378 = vmatmul.mubr.msk.f32.gmra.mrb[72].mxu1 %vm838_vm1, %v18113_v47  ;;  %13252 = vmatmul.mubr.msk.f32.gmra.mrb[8].mxu0 %vm838_vm1, %v17517_v26  ;;  %v18141_v26 = vld [vmem:[%s15539_s6 + $0x300] sm:$0xff] }
 0x206   : > { %12380 = vmatprep.mubr.msk.f32.mxu1 %vm838_vm1, %v18120_v6  ;;  %13254 = vmatprep.mubr.msk.f32.mxu0 %vm838_vm1, %v17524_v51  ;;  %v18162_v51 = vld [vmem:[%s15539_s6 + $0x320] sm:$0xff] }
 0x209   : > { %12381 = vmatmul.mubr.msk.f32.gmra.mrb[74].mxu1 %vm838_vm1, %v18127_v46  ;;  %13255 = vmatmul.mubr.msk.f32.gmra.mrb[10].mxu0 %vm838_vm1, %v17539_v49  ;;  %v18148_v49 = vld [vmem:[%s15539_s6 + $0x308] sm:$0xff] }
 0x20a   : > { %12383 = vmatprep.mubr.msk.f32.mxu1 %vm838_vm1, %v18134_v8  ;;  %13257 = vmatprep.mubr.msk.f32.mxu0 %vm838_vm1, %v17546_v40  ;;  %v18155_v40 = vld [vmem:[%s15539_s6 + $0x310] sm:$0xff] }
 0x20d   : > { %12384 = vmatmul.mubr.msk.f32.gmra.mrb[76].mxu1 %vm838_vm1, %v18141_v26  ;;  %13258 = vmatmul.mubr.msk.f32.gmra.mrb[12].mxu0 %vm838_vm1, %v17562_v9  ;;  %v18169_v9 = vld [vmem:[%s15539_s6 + $0x328] sm:$0xff] }
 0x20e   : > { %12386 = vmatprep.mubr.msk.f32.mxu1 %vm838_vm1, %v18148_v49  ;;  %13260 = vmatprep.mubr.msk.f32.mxu0 %vm838_vm1, %v17569_v60  ;;  %v18190_v60 = vld [vmem:[%s15539_s6 + $0x348] sm:$0xff] }
 0x211   : > { %12387 = vmatmul.mubr.msk.f32.gmra.mrb[78].mxu1 %vm838_vm1, %v18155_v40  ;;  %13261 = vmatmul.mubr.msk.f32.gmra.mrb[14].mxu0 %vm838_vm1, %v17584_v42  ;;  %v18176_v42 = vld [vmem:[%s15539_s6 + $0x330] sm:$0xff] }
 0x212   : > { %12389 = vmatprep.mubr.msk.f32.mxu1 %vm838_vm1, %v18162_v51  ;;  %13263 = vmatprep.mubr.msk.f32.mxu0 %vm838_vm1, %v17591_v53  ;;  %v18183_v53 = vld [vmem:[%s15539_s6 + $0x338] sm:$0xff] }
 0x215   : > { %12390 = vmatmul.mubr.msk.f32.gmra.mrb[80].mxu1 %vm838_vm1, %v18169_v9  ;;  %13264 = vmatmul.mubr.msk.f32.gmra.mrb[16].mxu0 %vm838_vm1, %v17607_v5  ;;  %v18197_v5 = vld [vmem:[%s15539_s6 + $0x350] sm:$0xff] }
 0x216   : > { %12392 = vmatprep.mubr.msk.f32.mxu1 %vm838_vm1, %v18176_v42  ;;  %13266 = vmatprep.mubr.msk.f32.mxu0 %vm838_vm1, %v17614_v56  ;;  %v18225_v56 = vld [vmem:[%s15539_s6 + $0x378] sm:$0xff] }
 0x219   : > { %12393 = vmatmul.mubr.msk.f32.gmra.mrb[82].mxu1 %vm838_vm1, %v18183_v53  ;;  %13267 = vmatmul.mubr.msk.f32.gmra.mrb[18].mxu0 %vm838_vm1, %v17629_v17  ;;  %v18204_v17 = vld [vmem:[%s15539_s6 + $0x358] sm:$0xff] }
 0x21a   : > { %12395 = vmatprep.mubr.msk.f32.mxu1 %vm838_vm1, %v18190_v60  ;;  %13269 = vmatprep.mubr.msk.f32.mxu0 %vm838_vm1, %v17636_v41  ;;  %v18211_v41 = vld [vmem:[%s15539_s6 + $0x360] sm:$0xff] }
 0x21d   : > { %12396 = vmatmul.mubr.msk.f32.gmra.mrb[84].mxu1 %vm838_vm1, %v18197_v5  ;;  %13270 = vmatmul.mubr.msk.f32.gmra.mrb[20].mxu0 %vm838_vm1, %v17652_v37  ;;  %v18218_v37 = vld [vmem:[%s15539_s6 + $0x370] sm:$0xff] }
 0x21e   : > { %12398 = vmatprep.mubr.msk.f32.mxu1 %vm838_vm1, %v18204_v17  ;;  %13272 = vmatprep.mubr.msk.f32.mxu0 %vm838_vm1, %v17659_v24  ;;  %v18253_v24 = vld [vmem:[%s15539_s6 + $0x3a0] sm:$0xff] }
 0x221   : > { %12399 = vmatmul.mubr.msk.f32.gmra.mrb[86].mxu1 %vm838_vm1, %v18211_v41  ;;  %13273 = vmatmul.mubr.msk.f32.gmra.mrb[22].mxu0 %vm838_vm1, %v17674_v48  ;;  %v18232_v48 = vld [vmem:[%s15539_s6 + $0x380] sm:$0xff] }
 0x222   : > { %12401 = vmatprep.mubr.msk.f32.mxu1 %vm838_vm1, %v18218_v37  ;;  %13275 = vmatprep.mubr.msk.f32.mxu0 %vm838_vm1, %v17681_v19  ;;  %v18239_v19 = vld [vmem:[%s15539_s6 + $0x388] sm:$0xff] }
 0x225   : > { %12402 = vmatmul.mubr.msk.f32.gmra.mrb[88].mxu1 %vm838_vm1, %v18225_v56  ;;  %13276 = vmatmul.mubr.msk.f32.gmra.mrb[24].mxu0 %vm838_vm1, %v17697_v32  ;;  %v18246_v32 = vld [vmem:[%s15539_s6 + $0x398] sm:$0xff] }
 0x226   : > { %12404 = vmatprep.mubr.msk.f32.mxu1 %vm838_vm1, %v18232_v48  ;;  %13278 = vmatprep.mubr.msk.f32.mxu0 %vm838_vm1, %v17704_v34  ;;  %v18281_v34 = vld [vmem:[%s15539_s6 + $0x3c8] sm:$0xff] }
 0x229   : > { %12405 = vmatmul.mubr.msk.f32.gmra.mrb[90].mxu1 %vm838_vm1, %v18239_v19  ;;  %13279 = vmatmul.mubr.msk.f32.gmra.mrb[26].mxu0 %vm838_vm1, %v17719_v27  ;;  %v18260_v27 = vld [vmem:[%s15539_s6 + $0x3a8] sm:$0xff] }
 0x22a   : > { %12407 = vmatprep.mubr.msk.f32.mxu1 %vm838_vm1, %v18246_v32  ;;  %13281 = vmatprep.mubr.msk.f32.mxu0 %vm838_vm1, %v17726_v28  ;;  %v18267_v28 = vld [vmem:[%s15539_s6 + $0x3b0] sm:$0xff] }
 0x22d   : > { %12408 = vmatmul.mubr.msk.f32.gmra.mrb[92].mxu1 %vm838_vm1, %v18253_v24  ;;  %13282 = vmatmul.mubr.msk.f32.gmra.mrb[28].mxu0 %vm838_vm1, %v17742_v20  ;;  %v18274_v20 = vld [vmem:[%s15539_s6 + $0x3c0] sm:$0xff] }
 0x22e   : > { %12410 = vmatprep.mubr.msk.f32.mxu1 %vm838_vm1, %v18260_v27  ;;  %13284 = vmatprep.mubr.msk.f32.mxu0 %vm838_vm1, %v17749_v43  ;;  %v18309_v43 = vld [vmem:[%s15539_s6 + $0x3f0] sm:$0xff] }
 0x231   : > { %12411 = vmatmul.mubr.msk.f32.gmra.mrb[94].mxu1 %vm838_vm1, %v18267_v28  ;;  %13285 = vmatmul.mubr.msk.f32.gmra.mrb[30].mxu0 %vm838_vm1, %v17764_v44  ;;  %v18288_v44 = vld [vmem:[%s15539_s6 + $0x3d0] sm:$0xff] }
 0x232   : > { %12413 = vmatprep.mubr.msk.f32.mxu1 %vm838_vm1, %v18274_v20  ;;  %13287 = vmatprep.mubr.msk.f32.mxu0 %vm838_vm1, %v17771_v45  ;;  %v18295_v45 = vld [vmem:[%s15539_s6 + $0x3d8] sm:$0xff] }
 0x235   : > { %12414 = vmatmul.mubr.msk.f32.gmra.mrb[96].mxu1 %vm838_vm1, %v18281_v34  ;;  %13288 = vmatmul.mubr.msk.f32.gmra.mrb[32].mxu0 %vm838_vm1, %v17787_v1  ;;  %v18302_v1 = vld [vmem:[%s15539_s6 + $0x3e8] sm:$0xff] }
 0x236   : > { %12416 = vmatprep.mubr.msk.f32.mxu1 %vm838_vm1, %v18288_v44  ;;  %13290 = vmatprep.mubr.msk.f32.mxu0 %vm838_vm1, %v17794_v22  ;;  %v18337_v22 = vld [vmem:[%s15539_s6 + $0x418] sm:$0xff] }
 0x239   : > { %12417 = vmatmul.mubr.msk.f32.gmra.mrb[98].mxu1 %vm838_vm1, %v18295_v45  ;;  %13291 = vmatmul.mubr.msk.f32.gmra.mrb[34].mxu0 %vm838_vm1, %v17809_v39  ;;  %v18316_v39 = vld [vmem:[%s15539_s6 + $0x3f8] sm:$0xff] }
 0x23a   : > { %12419 = vmatprep.mubr.msk.f32.mxu1 %vm838_vm1, %v18302_v1  ;;  %13293 = vmatprep.mubr.msk.f32.mxu0 %vm838_vm1, %v17816_v50  ;;  %v18323_v50 = vld [vmem:[%s15539_s6 + $0x400] sm:$0xff] }
 0x23d   : > { %12420 = vmatmul.mubr.msk.f32.gmra.mrb[100].mxu1 %vm838_vm1, %v18309_v43  ;;  %13294 = vmatmul.mubr.msk.f32.gmra.mrb[36].mxu0 %vm838_vm1, %v17832_v25  ;;  %v18330_v25 = vld [vmem:[%s15539_s6 + $0x410] sm:$0xff] }
 0x23e   : > { %12422 = vmatprep.mubr.msk.f32.mxu1 %vm838_vm1, %v18316_v39  ;;  %13296 = vmatprep.mubr.msk.f32.mxu0 %vm838_vm1, %v17839_v11  ;;  %v18365_v11 = vld [vmem:[%s15539_s6 + $0x440] sm:$0xff] }
 0x241   : > { %12423 = vmatmul.mubr.msk.f32.gmra.mrb[102].mxu1 %vm838_vm1, %v18323_v50  ;;  %13297 = vmatmul.mubr.msk.f32.gmra.mrb[38].mxu0 %vm838_vm1, %v17854_v2  ;;  %v18344_v2 = vld [vmem:[%s15539_s6 + $0x420] sm:$0xff] }
 0x242   : > { %12425 = vmatprep.mubr.msk.f32.mxu1 %vm838_vm1, %v18330_v25  ;;  %13299 = vmatprep.mubr.msk.f32.mxu0 %vm838_vm1, %v17861_v21  ;;  %v18351_v21 = vld [vmem:[%s15539_s6 + $0x428] sm:$0xff] }
 0x245   : > { %12426 = vmatmul.mubr.msk.f32.gmra.mrb[104].mxu1 %vm838_vm1, %v18337_v22  ;;  %13300 = vmatmul.mubr.msk.f32.gmra.mrb[40].mxu0 %vm838_vm1, %v17877_v57  ;;  %v18358_v57 = vld [vmem:[%s15539_s6 + $0x438] sm:$0xff] }
 0x246   : > { %12428 = vmatprep.mubr.msk.f32.mxu1 %vm838_vm1, %v18344_v2  ;;  %13302 = vmatprep.mubr.msk.f32.mxu0 %vm838_vm1, %v17884_v54  ;;  %v18372_v54 = vld [vmem:[%s15539_s6 + $0x448] sm:$0xff] }
 0x249   : > { %12429 = vmatmul.mubr.msk.f32.gmra.mrb[106].mxu1 %vm838_vm1, %v18351_v21  ;;  %13303 = vmatmul.mubr.msk.f32.gmra.mrb[42].mxu0 %vm838_vm1, %v17899_v23  ;;  %v18379_v23 = vld [vmem:[%s15539_s6 + $0x450] sm:$0xff] }
 0x24a   : > { %12431 = vmatprep.mubr.msk.f32.mxu1 %vm838_vm1, %v18358_v57  ;;  %13305 = vmatprep.mubr.msk.f32.mxu0 %vm838_vm1, %v17906_v33  ;;  %v18386_v33 = vld [vmem:[%s15539_s6 + $0x460] sm:$0xff] }
 0x24d   : > { %12432 = vmatmul.mubr.msk.f32.gmra.mrb[108].mxu1 %vm838_vm1, %v18365_v11  ;;  %13306 = vmatmul.mubr.msk.f32.gmra.mrb[44].mxu0 %vm838_vm1, %v17922_v3  ;;  %v18393_v3 = vld [vmem:[%s15539_s6 + $0x468] sm:$0xff] }
 0x24e   : > { %12434 = vmatprep.mubr.msk.f32.mxu1 %vm838_vm1, %v18372_v54  ;;  %13308 = vmatprep.mubr.msk.f32.mxu0 %vm838_vm1, %v17929_v4  ;;  %v21404_v4 = vld [vmem:[#allocation274_spill] sm:$0xff] }
 0x251   : > { %12435 = vmatmul.mubr.msk.f32.gmra.mrb[110].mxu1 %vm838_vm1, %v18379_v23  ;;  %13309 = vmatmul.mubr.msk.f32.gmra.mrb[46].mxu0 %vm838_vm1, %v17944_v58  ;;  %v21405_v58 = vld [vmem:[#allocation67_spill] sm:$0xff] }
 0x252   : > { %12437 = vmatprep.mubr.msk.f32.mxu1 %vm838_vm1, %v18386_v33  ;;  %13311 = vmatprep.mubr.msk.f32.mxu0 %vm838_vm1, %v17957_v59  ;;  %v21406_v59 = vld [vmem:[#allocation72_spill] sm:$0xff] }
 0x255   : > { %12438 = vmatmul.mubr.msk.f32.gmra.mrb[112].mxu1 %vm838_vm1, %v18393_v3  ;;  %13312 = vmatmul.mubr.msk.f32.gmra.mrb[48].mxu0 %vm838_vm1, %v21404_v4  ;;  %v21407_v4 = vld [vmem:[#allocation200_spill] sm:$0xff] }
 0x256   : > { %12440 = vmatprep.mubr.msk.f32.mxu1 %vm838_vm1, %v18400_v13  ;;  %13314 = vmatprep.mubr.msk.f32.mxu0 %vm838_vm1, %v17986_v38  ;;  %v21409_v38 = vld [vmem:[#allocation76_spill] sm:$0xff] }
 0x259   : > { %12441 = vmatmul.mubr.msk.f32.gmra.mrb[114].mxu1 %vm838_vm1, %v21405_v58  ;;  %13315 = vmatmul.mubr.msk.f32.gmra.mrb[50].mxu0 %vm838_vm1, %v18002_v63  ;;  %v21410_v63 = vld [vmem:[#allocation81_spill] sm:$0xff] }
 0x25a   : > { %12443 = vmatprep.mubr.msk.f32.mxu1 %vm838_vm1, %v21406_v59  ;;  %13317 = vmatprep.mubr.msk.f32.mxu0 %vm838_vm1, %v18009_v16  ;;  %v21411_v16 = vld [vmem:[#allocation208_spill] sm:$0xff] }
 0x25b   : > { %v21417_v59 = vld [vmem:[#allocation216_spill] sm:$0xff] }
 0x25d   : > { %12444 = vmatmul.mubr.msk.f32.gmra.mrb[116].mxu1 %vm838_vm1, %v21407_v4  ;;  %13318 = vmatmul.mubr.msk.f32.gmra.mrb[52].mxu0 %vm838_vm1, %v18022_v52  ;;  %v21413_v52 = vld [vmem:[#allocation85_spill] sm:$0xff] }
 0x25e   : > { %12446 = vmatprep.mubr.msk.f32.mxu1 %vm838_vm1, %v21408_v0  ;;  %13320 = vmatprep.mubr.msk.f32.mxu0 %vm838_vm1, %v18029_v29  ;;  %v21412_v0 = vld [vmem:[#allocation84_spill] sm:$0xff]  ;;  %v21414_v29 = vld [vmem:[#allocation90_spill] sm:$0xff] }
 0x261   : > { %12447 = vmatmul.mubr.msk.f32.gmra.mrb[118].mxu1 %vm838_vm1, %v21409_v38  ;;  %13321 = vmatmul.mubr.msk.f32.gmra.mrb[54].mxu0 %vm838_vm1, %v18039_v10  ;;  %v21415_v10 = vld [vmem:[#allocation232_spill] sm:$0xff]  ;;  %v21420_v38 = vld [vmem:[#allocation238_spill] sm:$0xff] }
 0x262   : > { %12449 = vmatprep.mubr.msk.f32.mxu1 %vm838_vm1, %v21410_v63  ;;  %13323 = vmatprep.mubr.msk.f32.mxu0 %vm838_vm1, %v18046_v18  ;;  %v2762_v18 = vrot.slane %v21415_v10, 2  ;;  %v2767_v63 = vrot.slane %v21420_v38, 2  ;;  %v21425_v10 = vld [vmem:[#allocation106_spill] sm:$0xff]  ;;  %21485 = vst [vmem:[#allocation232_spill] sm:$0xff] %v18729_v55 }
 0x263   : > { %v18687_v38 = vld [vmem:[%s15539_s6 + $0x4b8] sm:$0xff] }
 0x264   : > { %21473 = vst [vmem:[#allocation76_spill] sm:$0xff] %v18687_v38 }
 0x265   : > { %12450 = vmatmul.mubr.msk.f32.gmra.mrb[120].mxu1 %vm838_vm1, %v21411_v16  ;;  %13324 = vmatmul.mubr.msk.f32.gmra.mrb[56].mxu0 %vm838_vm1, %v18056_v62  ;;  %v21416_v62 = vld [vmem:[#allocation235_spill] sm:$0xff]  ;;  %v21421_v16 = vld [vmem:[#allocation93_spill] sm:$0xff] }
 0x266   : > { %12452 = vmatprep.mubr.msk.f32.mxu1 %vm838_vm1, %v21412_v0  ;;  %13326 = vmatprep.mubr.msk.f32.mxu0 %vm838_vm1, %v18063_v36  ;;  %v2763_v58 = vrot.slane %v21416_v62, 2  ;;  %v21418_v36 = vld [vmem:[#allocation103_spill] sm:$0xff]  ;;  %v15034_v0 = vld [vmem:[%s15539_s6 + $0x20] sm:$0x3] }
 0x267   : > { %v2765_v4 = vrot.slane %v21418_v36, 2  ;;  %v21466_v62 = vld [vmem:[#allocation188_spill] sm:$0xff] }
 0x268   : > { %v18673_v36 = vld [vmem:[%s15539_s6 + $0x4a0] sm:$0xff] }
 0x269   : > { %12453 = vmatmul.mubr.msk.f32.gmra.mrb[122].mxu1 %vm838_vm1, %v21413_v52  ;;  %13327 = vmatmul.mubr.msk.f32.gmra.mrb[58].mxu0 %vm838_vm1, %v18071_v14  ;;  %v21419_v14 = vld [vmem:[#allocation220_spill] sm:$0xff]  ;;  %v2769_v52 = vrot.slane %v15034_v0, 2  ;;  %21469 = vst [vmem:[#allocation200_spill] sm:$0xff] %v18673_v36 }
 0x26a   : > { %12455 = vmatprep.mubr.msk.f32.mxu1 %vm838_vm1, %v21414_v29  ;;  %13329 = vmatprep.mubr.msk.f32.mxu0 %vm838_vm1, %v18078_v35  ;;  %v2764_v35 = vsel %vm2761_vm2, %v2762_v18, %v2763_v58  ;;  %v2768_v29 = vsel %vm2761_vm2, %v2765_v4, %v2767_v63  ;;  %v21464_v18 = vld [vmem:[#allocation186_spill] sm:$0xff] }
 0x26b   : > { %v18701_v0 = vld [vmem:[%s15539_s6 + $0x4c8] sm:$0xff] }
 0x26c   : > { %21477 = vst [vmem:[#allocation208_spill] sm:$0xff] %v18701_v0 }
 0x26d   : > { %12456 = vmatmul.mubr.msk.f32.gmra.mrb[124].mxu1 %vm838_vm1, %v21417_v59  ;;  %13330 = vmatmul.mubr.msk.f32.gmra.mrb[60].mxu0 %vm838_vm1, %v18085_v15  ;;  %v2766_v15 = vsel %vm2761_vm2, %v2763_v58, %v2765_v4  ;;  %v18666_v58 = vld [vmem:[%s15539_s6 + $0x498] sm:$0xff] }
 0x26e   : > { %12458 = vmatprep.mubr.msk.f32.mxu1 %vm838_vm1, %v21419_v14  ;;  %13332 = vmatprep.mubr.msk.f32.mxu0 %vm838_vm1, %v18092_v12  ;;  %v18468_v12 = vld [vmem:[#allocation5 + $0x40] sm:$0xff]  ;;  %21467 = vst [vmem:[#allocation72_spill] sm:$0xff] %v18666_v58 }
 0x26f   : > { %13625 = vmatprep.subr.mxu0 %v18468_v12  ;;  %v21468_v59 = vld [vmem:[#allocation62_spill] sm:$0xff]  ;;  %v21470_v4 = vld [vmem:[#allocation191_spill] sm:$0xff] }
 0x270   : > { %v18680_v14 = vld [vmem:[%s15539_s6 + $0x4b0] sm:$0xff] }
 0x271   : > { %12459 = vmatmul.mubr.msk.f32.gmra.mrb[126].mxu1 %vm838_vm1, %v21421_v16  ;;  %13333 = vmatmul.mubr.msk.f32.gmra.mrb[62].mxu0 %vm838_vm1, %v18099_v31  ;;  %v2770_v31 = vsel %vm2761_vm2, %v2767_v63, %v2769_v52  ;;  %21471 = vst [vmem:[#allocation75_spill] sm:$0xff] %v18680_v14  ;;  %v21474_v63 = vld [vmem:[#allocation196_spill] sm:$0xff]  ;;  %v21478_v52 = vld [vmem:[#allocation199_spill] sm:$0xff] }
 0x272   : > { %12463 = vmatprep.mubr.msk.f32.mxu1 %vm838_vm1, %v2764_v35  ;;  %13335 = vmatprep.mubr.msk.f32.mxu0 %vm838_vm1, %v18106_v30  ;;  %v18480_v30 = vld [vmem:[#allocation5 + $0x20] sm:$0xff] }
 0x273   : > { %v21472_v35 = vld [vmem:[#allocation194_spill] sm:$0xff] }
 0x274   : > { %v18694_v16 = vld [vmem:[%s15539_s6 + $0x4c0] sm:$0xff] }
 0x275   : > { %12464 = vmatmul.mubr.msk.f32.vlgmr.msra.gmra.mrb[0].mxu1 %vm838_vm1, %v2766_v15  ;;  %13336 = vmatmul.mubr.msk.f32.gmra.mrb[64].mxu0 %vm838_vm1, %v18113_v47  ;;  %v21423_v47 = vld [vmem:[#allocation104_spill] sm:$0xff]  ;;  %21475 = vst [vmem:[#allocation81_spill] sm:$0xff] %v18694_v16  ;;  %v21476_v15 = vld [vmem:[#allocation71_spill] sm:$0xff] }
 0x276   : > { %12656 = vmatpush3.msra.mxu1 %v18050_v7  ;;  %12466 = vmatprep.mubr.msk.f32.mxu1 %vm838_vm1, %v2768_v29  ;;  %v21422_v7 = vld [vmem:[#allocation102_spill] sm:$0xff] }
 0x277   : > { %13338 = vmatprep.mubr.msk.f32.mxu0 %vm838_vm1, %v18120_v6  ;;  %13819 = vmatprep.subr.mxu1 %v18480_v30  ;;  %v21424_v6 = vld [vmem:[#allocation105_spill] sm:$0xff] }
 0x278   : > { %v18708_v29 = vld [vmem:[%s15539_s6 + $0x4d8] sm:$0xff] }
 0x279   : > { %12467 = vmatmul.mubr.msk.f32.gmra.mrb[2].mxu1 %vm838_vm1, %v2770_v31  ;;  %13339 = vmatmul.mubr.msk.f32.gmra.mrb[66].mxu0 %vm838_vm1, %v18127_v46  ;;  %v21426_v46 = vld [vmem:[#allocation108_spill] sm:$0xff]  ;;  %21479 = vst [vmem:[#allocation84_spill] sm:$0xff] %v18708_v29  ;;  %v21480_v31 = vld [vmem:[#allocation202_spill] sm:$0xff] }
 0x27a   : > { %12469 = vmatprep.mubr.msk.f32.mxu1 %vm838_vm1, %v21422_v7  ;;  %13341 = vmatprep.mubr.msk.f32.mxu0 %vm838_vm1, %v18134_v8  ;;  %v21427_v8 = vld [vmem:[#allocation110_spill] sm:$0xff] }
 0x27b   : > { %v18715_v7 = vld [vmem:[%s15539_s6 + $0x4e0] sm:$0xff] }
 0x27c   : > { %21481 = vst [vmem:[#allocation85_spill] sm:$0xff] %v18715_v7 }
 0x27d   : > { %12470 = vmatmul.mubr.msk.f32.gmra.mrb[4].mxu1 %vm838_vm1, %v21423_v47  ;;  %13342 = vmatmul.mubr.msk.f32.gmra.mrb[68].mxu0 %vm838_vm1, %v18141_v26  ;;  %v21428_v26 = vld [vmem:[#allocation112_spill] sm:$0xff] }
 0x27e   : > { %12472 = vmatprep.mubr.msk.f32.mxu1 %vm838_vm1, %v21424_v6  ;;  %13344 = vmatprep.mubr.msk.f32.mxu0 %vm838_vm1, %v18148_v49  ;;  %v21429_v49 = vld [vmem:[#allocation114_spill] sm:$0xff]  ;;  %v21482_v47 = vld [vmem:[#allocation204_spill] sm:$0xff] }
 0x27f   : > { %v18722_v6 = vld [vmem:[%s15539_s6 + $0x4e8] sm:$0xff] }
 0x280   : > { %21483 = vst [vmem:[#allocation90_spill] sm:$0xff] %v18722_v6 }
 0x281   : > { %12473 = vmatmul.mubr.msk.f32.gmra.mrb[6].mxu1 %vm838_vm1, %v21425_v10  ;;  %13345 = vmatmul.mubr.msk.f32.gmra.mrb[70].mxu0 %vm838_vm1, %v18155_v40  ;;  %v21430_v40 = vld [vmem:[#allocation116_spill] sm:$0xff] }
 0x282   : > { %12475 = vmatprep.mubr.msk.f32.mxu1 %vm838_vm1, %v21426_v46  ;;  %13347 = vmatprep.mubr.msk.f32.mxu0 %vm838_vm1, %v18162_v51  ;;  %v21431_v51 = vld [vmem:[#allocation118_spill] sm:$0xff]  ;;  %v21484_v10 = vld [vmem:[#allocation80_spill] sm:$0xff] }
 0x285   : > { %12476 = vmatmul.mubr.msk.f32.gmra.mrb[8].mxu1 %vm838_vm1, %v21427_v8  ;;  %13348 = vmatmul.mubr.msk.f32.gmra.mrb[72].mxu0 %vm838_vm1, %v18169_v9  ;;  %v21432_v9 = vld [vmem:[#allocation120_spill] sm:$0xff] }
 0x286   : > { %12478 = vmatprep.mubr.msk.f32.mxu1 %vm838_vm1, %v21428_v26  ;;  %13350 = vmatprep.mubr.msk.f32.mxu0 %vm838_vm1, %v18176_v42  ;;  %v21433_v42 = vld [vmem:[#allocation122_spill] sm:$0xff] }
 0x289   : > { %12479 = vmatmul.mubr.msk.f32.gmra.mrb[10].mxu1 %vm838_vm1, %v21429_v49  ;;  %13351 = vmatmul.mubr.msk.f32.gmra.mrb[74].mxu0 %vm838_vm1, %v18183_v53  ;;  %v21434_v53 = vld [vmem:[#allocation124_spill] sm:$0xff] }
 0x28a   : > { %12481 = vmatprep.mubr.msk.f32.mxu1 %vm838_vm1, %v21430_v40  ;;  %13353 = vmatprep.mubr.msk.f32.mxu0 %vm838_vm1, %v18190_v60  ;;  %v21435_v60 = vld [vmem:[#allocation126_spill] sm:$0xff] }
 0x28d   : > { %12482 = vmatmul.mubr.msk.f32.gmra.mrb[12].mxu1 %vm838_vm1, %v21431_v51  ;;  %13354 = vmatmul.mubr.msk.f32.gmra.mrb[76].mxu0 %vm838_vm1, %v18197_v5  ;;  %v21436_v5 = vld [vmem:[#allocation128_spill] sm:$0xff] }
 0x28e   : > { %12484 = vmatprep.mubr.msk.f32.mxu1 %vm838_vm1, %v21432_v9  ;;  %13356 = vmatprep.mubr.msk.f32.mxu0 %vm838_vm1, %v18204_v17  ;;  %v21437_v17 = vld [vmem:[#allocation130_spill] sm:$0xff] }
 0x291   : > { %12485 = vmatmul.mubr.msk.f32.gmra.mrb[14].mxu1 %vm838_vm1, %v21433_v42  ;;  %13357 = vmatmul.mubr.msk.f32.gmra.mrb[78].mxu0 %vm838_vm1, %v18211_v41  ;;  %v21438_v41 = vld [vmem:[#allocation132_spill] sm:$0xff] }
 0x292   : > { %12487 = vmatprep.mubr.msk.f32.mxu1 %vm838_vm1, %v21434_v53  ;;  %13359 = vmatprep.mubr.msk.f32.mxu0 %vm838_vm1, %v18218_v37  ;;  %v21439_v37 = vld [vmem:[#allocation134_spill] sm:$0xff] }
 0x295   : > { %12488 = vmatmul.mubr.msk.f32.gmra.mrb[16].mxu1 %vm838_vm1, %v21435_v60  ;;  %13360 = vmatmul.mubr.msk.f32.gmra.mrb[80].mxu0 %vm838_vm1, %v18225_v56  ;;  %v21440_v56 = vld [vmem:[#allocation136_spill] sm:$0xff] }
 0x296   : > { %12490 = vmatprep.mubr.msk.f32.mxu1 %vm838_vm1, %v21436_v5  ;;  %13362 = vmatprep.mubr.msk.f32.mxu0 %vm838_vm1, %v18232_v48  ;;  %v21441_v48 = vld [vmem:[#allocation138_spill] sm:$0xff] }
 0x299   : > { %12491 = vmatmul.mubr.msk.f32.gmra.mrb[18].mxu1 %vm838_vm1, %v21437_v17  ;;  %13363 = vmatmul.mubr.msk.f32.gmra.mrb[82].mxu0 %vm838_vm1, %v18239_v19  ;;  %v21442_v19 = vld [vmem:[#allocation140_spill] sm:$0xff] }
 0x29a   : > { %12493 = vmatprep.mubr.msk.f32.mxu1 %vm838_vm1, %v21438_v41  ;;  %13365 = vmatprep.mubr.msk.f32.mxu0 %vm838_vm1, %v18246_v32  ;;  %v21443_v32 = vld [vmem:[#allocation142_spill] sm:$0xff] }
 0x29d   : > { %12494 = vmatmul.mubr.msk.f32.gmra.mrb[20].mxu1 %vm838_vm1, %v21439_v37  ;;  %13366 = vmatmul.mubr.msk.f32.gmra.mrb[84].mxu0 %vm838_vm1, %v18253_v24  ;;  %v21444_v24 = vld [vmem:[#allocation144_spill] sm:$0xff] }
 0x29e   : > { %12496 = vmatprep.mubr.msk.f32.mxu1 %vm838_vm1, %v21440_v56  ;;  %13368 = vmatprep.mubr.msk.f32.mxu0 %vm838_vm1, %v18260_v27  ;;  %v21445_v27 = vld [vmem:[#allocation146_spill] sm:$0xff] }
 0x2a1   : > { %12497 = vmatmul.mubr.msk.f32.gmra.mrb[22].mxu1 %vm838_vm1, %v21441_v48  ;;  %13369 = vmatmul.mubr.msk.f32.gmra.mrb[86].mxu0 %vm838_vm1, %v18267_v28  ;;  %v21446_v28 = vld [vmem:[#allocation148_spill] sm:$0xff] }
 0x2a2   : > { %12499 = vmatprep.mubr.msk.f32.mxu1 %vm838_vm1, %v21442_v19  ;;  %13371 = vmatprep.mubr.msk.f32.mxu0 %vm838_vm1, %v18274_v20  ;;  %v21447_v20 = vld [vmem:[#allocation150_spill] sm:$0xff] }
 0x2a5   : > { %12500 = vmatmul.mubr.msk.f32.gmra.mrb[24].mxu1 %vm838_vm1, %v21443_v32  ;;  %13372 = vmatmul.mubr.msk.f32.gmra.mrb[88].mxu0 %vm838_vm1, %v18281_v34  ;;  %v21448_v34 = vld [vmem:[#allocation152_spill] sm:$0xff] }
 0x2a6   : > { %12502 = vmatprep.mubr.msk.f32.mxu1 %vm838_vm1, %v21444_v24  ;;  %13374 = vmatprep.mubr.msk.f32.mxu0 %vm838_vm1, %v18288_v44  ;;  %v21449_v44 = vld [vmem:[#allocation154_spill] sm:$0xff] }
 0x2a9   : > { %12503 = vmatmul.mubr.msk.f32.gmra.mrb[26].mxu1 %vm838_vm1, %v21445_v27  ;;  %13375 = vmatmul.mubr.msk.f32.gmra.mrb[90].mxu0 %vm838_vm1, %v18295_v45  ;;  %v21450_v45 = vld [vmem:[#allocation156_spill] sm:$0xff] }
 0x2aa   : > { %12505 = vmatprep.mubr.msk.f32.mxu1 %vm838_vm1, %v21446_v28  ;;  %13377 = vmatprep.mubr.msk.f32.mxu0 %vm838_vm1, %v18302_v1  ;;  %v21451_v1 = vld [vmem:[#allocation158_spill] sm:$0xff] }
 0x2ad   : > { %12506 = vmatmul.mubr.msk.f32.gmra.mrb[28].mxu1 %vm838_vm1, %v21447_v20  ;;  %13378 = vmatmul.mubr.msk.f32.gmra.mrb[92].mxu0 %vm838_vm1, %v18309_v43  ;;  %v21452_v43 = vld [vmem:[#allocation160_spill] sm:$0xff] }
 0x2ae   : > { %12508 = vmatprep.mubr.msk.f32.mxu1 %vm838_vm1, %v21448_v34  ;;  %13380 = vmatprep.mubr.msk.f32.mxu0 %vm838_vm1, %v18316_v39  ;;  %v21453_v39 = vld [vmem:[#allocation162_spill] sm:$0xff] }
 0x2b1   : > { %12509 = vmatmul.mubr.msk.f32.gmra.mrb[30].mxu1 %vm838_vm1, %v21449_v44  ;;  %13381 = vmatmul.mubr.msk.f32.gmra.mrb[94].mxu0 %vm838_vm1, %v18323_v50  ;;  %v21454_v50 = vld [vmem:[#allocation164_spill] sm:$0xff] }
 0x2b2   : > { %12511 = vmatprep.mubr.msk.f32.mxu1 %vm838_vm1, %v21450_v45  ;;  %13383 = vmatprep.mubr.msk.f32.mxu0 %vm838_vm1, %v18330_v25  ;;  %v21455_v25 = vld [vmem:[#allocation168_spill] sm:$0xff] }
 0x2b5   : > { %12512 = vmatmul.mubr.msk.f32.gmra.mrb[32].mxu1 %vm838_vm1, %v21451_v1  ;;  %13384 = vmatmul.mubr.msk.f32.gmra.mrb[96].mxu0 %vm838_vm1, %v18337_v22  ;;  %v21456_v22 = vld [vmem:[#allocation171_spill] sm:$0xff] }
 0x2b6   : > { %12514 = vmatprep.mubr.msk.f32.mxu1 %vm838_vm1, %v21452_v43  ;;  %13386 = vmatprep.mubr.msk.f32.mxu0 %vm838_vm1, %v18344_v2  ;;  %v21457_v2 = vld [vmem:[#allocation44_spill] sm:$0xff] }
 0x2b9   : > { %12515 = vmatmul.mubr.msk.f32.gmra.mrb[34].mxu1 %vm838_vm1, %v21453_v39  ;;  %13387 = vmatmul.mubr.msk.f32.gmra.mrb[98].mxu0 %vm838_vm1, %v18351_v21  ;;  %v21458_v21 = vld [vmem:[#allocation175_spill] sm:$0xff] }
 0x2ba   : > { %12517 = vmatprep.mubr.msk.f32.mxu1 %vm838_vm1, %v21454_v50  ;;  %13389 = vmatprep.mubr.msk.f32.mxu0 %vm838_vm1, %v18358_v57  ;;  %v21459_v57 = vld [vmem:[#allocation178_spill] sm:$0xff] }
 0x2bd   : > { %12518 = vmatmul.mubr.msk.f32.gmra.mrb[36].mxu1 %vm838_vm1, %v21455_v25  ;;  %13390 = vmatmul.mubr.msk.f32.gmra.mrb[100].mxu0 %vm838_vm1, %v18365_v11  ;;  %v21460_v11 = vld [vmem:[#allocation180_spill] sm:$0xff] }
 0x2be   : > { %12520 = vmatprep.mubr.msk.f32.mxu1 %vm838_vm1, %v21456_v22  ;;  %13392 = vmatprep.mubr.msk.f32.mxu0 %vm838_vm1, %v18372_v54  ;;  %v21461_v54 = vld [vmem:[#allocation53_spill] sm:$0xff] }
 0x2c1   : > { %12521 = vmatmul.mubr.msk.f32.gmra.mrb[38].mxu1 %vm838_vm1, %v21457_v2  ;;  %13393 = vmatmul.mubr.msk.f32.gmra.mrb[102].mxu0 %vm838_vm1, %v18379_v23  ;;  %v18645_v23 = vld [vmem:[%s15539_s6 + $0x478] sm:$0xff] }
 0x2c2   : > { %12523 = vmatprep.mubr.msk.f32.mxu1 %vm838_vm1, %v21458_v21  ;;  %13395 = vmatprep.mubr.msk.f32.mxu0 %vm838_vm1, %v18386_v33  ;;  %v21462_v33 = vld [vmem:[#allocation183_spill] sm:$0xff] }
 0x2c5   : > { %12524 = vmatmul.mubr.msk.f32.gmra.mrb[40].mxu1 %vm838_vm1, %v21459_v57  ;;  %13396 = vmatmul.mubr.msk.f32.gmra.mrb[104].mxu0 %vm838_vm1, %v18393_v3  ;;  %v18652_v3 = vld [vmem:[%s15539_s6 + $0x488] sm:$0xff] }
 0x2c6   : > { %12526 = vmatprep.mubr.msk.f32.mxu1 %vm838_vm1, %v21460_v11  ;;  %13398 = vmatprep.mubr.msk.f32.mxu0 %vm838_vm1, %v18400_v13  ;;  %21463 = vst [vmem:[#allocation274_spill] sm:$0xff] %v18652_v3  ;;  %v18659_v13 = vld [vmem:[%s15539_s6 + $0x490] sm:$0xff] }
 0x2c7   : > { %21465 = vst [vmem:[#allocation67_spill] sm:$0xff] %v18659_v13 }
 0x2c9   : > { %12527 = vmatmul.mubr.msk.f32.gmra.mrb[42].mxu1 %vm838_vm1, %v21461_v54  ;;  %13399 = vmatmul.mubr.msk.f32.gmra.mrb[106].mxu0 %vm838_vm1, %v18645_v23 }
 0x2ca   : > { %12529 = vmatprep.mubr.msk.f32.mxu1 %vm838_vm1, %v21462_v33  ;;  %13401 = vmatprep.mubr.msk.f32.mxu0 %vm838_vm1, %v18652_v3 }
 0x2cd   : > { %12530 = vmatmul.mubr.msk.f32.gmra.mrb[44].mxu1 %vm838_vm1, %v21464_v18  ;;  %13402 = vmatmul.mubr.msk.f32.gmra.mrb[108].mxu0 %vm838_vm1, %v18659_v13  ;;  %v21503_v13 = vld [vmem:[#allocation230_spill] sm:$0xff] }
 0x2ce   : > { %12532 = vmatprep.mubr.msk.f32.mxu1 %vm838_vm1, %v21466_v62  ;;  %13404 = vmatprep.mubr.msk.f32.mxu0 %vm838_vm1, %v18666_v58  ;;  %v21499_v58 = vld [vmem:[#allocation226_spill] sm:$0xff] }
 0x2d1   : > { %12533 = vmatmul.mubr.msk.f32.gmra.mrb[46].mxu1 %vm838_vm1, %v21468_v59  ;;  %13405 = vmatmul.mubr.msk.f32.gmra.mrb[110].mxu0 %vm838_vm1, %v18673_v36  ;;  %v18760_v36 = vld [vmem:[%s15539_s6 + $0x538] sm:$0xff] }
 0x2d2   : > { %12535 = vmatprep.mubr.msk.f32.mxu1 %vm838_vm1, %v21470_v4  ;;  %13407 = vmatprep.mubr.msk.f32.mxu0 %vm838_vm1, %v18680_v14  ;;  %v21492_v14 = vld [vmem:[#allocation275_spill] sm:$0xff] }
 0x2d5   : > { %12536 = vmatmul.mubr.msk.f32.gmra.mrb[48].mxu1 %vm838_vm1, %v21472_v35  ;;  %13408 = vmatmul.mubr.msk.f32.gmra.mrb[112].mxu0 %vm838_vm1, %v18687_v38  ;;  %v21491_v38 = vld [vmem:[#allocation89_spill] sm:$0xff] }
 0x2d6   : > { %12538 = vmatprep.mubr.msk.f32.mxu1 %vm838_vm1, %v21474_v63  ;;  %13410 = vmatprep.mubr.msk.f32.mxu0 %vm838_vm1, %v18694_v16  ;;  %v21490_v16 = vld [vmem:[#allocation212_spill] sm:$0xff] }
 0x2d9   : > { %12539 = vmatmul.mubr.msk.f32.gmra.mrb[50].mxu1 %vm838_vm1, %v21476_v15  ;;  %13411 = vmatmul.mubr.msk.f32.gmra.mrb[114].mxu0 %vm838_vm1, %v18701_v0  ;;  %v21488_v0 = vld [vmem:[#allocation210_spill] sm:$0xff] }
 0x2da   : > { %12541 = vmatprep.mubr.msk.f32.mxu1 %vm838_vm1, %v21478_v52  ;;  %13413 = vmatprep.mubr.msk.f32.mxu0 %vm838_vm1, %v18708_v29  ;;  %v21486_v29 = vld [vmem:[#allocation207_spill] sm:$0xff] }
 0x2dd   : > { %12542 = vmatmul.mubr.msk.f32.gmra.mrb[52].mxu1 %vm838_vm1, %v21480_v31  ;;  %13414 = vmatmul.mubr.msk.f32.gmra.mrb[116].mxu0 %vm838_vm1, %v18715_v7  ;;  %v21487_v7 = vld [vmem:[#allocation270_spill] sm:$0xff] }
 0x2de   : > { %12544 = vmatprep.mubr.msk.f32.mxu1 %vm838_vm1, %v21482_v47  ;;  %13416 = vmatprep.mubr.msk.f32.mxu0 %vm838_vm1, %v18722_v6  ;;  %v21489_v6 = vld [vmem:[#allocation271_spill] sm:$0xff] }
 0x2e1   : > { %12545 = vmatmul.mubr.msk.f32.gmra.mrb[54].mxu1 %vm838_vm1, %v21484_v10  ;;  %13417 = vmatmul.mubr.msk.f32.gmra.mrb[118].mxu0 %vm838_vm1, %v18729_v55  ;;  %v18746_v55 = vld [vmem:[%s15539_s6 + $0x528] sm:$0xff]  ;;  %v15111_v10 = vld [vmem:[%s15539_s6 + $0x260] sm:$0xff] }
 0x2e2   : > { %12547 = vmatprep.mubr.msk.f32.mxu1 %vm838_vm1, %v21486_v29  ;;  %13419 = vmatprep.mubr.msk.f32.mxu0 %vm838_vm1, %v21487_v7  ;;  %v21493_v7 = vld [vmem:[#allocation215_spill] sm:$0xff]  ;;  %v7541_v3 = vrot.slane %v18746_v55, 1 }
 0x2e3   : > { %v19271_v29 = vld [vmem:[%s15539_s6 + $0x518] sm:$0xff] }
 0x2e4   : > { %21683 = vst [vmem:[#allocation220_spill] sm:$0xff] %v19271_v29 }
 0x2e5   : > { %12548 = vmatmul.mubr.msk.f32.gmra.mrb[56].mxu1 %vm838_vm1, %v21488_v0  ;;  %13420 = vmatmul.mubr.msk.f32.gmra.mrb[120].mxu0 %vm838_vm1, %v21489_v6  ;;  %v18757_v6 = vld [vmem:[%s15539_s6 + $0x530] sm:$0xff] }
 0x2e6   : > { %12550 = vmatprep.mubr.msk.f32.mxu1 %vm838_vm1, %v21490_v16  ;;  %13422 = vmatprep.mubr.msk.f32.mxu0 %vm838_vm1, %v17973_v61  ;;  %v21494_v16 = vld [vmem:[#allocation218_spill] sm:$0xff]  ;;  %v21495_v61 = vld [vmem:[#allocation221_spill] sm:$0xff]  ;;  %v21501_v0 = vld [vmem:[#allocation228_spill] sm:$0xff] }
 0x2e9   : > { %12551 = vmatmul.mubr.msk.f32.gmra.mrb[58].mxu1 %vm838_vm1, %v21491_v38  ;;  %13423 = vmatmul.mubr.msk.f32.gmra.mrb[122].mxu0 %vm838_vm1, %v21492_v14  ;;  %v18771_v14 = vld [vmem:[%s15539_s6 + $0x540] sm:$0xff] }
 0x2ea   : > { %12553 = vmatprep.mubr.msk.f32.mxu1 %vm838_vm1, %v21493_v7  ;;  %13425 = vmatprep.mubr.msk.f32.mxu0 %vm838_vm1, %v18746_v55  ;;  %v21496_v7 = vld [vmem:[#allocation222_spill] sm:$0xff]  ;;  %v21497_v38 = vld [vmem:[#allocation224_spill] sm:$0xff] }
 0x2ed   : > { %12554 = vmatmul.mubr.msk.f32.gmra.mrb[60].mxu1 %vm838_vm1, %v21494_v16  ;;  %13426 = vmatmul.mubr.msk.f32.gmra.mrb[124].mxu0 %vm838_vm1, %v18757_v6  ;;  %v21498_v16 = vld [vmem:[#allocation12_spill] sm:$0xff] }
 0x2ee   : > { %12556 = vmatprep.mubr.msk.f32.mxu1 %vm838_vm1, %v21495_v61  ;;  %13428 = vmatprep.mubr.msk.f32.mxu0 %vm838_vm1, %v18760_v36  ;;  %v21500_v61 = vld [vmem:[#allocation13_spill] sm:$0xff] }
 0x2f1   : > { %12557 = vmatmul.mubr.msk.f32.gmra.mrb[62].mxu1 %vm838_vm1, %v21496_v7  ;;  %13429 = vmatmul.mubr.msk.f32.gmra.mrb[126].mxu0 %vm838_vm1, %v18771_v14  ;;  %v21502_v7 = vld [vmem:[#allocation14_spill] sm:$0xff] }
 0x2f2   : > { %12559 = vmatprep.mubr.msk.f32.mxu1 %vm838_vm1, %v21497_v38  ;;  %13433 = vmatprep.mubr.msk.f32.mxu0 %vm838_vm1, %v21498_v16  ;;  %v21504_v38 = vld [vmem:[#allocation15_spill] sm:$0xff] }
 0x2f3   : > { %v21505_v16 = vld [vmem:[#allocation231_spill] sm:$0xff] }
 0x2f5   : > { %12560 = vmatmul.mubr.msk.f32.gmra.mrb[64].mxu1 %vm838_vm1, %v21499_v58  ;;  %13434 = vmatmul.mubr.msk.f32.vlgmr.msra.gmra.mrb[0].mxu0 %vm838_vm1, %v21500_v61  ;;  %v21506_v58 = vld [vmem:[#allocation16_spill] sm:$0xff]  ;;  %v21507_v61 = vld [vmem:[#allocation233_spill] sm:$0xff] }
 0x2f6   : > { %12562 = vmatprep.mubr.msk.f32.mxu1 %vm838_vm1, %v21501_v0  ;;  %13626 = vmatpush3.msra.mxu0 %v18468_v12  ;;  %v21508_v0 = vld [vmem:[#allocation17_spill] sm:$0xff]  ;;  %v21509_v12 = vld [vmem:[#allocation234_spill] sm:$0xff] }
 0x2f7   : > { %13436 = vmatprep.mubr.msk.f32.mxu0 %vm838_vm1, %v21502_v7  ;;  %v21510_v7 = vld [vmem:[#allocation18_spill] sm:$0xff] }
 0x2f9   : > { %12563 = vmatmul.mubr.msk.f32.gmra.mrb[66].mxu1 %vm838_vm1, %v21503_v13  ;;  %13437 = vmatmul.mubr.msk.f32.gmra.mrb[2].mxu0 %vm838_vm1, %v21504_v38  ;;  %v21511_v13 = vld [vmem:[#allocation236_spill] sm:$0xff]  ;;  %v21512_v38 = vld [vmem:[#allocation19_spill] sm:$0xff] }
 0x2fa   : > { %12565 = vmatprep.mubr.msk.f32.mxu1 %vm838_vm1, %v21505_v16  ;;  %13439 = vmatprep.mubr.msk.f32.mxu0 %vm838_vm1, %v21506_v58  ;;  %v21513_v16 = vld [vmem:[#allocation237_spill] sm:$0xff]  ;;  %v21514_v58 = vld [vmem:[#allocation20_spill] sm:$0xff] }
 0x2fd   : > { %12566 = vmatmul.mubr.msk.f32.gmra.mrb[68].mxu1 %vm838_vm1, %v21507_v61  ;;  %13440 = vmatmul.mubr.msk.f32.gmra.mrb[4].mxu0 %vm838_vm1, %v21508_v0  ;;  %v21515_v61 = vld [vmem:[#allocation239_spill] sm:$0xff]  ;;  %v21516_v0 = vld [vmem:[#allocation21_spill] sm:$0xff] }
 0x2fe   : > { %12568 = vmatprep.mubr.msk.f32.mxu1 %vm838_vm1, %v21509_v12  ;;  %13442 = vmatprep.mubr.msk.f32.mxu0 %vm838_vm1, %v21510_v7  ;;  %v21517_v12 = vld [vmem:[#allocation240_spill] sm:$0xff]  ;;  %v21518_v7 = vld [vmem:[#allocation22_spill] sm:$0xff] }
 0x301   : > { %12569 = vmatmul.mubr.msk.f32.gmra.mrb[70].mxu1 %vm838_vm1, %v21511_v13  ;;  %13443 = vmatmul.mubr.msk.f32.gmra.mrb[6].mxu0 %vm838_vm1, %v21512_v38  ;;  %v21519_v13 = vld [vmem:[#allocation241_spill] sm:$0xff]  ;;  %v21520_v38 = vld [vmem:[#allocation23_spill] sm:$0xff] }
 0x302   : > { %12571 = vmatprep.mubr.msk.f32.mxu1 %vm838_vm1, %v21513_v16  ;;  %13445 = vmatprep.mubr.msk.f32.mxu0 %vm838_vm1, %v21514_v58  ;;  %v21521_v16 = vld [vmem:[#allocation242_spill] sm:$0xff]  ;;  %v21522_v58 = vld [vmem:[#allocation24_spill] sm:$0xff] }
 0x305   : > { %12572 = vmatmul.mubr.msk.f32.gmra.mrb[72].mxu1 %vm838_vm1, %v21515_v61  ;;  %13446 = vmatmul.mubr.msk.f32.gmra.mrb[8].mxu0 %vm838_vm1, %v21516_v0  ;;  %v21523_v61 = vld [vmem:[#allocation243_spill] sm:$0xff]  ;;  %v21524_v0 = vld [vmem:[#allocation25_spill] sm:$0xff] }
 0x306   : > { %12574 = vmatprep.mubr.msk.f32.mxu1 %vm838_vm1, %v21517_v12  ;;  %13448 = vmatprep.mubr.msk.f32.mxu0 %vm838_vm1, %v21518_v7  ;;  %v21525_v12 = vld [vmem:[#allocation244_spill] sm:$0xff]  ;;  %v21526_v7 = vld [vmem:[#allocation26_spill] sm:$0xff] }
 0x309   : > { %12575 = vmatmul.mubr.msk.f32.gmra.mrb[74].mxu1 %vm838_vm1, %v21519_v13  ;;  %13449 = vmatmul.mubr.msk.f32.gmra.mrb[10].mxu0 %vm838_vm1, %v21520_v38  ;;  %v21527_v13 = vld [vmem:[#allocation245_spill] sm:$0xff]  ;;  %v21528_v38 = vld [vmem:[#allocation27_spill] sm:$0xff] }
 0x30a   : > { %12577 = vmatprep.mubr.msk.f32.mxu1 %vm838_vm1, %v21521_v16  ;;  %13451 = vmatprep.mubr.msk.f32.mxu0 %vm838_vm1, %v21522_v58  ;;  %v21529_v16 = vld [vmem:[#allocation246_spill] sm:$0xff]  ;;  %v21530_v58 = vld [vmem:[#allocation28_spill] sm:$0xff] }
 0x30d   : > { %12578 = vmatmul.mubr.msk.f32.gmra.mrb[76].mxu1 %vm838_vm1, %v21523_v61  ;;  %13452 = vmatmul.mubr.msk.f32.gmra.mrb[12].mxu0 %vm838_vm1, %v21524_v0  ;;  %v21531_v61 = vld [vmem:[#allocation247_spill] sm:$0xff]  ;;  %v21532_v0 = vld [vmem:[#allocation29_spill] sm:$0xff] }
 0x30e   : > { %12580 = vmatprep.mubr.msk.f32.mxu1 %vm838_vm1, %v21525_v12  ;;  %13454 = vmatprep.mubr.msk.f32.mxu0 %vm838_vm1, %v21526_v7  ;;  %v21533_v12 = vld [vmem:[#allocation248_spill] sm:$0xff]  ;;  %v21534_v7 = vld [vmem:[#allocation30_spill] sm:$0xff] }
 0x311   : > { %12581 = vmatmul.mubr.msk.f32.gmra.mrb[78].mxu1 %vm838_vm1, %v21527_v13  ;;  %13455 = vmatmul.mubr.msk.f32.gmra.mrb[14].mxu0 %vm838_vm1, %v21528_v38  ;;  %v21535_v13 = vld [vmem:[#allocation249_spill] sm:$0xff]  ;;  %v21536_v38 = vld [vmem:[#allocation31_spill] sm:$0xff] }
 0x312   : > { %12583 = vmatprep.mubr.msk.f32.mxu1 %vm838_vm1, %v21529_v16  ;;  %13457 = vmatprep.mubr.msk.f32.mxu0 %vm838_vm1, %v21530_v58  ;;  %v21537_v16 = vld [vmem:[#allocation250_spill] sm:$0xff]  ;;  %v21538_v58 = vld [vmem:[#allocation32_spill] sm:$0xff] }
 0x315   : > { %12584 = vmatmul.mubr.msk.f32.gmra.mrb[80].mxu1 %vm838_vm1, %v21531_v61  ;;  %13458 = vmatmul.mubr.msk.f32.gmra.mrb[16].mxu0 %vm838_vm1, %v21532_v0  ;;  %v21539_v61 = vld [vmem:[#allocation251_spill] sm:$0xff]  ;;  %v21540_v0 = vld [vmem:[#allocation33_spill] sm:$0xff] }
 0x316   : > { %12586 = vmatprep.mubr.msk.f32.mxu1 %vm838_vm1, %v21533_v12  ;;  %13460 = vmatprep.mubr.msk.f32.mxu0 %vm838_vm1, %v21534_v7  ;;  %v21541_v12 = vld [vmem:[#allocation252_spill] sm:$0xff]  ;;  %v21542_v7 = vld [vmem:[#allocation34_spill] sm:$0xff] }
 0x319   : > { %12587 = vmatmul.mubr.msk.f32.gmra.mrb[82].mxu1 %vm838_vm1, %v21535_v13  ;;  %13461 = vmatmul.mubr.msk.f32.gmra.mrb[18].mxu0 %vm838_vm1, %v21536_v38  ;;  %v21543_v13 = vld [vmem:[#allocation253_spill] sm:$0xff]  ;;  %v21544_v38 = vld [vmem:[#allocation35_spill] sm:$0xff] }
 0x31a   : > { %12589 = vmatprep.mubr.msk.f32.mxu1 %vm838_vm1, %v21537_v16  ;;  %13463 = vmatprep.mubr.msk.f32.mxu0 %vm838_vm1, %v21538_v58  ;;  %v21545_v16 = vld [vmem:[#allocation254_spill] sm:$0xff]  ;;  %v21546_v58 = vld [vmem:[#allocation36_spill] sm:$0xff] }
 0x31d   : > { %12590 = vmatmul.mubr.msk.f32.gmra.mrb[84].mxu1 %vm838_vm1, %v21539_v61  ;;  %13464 = vmatmul.mubr.msk.f32.gmra.mrb[20].mxu0 %vm838_vm1, %v21540_v0  ;;  %v21547_v61 = vld [vmem:[#allocation255_spill] sm:$0xff]  ;;  %v21548_v0 = vld [vmem:[#allocation37_spill] sm:$0xff] }
 0x31e   : > { %12592 = vmatprep.mubr.msk.f32.mxu1 %vm838_vm1, %v21541_v12  ;;  %13466 = vmatprep.mubr.msk.f32.mxu0 %vm838_vm1, %v21542_v7  ;;  %v21549_v12 = vld [vmem:[#allocation256_spill] sm:$0xff]  ;;  %v21550_v7 = vld [vmem:[#allocation38_spill] sm:$0xff] }
 0x321   : > { %12593 = vmatmul.mubr.msk.f32.gmra.mrb[86].mxu1 %vm838_vm1, %v21543_v13  ;;  %13467 = vmatmul.mubr.msk.f32.gmra.mrb[22].mxu0 %vm838_vm1, %v21544_v38  ;;  %v21551_v13 = vld [vmem:[#allocation257_spill] sm:$0xff]  ;;  %v21552_v38 = vld [vmem:[#allocation39_spill] sm:$0xff] }
 0x322   : > { %12595 = vmatprep.mubr.msk.f32.mxu1 %vm838_vm1, %v21545_v16  ;;  %13469 = vmatprep.mubr.msk.f32.mxu0 %vm838_vm1, %v21546_v58  ;;  %v21553_v16 = vld [vmem:[#allocation258_spill] sm:$0xff]  ;;  %v21554_v58 = vld [vmem:[#allocation40_spill] sm:$0xff] }
 0x325   : > { %12596 = vmatmul.mubr.msk.f32.gmra.mrb[88].mxu1 %vm838_vm1, %v21547_v61  ;;  %13470 = vmatmul.mubr.msk.f32.gmra.mrb[24].mxu0 %vm838_vm1, %v21548_v0  ;;  %v21555_v61 = vld [vmem:[#allocation259_spill] sm:$0xff]  ;;  %v21556_v0 = vld [vmem:[#allocation42_spill] sm:$0xff] }
 0x326   : > { %12598 = vmatprep.mubr.msk.f32.mxu1 %vm838_vm1, %v21549_v12  ;;  %13472 = vmatprep.mubr.msk.f32.mxu0 %vm838_vm1, %v21550_v7  ;;  %v21557_v12 = vld [vmem:[#allocation260_spill] sm:$0xff]  ;;  %v21558_v7 = vld [vmem:[#allocation43_spill] sm:$0xff] }
 0x329   : > { %12599 = vmatmul.mubr.msk.f32.gmra.mrb[90].mxu1 %vm838_vm1, %v21551_v13  ;;  %13473 = vmatmul.mubr.msk.f32.gmra.mrb[26].mxu0 %vm838_vm1, %v21552_v38  ;;  %v21559_v13 = vld [vmem:[#allocation261_spill] sm:$0xff]  ;;  %v21560_v38 = vld [vmem:[#allocation46_spill] sm:$0xff] }
 0x32a   : > { %12601 = vmatprep.mubr.msk.f32.mxu1 %vm838_vm1, %v21553_v16  ;;  %13475 = vmatprep.mubr.msk.f32.mxu0 %vm838_vm1, %v21554_v58  ;;  %v21561_v16 = vld [vmem:[#allocation262_spill] sm:$0xff]  ;;  %v21562_v58 = vld [vmem:[#allocation47_spill] sm:$0xff] }
 0x32d   : > { %12602 = vmatmul.mubr.msk.f32.gmra.mrb[92].mxu1 %vm838_vm1, %v21555_v61  ;;  %13476 = vmatmul.mubr.msk.f32.gmra.mrb[28].mxu0 %vm838_vm1, %v21556_v0  ;;  %v21563_v61 = vld [vmem:[#allocation263_spill] sm:$0xff] }
 0x32e   : > { %12604 = vmatprep.mubr.msk.f32.mxu1 %vm838_vm1, %v21557_v12  ;;  %13478 = vmatprep.mubr.msk.f32.mxu0 %vm838_vm1, %v21558_v7  ;;  %v21564_v0 = vld [vmem:[#allocation51_spill] sm:$0xff]  ;;  %v21565_v12 = vld [vmem:[#allocation264_spill] sm:$0xff] }
 0x32f   : > { %v21566_v7 = vld [vmem:[#allocation52_spill] sm:$0xff] }
 0x331   : > { %12605 = vmatmul.mubr.msk.f32.gmra.mrb[94].mxu1 %vm838_vm1, %v21559_v13  ;;  %13479 = vmatmul.mubr.msk.f32.gmra.mrb[30].mxu0 %vm838_vm1, %v21560_v38  ;;  %v21567_v13 = vld [vmem:[#allocation165_spill] sm:$0xff]  ;;  %v21568_v38 = vld [vmem:[#allocation55_spill] sm:$0xff] }
 0x332   : > { %12607 = vmatprep.mubr.msk.f32.mxu1 %vm838_vm1, %v21561_v16  ;;  %13481 = vmatprep.mubr.msk.f32.mxu0 %vm838_vm1, %v21562_v58  ;;  %v21569_v16 = vld [vmem:[#allocation166_spill] sm:$0xff]  ;;  %v21570_v58 = vld [vmem:[#allocation56_spill] sm:$0xff] }
 0x335   : > { %12608 = vmatmul.mubr.msk.f32.gmra.mrb[96].mxu1 %vm838_vm1, %v21563_v61  ;;  %13482 = vmatmul.mubr.msk.f32.gmra.mrb[32].mxu0 %vm838_vm1, %v21564_v0  ;;  %v21571_v61 = vld [vmem:[#allocation170_spill] sm:$0xff]  ;;  %v21572_v0 = vld [vmem:[#allocation60_spill] sm:$0xff] }
 0x336   : > { %12610 = vmatprep.mubr.msk.f32.mxu1 %vm838_vm1, %v21565_v12  ;;  %13484 = vmatprep.mubr.msk.f32.mxu0 %vm838_vm1, %v21566_v7  ;;  %v21573_v12 = vld [vmem:[#allocation41_spill] sm:$0xff] }
 0x337   : > { %v21574_v7 = vld [vmem:[#allocation61_spill] sm:$0xff] }
 0x339   : > { %12611 = vmatmul.mubr.msk.f32.gmra.mrb[98].mxu1 %vm838_vm1, %v21567_v13  ;;  %13485 = vmatmul.mubr.msk.f32.gmra.mrb[34].mxu0 %vm838_vm1, %v21568_v38  ;;  %v21575_v13 = vld [vmem:[#allocation174_spill] sm:$0xff]  ;;  %v21576_v38 = vld [vmem:[#allocation64_spill] sm:$0xff] }
 0x33a   : > { %12613 = vmatprep.mubr.msk.f32.mxu1 %vm838_vm1, %v21569_v16  ;;  %13487 = vmatprep.mubr.msk.f32.mxu0 %vm838_vm1, %v21570_v58  ;;  %v21577_v16 = vld [vmem:[#allocation45_spill] sm:$0xff] }
 0x33b   : > { %v21578_v58 = vld [vmem:[#allocation65_spill] sm:$0xff] }
 0x33d   : > { %12614 = vmatmul.mubr.msk.f32.gmra.mrb[100].mxu1 %vm838_vm1, %v21571_v61  ;;  %13488 = vmatmul.mubr.msk.f32.gmra.mrb[36].mxu0 %vm838_vm1, %v21572_v0  ;;  %v21579_v61 = vld [vmem:[#allocation176_spill] sm:$0xff]  ;;  %v21580_v0 = vld [vmem:[#allocation69_spill] sm:$0xff] }
 0x33e   : > { %12616 = vmatprep.mubr.msk.f32.mxu1 %vm838_vm1, %v21573_v12  ;;  %13490 = vmatprep.mubr.msk.f32.mxu0 %vm838_vm1, %v21574_v7  ;;  %v21581_v12 = vld [vmem:[#allocation48_spill] sm:$0xff]  ;;  %v21582_v7 = vld [vmem:[#allocation70_spill] sm:$0xff] }
 0x341   : > { %12617 = vmatmul.mubr.msk.f32.gmra.mrb[102].mxu1 %vm838_vm1, %v21575_v13  ;;  %13491 = vmatmul.mubr.msk.f32.gmra.mrb[38].mxu0 %vm838_vm1, %v21576_v38  ;;  %v21583_v13 = vld [vmem:[#allocation49_spill] sm:$0xff] }
 0x342   : > { %12619 = vmatprep.mubr.msk.f32.mxu1 %vm838_vm1, %v21577_v16  ;;  %13493 = vmatprep.mubr.msk.f32.mxu0 %vm838_vm1, %v21578_v58  ;;  %v21584_v38 = vld [vmem:[#allocation73_spill] sm:$0xff]  ;;  %v21585_v16 = vld [vmem:[#allocation182_spill] sm:$0xff] }
 0x343   : > { %v21586_v58 = vld [vmem:[#allocation74_spill] sm:$0xff] }
 0x345   : > { %12620 = vmatmul.mubr.msk.f32.gmra.mrb[104].mxu1 %vm838_vm1, %v21579_v61  ;;  %13494 = vmatmul.mubr.msk.f32.gmra.mrb[40].mxu0 %vm838_vm1, %v21580_v0  ;;  %v21587_v61 = vld [vmem:[#allocation54_spill] sm:$0xff] }
 0x346   : > { %12622 = vmatprep.mubr.msk.f32.mxu1 %vm838_vm1, %v21581_v12  ;;  %13496 = vmatprep.mubr.msk.f32.mxu0 %vm838_vm1, %v21582_v7  ;;  %v21588_v0 = vld [vmem:[#allocation78_spill] sm:$0xff]  ;;  %v21589_v12 = vld [vmem:[#allocation184_spill] sm:$0xff]  ;;  %v21590_v7 = vld [vmem:[#allocation79_spill] sm:$0xff] }
 0x349   : > { %12623 = vmatmul.mubr.msk.f32.gmra.mrb[106].mxu1 %vm838_vm1, %v21583_v13  ;;  %13497 = vmatmul.mubr.msk.f32.gmra.mrb[42].mxu0 %vm838_vm1, %v21584_v38  ;;  %v21591_v13 = vld [vmem:[#allocation57_spill] sm:$0xff]  ;;  %v21592_v38 = vld [vmem:[#allocation82_spill] sm:$0xff] }
 0x34a   : > { %12625 = vmatprep.mubr.msk.f32.mxu1 %vm838_vm1, %v21585_v16  ;;  %13499 = vmatprep.mubr.msk.f32.mxu0 %vm838_vm1, %v21586_v58  ;;  %v21593_v16 = vld [vmem:[#allocation58_spill] sm:$0xff]  ;;  %v21594_v58 = vld [vmem:[#allocation83_spill] sm:$0xff] }
 0x34d   : > { %12626 = vmatmul.mubr.msk.f32.gmra.mrb[108].mxu1 %vm838_vm1, %v21587_v61  ;;  %13500 = vmatmul.mubr.msk.f32.gmra.mrb[44].mxu0 %vm838_vm1, %v21588_v0  ;;  %v21595_v61 = vld [vmem:[#allocation190_spill] sm:$0xff]  ;;  %v21596_v0 = vld [vmem:[#allocation87_spill] sm:$0xff] }
 0x34e   : > { %12628 = vmatprep.mubr.msk.f32.mxu1 %vm838_vm1, %v21589_v12  ;;  %13502 = vmatprep.mubr.msk.f32.mxu0 %vm838_vm1, %v21590_v7  ;;  %v21597_v12 = vld [vmem:[#allocation63_spill] sm:$0xff]  ;;  %v21598_v7 = vld [vmem:[#allocation88_spill] sm:$0xff] }
 0x351   : > { %12629 = vmatmul.mubr.msk.f32.gmra.mrb[110].mxu1 %vm838_vm1, %v21591_v13  ;;  %13503 = vmatmul.mubr.msk.f32.gmra.mrb[46].mxu0 %vm838_vm1, %v21592_v38  ;;  %v21599_v13 = vld [vmem:[#allocation192_spill] sm:$0xff]  ;;  %v21600_v38 = vld [vmem:[#allocation91_spill] sm:$0xff] }
 0x352   : > { %12631 = vmatprep.mubr.msk.f32.mxu1 %vm838_vm1, %v21593_v16  ;;  %13505 = vmatprep.mubr.msk.f32.mxu0 %vm838_vm1, %v21594_v58  ;;  %v21601_v16 = vld [vmem:[#allocation66_spill] sm:$0xff]  ;;  %v21602_v58 = vld [vmem:[#allocation92_spill] sm:$0xff] }
 0x355   : > { %12632 = vmatmul.mubr.msk.f32.gmra.mrb[112].mxu1 %vm838_vm1, %v21595_v61  ;;  %13506 = vmatmul.mubr.msk.f32.gmra.mrb[48].mxu0 %vm838_vm1, %v21596_v0  ;;  %v21603_v61 = vld [vmem:[#allocation198_spill] sm:$0xff]  ;;  %v21604_v0 = vld [vmem:[#allocation95_spill] sm:$0xff] }
 0x356   : > { %12634 = vmatprep.mubr.msk.f32.mxu1 %vm838_vm1, %v21597_v12  ;;  %13508 = vmatprep.mubr.msk.f32.mxu0 %vm838_vm1, %v21598_v7  ;;  %v21605_v12 = vld [vmem:[#allocation206_spill] sm:$0xff]  ;;  %v21606_v7 = vld [vmem:[#allocation96_spill] sm:$0xff] }
 0x359   : > { %12635 = vmatmul.mubr.msk.f32.gmra.mrb[114].mxu1 %vm838_vm1, %v21599_v13  ;;  %13509 = vmatmul.mubr.msk.f32.gmra.mrb[50].mxu0 %vm838_vm1, %v21600_v38  ;;  %v21607_v13 = vld [vmem:[#allocation265_spill] sm:$0xff] }
 0x35a   : > { %12637 = vmatprep.mubr.msk.f32.mxu1 %vm838_vm1, %v21601_v16  ;;  %13511 = vmatprep.mubr.msk.f32.mxu0 %vm838_vm1, %v21602_v58  ;;  %v21608_v38 = vld [vmem:[#allocation97_spill] sm:$0xff]  ;;  %v21609_v16 = vld [vmem:[#allocation266_spill] sm:$0xff] }
 0x35b   : > { %v21610_v58 = vld [vmem:[#allocation98_spill] sm:$0xff] }
 0x35d   : > { %12638 = vmatmul.mubr.msk.f32.gmra.mrb[116].mxu1 %vm838_vm1, %v21603_v61  ;;  %13512 = vmatmul.mubr.msk.f32.gmra.mrb[52].mxu0 %vm838_vm1, %v21604_v0  ;;  %v21611_v0 = vld [vmem:[#allocation267_spill] sm:$0xff] }
 0x35e   : > { %12640 = vmatprep.mubr.msk.f32.mxu1 %vm838_vm1, %v21605_v12  ;;  %13514 = vmatprep.mubr.msk.f32.mxu0 %vm838_vm1, %v21606_v7  ;;  %v21612_v12 = vld [vmem:[#allocation99_spill] sm:$0xff]  ;;  %v21613_v7 = vld [vmem:[#allocation214_spill] sm:$0xff] }
 0x35f   : > { %v15049_v61 = vld [vmem:[%s15539_s6 + $0x28] sm:$0xff] }
 0x361   : > { %12641 = vmatmul.mubr.msk.f32.gmra.mrb[118].mxu1 %vm838_vm1, %v21607_v13  ;;  %13515 = vmatmul.mubr.msk.f32.gmra.mrb[54].mxu0 %vm838_vm1, %v21608_v38  ;;  %v21614_v13 = vld [vmem:[#allocation100_spill] sm:$0xff] }
 0x362   : > { %12643 = vmatprep.mubr.msk.f32.mxu1 %vm838_vm1, %v21609_v16  ;;  %13517 = vmatprep.mubr.msk.f32.mxu0 %vm838_vm1, %v21610_v58  ;;  %v21615_v38 = vld [vmem:[#allocation268_spill] sm:$0xff]  ;;  %v21616_v16 = vld [vmem:[#allocation101_spill] sm:$0xff] }
 0x363   : > { %v21617_v58 = vld [vmem:[#allocation269_spill] sm:$0xff] }
 0x365   : > { %12644 = vmatmul.mubr.msk.f32.gmra.mrb[120].mxu1 %vm838_vm1, %v21611_v0  ;;  %13518 = vmatmul.mubr.msk.f32.gmra.mrb[56].mxu0 %vm838_vm1, %v21612_v12  ;;  %v21618_v0 = vld [vmem:[#allocation107_spill] sm:$0xff]  ;;  %v21619_v12 = vld [vmem:[#allocation272_spill] sm:$0xff] }
 0x366   : > { %12646 = vmatprep.mubr.msk.f32.mxu1 %vm838_vm1, %v21613_v7  ;;  %13520 = vmatprep.mubr.msk.f32.mxu0 %vm838_vm1, %v21614_v13  ;;  %v21620_v7 = vld [vmem:[#allocation109_spill] sm:$0xff] }
 0x367   : > { %v21621_v13 = vld [vmem:[#allocation273_spill] sm:$0xff] }
 0x369   : > { %12647 = vmatmul.mubr.msk.f32.gmra.mrb[122].mxu1 %vm838_vm1, %v21615_v38  ;;  %13521 = vmatmul.mubr.msk.f32.gmra.mrb[58].mxu0 %vm838_vm1, %v21616_v16  ;;  %v21622_v38 = vld [vmem:[#allocation111_spill] sm:$0xff]  ;;  %v21623_v16 = vld [vmem:[#allocation276_spill] sm:$0xff] }
 0x36a   : > { %12649 = vmatprep.mubr.msk.f32.mxu1 %vm838_vm1, %v21617_v58  ;;  %13523 = vmatprep.mubr.msk.f32.mxu0 %vm838_vm1, %v21618_v0  ;;  %v21624_v58 = vld [vmem:[#allocation113_spill] sm:$0xff] }
 0x36b   : > { %v19264_v0 = vld [vmem:[%s15539_s6 + $0x510] sm:$0xff] }
 0x36c   : > { %21682 = vst [vmem:[#allocation103_spill] sm:$0xff] %v19264_v0 }
 0x36d   : > { %12650 = vmatmul.mubr.msk.f32.gmra.mrb[124].mxu1 %vm838_vm1, %v21619_v12  ;;  %13524 = vmatmul.mubr.msk.f32.gmra.mrb[60].mxu0 %vm838_vm1, %v21620_v7  ;;  %v21625_v12 = vld [vmem:[#allocation115_spill] sm:$0xff] }
 0x36e   : > { %12652 = vmatprep.mubr.msk.f32.mxu1 %vm838_vm1, %v21621_v13  ;;  %13526 = vmatprep.mubr.msk.f32.mxu0 %vm838_vm1, %v21622_v38  ;;  %v15050_v7 = vld [vmem:[%s15539_s6 + $0x30] sm:$0xff]  ;;  %v15104_v38 = vld [vmem:[%s15539_s6 + $0x238] sm:$0xff] }
 0x36f   : > { %v21626_v13 = vld [vmem:[#allocation117_spill] sm:$0xff] }
 0x371   : > { %12653 = vmatmul.mubr.msk.f32.gmra.mrb[126].mxu1 %vm838_vm1, %v21623_v16  ;;  %13527 = vmatmul.mubr.msk.f32.gmra.mrb[62].mxu0 %vm838_vm1, %v21624_v58  ;;  %v15051_v16 = vld [vmem:[%s15539_s6 + $0x38] sm:$0xff] }
 0x372   : > { %12657 = vmatprep.mubr.msk.f32.mxu1 %vm838_vm1, %v15049_v61  ;;  %13529 = vmatprep.mubr.msk.f32.mxu0 %vm838_vm1, %v21625_v12  ;;  %v21627_v58 = vld [vmem:[#allocation119_spill] sm:$0xff]  ;;  %v21628_v12 = vld [vmem:[#allocation121_spill] sm:$0xff] }
 0x373   : > { %v15052_v61 = vld [vmem:[%s15539_s6 + $0x40] sm:$0xff] }
 0x375   : > { %12658 = vmatmul.mubr.msk.f32.vlgmr.msra.gmra.mrb[0].mxu1 %vm838_vm1, %v15050_v7  ;;  %13530 = vmatmul.mubr.msk.f32.gmra.mrb[64].mxu0 %vm838_vm1, %v21626_v13  ;;  %v15053_v7 = vld [vmem:[%s15539_s6 + $0x50] sm:$0xff]  ;;  %v15054_v13 = vld [vmem:[%s15539_s6 + $0x58] sm:$0xff] }
 0x376   : > { %13820 = vmatpush3.msra.mxu1 %v18480_v30  ;;  %12660 = vmatprep.mubr.msk.f32.mxu1 %vm838_vm1, %v15051_v16  ;;  %v21629_v30 = vld [vmem:[#allocation123_spill] sm:$0xff]  ;;  %v21630_v16 = vld [vmem:[#allocation125_spill] sm:$0xff] }
 0x377   : > { %13532 = vmatprep.mubr.msk.f32.mxu0 %vm838_vm1, %v21627_v58  ;;  %v15055_v58 = vld [vmem:[%s15539_s6 + $0x60] sm:$0xff] }
 0x379   : > { %12661 = vmatmul.mubr.msk.f32.gmra.mrb[2].mxu1 %vm838_vm1, %v15052_v61  ;;  %13533 = vmatmul.mubr.msk.f32.gmra.mrb[66].mxu0 %vm838_vm1, %v21628_v12  ;;  %v21631_v61 = vld [vmem:[#allocation127_spill] sm:$0xff] }
 0x37a   : > { %12663 = vmatprep.mubr.msk.f32.mxu1 %vm838_vm1, %v15053_v7  ;;  %13535 = vmatprep.mubr.msk.f32.mxu0 %vm838_vm1, %v21629_v30  ;;  %v15056_v12 = vld [vmem:[%s15539_s6 + $0x68] sm:$0xff]  ;;  %v15057_v30 = vld [vmem:[%s15539_s6 + $0x78] sm:$0xff] }
 0x37b   : > { %v21632_v7 = vld [vmem:[#allocation129_spill] sm:$0xff] }
 0x37d   : > { %12664 = vmatmul.mubr.msk.f32.gmra.mrb[4].mxu1 %vm838_vm1, %v15054_v13  ;;  %13536 = vmatmul.mubr.msk.f32.gmra.mrb[68].mxu0 %vm838_vm1, %v21630_v16  ;;  %v21633_v13 = vld [vmem:[#allocation131_spill] sm:$0xff] }
 0x37e   : > { %12666 = vmatprep.mubr.msk.f32.mxu1 %vm838_vm1, %v15055_v58  ;;  %13538 = vmatprep.mubr.msk.f32.mxu0 %vm838_vm1, %v21631_v61  ;;  %v15058_v16 = vld [vmem:[%s15539_s6 + $0x80] sm:$0xff]  ;;  %v15059_v61 = vld [vmem:[%s15539_s6 + $0x88] sm:$0xff] }
 0x37f   : > { %v21634_v58 = vld [vmem:[#allocation133_spill] sm:$0xff] }
 0x381   : > { %12667 = vmatmul.mubr.msk.f32.gmra.mrb[6].mxu1 %vm838_vm1, %v15056_v12  ;;  %13539 = vmatmul.mubr.msk.f32.gmra.mrb[70].mxu0 %vm838_vm1, %v21632_v7  ;;  %v21635_v12 = vld [vmem:[#allocation135_spill] sm:$0xff] }
 0x382   : > { %12669 = vmatprep.mubr.msk.f32.mxu1 %vm838_vm1, %v15057_v30  ;;  %13541 = vmatprep.mubr.msk.f32.mxu0 %vm838_vm1, %v21633_v13  ;;  %v15060_v7 = vld [vmem:[%s15539_s6 + $0x90] sm:$0xff]  ;;  %v15061_v13 = vld [vmem:[%s15539_s6 + $0xa0] sm:$0xff] }
 0x383   : > { %v21636_v30 = vld [vmem:[#allocation137_spill] sm:$0xff] }
 0x385   : > { %12670 = vmatmul.mubr.msk.f32.gmra.mrb[8].mxu1 %vm838_vm1, %v15058_v16  ;;  %13542 = vmatmul.mubr.msk.f32.gmra.mrb[72].mxu0 %vm838_vm1, %v21634_v58  ;;  %v21637_v16 = vld [vmem:[#allocation139_spill] sm:$0xff] }
 0x386   : > { %12672 = vmatprep.mubr.msk.f32.mxu1 %vm838_vm1, %v15059_v61  ;;  %13544 = vmatprep.mubr.msk.f32.mxu0 %vm838_vm1, %v21635_v12  ;;  %v15062_v58 = vld [vmem:[%s15539_s6 + $0xa8] sm:$0xff]  ;;  %v15063_v12 = vld [vmem:[%s15539_s6 + $0xb0] sm:$0xff] }
 0x387   : > { %v21638_v61 = vld [vmem:[#allocation141_spill] sm:$0xff] }
 0x389   : > { %12673 = vmatmul.mubr.msk.f32.gmra.mrb[10].mxu1 %vm838_vm1, %v15060_v7  ;;  %13545 = vmatmul.mubr.msk.f32.gmra.mrb[74].mxu0 %vm838_vm1, %v21636_v30  ;;  %v21639_v7 = vld [vmem:[#allocation143_spill] sm:$0xff] }
 0x38a   : > { %12675 = vmatprep.mubr.msk.f32.mxu1 %vm838_vm1, %v15061_v13  ;;  %13547 = vmatprep.mubr.msk.f32.mxu0 %vm838_vm1, %v21637_v16  ;;  %v15064_v30 = vld [vmem:[%s15539_s6 + $0xb8] sm:$0xff]  ;;  %v15065_v16 = vld [vmem:[%s15539_s6 + $0xc8] sm:$0xff] }
 0x38b   : > { %v21640_v13 = vld [vmem:[#allocation145_spill] sm:$0xff] }
 0x38d   : > { %12676 = vmatmul.mubr.msk.f32.gmra.mrb[12].mxu1 %vm838_vm1, %v15062_v58  ;;  %13548 = vmatmul.mubr.msk.f32.gmra.mrb[76].mxu0 %vm838_vm1, %v21638_v61  ;;  %v21641_v58 = vld [vmem:[#allocation147_spill] sm:$0xff] }
 0x38e   : > { %12678 = vmatprep.mubr.msk.f32.mxu1 %vm838_vm1, %v15063_v12  ;;  %13550 = vmatprep.mubr.msk.f32.mxu0 %vm838_vm1, %v21639_v7  ;;  %v15066_v61 = vld [vmem:[%s15539_s6 + $0xd0] sm:$0xff]  ;;  %v15067_v7 = vld [vmem:[%s15539_s6 + $0xd8] sm:$0xff] }
 0x38f   : > { %v21642_v12 = vld [vmem:[#allocation149_spill] sm:$0xff] }
 0x391   : > { %12679 = vmatmul.mubr.msk.f32.gmra.mrb[14].mxu1 %vm838_vm1, %v15064_v30  ;;  %13551 = vmatmul.mubr.msk.f32.gmra.mrb[78].mxu0 %vm838_vm1, %v21640_v13  ;;  %v21643_v30 = vld [vmem:[#allocation151_spill] sm:$0xff] }
 0x392   : > { %12681 = vmatprep.mubr.msk.f32.mxu1 %vm838_vm1, %v15065_v16  ;;  %13553 = vmatprep.mubr.msk.f32.mxu0 %vm838_vm1, %v21641_v58  ;;  %v15068_v13 = vld [vmem:[%s15539_s6 + $0xe0] sm:$0xff]  ;;  %v15069_v58 = vld [vmem:[%s15539_s6 + $0xf0] sm:$0xff] }
 0x393   : > { %v21644_v16 = vld [vmem:[#allocation153_spill] sm:$0xff] }
 0x395   : > { %12682 = vmatmul.mubr.msk.f32.gmra.mrb[16].mxu1 %vm838_vm1, %v15066_v61  ;;  %13554 = vmatmul.mubr.msk.f32.gmra.mrb[80].mxu0 %vm838_vm1, %v21642_v12  ;;  %v21645_v61 = vld [vmem:[#allocation155_spill] sm:$0xff] }
 0x396   : > { %12684 = vmatprep.mubr.msk.f32.mxu1 %vm838_vm1, %v15067_v7  ;;  %13556 = vmatprep.mubr.msk.f32.mxu0 %vm838_vm1, %v21643_v30  ;;  %v15070_v12 = vld [vmem:[%s15539_s6 + $0xf8] sm:$0xff]  ;;  %v15071_v30 = vld [vmem:[%s15539_s6 + $0x100] sm:$0xff] }
 0x397   : > { %v21646_v7 = vld [vmem:[#allocation157_spill] sm:$0xff] }
 0x399   : > { %12685 = vmatmul.mubr.msk.f32.gmra.mrb[18].mxu1 %vm838_vm1, %v15068_v13  ;;  %13557 = vmatmul.mubr.msk.f32.gmra.mrb[82].mxu0 %vm838_vm1, %v21644_v16  ;;  %v21647_v13 = vld [vmem:[#allocation159_spill] sm:$0xff] }
 0x39a   : > { %12687 = vmatprep.mubr.msk.f32.mxu1 %vm838_vm1, %v15069_v58  ;;  %13559 = vmatprep.mubr.msk.f32.mxu0 %vm838_vm1, %v21645_v61  ;;  %v15072_v16 = vld [vmem:[%s15539_s6 + $0x108] sm:$0xff]  ;;  %v15073_v61 = vld [vmem:[%s15539_s6 + $0x118] sm:$0xff] }
 0x39b   : > { %v21648_v58 = vld [vmem:[#allocation161_spill] sm:$0xff] }
 0x39d   : > { %12688 = vmatmul.mubr.msk.f32.gmra.mrb[20].mxu1 %vm838_vm1, %v15070_v12  ;;  %13560 = vmatmul.mubr.msk.f32.gmra.mrb[84].mxu0 %vm838_vm1, %v21646_v7  ;;  %v21649_v12 = vld [vmem:[#allocation163_spill] sm:$0xff] }
 0x39e   : > { %12690 = vmatprep.mubr.msk.f32.mxu1 %vm838_vm1, %v15071_v30  ;;  %13562 = vmatprep.mubr.msk.f32.mxu0 %vm838_vm1, %v21647_v13  ;;  %v15074_v7 = vld [vmem:[%s15539_s6 + $0x120] sm:$0xff]  ;;  %v15075_v13 = vld [vmem:[%s15539_s6 + $0x128] sm:$0xff] }
 0x39f   : > { %v21650_v30 = vld [vmem:[#allocation167_spill] sm:$0xff] }
 0x3a1   : > { %12691 = vmatmul.mubr.msk.f32.gmra.mrb[22].mxu1 %vm838_vm1, %v15072_v16  ;;  %13563 = vmatmul.mubr.msk.f32.gmra.mrb[86].mxu0 %vm838_vm1, %v21648_v58  ;;  %v21651_v16 = vld [vmem:[#allocation169_spill] sm:$0xff] }
 0x3a2   : > { %12693 = vmatprep.mubr.msk.f32.mxu1 %vm838_vm1, %v15073_v61  ;;  %13565 = vmatprep.mubr.msk.f32.mxu0 %vm838_vm1, %v21649_v12  ;;  %v15076_v58 = vld [vmem:[%s15539_s6 + $0x130] sm:$0xff]  ;;  %v15077_v12 = vld [vmem:[%s15539_s6 + $0x140] sm:$0xff] }
 0x3a3   : > { %v21652_v61 = vld [vmem:[#allocation172_spill] sm:$0xff] }
 0x3a5   : > { %12694 = vmatmul.mubr.msk.f32.gmra.mrb[24].mxu1 %vm838_vm1, %v15074_v7  ;;  %13566 = vmatmul.mubr.msk.f32.gmra.mrb[88].mxu0 %vm838_vm1, %v21650_v30  ;;  %v21653_v7 = vld [vmem:[#allocation173_spill] sm:$0xff] }
 0x3a6   : > { %12696 = vmatprep.mubr.msk.f32.mxu1 %vm838_vm1, %v15075_v13  ;;  %13568 = vmatprep.mubr.msk.f32.mxu0 %vm838_vm1, %v21651_v16  ;;  %v15078_v30 = vld [vmem:[%s15539_s6 + $0x148] sm:$0xff]  ;;  %v15079_v16 = vld [vmem:[%s15539_s6 + $0x150] sm:$0xff] }
 0x3a7   : > { %v21654_v13 = vld [vmem:[#allocation177_spill] sm:$0xff] }
 0x3a9   : > { %12697 = vmatmul.mubr.msk.f32.gmra.mrb[26].mxu1 %vm838_vm1, %v15076_v58  ;;  %13569 = vmatmul.mubr.msk.f32.gmra.mrb[90].mxu0 %vm838_vm1, %v21652_v61  ;;  %v21655_v58 = vld [vmem:[#allocation179_spill] sm:$0xff] }
 0x3aa   : > { %12699 = vmatprep.mubr.msk.f32.mxu1 %vm838_vm1, %v15077_v12  ;;  %13571 = vmatprep.mubr.msk.f32.mxu0 %vm838_vm1, %v21653_v7  ;;  %v15080_v61 = vld [vmem:[%s15539_s6 + $0x158] sm:$0xff]  ;;  %v15081_v7 = vld [vmem:[%s15539_s6 + $0x168] sm:$0xff] }
 0x3ab   : > { %v21656_v12 = vld [vmem:[#allocation50_spill] sm:$0xff] }
 0x3ad   : > { %12700 = vmatmul.mubr.msk.f32.gmra.mrb[28].mxu1 %vm838_vm1, %v15078_v30  ;;  %13572 = vmatmul.mubr.msk.f32.gmra.mrb[92].mxu0 %vm838_vm1, %v21654_v13  ;;  %v21657_v30 = vld [vmem:[#allocation181_spill] sm:$0xff] }
 0x3ae   : > { %12702 = vmatprep.mubr.msk.f32.mxu1 %vm838_vm1, %v15079_v16  ;;  %13574 = vmatprep.mubr.msk.f32.mxu0 %vm838_vm1, %v21655_v58  ;;  %v15082_v13 = vld [vmem:[%s15539_s6 + $0x170] sm:$0xff]  ;;  %v15083_v58 = vld [vmem:[%s15539_s6 + $0x178] sm:$0xff] }
 0x3af   : > { %v21658_v16 = vld [vmem:[#allocation185_spill] sm:$0xff] }
 0x3b1   : > { %12703 = vmatmul.mubr.msk.f32.gmra.mrb[30].mxu1 %vm838_vm1, %v15080_v61  ;;  %13575 = vmatmul.mubr.msk.f32.gmra.mrb[94].mxu0 %vm838_vm1, %v21656_v12  ;;  %v21659_v61 = vld [vmem:[#allocation187_spill] sm:$0xff] }
 0x3b2   : > { %12705 = vmatprep.mubr.msk.f32.mxu1 %vm838_vm1, %v15081_v7  ;;  %13577 = vmatprep.mubr.msk.f32.mxu0 %vm838_vm1, %v21657_v30  ;;  %v15084_v12 = vld [vmem:[%s15539_s6 + $0x180] sm:$0xff]  ;;  %v15085_v30 = vld [vmem:[%s15539_s6 + $0x190] sm:$0xff] }
 0x3b3   : > { %v21660_v7 = vld [vmem:[#allocation59_spill] sm:$0xff] }
 0x3b5   : > { %12706 = vmatmul.mubr.msk.f32.gmra.mrb[32].mxu1 %vm838_vm1, %v15082_v13  ;;  %13578 = vmatmul.mubr.msk.f32.gmra.mrb[96].mxu0 %vm838_vm1, %v21658_v16  ;;  %v21661_v13 = vld [vmem:[#allocation189_spill] sm:$0xff] }
 0x3b6   : > { %12708 = vmatprep.mubr.msk.f32.mxu1 %vm838_vm1, %v15083_v58  ;;  %13580 = vmatprep.mubr.msk.f32.mxu0 %vm838_vm1, %v21659_v61  ;;  %v15086_v16 = vld [vmem:[%s15539_s6 + $0x198] sm:$0xff]  ;;  %v15087_v61 = vld [vmem:[%s15539_s6 + $0x1a0] sm:$0xff] }
 0x3b7   : > { %v21662_v58 = vld [vmem:[#allocation193_spill] sm:$0xff] }
 0x3b9   : > { %12709 = vmatmul.mubr.msk.f32.gmra.mrb[34].mxu1 %vm838_vm1, %v15084_v12  ;;  %13581 = vmatmul.mubr.msk.f32.gmra.mrb[98].mxu0 %vm838_vm1, %v21660_v7  ;;  %v21663_v12 = vld [vmem:[#allocation195_spill] sm:$0xff] }
 0x3ba   : > { %12711 = vmatprep.mubr.msk.f32.mxu1 %vm838_vm1, %v15085_v30  ;;  %13583 = vmatprep.mubr.msk.f32.mxu0 %vm838_vm1, %v21661_v13  ;;  %v15088_v7 = vld [vmem:[%s15539_s6 + $0x1a8] sm:$0xff]  ;;  %v15089_v13 = vld [vmem:[%s15539_s6 + $0x1b8] sm:$0xff] }
 0x3bb   : > { %v21664_v30 = vld [vmem:[#allocation68_spill] sm:$0xff] }
 0x3bd   : > { %12712 = vmatmul.mubr.msk.f32.gmra.mrb[36].mxu1 %vm838_vm1, %v15086_v16  ;;  %13584 = vmatmul.mubr.msk.f32.gmra.mrb[100].mxu0 %vm838_vm1, %v21662_v58  ;;  %v21665_v16 = vld [vmem:[#allocation197_spill] sm:$0xff] }
 0x3be   : > { %12714 = vmatprep.mubr.msk.f32.mxu1 %vm838_vm1, %v15087_v61  ;;  %13586 = vmatprep.mubr.msk.f32.mxu0 %vm838_vm1, %v21663_v12  ;;  %v15090_v58 = vld [vmem:[%s15539_s6 + $0x1c0] sm:$0xff]  ;;  %v15091_v12 = vld [vmem:[%s15539_s6 + $0x1c8] sm:$0xff] }
 0x3bf   : > { %v21666_v61 = vld [vmem:[#allocation201_spill] sm:$0xff] }
 0x3c1   : > { %12715 = vmatmul.mubr.msk.f32.gmra.mrb[38].mxu1 %vm838_vm1, %v15088_v7  ;;  %13587 = vmatmul.mubr.msk.f32.gmra.mrb[102].mxu0 %vm838_vm1, %v21664_v30  ;;  %v21667_v7 = vld [vmem:[#allocation203_spill] sm:$0xff] }
 0x3c2   : > { %12717 = vmatprep.mubr.msk.f32.mxu1 %vm838_vm1, %v15089_v13  ;;  %13589 = vmatprep.mubr.msk.f32.mxu0 %vm838_vm1, %v21665_v16  ;;  %v15092_v30 = vld [vmem:[%s15539_s6 + $0x1d0] sm:$0xff]  ;;  %v15093_v16 = vld [vmem:[%s15539_s6 + $0x1e0] sm:$0xff] }
 0x3c3   : > { %v21668_v13 = vld [vmem:[#allocation77_spill] sm:$0xff] }
 0x3c5   : > { %12718 = vmatmul.mubr.msk.f32.gmra.mrb[40].mxu1 %vm838_vm1, %v15090_v58  ;;  %13590 = vmatmul.mubr.msk.f32.gmra.mrb[104].mxu0 %vm838_vm1, %v21666_v61  ;;  %v21669_v58 = vld [vmem:[#allocation205_spill] sm:$0xff] }
 0x3c6   : > { %12720 = vmatprep.mubr.msk.f32.mxu1 %vm838_vm1, %v15091_v12  ;;  %13592 = vmatprep.mubr.msk.f32.mxu0 %vm838_vm1, %v21667_v7  ;;  %v15094_v61 = vld [vmem:[%s15539_s6 + $0x1e8] sm:$0xff]  ;;  %v15095_v7 = vld [vmem:[%s15539_s6 + $0x1f0] sm:$0xff] }
 0x3c7   : > { %v21670_v12 = vld [vmem:[#allocation209_spill] sm:$0xff] }
 0x3c9   : > { %12721 = vmatmul.mubr.msk.f32.gmra.mrb[42].mxu1 %vm838_vm1, %v15092_v30  ;;  %13593 = vmatmul.mubr.msk.f32.gmra.mrb[106].mxu0 %vm838_vm1, %v21668_v13  ;;  %v21671_v30 = vld [vmem:[#allocation211_spill] sm:$0xff] }
 0x3ca   : > { %12723 = vmatprep.mubr.msk.f32.mxu1 %vm838_vm1, %v15093_v16  ;;  %13595 = vmatprep.mubr.msk.f32.mxu0 %vm838_vm1, %v21669_v58  ;;  %v15096_v13 = vld [vmem:[%s15539_s6 + $0x1f8] sm:$0xff]  ;;  %v15097_v58 = vld [vmem:[%s15539_s6 + $0x208] sm:$0xff] }
 0x3cb   : > { %v21672_v16 = vld [vmem:[#allocation86_spill] sm:$0xff] }
 0x3cd   : > { %12724 = vmatmul.mubr.msk.f32.gmra.mrb[44].mxu1 %vm838_vm1, %v15094_v61  ;;  %13596 = vmatmul.mubr.msk.f32.gmra.mrb[108].mxu0 %vm838_vm1, %v21670_v12  ;;  %v21673_v61 = vld [vmem:[#allocation213_spill] sm:$0xff] }
 0x3ce   : > { %12726 = vmatprep.mubr.msk.f32.mxu1 %vm838_vm1, %v15095_v7  ;;  %13598 = vmatprep.mubr.msk.f32.mxu0 %vm838_vm1, %v21671_v30  ;;  %v15098_v12 = vld [vmem:[%s15539_s6 + $0x210] sm:$0xff]  ;;  %v15099_v30 = vld [vmem:[%s15539_s6 + $0x218] sm:$0xff] }
 0x3cf   : > { %v21674_v7 = vld [vmem:[#allocation217_spill] sm:$0xff] }
 0x3d1   : > { %12727 = vmatmul.mubr.msk.f32.gmra.mrb[46].mxu1 %vm838_vm1, %v15096_v13  ;;  %13599 = vmatmul.mubr.msk.f32.gmra.mrb[110].mxu0 %vm838_vm1, %v21672_v16  ;;  %v21675_v13 = vld [vmem:[#allocation219_spill] sm:$0xff] }
 0x3d2   : > { %12729 = vmatprep.mubr.msk.f32.mxu1 %vm838_vm1, %v15097_v58  ;;  %13601 = vmatprep.mubr.msk.f32.mxu0 %vm838_vm1, %v21673_v61  ;;  %v15100_v16 = vld [vmem:[%s15539_s6 + $0x220] sm:$0xff]  ;;  %v15101_v61 = vld [vmem:[%s15539_s6 + $0x230] sm:$0xff] }
 0x3d3   : > { %v21676_v58 = vld [vmem:[#allocation94_spill] sm:$0xff] }
 0x3d5   : > { %12730 = vmatmul.mubr.msk.f32.gmra.mrb[48].mxu1 %vm838_vm1, %v15098_v12  ;;  %13602 = vmatmul.mubr.msk.f32.gmra.mrb[112].mxu0 %vm838_vm1, %v21674_v7  ;;  %v21677_v12 = vld [vmem:[#allocation223_spill] sm:$0xff] }
 0x3d6   : > { %12732 = vmatprep.mubr.msk.f32.mxu1 %vm838_vm1, %v15099_v30  ;;  %13604 = vmatprep.mubr.msk.f32.mxu0 %vm838_vm1, %v21675_v13  ;;  %v19248_v7 = vld [vmem:[%s15539_s6 + $0x500] sm:$0xff]  ;;  %v19252_v13 = vld [vmem:[%s15539_s6 + $0x508] sm:$0xff] }
 0x3d7   : > { %21678 = vst [vmem:[#allocation235_spill] sm:$0xff] %v19248_v7  ;;  %v4989_v30 = vrot.slane %v19248_v7, 1  ;;  %21679 = vst [vmem:[#allocation216_spill] sm:$0xff] %v19252_v13  ;;  %v4992_v7 = vrot.slane %v19264_v0, 1  ;;  %v15110_v0 = vld [vmem:[%s15539_s6 + $0x520] sm:$0x3] }
 0x3d9   : > { %12733 = vmatmul.mubr.msk.f32.gmra.mrb[50].mxu1 %vm838_vm1, %v15100_v16  ;;  %13605 = vmatmul.mubr.msk.f32.gmra.mrb[114].mxu0 %vm838_vm1, %v21676_v58  ;;  %v4990_v16 = vrot.slane %v19252_v13, 1  ;;  %v21680_v58 = vld [vmem:[#allocation225_spill] sm:$0xff] }
 0x3da   : > { %12735 = vmatprep.mubr.msk.f32.mxu1 %vm838_vm1, %v15101_v61  ;;  %13607 = vmatprep.mubr.msk.f32.mxu0 %vm838_vm1, %v21677_v12  ;;  %v15105_v61 = vld [vmem:[%s15539_s6 + $0x240] sm:$0xff] }
 0x3db   : > { %v21681_v12 = vld [vmem:[#allocation227_spill] sm:$0xff]  ;;  %v19268_v13 = vsel %vm547_vm0, %v4989_v30, %v4990_v16  ;;  %v19283_v30 = vsel %vm547_vm0, %v4990_v16, %v4992_v7 }
 0x3dc   : > { %v15113_v16 = vld [vmem:[%s15539_s6 + $0x270] sm:$0xff] }
 0x3dd   : > { %12736 = vmatmul.mubr.msk.f32.gmra.mrb[52].mxu1 %vm838_vm1, %v15104_v38  ;;  %13608 = vmatmul.mubr.msk.f32.gmra.mrb[116].mxu0 %vm838_vm1, %v21680_v58  ;;  %v4994_v38 = vrot.slane %v19271_v29, 1  ;;  %v15108_v58 = vld [vmem:[%s15539_s6 + $0x248] sm:$0xff]  ;;  %v4996_v29 = vrot.slane %v15110_v0, 1  ;;  %v7544_v0 = vrot.slane %v18760_v36, 1  ;;  %v15114_v36 = vld [vmem:[%s15539_s6 + $0x280] sm:$0xff] }
 0x3de   : > { %12738 = vmatprep.mubr.msk.f32.mxu1 %vm838_vm1, %v15105_v61  ;;  %13610 = vmatprep.mubr.msk.f32.mxu0 %vm838_vm1, %v21681_v12  ;;  %v21684_v61 = vld [vmem:[#allocation229_spill] sm:$0xff] }
 0x3df   : > { %v15109_v12 = vld [vmem:[%s15539_s6 + $0x258] sm:$0xff]  ;;  %v19301_v55 = vsel %vm547_vm0, %v4994_v38, %v4996_v29 }
 0x3e1   : > { %12739 = vmatmul.mubr.msk.f32.gmra.mrb[54].mxu1 %vm838_vm1, %v15108_v58  ;;  %13611 = vmatmul.mubr.msk.f32.gmra.mrb[118].mxu0 %vm838_vm1, %v21684_v61  ;;  %v7542_v58 = vrot.slane %v18757_v6, 1  ;;  %v19289_v61 = vsel %vm547_vm0, %v4992_v7, %v4994_v38  ;;  %v7546_v6 = vrot.slane %v18771_v14, 1  ;;  %v19306_v7 = vld [vmem:[%s15539_s6 + $0x548] sm:$0x3] }
 0x3e2   : > { %12741 = vmatprep.mubr.msk.f32.mxu1 %vm838_vm1, %v15109_v12  ;;  %13613 = vmatprep.mubr.msk.f32.mxu0 %vm838_vm1, %v19268_v13  ;;  %v15112_v12 = vld [vmem:[%s15539_s6 + $0x268] sm:$0xff] }
 0x3e3   : > { %v7545_v29 = vsel %vm547_vm0, %v7542_v58, %v7544_v0  ;;  %v7547_v14 = vsel %vm547_vm0, %v7544_v0, %v7546_v6  ;;  %v15115_v38 = vld [vmem:[%s15539_s6 + $0x288] sm:$0xff] }
 0x3e4   : > { %v15118_v0 = vld [vmem:[%s15539_s6 + $0x2a8] sm:$0xff] }
 0x3e5   : > { %12742 = vmatmul.mubr.msk.f32.gmra.mrb[56].mxu1 %vm838_vm1, %v15111_v10  ;;  %13614 = vmatmul.mubr.msk.f32.gmra.mrb[120].mxu0 %vm838_vm1, %v19283_v30  ;;  %v7543_v10 = vsel %vm547_vm0, %v7541_v3, %v7542_v58  ;;  %v7548_v3 = vrot.slane %v19306_v7, 1  ;;  %v15117_v58 = vld [vmem:[%s15539_s6 + $0x298] sm:$0xff] }
 0x3e6   : > { %12744 = vmatprep.mubr.msk.f32.mxu1 %vm838_vm1, %v15112_v12  ;;  %13616 = vmatprep.mubr.msk.f32.mxu0 %vm838_vm1, %v19289_v61  ;;  %v15116_v12 = vld [vmem:[%s15539_s6 + $0x290] sm:$0xff] }
 0x3e9   : > { %12745 = vmatmul.mubr.msk.f32.gmra.mrb[58].mxu1 %vm838_vm1, %v15113_v16  ;;  %13617 = vmatmul.mubr.msk.f32.gmra.mrb[122].mxu0 %vm838_vm1, %v19301_v55  ;;  %v15119_v16 = vld [vmem:[%s15539_s6 + $0x2b0] sm:$0xff] }
 0x3ea   : > { %12747 = vmatprep.mubr.msk.f32.mxu1 %vm838_vm1, %v15114_v36  ;;  %13619 = vmatprep.mubr.msk.f32.mxu0 %vm838_vm1, %v7543_v10  ;;  %v7549_v10 = vsel %vm547_vm0, %v7546_v6, %v7548_v3  ;;  %v15120_v6 = vld [vmem:[%s15539_s6 + $0x2b8] sm:$0xff]  ;;  %v15121_v36 = vld [vmem:[%s15539_s6 + $0x2c0] sm:$0xff]  ;;  %v15161_v3 = vld [vmem:[%s15539_s6 + $0x450] sm:$0xff] }
 0x3ed   : > { %12748 = vmatmul.mubr.msk.f32.gmra.mrb[60].mxu1 %vm838_vm1, %v15115_v38  ;;  %13620 = vmatmul.mubr.msk.f32.gmra.mrb[124].mxu0 %vm838_vm1, %v7545_v29  ;;  %v15164_v38 = vld [vmem:[%s15539_s6 + $0x470] sm:$0xff] }
 0x3ee   : > { %12750 = vmatprep.mubr.msk.f32.mxu1 %vm838_vm1, %v15116_v12  ;;  %13622 = vmatprep.mubr.msk.f32.mxu0 %vm838_vm1, %v7547_v14 }
 0x3f1   : > { %12751 = vmatmul.mubr.msk.f32.gmra.mrb[62].mxu1 %vm838_vm1, %v15117_v58  ;;  %13623 = vmatmul.mubr.msk.f32.gmra.mrb[126].mxu0 %vm838_vm1, %v7549_v10  ;;  %v21686_v10 = vld [vmem:[#allocation274_spill] sm:$0xff] }
 0x3f2   : > { %12753 = vmatprep.mubr.msk.f32.mxu1 %vm838_vm1, %v15118_v0  ;;  %13627 = vmatprep.mubr.msk.f32.mxu0 %vm838_vm1, %v21426_v46  ;;  %v15122_v46 = vld [vmem:[%s15539_s6 + $0x2d0] sm:$0xff] }
 0x3f5   : > { %12754 = vmatmul.mubr.msk.f32.gmra.mrb[64].mxu1 %vm838_vm1, %v15119_v16  ;;  %13628 = vmatmul.mubr.msk.f32.vlgmr.msra.gmra.mrb[0].mxu0 %vm838_vm1, %v21427_v8  ;;  %v15123_v8 = vld [vmem:[%s15539_s6 + $0x2d8] sm:$0xff] }
 0x3f6   : > { %12756 = vmatprep.mubr.msk.f32.mxu1 %vm838_vm1, %v15120_v6  ;;  %13630 = vmatprep.mubr.msk.f32.mxu0 %vm838_vm1, %v21428_v26  ;;  %v15124_v26 = vld [vmem:[%s15539_s6 + $0x2e0] sm:$0xff] }
 0x3f7   : > { %v21689_v16 = vld [vmem:[#allocation210_spill] sm:$0xff]  ;;  %v21691_v6 = vld [vmem:[#allocation212_spill] sm:$0xff] }
 0x3f9   : > { %12757 = vmatmul.mubr.msk.f32.gmra.mrb[66].mxu1 %vm838_vm1, %v15121_v36  ;;  %13631 = vmatmul.mubr.msk.f32.gmra.mrb[2].mxu0 %vm838_vm1, %v21429_v49  ;;  %v15125_v49 = vld [vmem:[%s15539_s6 + $0x2e8] sm:$0xff] }
 0x3fa   : > { %12759 = vmatprep.mubr.msk.f32.mxu1 %vm838_vm1, %v15122_v46  ;;  %13633 = vmatprep.mubr.msk.f32.mxu0 %vm838_vm1, %v21430_v40  ;;  %v15126_v40 = vld [vmem:[%s15539_s6 + $0x2f8] sm:$0xff] }
 0x3fd   : > { %12760 = vmatmul.mubr.msk.f32.gmra.mrb[68].mxu1 %vm838_vm1, %v15123_v8  ;;  %13634 = vmatmul.mubr.msk.f32.gmra.mrb[4].mxu0 %vm838_vm1, %v21431_v51  ;;  %v15127_v51 = vld [vmem:[%s15539_s6 + $0x300] sm:$0xff] }
 0x3fe   : > { %12762 = vmatprep.mubr.msk.f32.mxu1 %vm838_vm1, %v15124_v26  ;;  %13636 = vmatprep.mubr.msk.f32.mxu0 %vm838_vm1, %v21432_v9  ;;  %v15128_v9 = vld [vmem:[%s15539_s6 + $0x308] sm:$0xff] }
 0x3ff   : > { %v21692_v8 = vld [vmem:[#allocation200_spill] sm:$0xff]  ;;  %v21693_v26 = vld [vmem:[#allocation89_spill] sm:$0xff] }
 0x401   : > { %12763 = vmatmul.mubr.msk.f32.gmra.mrb[70].mxu1 %vm838_vm1, %v15125_v49  ;;  %13637 = vmatmul.mubr.msk.f32.gmra.mrb[6].mxu0 %vm838_vm1, %v21433_v42  ;;  %v15129_v42 = vld [vmem:[%s15539_s6 + $0x310] sm:$0xff] }
 0x402   : > { %12765 = vmatprep.mubr.msk.f32.mxu1 %vm838_vm1, %v15126_v40  ;;  %13639 = vmatprep.mubr.msk.f32.mxu0 %vm838_vm1, %v21434_v53  ;;  %v15130_v53 = vld [vmem:[%s15539_s6 + $0x320] sm:$0xff] }
 0x403   : > { %v21694_v49 = vld [vmem:[#allocation75_spill] sm:$0xff] }
 0x404   : > { %v21695_v40 = vld [vmem:[#allocation215_spill] sm:$0xff] }
 0x405   : > { %12766 = vmatmul.mubr.msk.f32.gmra.mrb[72].mxu1 %vm838_vm1, %v15127_v51  ;;  %13640 = vmatmul.mubr.msk.f32.gmra.mrb[8].mxu0 %vm838_vm1, %v21435_v60  ;;  %v15131_v60 = vld [vmem:[%s15539_s6 + $0x328] sm:$0xff] }
 0x406   : > { %12768 = vmatprep.mubr.msk.f32.mxu1 %vm838_vm1, %v15128_v9  ;;  %13642 = vmatprep.mubr.msk.f32.mxu0 %vm838_vm1, %v21436_v5  ;;  %v15132_v5 = vld [vmem:[%s15539_s6 + $0x330] sm:$0xff] }
 0x409   : > { %12769 = vmatmul.mubr.msk.f32.gmra.mrb[74].mxu1 %vm838_vm1, %v15129_v42  ;;  %13643 = vmatmul.mubr.msk.f32.gmra.mrb[10].mxu0 %vm838_vm1, %v21437_v17  ;;  %v15133_v17 = vld [vmem:[%s15539_s6 + $0x338] sm:$0xff] }
 0x40a   : > { %12771 = vmatprep.mubr.msk.f32.mxu1 %vm838_vm1, %v15130_v53  ;;  %13645 = vmatprep.mubr.msk.f32.mxu0 %vm838_vm1, %v21438_v41  ;;  %v15134_v41 = vld [vmem:[%s15539_s6 + $0x348] sm:$0xff] }
 0x40b   : > { %v21696_v42 = vld [vmem:[#allocation76_spill] sm:$0xff]  ;;  %v21697_v53 = vld [vmem:[#allocation218_spill] sm:$0xff] }
 0x40d   : > { %12772 = vmatmul.mubr.msk.f32.gmra.mrb[76].mxu1 %vm838_vm1, %v15131_v60  ;;  %13646 = vmatmul.mubr.msk.f32.gmra.mrb[12].mxu0 %vm838_vm1, %v21439_v37  ;;  %v15135_v37 = vld [vmem:[%s15539_s6 + $0x350] sm:$0xff] }
 0x40e   : > { %12774 = vmatprep.mubr.msk.f32.mxu1 %vm838_vm1, %v15132_v5  ;;  %13648 = vmatprep.mubr.msk.f32.mxu0 %vm838_vm1, %v21440_v56  ;;  %v15136_v56 = vld [vmem:[%s15539_s6 + $0x358] sm:$0xff] }
 0x40f   : > { %v21698_v60 = vld [vmem:[#allocation81_spill] sm:$0xff] }
 0x410   : > { %v21699_v5 = vld [vmem:[#allocation221_spill] sm:$0xff] }
 0x411   : > { %12775 = vmatmul.mubr.msk.f32.gmra.mrb[78].mxu1 %vm838_vm1, %v15133_v17  ;;  %13649 = vmatmul.mubr.msk.f32.gmra.mrb[14].mxu0 %vm838_vm1, %v21441_v48  ;;  %v15137_v48 = vld [vmem:[%s15539_s6 + $0x360] sm:$0xff] }
 0x412   : > { %12777 = vmatprep.mubr.msk.f32.mxu1 %vm838_vm1, %v15134_v41  ;;  %13651 = vmatprep.mubr.msk.f32.mxu0 %vm838_vm1, %v21442_v19  ;;  %v15138_v19 = vld [vmem:[%s15539_s6 + $0x370] sm:$0xff] }
 0x415   : > { %12778 = vmatmul.mubr.msk.f32.gmra.mrb[80].mxu1 %vm838_vm1, %v15135_v37  ;;  %13652 = vmatmul.mubr.msk.f32.gmra.mrb[16].mxu0 %vm838_vm1, %v21443_v32  ;;  %v15139_v32 = vld [vmem:[%s15539_s6 + $0x378] sm:$0xff] }
 0x416   : > { %12780 = vmatprep.mubr.msk.f32.mxu1 %vm838_vm1, %v15136_v56  ;;  %13654 = vmatprep.mubr.msk.f32.mxu0 %vm838_vm1, %v21444_v24  ;;  %v15140_v24 = vld [vmem:[%s15539_s6 + $0x380] sm:$0xff] }
 0x417   : > { %v21700_v37 = vld [vmem:[#allocation208_spill] sm:$0xff]  ;;  %v21701_v56 = vld [vmem:[#allocation222_spill] sm:$0xff] }
 0x419   : > { %12781 = vmatmul.mubr.msk.f32.gmra.mrb[82].mxu1 %vm838_vm1, %v15137_v48  ;;  %13655 = vmatmul.mubr.msk.f32.gmra.mrb[18].mxu0 %vm838_vm1, %v21445_v27  ;;  %v15141_v27 = vld [vmem:[%s15539_s6 + $0x388] sm:$0xff] }
 0x41a   : > { %12783 = vmatprep.mubr.msk.f32.mxu1 %vm838_vm1, %v15138_v19  ;;  %13657 = vmatprep.mubr.msk.f32.mxu0 %vm838_vm1, %v21446_v28  ;;  %v15142_v28 = vld [vmem:[%s15539_s6 + $0x398] sm:$0xff] }
 0x41b   : > { %v21702_v48 = vld [vmem:[#allocation84_spill] sm:$0xff] }
 0x41c   : > { %v21703_v19 = vld [vmem:[#allocation224_spill] sm:$0xff] }
 0x41d   : > { %12784 = vmatmul.mubr.msk.f32.gmra.mrb[84].mxu1 %vm838_vm1, %v15139_v32  ;;  %13658 = vmatmul.mubr.msk.f32.gmra.mrb[20].mxu0 %vm838_vm1, %v21447_v20  ;;  %v15143_v20 = vld [vmem:[%s15539_s6 + $0x3a0] sm:$0xff] }
 0x41e   : > { %12786 = vmatprep.mubr.msk.f32.mxu1 %vm838_vm1, %v15140_v24  ;;  %13660 = vmatprep.mubr.msk.f32.mxu0 %vm838_vm1, %v21448_v34  ;;  %v15144_v34 = vld [vmem:[%s15539_s6 + $0x3a8] sm:$0xff] }
 0x421   : > { %12787 = vmatmul.mubr.msk.f32.gmra.mrb[86].mxu1 %vm838_vm1, %v15141_v27  ;;  %13661 = vmatmul.mubr.msk.f32.gmra.mrb[22].mxu0 %vm838_vm1, %v21449_v44  ;;  %v15145_v44 = vld [vmem:[%s15539_s6 + $0x3b0] sm:$0xff] }
 0x422   : > { %12789 = vmatprep.mubr.msk.f32.mxu1 %vm838_vm1, %v15142_v28  ;;  %13663 = vmatprep.mubr.msk.f32.mxu0 %vm838_vm1, %v21450_v45  ;;  %v15146_v45 = vld [vmem:[%s15539_s6 + $0x3c0] sm:$0xff] }
 0x423   : > { %v21704_v27 = vld [vmem:[#allocation85_spill] sm:$0xff]  ;;  %v21705_v28 = vld [vmem:[#allocation226_spill] sm:$0xff] }
 0x425   : > { %12790 = vmatmul.mubr.msk.f32.gmra.mrb[88].mxu1 %vm838_vm1, %v15143_v20  ;;  %13664 = vmatmul.mubr.msk.f32.gmra.mrb[24].mxu0 %vm838_vm1, %v21451_v1  ;;  %v15147_v1 = vld [vmem:[%s15539_s6 + $0x3c8] sm:$0xff] }
 0x426   : > { %12792 = vmatprep.mubr.msk.f32.mxu1 %vm838_vm1, %v15144_v34  ;;  %13666 = vmatprep.mubr.msk.f32.mxu0 %vm838_vm1, %v21452_v43  ;;  %v15148_v43 = vld [vmem:[%s15539_s6 + $0x3d0] sm:$0xff] }
 0x427   : > { %v21706_v20 = vld [vmem:[#allocation90_spill] sm:$0xff]  ;;  %v21707_v34 = vld [vmem:[#allocation228_spill] sm:$0xff] }
 0x429   : > { %12793 = vmatmul.mubr.msk.f32.gmra.mrb[90].mxu1 %vm838_vm1, %v15145_v44  ;;  %13667 = vmatmul.mubr.msk.f32.gmra.mrb[26].mxu0 %vm838_vm1, %v21453_v39  ;;  %v15149_v39 = vld [vmem:[%s15539_s6 + $0x3d8] sm:$0xff] }
 0x42a   : > { %12795 = vmatprep.mubr.msk.f32.mxu1 %vm838_vm1, %v15146_v45  ;;  %13669 = vmatprep.mubr.msk.f32.mxu0 %vm838_vm1, %v21454_v50  ;;  %v15150_v50 = vld [vmem:[%s15539_s6 + $0x3e8] sm:$0xff] }
 0x42d   : > { %12796 = vmatmul.mubr.msk.f32.gmra.mrb[92].mxu1 %vm838_vm1, %v15147_v1  ;;  %13670 = vmatmul.mubr.msk.f32.gmra.mrb[28].mxu0 %vm838_vm1, %v21455_v25  ;;  %v15151_v25 = vld [vmem:[%s15539_s6 + $0x3f0] sm:$0xff] }
 0x42e   : > { %12798 = vmatprep.mubr.msk.f32.mxu1 %vm838_vm1, %v15148_v43  ;;  %13672 = vmatprep.mubr.msk.f32.mxu0 %vm838_vm1, %v21456_v22  ;;  %v15152_v22 = vld [vmem:[%s15539_s6 + $0x3f8] sm:$0xff] }
 0x42f   : > { %v21708_v1 = vld [vmem:[#allocation232_spill] sm:$0xff]  ;;  %v21709_v43 = vld [vmem:[#allocation230_spill] sm:$0xff] }
 0x431   : > { %12799 = vmatmul.mubr.msk.f32.gmra.mrb[94].mxu1 %vm838_vm1, %v15149_v39  ;;  %13673 = vmatmul.mubr.msk.f32.gmra.mrb[30].mxu0 %vm838_vm1, %v21457_v2  ;;  %v15153_v2 = vld [vmem:[%s15539_s6 + $0x400] sm:$0xff] }
 0x432   : > { %12801 = vmatprep.mubr.msk.f32.mxu1 %vm838_vm1, %v15150_v50  ;;  %13675 = vmatprep.mubr.msk.f32.mxu0 %vm838_vm1, %v21458_v21  ;;  %v15154_v21 = vld [vmem:[%s15539_s6 + $0x410] sm:$0xff] }
 0x433   : > { %v21710_v39 = vld [vmem:[#allocation235_spill] sm:$0xff] }
 0x434   : > { %v21711_v50 = vld [vmem:[#allocation231_spill] sm:$0xff] }
 0x435   : > { %12802 = vmatmul.mubr.msk.f32.gmra.mrb[96].mxu1 %vm838_vm1, %v15151_v25  ;;  %13676 = vmatmul.mubr.msk.f32.gmra.mrb[32].mxu0 %vm838_vm1, %v21459_v57  ;;  %v15155_v57 = vld [vmem:[%s15539_s6 + $0x418] sm:$0xff] }
 0x436   : > { %12804 = vmatprep.mubr.msk.f32.mxu1 %vm838_vm1, %v15152_v22  ;;  %13678 = vmatprep.mubr.msk.f32.mxu0 %vm838_vm1, %v21460_v11  ;;  %v15156_v11 = vld [vmem:[%s15539_s6 + $0x420] sm:$0xff] }
 0x439   : > { %12805 = vmatmul.mubr.msk.f32.gmra.mrb[98].mxu1 %vm838_vm1, %v15153_v2  ;;  %13679 = vmatmul.mubr.msk.f32.gmra.mrb[34].mxu0 %vm838_vm1, %v21461_v54  ;;  %v15157_v54 = vld [vmem:[%s15539_s6 + $0x428] sm:$0xff] }
 0x43a   : > { %12807 = vmatprep.mubr.msk.f32.mxu1 %vm838_vm1, %v15154_v21  ;;  %13681 = vmatprep.mubr.msk.f32.mxu0 %vm838_vm1, %v21462_v33  ;;  %v15158_v33 = vld [vmem:[%s15539_s6 + $0x438] sm:$0xff] }
 0x43b   : > { %v21712_v2 = vld [vmem:[#allocation216_spill] sm:$0xff]  ;;  %v21713_v21 = vld [vmem:[#allocation233_spill] sm:$0xff] }
 0x43d   : > { %12808 = vmatmul.mubr.msk.f32.gmra.mrb[100].mxu1 %vm838_vm1, %v15155_v57  ;;  %13682 = vmatmul.mubr.msk.f32.gmra.mrb[36].mxu0 %vm838_vm1, %v21464_v18  ;;  %v15159_v18 = vld [vmem:[%s15539_s6 + $0x440] sm:$0xff] }
 0x43e   : > { %12810 = vmatprep.mubr.msk.f32.mxu1 %vm838_vm1, %v15156_v11  ;;  %13684 = vmatprep.mubr.msk.f32.mxu0 %vm838_vm1, %v21466_v62  ;;  %v15160_v62 = vld [vmem:[%s15539_s6 + $0x448] sm:$0xff] }
 0x43f   : > { %v21714_v57 = vld [vmem:[#allocation103_spill] sm:$0xff]  ;;  %v21715_v11 = vld [vmem:[#allocation234_spill] sm:$0xff] }
 0x441   : > { %12811 = vmatmul.mubr.msk.f32.gmra.mrb[102].mxu1 %vm838_vm1, %v15157_v54  ;;  %13685 = vmatmul.mubr.msk.f32.gmra.mrb[38].mxu0 %vm838_vm1, %v21468_v59 }
 0x442   : > { %12813 = vmatprep.mubr.msk.f32.mxu1 %vm838_vm1, %v15158_v33  ;;  %13687 = vmatprep.mubr.msk.f32.mxu0 %vm838_vm1, %v21470_v4  ;;  %v15162_v4 = vld [vmem:[%s15539_s6 + $0x460] sm:$0xff] }
 0x445   : > { %12814 = vmatmul.mubr.msk.f32.gmra.mrb[104].mxu1 %vm838_vm1, %v15159_v18  ;;  %13688 = vmatmul.mubr.msk.f32.gmra.mrb[40].mxu0 %vm838_vm1, %v21472_v35  ;;  %v21716_v18 = vld [vmem:[#allocation220_spill] sm:$0xff] }
 0x446   : > { %12816 = vmatprep.mubr.msk.f32.mxu1 %vm838_vm1, %v15160_v62  ;;  %13690 = vmatprep.mubr.msk.f32.mxu0 %vm838_vm1, %v21474_v63  ;;  %v15163_v63 = vld [vmem:[%s15539_s6 + $0x468] sm:$0xff] }
 0x447   : > { %v21717_v62 = vld [vmem:[#allocation236_spill] sm:$0xff] }
 0x448   : > { %v19500_v59 = vpop.f32.mrb[0].mxu1 }
 0x449   : > { %v19502_v29 = vpop.f32.mrb[1].mxu1  ;;  %12817 = vmatmul.mubr.msk.f32.gmra.mrb[106].mxu1 %vm838_vm1, %v15161_v3  ;;  %13691 = vmatmul.mubr.msk.f32.gmra.mrb[42].mxu0 %vm838_vm1, %v21476_v15  ;;  %v21718_v3 = vld [vmem:[#allocation107_spill] sm:$0xff] }
 0x44a   : > { %12819 = vmatprep.mubr.msk.f32.mxu1 %vm838_vm1, %v15162_v4  ;;  %13693 = vmatprep.mubr.msk.f32.mxu0 %vm838_vm1, %v21478_v52  ;;  %v21685_v52 = vld [vmem:[#allocation80_spill] sm:$0xff]  ;;  %v21719_v4 = vld [vmem:[#allocation237_spill] sm:$0xff] }
 0x44c   : > { %v19512_v35 = vpop.f32.mrb[2].mxu1 }
 0x44d   : > { %v19514_v14 = vpop.f32.mrb[3].mxu1  ;;  %12820 = vmatmul.mubr.msk.f32.gmra.mrb[108].mxu1 %vm838_vm1, %v15163_v63  ;;  %13694 = vmatmul.mubr.msk.f32.gmra.mrb[44].mxu0 %vm838_vm1, %v21480_v31  ;;  %v21687_v31 = vld [vmem:[#allocation207_spill] sm:$0xff] }
 0x44e   : > { %12822 = vmatprep.mubr.msk.f32.mxu1 %vm838_vm1, %v15164_v38  ;;  %13696 = vmatprep.mubr.msk.f32.mxu0 %vm838_vm1, %v21482_v47  ;;  %v21688_v47 = vld [vmem:[#allocation67_spill] sm:$0xff] }
 0x450   : > { %v19524_v15 = vpop.f32.mrb[4].mxu1 }
 0x451   : > { %v19526_v12 = vpop.f32.mrb[5].mxu1  ;;  %12823 = vmatmul.mubr.msk.f32.gmra.mrb[110].mxu1 %vm838_vm1, %v18645_v23  ;;  %13697 = vmatmul.mubr.msk.f32.gmra.mrb[46].mxu0 %vm838_vm1, %v21685_v52  ;;  %v21690_v23 = vld [vmem:[#allocation72_spill] sm:$0xff]  ;;  %v21720_v52 = vld [vmem:[#allocation109_spill] sm:$0xff] }
 0x452   : > { %12825 = vmatprep.mubr.msk.f32.mxu1 %vm838_vm1, %v21686_v10  ;;  %13699 = vmatprep.mubr.msk.f32.mxu0 %vm838_vm1, %v21687_v31  ;;  %v21721_v10 = vld [vmem:[#allocation239_spill] sm:$0xff] }
 0x453   : > { %v21722_v31 = vld [vmem:[#allocation111_spill] sm:$0xff] }
 0x454   : > { %v19536_v58 = vpop.f32.mrb[6].mxu1 }
 0x455   : > { %v19538_v0 = vpop.f32.mrb[7].mxu1  ;;  %12826 = vmatmul.mubr.msk.f32.gmra.mrb[112].mxu1 %vm838_vm1, %v21688_v47  ;;  %13700 = vmatmul.mubr.msk.f32.gmra.mrb[48].mxu0 %vm838_vm1, %v21689_v16  ;;  %v21723_v47 = vld [vmem:[#allocation240_spill] sm:$0xff] }
 0x456   : > { %12828 = vmatprep.mubr.msk.f32.mxu1 %vm838_vm1, %v21690_v23  ;;  %13702 = vmatprep.mubr.msk.f32.mxu0 %vm838_vm1, %v21691_v6  ;;  %v21724_v6 = vld [vmem:[#allocation113_spill] sm:$0xff] }
 0x458   : > { %v19548_v36 = vpop.f32.mrb[8].mxu1 }
 0x459   : > { %v19550_v46 = vpop.f32.mrb[9].mxu1  ;;  %12829 = vmatmul.mubr.msk.f32.gmra.mrb[114].mxu1 %vm838_vm1, %v21692_v8  ;;  %13703 = vmatmul.mubr.msk.f32.gmra.mrb[50].mxu0 %vm838_vm1, %v21693_v26  ;;  %v21725_v8 = vld [vmem:[#allocation241_spill] sm:$0xff]  ;;  %v21726_v26 = vld [vmem:[#allocation115_spill] sm:$0xff] }
 0x45a   : > { %12831 = vmatprep.mubr.msk.f32.mxu1 %vm838_vm1, %v21694_v49  ;;  %13705 = vmatprep.mubr.msk.f32.mxu0 %vm838_vm1, %v21695_v40  ;;  %v21727_v49 = vld [vmem:[#allocation242_spill] sm:$0xff] }
 0x45c   : > { %v19560_v51 = vpop.f32.mrb[10].mxu1 }
 0x45d   : > { %v19562_v9 = vpop.f32.mrb[11].mxu1  ;;  %12832 = vmatmul.mubr.msk.f32.gmra.mrb[116].mxu1 %vm838_vm1, %v21696_v42  ;;  %13706 = vmatmul.mubr.msk.f32.gmra.mrb[52].mxu0 %vm838_vm1, %v21697_v53  ;;  %v21728_v53 = vld [vmem:[#allocation117_spill] sm:$0xff] }
 0x45e   : > { %12834 = vmatprep.mubr.msk.f32.mxu1 %vm838_vm1, %v21698_v60  ;;  %13708 = vmatprep.mubr.msk.f32.mxu0 %vm838_vm1, %v21699_v5  ;;  %v21729_v60 = vld [vmem:[#allocation243_spill] sm:$0xff] }
 0x45f   : > { %v21730_v5 = vld [vmem:[#allocation119_spill] sm:$0xff] }
 0x460   : > { %v19572_v17 = vpop.f32.mrb[12].mxu1 }
 0x461   : > { %v19574_v41 = vpop.f32.mrb[13].mxu1  ;;  %12835 = vmatmul.mubr.msk.f32.gmra.mrb[118].mxu1 %vm838_vm1, %v21700_v37  ;;  %13709 = vmatmul.mubr.msk.f32.gmra.mrb[54].mxu0 %vm838_vm1, %v21701_v56  ;;  %v21731_v37 = vld [vmem:[#allocation244_spill] sm:$0xff] }
 0x462   : > { %12837 = vmatprep.mubr.msk.f32.mxu1 %vm838_vm1, %v21702_v48  ;;  %13711 = vmatprep.mubr.msk.f32.mxu0 %vm838_vm1, %v21703_v19  ;;  %v21732_v19 = vld [vmem:[#allocation121_spill] sm:$0xff] }
 0x464   : > { %v19584_v32 = vpop.f32.mrb[14].mxu1 }
 0x465   : > { %v19586_v24 = vpop.f32.mrb[15].mxu1  ;;  %12838 = vmatmul.mubr.msk.f32.gmra.mrb[120].mxu1 %vm838_vm1, %v21704_v27  ;;  %13712 = vmatmul.mubr.msk.f32.gmra.mrb[56].mxu0 %vm838_vm1, %v21705_v28  ;;  %v21733_v27 = vld [vmem:[#allocation245_spill] sm:$0xff]  ;;  %v21734_v28 = vld [vmem:[#allocation123_spill] sm:$0xff] }
 0x466   : > { %12840 = vmatprep.mubr.msk.f32.mxu1 %vm838_vm1, %v21706_v20  ;;  %13714 = vmatprep.mubr.msk.f32.mxu0 %vm838_vm1, %v21707_v34  ;;  %v21735_v20 = vld [vmem:[#allocation246_spill] sm:$0xff] }
 0x468   : > { %v19596_v44 = vpop.f32.mrb[16].mxu1 }
 0x469   : > { %v19598_v45 = vpop.f32.mrb[17].mxu1  ;;  %12841 = vmatmul.mubr.msk.f32.gmra.mrb[122].mxu1 %vm838_vm1, %v21708_v1  ;;  %13715 = vmatmul.mubr.msk.f32.gmra.mrb[58].mxu0 %vm838_vm1, %v21709_v43  ;;  %v21736_v43 = vld [vmem:[#allocation125_spill] sm:$0xff] }
 0x46a   : > { %12843 = vmatprep.mubr.msk.f32.mxu1 %vm838_vm1, %v21710_v39  ;;  %13717 = vmatprep.mubr.msk.f32.mxu0 %vm838_vm1, %v21711_v50  ;;  %v21737_v39 = vld [vmem:[#allocation247_spill] sm:$0xff] }
 0x46b   : > { %v21738_v50 = vld [vmem:[#allocation127_spill] sm:$0xff] }
 0x46c   : > { %v19608_v25 = vpop.f32.mrb[18].mxu1 }
 0x46d   : > { %v19610_v22 = vpop.f32.mrb[19].mxu1  ;;  %12844 = vmatmul.mubr.msk.f32.gmra.mrb[124].mxu1 %vm838_vm1, %v21712_v2  ;;  %13718 = vmatmul.mubr.msk.f32.gmra.mrb[60].mxu0 %vm838_vm1, %v21713_v21  ;;  %v21739_v2 = vld [vmem:[#allocation248_spill] sm:$0xff] }
 0x46e   : > { %12846 = vmatprep.mubr.msk.f32.mxu1 %vm838_vm1, %v21714_v57  ;;  %13720 = vmatprep.mubr.msk.f32.mxu0 %vm838_vm1, %v21715_v11  ;;  %v21740_v11 = vld [vmem:[#allocation129_spill] sm:$0xff] }
 0x470   : > { %v19620_v54 = vpop.f32.mrb[20].mxu1 }
 0x471   : > { %v19622_v33 = vpop.f32.mrb[21].mxu1  ;;  %12847 = vmatmul.mubr.msk.f32.gmra.mrb[126].mxu1 %vm838_vm1, %v21716_v18  ;;  %13721 = vmatmul.mubr.msk.f32.gmra.mrb[62].mxu0 %vm838_vm1, %v21717_v62  ;;  %v21741_v18 = vld [vmem:[#allocation249_spill] sm:$0xff]  ;;  %v21742_v62 = vld [vmem:[#allocation131_spill] sm:$0xff] }
 0x472   : > { %12947 = vmatprep.mubr.msk.f32.mxu1 %vm838_vm1, %v21718_v3  ;;  %13723 = vmatprep.mubr.msk.f32.mxu0 %vm838_vm1, %v21719_v4  ;;  %v21743_v3 = vld [vmem:[#allocation250_spill] sm:$0xff] }
 0x474   : > { %v19632_v63 = vpop.f32.mrb[22].mxu1 }
 0x475   : > { %v19634_v38 = vpop.f32.mrb[23].mxu1  ;;  %12948 = vmatmul.mubr.msk.f32.vlgmr.msra.gmra.mrb[64].mxu1 %vm838_vm1, %v21720_v52  ;;  %13724 = vmatmul.mubr.msk.f32.gmra.mrb[64].mxu0 %vm838_vm1, %v21721_v10  ;;  %v21744_v10 = vld [vmem:[#allocation133_spill] sm:$0xff] }
 0x476   : > { %12950 = vmatprep.mubr.msk.f32.mxu1 %vm838_vm1, %v21722_v31  ;;  %13726 = vmatprep.mubr.msk.f32.mxu0 %vm838_vm1, %v21723_v47  ;;  %v21745_v31 = vld [vmem:[#allocation251_spill] sm:$0xff] }
 0x477   : > { %v21746_v47 = vld [vmem:[#allocation135_spill] sm:$0xff] }
 0x478   : > { %v19644_v16 = vpop.f32.mrb[24].mxu1 }
 0x479   : > { %v19646_v23 = vpop.f32.mrb[25].mxu1  ;;  %12951 = vmatmul.mubr.msk.f32.gmra.mrb[66].mxu1 %vm838_vm1, %v21724_v6  ;;  %13727 = vmatmul.mubr.msk.f32.gmra.mrb[66].mxu0 %vm838_vm1, %v21725_v8  ;;  %v21747_v6 = vld [vmem:[#allocation252_spill] sm:$0xff] }
 0x47a   : > { %12953 = vmatprep.mubr.msk.f32.mxu1 %vm838_vm1, %v21726_v26  ;;  %13729 = vmatprep.mubr.msk.f32.mxu0 %vm838_vm1, %v21727_v49  ;;  %v21748_v49 = vld [vmem:[#allocation137_spill] sm:$0xff] }
 0x47c   : > { %v19656_v40 = vpop.f32.mrb[26].mxu1 }
 0x47d   : > { %v19658_v42 = vpop.f32.mrb[27].mxu1  ;;  %12954 = vmatmul.mubr.msk.f32.gmra.mrb[68].mxu1 %vm838_vm1, %v21728_v53  ;;  %13730 = vmatmul.mubr.msk.f32.gmra.mrb[68].mxu0 %vm838_vm1, %v21729_v60  ;;  %v21749_v53 = vld [vmem:[#allocation253_spill] sm:$0xff]  ;;  %v21750_v60 = vld [vmem:[#allocation139_spill] sm:$0xff] }
 0x47e   : > { %12956 = vmatprep.mubr.msk.f32.mxu1 %vm838_vm1, %v21730_v5  ;;  %13732 = vmatprep.mubr.msk.f32.mxu0 %vm838_vm1, %v21731_v37  ;;  %v21751_v5 = vld [vmem:[#allocation254_spill] sm:$0xff] }
 0x480   : > { %v19668_v56 = vpop.f32.mrb[28].mxu1 }
 0x481   : > { %v19670_v48 = vpop.f32.mrb[29].mxu1  ;;  %12957 = vmatmul.mubr.msk.f32.gmra.mrb[70].mxu1 %vm838_vm1, %v21732_v19  ;;  %13733 = vmatmul.mubr.msk.f32.gmra.mrb[70].mxu0 %vm838_vm1, %v21733_v27  ;;  %v21752_v27 = vld [vmem:[#allocation141_spill] sm:$0xff] }
 0x482   : > { %12959 = vmatprep.mubr.msk.f32.mxu1 %vm838_vm1, %v21734_v28  ;;  %13735 = vmatprep.mubr.msk.f32.mxu0 %vm838_vm1, %v21735_v20  ;;  %v21753_v28 = vld [vmem:[#allocation255_spill] sm:$0xff] }
 0x483   : > { %v21754_v20 = vld [vmem:[#allocation143_spill] sm:$0xff] }
 0x484   : > { %v19680_v34 = vpop.f32.mrb[30].mxu1 }
 0x485   : > { %v19682_v1 = vpop.f32.mrb[31].mxu1  ;;  %12960 = vmatmul.mubr.msk.f32.gmra.mrb[72].mxu1 %vm838_vm1, %v21736_v43  ;;  %13736 = vmatmul.mubr.msk.f32.gmra.mrb[72].mxu0 %vm838_vm1, %v21737_v39  ;;  %v21755_v43 = vld [vmem:[#allocation256_spill] sm:$0xff] }
 0x486   : > { %12962 = vmatprep.mubr.msk.f32.mxu1 %vm838_vm1, %v21738_v50  ;;  %13738 = vmatprep.mubr.msk.f32.mxu0 %vm838_vm1, %v21739_v2  ;;  %v21756_v2 = vld [vmem:[#allocation145_spill] sm:$0xff] }
 0x488   : > { %v19692_v21 = vpop.f32.mrb[32].mxu1 }
 0x489   : > { %v19694_v57 = vpop.f32.mrb[33].mxu1  ;;  %12963 = vmatmul.mubr.msk.f32.gmra.mrb[74].mxu1 %vm838_vm1, %v21740_v11  ;;  %13739 = vmatmul.mubr.msk.f32.gmra.mrb[74].mxu0 %vm838_vm1, %v21741_v18  ;;  %v21757_v11 = vld [vmem:[#allocation257_spill] sm:$0xff]  ;;  %v21758_v18 = vld [vmem:[#allocation147_spill] sm:$0xff] }
 0x48a   : > { %12965 = vmatprep.mubr.msk.f32.mxu1 %vm838_vm1, %v21742_v62  ;;  %13741 = vmatprep.mubr.msk.f32.mxu0 %vm838_vm1, %v21743_v3  ;;  %v21759_v62 = vld [vmem:[#allocation258_spill] sm:$0xff] }
 0x48c   : > { %v19704_v4 = vpop.f32.mrb[34].mxu1 }
 0x48d   : > { %v19706_v52 = vpop.f32.mrb[35].mxu1  ;;  %12966 = vmatmul.mubr.msk.f32.gmra.mrb[76].mxu1 %vm838_vm1, %v21744_v10  ;;  %13742 = vmatmul.mubr.msk.f32.gmra.mrb[76].mxu0 %vm838_vm1, %v21745_v31  ;;  %v21760_v31 = vld [vmem:[#allocation149_spill] sm:$0xff] }
 0x48e   : > { %12968 = vmatprep.mubr.msk.f32.mxu1 %vm838_vm1, %v21746_v47  ;;  %13744 = vmatprep.mubr.msk.f32.mxu0 %vm838_vm1, %v21747_v6  ;;  %v21761_v47 = vld [vmem:[#allocation259_spill] sm:$0xff] }
 0x48f   : > { %v21762_v6 = vld [vmem:[#allocation151_spill] sm:$0xff] }
 0x490   : > { %v19716_v8 = vpop.f32.mrb[36].mxu1 }
 0x491   : > { %v19718_v26 = vpop.f32.mrb[37].mxu1  ;;  %12969 = vmatmul.mubr.msk.f32.gmra.mrb[78].mxu1 %vm838_vm1, %v21748_v49  ;;  %13745 = vmatmul.mubr.msk.f32.gmra.mrb[78].mxu0 %vm838_vm1, %v21749_v53  ;;  %v21763_v49 = vld [vmem:[#allocation260_spill] sm:$0xff] }
 0x492   : > { %12971 = vmatprep.mubr.msk.f32.mxu1 %vm838_vm1, %v21750_v60  ;;  %13747 = vmatprep.mubr.msk.f32.mxu0 %vm838_vm1, %v21751_v5  ;;  %v21764_v5 = vld [vmem:[#allocation153_spill] sm:$0xff] }
 0x494   : > { %v19728_v37 = vpop.f32.mrb[38].mxu1 }
 0x495   : > { %v19730_v19 = vpop.f32.mrb[39].mxu1  ;;  %12972 = vmatmul.mubr.msk.f32.gmra.mrb[80].mxu1 %vm838_vm1, %v21752_v27  ;;  %13748 = vmatmul.mubr.msk.f32.gmra.mrb[80].mxu0 %vm838_vm1, %v21753_v28  ;;  %v21765_v27 = vld [vmem:[#allocation261_spill] sm:$0xff]  ;;  %v21766_v28 = vld [vmem:[#allocation155_spill] sm:$0xff] }
 0x496   : > { %12974 = vmatprep.mubr.msk.f32.mxu1 %vm838_vm1, %v21754_v20  ;;  %13750 = vmatprep.mubr.msk.f32.mxu0 %vm838_vm1, %v21755_v43  ;;  %v21767_v20 = vld [vmem:[#allocation262_spill] sm:$0xff] }
 0x498   : > { %v19740_v39 = vpop.f32.mrb[40].mxu1 }
 0x499   : > { %v19742_v50 = vpop.f32.mrb[41].mxu1  ;;  %12975 = vmatmul.mubr.msk.f32.gmra.mrb[82].mxu1 %vm838_vm1, %v21756_v2  ;;  %13751 = vmatmul.mubr.msk.f32.gmra.mrb[82].mxu0 %vm838_vm1, %v21757_v11  ;;  %v21770_v11 = vld [vmem:[#allocation157_spill] sm:$0xff] }
 0x49a   : > { %12977 = vmatprep.mubr.msk.f32.mxu1 %vm838_vm1, %v21758_v18  ;;  %13753 = vmatprep.mubr.msk.f32.mxu0 %vm838_vm1, %v21759_v62  ;;  %v21771_v18 = vld [vmem:[#allocation263_spill] sm:$0xff] }
 0x49b   : > { %v21772_v62 = vld [vmem:[#allocation159_spill] sm:$0xff] }
 0x49c   : > { %v19752_v3 = vpop.f32.mrb[42].mxu1 }
 0x49d   : > { %v19754_v10 = vpop.f32.mrb[43].mxu1  ;;  %12978 = vmatmul.mubr.msk.f32.gmra.mrb[84].mxu1 %vm838_vm1, %v21760_v31  ;;  %13754 = vmatmul.mubr.msk.f32.gmra.mrb[84].mxu0 %vm838_vm1, %v21761_v47  ;;  %v21773_v31 = vld [vmem:[#allocation264_spill] sm:$0xff] }
 0x49e   : > { %12980 = vmatprep.mubr.msk.f32.mxu1 %vm838_vm1, %v21762_v6  ;;  %13756 = vmatprep.mubr.msk.f32.mxu0 %vm838_vm1, %v21763_v49  ;;  %v21776_v49 = vld [vmem:[#allocation161_spill] sm:$0xff] }
 0x4a0   : > { %v19764_v53 = vpop.f32.mrb[44].mxu1 }
 0x4a1   : > { %v19766_v60 = vpop.f32.mrb[45].mxu1  ;;  %12981 = vmatmul.mubr.msk.f32.gmra.mrb[86].mxu1 %vm838_vm1, %v21764_v5  ;;  %13757 = vmatmul.mubr.msk.f32.gmra.mrb[86].mxu0 %vm838_vm1, %v21765_v27  ;;  %v21777_v5 = vld [vmem:[#allocation165_spill] sm:$0xff]  ;;  %v21778_v27 = vld [vmem:[#allocation163_spill] sm:$0xff] }
 0x4a2   : > { %12983 = vmatprep.mubr.msk.f32.mxu1 %vm838_vm1, %v21766_v28  ;;  %13759 = vmatprep.mubr.msk.f32.mxu0 %vm838_vm1, %v21767_v20  ;;  %v21779_v28 = vld [vmem:[#allocation166_spill] sm:$0xff] }
 0x4a4   : > { %v19776_v43 = vpop.f32.mrb[46].mxu1 }
 0x4a5   : > { %21768 = vst [vmem:[#allocation238_spill] sm:$0xff] %v19776_v43  ;;  %v19778_v2 = vpop.f32.mrb[47].mxu1  ;;  %12984 = vmatmul.mubr.msk.f32.gmra.mrb[88].mxu1 %vm838_vm1, %v21770_v11  ;;  %13760 = vmatmul.mubr.msk.f32.gmra.mrb[88].mxu0 %vm838_vm1, %v21771_v18  ;;  %v21782_v18 = vld [vmem:[#allocation167_spill] sm:$0xff]  ;;  %v21827_v43 = vld [vmem:[#allocation198_spill] sm:$0xff] }
 0x4a6   : > { %21769 = vst [vmem:[#allocation93_spill] sm:$0xff] %v19778_v2  ;;  %12986 = vmatprep.mubr.msk.f32.mxu1 %vm838_vm1, %v21772_v62  ;;  %13762 = vmatprep.mubr.msk.f32.mxu0 %vm838_vm1, %v21773_v31  ;;  %v21783_v62 = vld [vmem:[#allocation170_spill] sm:$0xff]  ;;  %v21784_v31 = vld [vmem:[#allocation169_spill] sm:$0xff] }
 0x4a7   : > { %v21826_v2 = vld [vmem:[#allocation201_spill] sm:$0xff] }
 0x4a8   : > { %v19788_v47 = vpop.f32.mrb[48].mxu1 }
 0x4a9   : > { %21774 = vst [vmem:[#allocation102_spill] sm:$0xff] %v19788_v47  ;;  %v19790_v6 = vpop.f32.mrb[49].mxu1  ;;  %12987 = vmatmul.mubr.msk.f32.gmra.mrb[90].mxu1 %vm838_vm1, %v21776_v49  ;;  %13763 = vmatmul.mubr.msk.f32.gmra.mrb[90].mxu0 %vm838_vm1, %v21777_v5  ;;  %v21785_v49 = vld [vmem:[#allocation41_spill] sm:$0xff] }
 0x4aa   : > { %21775 = vst [vmem:[#allocation104_spill] sm:$0xff] %v19790_v6  ;;  %12989 = vmatprep.mubr.msk.f32.mxu1 %vm838_vm1, %v21778_v27  ;;  %13765 = vmatprep.mubr.msk.f32.mxu0 %vm838_vm1, %v21779_v28  ;;  %v21788_v28 = vld [vmem:[#allocation172_spill] sm:$0xff]  ;;  %v21825_v6 = vld [vmem:[#allocation66_spill] sm:$0xff] }
 0x4ac   : > { %v19800_v20 = vpop.f32.mrb[50].mxu1 }
 0x4ad   : > { %21780 = vst [vmem:[#allocation105_spill] sm:$0xff] %v19800_v20  ;;  %v19802_v11 = vpop.f32.mrb[51].mxu1  ;;  %12990 = vmatmul.mubr.msk.f32.gmra.mrb[92].mxu1 %vm838_vm1, %v21782_v18  ;;  %13766 = vmatmul.mubr.msk.f32.gmra.mrb[92].mxu0 %vm838_vm1, %v21783_v62  ;;  %v21790_v18 = vld [vmem:[#allocation173_spill] sm:$0xff] }
 0x4ae   : > { %21781 = vst [vmem:[#allocation106_spill] sm:$0xff] %v19802_v11  ;;  %12992 = vmatprep.mubr.msk.f32.mxu1 %vm838_vm1, %v21784_v31  ;;  %13768 = vmatprep.mubr.msk.f32.mxu0 %vm838_vm1, %v21785_v49  ;;  %v21789_v11 = vld [vmem:[#allocation174_spill] sm:$0xff]  ;;  %v21791_v62 = vld [vmem:[#allocation45_spill] sm:$0xff] }
 0x4af   : > { %v21794_v49 = vld [vmem:[#allocation177_spill] sm:$0xff] }
 0x4b0   : > { %v19812_v5 = vpop.f32.mrb[52].mxu1 }
 0x4b1   : > { %21786 = vst [vmem:[#allocation108_spill] sm:$0xff] %v19812_v5  ;;  %v19814_v27 = vpop.f32.mrb[53].mxu1  ;;  %12993 = vmatmul.mubr.msk.f32.gmra.mrb[94].mxu1 %vm838_vm1, %v21788_v28  ;;  %13769 = vmatmul.mubr.msk.f32.gmra.mrb[94].mxu0 %vm838_vm1, %v21789_v11  ;;  %v21796_v28 = vld [vmem:[#allocation179_spill] sm:$0xff]  ;;  %v21797_v11 = vld [vmem:[#allocation48_spill] sm:$0xff] }
 0x4b2   : > { %21787 = vst [vmem:[#allocation110_spill] sm:$0xff] %v19814_v27  ;;  %12995 = vmatprep.mubr.msk.f32.mxu1 %vm838_vm1, %v21790_v18  ;;  %13771 = vmatprep.mubr.msk.f32.mxu0 %vm838_vm1, %v21791_v62  ;;  %v21795_v27 = vld [vmem:[#allocation176_spill] sm:$0xff]  ;;  %v21800_v62 = vld [vmem:[#allocation50_spill] sm:$0xff] }
 0x4b4   : > { %v19824_v31 = vpop.f32.mrb[54].mxu1 }
 0x4b5   : > { %21792 = vst [vmem:[#allocation112_spill] sm:$0xff] %v19824_v31  ;;  %v19826_v20 = vpop.f32.mrb[55].mxu1  ;;  %12996 = vmatmul.mubr.msk.f32.gmra.mrb[96].mxu1 %vm838_vm1, %v21794_v49  ;;  %13772 = vmatmul.mubr.msk.f32.gmra.mrb[96].mxu0 %vm838_vm1, %v21795_v27  ;;  %v21802_v49 = vld [vmem:[#allocation181_spill] sm:$0xff]  ;;  %v21803_v27 = vld [vmem:[#allocation182_spill] sm:$0xff] }
 0x4b6   : > { %21793 = vst [vmem:[#allocation114_spill] sm:$0xff] %v19826_v20  ;;  %12998 = vmatprep.mubr.msk.f32.mxu1 %vm838_vm1, %v21796_v28  ;;  %13774 = vmatprep.mubr.msk.f32.mxu0 %vm838_vm1, %v21797_v11  ;;  %v21801_v20 = vld [vmem:[#allocation49_spill] sm:$0xff] }
 0x4b7   : > { %v21806_v11 = vld [vmem:[#allocation185_spill] sm:$0xff] }
 0x4b8   : > { %v19836_v18 = vpop.f32.mrb[56].mxu1 }
 0x4b9   : > { %21798 = vst [vmem:[#allocation116_spill] sm:$0xff] %v19836_v18  ;;  %v19838_v5 = vpop.f32.mrb[57].mxu1  ;;  %12999 = vmatmul.mubr.msk.f32.gmra.mrb[98].mxu1 %vm838_vm1, %v21800_v62  ;;  %13775 = vmatmul.mubr.msk.f32.gmra.mrb[98].mxu0 %vm838_vm1, %v21801_v20  ;;  %v21808_v62 = vld [vmem:[#allocation187_spill] sm:$0xff]  ;;  %v21809_v20 = vld [vmem:[#allocation184_spill] sm:$0xff]  ;;  %v21818_v18 = vld [vmem:[#allocation193_spill] sm:$0xff] }
 0x4ba   : > { %21799 = vst [vmem:[#allocation118_spill] sm:$0xff] %v19838_v5  ;;  %13001 = vmatprep.mubr.msk.f32.mxu1 %vm838_vm1, %v21802_v49  ;;  %13777 = vmatprep.mubr.msk.f32.mxu0 %vm838_vm1, %v21803_v27  ;;  %v21807_v5 = vld [vmem:[#allocation54_spill] sm:$0xff] }
 0x4bc   : > { %v19848_v28 = vpop.f32.mrb[58].mxu1 }
 0x4bd   : > { %21804 = vst [vmem:[#allocation120_spill] sm:$0xff] %v19848_v28  ;;  %v19850_v31 = vpop.f32.mrb[59].mxu1  ;;  %13002 = vmatmul.mubr.msk.f32.gmra.mrb[100].mxu1 %vm838_vm1, %v21806_v11  ;;  %13778 = vmatmul.mubr.msk.f32.gmra.mrb[100].mxu0 %vm838_vm1, %v21807_v5  ;;  %v21812_v28 = vld [vmem:[#allocation59_spill] sm:$0xff]  ;;  %v21814_v11 = vld [vmem:[#allocation189_spill] sm:$0xff]  ;;  %v21815_v5 = vld [vmem:[#allocation58_spill] sm:$0xff] }
 0x4be   : > { %21805 = vst [vmem:[#allocation122_spill] sm:$0xff] %v19850_v31  ;;  %13004 = vmatprep.mubr.msk.f32.mxu1 %vm838_vm1, %v21808_v62  ;;  %13780 = vmatprep.mubr.msk.f32.mxu0 %vm838_vm1, %v21809_v20  ;;  %v21813_v31 = vld [vmem:[#allocation57_spill] sm:$0xff] }
 0x4c0   : > { %v19860_v49 = vpop.f32.mrb[60].mxu1 }
 0x4c1   : > { %21810 = vst [vmem:[#allocation124_spill] sm:$0xff] %v19860_v49  ;;  %v19862_v27 = vpop.f32.mrb[61].mxu1  ;;  %13005 = vmatmul.mubr.msk.f32.gmra.mrb[102].mxu1 %vm838_vm1, %v21812_v28  ;;  %13781 = vmatmul.mubr.msk.f32.gmra.mrb[102].mxu0 %vm838_vm1, %v21813_v31  ;;  %v21820_v28 = vld [vmem:[#allocation195_spill] sm:$0xff] }
 0x4c2   : > { %21811 = vst [vmem:[#allocation126_spill] sm:$0xff] %v19862_v27  ;;  %13007 = vmatprep.mubr.msk.f32.mxu1 %vm838_vm1, %v21814_v11  ;;  %13783 = vmatprep.mubr.msk.f32.mxu0 %vm838_vm1, %v21815_v5  ;;  %v21819_v27 = vld [vmem:[#allocation190_spill] sm:$0xff]  ;;  %v21821_v31 = vld [vmem:[#allocation63_spill] sm:$0xff]  ;;  %v21822_v5 = vld [vmem:[#allocation68_spill] sm:$0xff] }
 0x4c3   : > { %v19884_v49 = vld [vmem:[#allocation7] ss:$0 sm:$0xff] }
 0x4c4   : > { %v19872_v62 = vpop.f32.mrb[62].mxu1 }
 0x4c5   : > { %21816 = vst [vmem:[#allocation128_spill] sm:$0xff] %v19872_v62  ;;  %v19874_v20 = vpop.f32.mrb[63].mxu1  ;;  %13008 = vmatmul.mubr.msk.f32.gmra.mrb[104].mxu1 %vm838_vm1, %v21818_v18  ;;  %13784 = vmatmul.mubr.msk.f32.gmra.mrb[104].mxu0 %vm838_vm1, %v21819_v27  ;;  %v21823_v18 = vld [vmem:[#allocation192_spill] sm:$0xff]  ;;  %v21824_v27 = vld [vmem:[#allocation197_spill] sm:$0xff] }
 0x4c6   : > { %21817 = vst [vmem:[#allocation130_spill] sm:$0xff] %v19874_v20  ;;  %13010 = vmatprep.mubr.msk.f32.mxu1 %vm838_vm1, %v21820_v28  ;;  %13786 = vmatprep.mubr.msk.f32.mxu0 %vm838_vm1, %v21821_v31 }
 0x4c8   : > { %v13629_v11 = vpop.f32.mrb[0].mxu0 }
 0x4c9   : > { %13011 = vmatmul.mubr.msk.f32.gmra.mrb[106].mxu1 %vm838_vm1, %v21822_v5  ;;  %v13821_v20 = vadd.f32 %v13629_v11, %v19500_v59  ;;  %v8478_v62 = vpop.f32.mrb[1].mxu0  ;;  %13787 = vmatmul.mubr.msk.f32.gmra.mrb[106].mxu0 %vm838_vm1, %v21823_v18 }
 0x4ca   : > { %13013 = vmatprep.mubr.msk.f32.mxu1 %vm838_vm1, %v21824_v27  ;;  %v13822_v28 = vadd.f32 %v8478_v62, %v19502_v29  ;;  %13789 = vmatprep.mubr.msk.f32.mxu0 %vm838_vm1, %v21825_v6  ;;  %v21828_v29 = vld [vmem:[#allocation203_spill] sm:$0xff] }
 0x4cb   : > { %v9253_v31 = vadd.f32 %v13821_v20, %v19884_v49  ;;  %v21829_v20 = vld [vmem:[#allocation206_spill] sm:$0xff] }
 0x4cc   : > { %v9252_v5 = vadd.f32 %v13822_v28, %v19884_v49  ;;  %v13632_v47 = vpop.f32.mrb[2].mxu0 }
 0x4cd   : > { %13014 = vmatmul.mubr.msk.f32.gmra.mrb[108].mxu1 %vm838_vm1, %v21826_v2  ;;  %v9381_v59 = vmax.f32 %v9253_v31, 0.0  ;;  %v13823_v11 = vadd.f32 %v13632_v47, %v19512_v35  ;;  %v8488_v18 = vpop.f32.mrb[3].mxu0  ;;  %13790 = vmatmul.mubr.msk.f32.gmra.mrb[108].mxu0 %vm838_vm1, %v21827_v43  ;;  %v21830_v47 = vld [vmem:[#allocation77_spill] sm:$0xff] }
 0x4ce   : > { %13016 = vmatprep.mubr.msk.f32.mxu1 %vm838_vm1, %v21828_v29  ;;  %v9380_v6 = vmax.f32 %v9252_v5, 0.0  ;;  %v13824_v62 = vadd.f32 %v8488_v18, %v19514_v14  ;;  %13792 = vmatprep.mubr.msk.f32.mxu0 %vm838_vm1, %v21829_v20  ;;  %v21831_v31 = vld [vmem:[#allocation265_spill] sm:$0xff]  ;;  %v21833_v18 = vld [vmem:[#allocation266_spill] sm:$0xff] }
 0x4cf   : > { %9510 = vst.msk [vmem:[%s19909_s20 + $0x8] sm:$0xff] %vm9508_vm3, %v9381_v59  ;;  %v9255_v35 = vadd.f32 %v13823_v11, %v19884_v49  ;;  %v21832_v5 = vld [vmem:[#allocation205_spill] sm:$0xff] }
 0x4d0   : > { %9509 = vst.msk [vmem:[%s19909_s20] sm:$0xff] %vm9508_vm3, %v9380_v6  ;;  %v9254_v43 = vadd.f32 %v13824_v62, %v19884_v49  ;;  %v13635_v2 = vpop.f32.mrb[4].mxu0  ;;  %v21834_v62 = vld [vmem:[#allocation209_spill] sm:$0xff] }
 0x4d1   : > { %13017 = vmatmul.mubr.msk.f32.gmra.mrb[110].mxu1 %vm838_vm1, %v21830_v47  ;;  %v9383_v14 = vmax.f32 %v9255_v35, 0.0  ;;  %v13825_v27 = vadd.f32 %v13635_v2, %v19524_v15  ;;  %v8498_v28 = vpop.f32.mrb[5].mxu0  ;;  %13793 = vmatmul.mubr.msk.f32.gmra.mrb[110].mxu0 %vm838_vm1, %v21831_v31  ;;  %v21836_v2 = vld [vmem:[#allocation211_spill] sm:$0xff] }
 0x4d2   : > { %13019 = vmatprep.mubr.msk.f32.mxu1 %vm838_vm1, %v21832_v5  ;;  %v9382_v59 = vmax.f32 %v9254_v43, 0.0  ;;  %v13826_v11 = vadd.f32 %v8498_v28, %v19526_v12  ;;  %13795 = vmatprep.mubr.msk.f32.mxu0 %vm838_vm1, %v21833_v18  ;;  %v21835_v43 = vld [vmem:[#allocation267_spill] sm:$0xff]  ;;  %v21838_v5 = vld [vmem:[#allocation86_spill] sm:$0xff]  ;;  %v21839_v18 = vld [vmem:[#allocation268_spill] sm:$0xff] }
 0x4d3   : > { %9512 = vst.msk [vmem:[%s19909_s20 + $0x18] sm:$0xff] %vm9508_vm3, %v9383_v14  ;;  %v9257_v29 = vadd.f32 %v13825_v27, %v19884_v49  ;;  %v21837_v27 = vld [vmem:[#allocation214_spill] sm:$0xff] }
 0x4d4   : > { %9511 = vst.msk [vmem:[%s19909_s20 + $0x10] sm:$0xff] %vm9508_vm3, %v9382_v59  ;;  %v9256_v15 = vadd.f32 %v13826_v11, %v19884_v49  ;;  %v13638_v6 = vpop.f32.mrb[6].mxu0 }
 0x4d5   : > { %13020 = vmatmul.mubr.msk.f32.gmra.mrb[112].mxu1 %vm838_vm1, %v21834_v62  ;;  %v9385_v20 = vmax.f32 %v9257_v29, 0.0  ;;  %v13827_v12 = vadd.f32 %v13638_v6, %v19536_v58  ;;  %v8508_v35 = vpop.f32.mrb[7].mxu0  ;;  %13796 = vmatmul.mubr.msk.f32.gmra.mrb[112].mxu0 %vm838_vm1, %v21835_v43  ;;  %v21840_v29 = vld [vmem:[#allocation213_spill] sm:$0xff] }
 0x4d6   : > { %13022 = vmatprep.mubr.msk.f32.mxu1 %vm838_vm1, %v21836_v2  ;;  %v9384_v47 = vmax.f32 %v9256_v15, 0.0  ;;  %v13828_v14 = vadd.f32 %v8508_v35, %v19538_v0  ;;  %13798 = vmatprep.mubr.msk.f32.mxu0 %vm838_vm1, %v21837_v27  ;;  %v21841_v62 = vld [vmem:[#allocation269_spill] sm:$0xff] }
 0x4d7   : > { %9514 = vst.msk [vmem:[%s19909_s20 + $0x28] sm:$0xff] %vm9508_vm3, %v9385_v20  ;;  %v9259_v28 = vadd.f32 %v13827_v12, %v19884_v49  ;;  %v21842_v35 = vld [vmem:[#allocation217_spill] sm:$0xff] }
 0x4d8   : > { %9513 = vst.msk [vmem:[%s19909_s20 + $0x20] sm:$0xff] %vm9508_vm3, %v9384_v47  ;;  %v9258_v58 = vadd.f32 %v13828_v14, %v19884_v49  ;;  %v13641_v31 = vpop.f32.mrb[8].mxu0  ;;  %v21843_v47 = vld [vmem:[#allocation272_spill] sm:$0xff]  ;;  %v21844_v14 = vld [vmem:[#allocation219_spill] sm:$0xff] }
 0x4d9   : > { %13023 = vmatmul.mubr.msk.f32.gmra.mrb[114].mxu1 %vm838_vm1, %v21838_v5  ;;  %v9387_v59 = vmax.f32 %v9259_v28, 0.0  ;;  %v13829_v0 = vadd.f32 %v13641_v31, %v19548_v36  ;;  %v8518_v11 = vpop.f32.mrb[9].mxu0  ;;  %13799 = vmatmul.mubr.msk.f32.gmra.mrb[114].mxu0 %vm838_vm1, %v21839_v18  ;;  %v21847_v18 = vld [vmem:[#allocation276_spill] sm:$0xff] }
 0x4da   : > { %13025 = vmatprep.mubr.msk.f32.mxu1 %vm838_vm1, %v21840_v29  ;;  %v9386_v15 = vmax.f32 %v9258_v58, 0.0  ;;  %v13830_v6 = vadd.f32 %v8518_v11, %v19550_v46  ;;  %13801 = vmatprep.mubr.msk.f32.mxu0 %vm838_vm1, %v21841_v62  ;;  %v21845_v58 = vld [vmem:[#allocation273_spill] sm:$0xff]  ;;  %v21848_v29 = vld [vmem:[#allocation223_spill] sm:$0xff] }
 0x4db   : > { %9516 = vst.msk [vmem:[%s19909_s20 + $0x38] sm:$0xff] %vm9508_vm3, %v9387_v59  ;;  %v9261_v20 = vadd.f32 %v13829_v0, %v19884_v49  ;;  %v21846_v59 = vld [vmem:[#allocation94_spill] sm:$0xff]  ;;  %v21849_v62 = vld [vmem:[#allocation277_spill] sm:$0xff] }
 0x4dc   : > { %9515 = vst.msk [vmem:[%s19909_s20 + $0x30] sm:$0xff] %vm9508_vm3, %v9386_v15  ;;  %v9260_v36 = vadd.f32 %v13830_v6, %v19884_v49  ;;  %v13644_v12 = vpop.f32.mrb[10].mxu0 }
 0x4dd   : > { %13026 = vmatmul.mubr.msk.f32.gmra.mrb[116].mxu1 %vm838_vm1, %v21842_v35  ;;  %v9389_v43 = vmax.f32 %v9261_v20, 0.0  ;;  %v13831_v46 = vadd.f32 %v13644_v12, %v19560_v51  ;;  %v8528_v2 = vpop.f32.mrb[11].mxu0  ;;  %13802 = vmatmul.mubr.msk.f32.gmra.mrb[116].mxu0 %vm838_vm1, %v21843_v47  ;;  %v15165_v20 = vld [vmem:[%s15539_s6 + $0x528] sm:$0xff]  ;;  %v15166_v12 = vld [vmem:[%s15539_s6 + $0x530] sm:$0xff] }
 0x4de   : > { %13028 = vmatprep.mubr.msk.f32.mxu1 %vm838_vm1, %v21844_v14  ;;  %v9388_v27 = vmax.f32 %v9260_v36, 0.0  ;;  %v13832_v28 = vadd.f32 %v8528_v2, %v19562_v9  ;;  %13804 = vmatprep.mubr.msk.f32.mxu0 %vm838_vm1, %v21845_v58  ;;  %v8393_v36 = vrot.slane %v15165_v20, 2  ;;  %v8394_v35 = vrot.slane %v15166_v12, 2  ;;  %v15167_v58 = vld [vmem:[%s15539_s6 + $0x538] sm:$0xff] }
 0x4df   : > { %9518 = vst.msk [vmem:[%s19909_s20 + $0x48] sm:$0xff] %vm9508_vm3, %v9389_v43  ;;  %v9263_v31 = vadd.f32 %v13831_v46, %v19884_v49  ;;  %v21855_v20 = vld [vmem:[#allocation280_spill] sm:$0xff] }
 0x4e0   : > { %9517 = vst.msk [vmem:[%s19909_s20 + $0x40] sm:$0xff] %vm9508_vm3, %v9388_v27  ;;  %v9262_v51 = vadd.f32 %v13832_v28, %v19884_v49  ;;  %v13647_v5 = vpop.f32.mrb[12].mxu0  ;;  %v21851_v27 = vld [vmem:[#allocation278_spill] sm:$0xff]  ;;  %v21852_v28 = vld [vmem:[#allocation227_spill] sm:$0xff] }
 0x4e1   : > { %13029 = vmatmul.mubr.msk.f32.gmra.mrb[118].mxu1 %vm838_vm1, %v21846_v59  ;;  %v9391_v9 = vmax.f32 %v9263_v31, 0.0  ;;  %v13833_v0 = vadd.f32 %v13647_v5, %v19572_v17  ;;  %v8538_v11 = vpop.f32.mrb[13].mxu0  ;;  %13805 = vmatmul.mubr.msk.f32.gmra.mrb[118].mxu0 %vm838_vm1, %v21847_v18  ;;  %v8396_v31 = vrot.slane %v15167_v58, 2  ;;  %v21853_v59 = vld [vmem:[#allocation279_spill] sm:$0xff] }
 0x4e2   : > { %13031 = vmatprep.mubr.msk.f32.mxu1 %vm838_vm1, %v21848_v29  ;;  %v9390_v15 = vmax.f32 %v9262_v51, 0.0  ;;  %v13834_v6 = vadd.f32 %v8538_v11, %v19574_v41  ;;  %13807 = vmatprep.mubr.msk.f32.mxu0 %vm838_vm1, %v21849_v62  ;;  %v21850_v41 = vld [vmem:[#allocation225_spill] sm:$0xff]  ;;  %v8395_v11 = vsel %vm2761_vm2, %v8393_v36, %v8394_v35 }
 0x4e3   : > { %9520 = vst.msk [vmem:[%s19909_s20 + $0x58] sm:$0xff] %vm9508_vm3, %v9391_v9  ;;  %v9265_v17 = vadd.f32 %v13833_v0, %v19884_v49  ;;  %v15168_v9 = vld [vmem:[%s15539_s6 + $0x540] sm:$0xff] }
 0x4e4   : > { %9519 = vst.msk [vmem:[%s19909_s20 + $0x50] sm:$0xff] %vm9508_vm3, %v9390_v15  ;;  %v9264_v43 = vadd.f32 %v13834_v6, %v19884_v49  ;;  %v13650_v46 = vpop.f32.mrb[14].mxu0  ;;  %v8398_v0 = vrot.slane %v15168_v9, 2  ;;  %v21854_v15 = vld [vmem:[#allocation229_spill] sm:$0xff] }
 0x4e5   : > { %13032 = vmatmul.mubr.msk.f32.gmra.mrb[120].mxu1 %vm838_vm1, %v21850_v41  ;;  %v9393_v2 = vmax.f32 %v9265_v17, 0.0  ;;  %v13835_v47 = vadd.f32 %v13650_v46, %v19584_v32  ;;  %v8548_v14 = vpop.f32.mrb[15].mxu0  ;;  %13808 = vmatmul.mubr.msk.f32.gmra.mrb[120].mxu0 %vm838_vm1, %v21851_v27  ;;  %v8397_v17 = vsel %vm2761_vm2, %v8394_v35, %v8396_v31 }
 0x4e6   : > { %13034 = vmatprep.mubr.msk.f32.mxu1 %vm838_vm1, %v21852_v28  ;;  %v9392_v51 = vmax.f32 %v9264_v43, 0.0  ;;  %v13836_v5 = vadd.f32 %v8548_v14, %v19586_v24  ;;  %13810 = vmatprep.mubr.msk.f32.mxu0 %vm838_vm1, %v21853_v59  ;;  %v8400_v43 = vrot.slane %v19306_v7, 2  ;;  %v8399_v46 = vsel %vm2761_vm2, %v8396_v31, %v8398_v0 }
 0x4e7   : > { %9522 = vst.msk [vmem:[%s19909_s20 + $0x68] sm:$0xff] %vm9508_vm3, %v9393_v2  ;;  %v9267_v32 = vadd.f32 %v13835_v47, %v19884_v49 }
 0x4e8   : > { %9521 = vst.msk [vmem:[%s19909_s20 + $0x60] sm:$0xff] %vm9508_vm3, %v9392_v51  ;;  %v9266_v18 = vadd.f32 %v13836_v5, %v19884_v49  ;;  %v13653_v29 = vpop.f32.mrb[16].mxu0  ;;  %v8401_v14 = vsel %vm2761_vm2, %v8398_v0, %v8400_v43 }
 0x4e9   : > { %13035 = vmatmul.mubr.msk.f32.gmra.mrb[122].mxu1 %vm838_vm1, %v21854_v15  ;;  %v9395_v24 = vmax.f32 %v9267_v32, 0.0  ;;  %v13837_v6 = vadd.f32 %v13653_v29, %v19596_v44  ;;  %v8558_v62 = vpop.f32.mrb[17].mxu0  ;;  %13811 = vmatmul.mubr.msk.f32.gmra.mrb[122].mxu0 %vm838_vm1, %v21855_v20 }
 0x4ea   : > { %13037 = vmatprep.mubr.msk.f32.mxu1 %vm838_vm1, %v19268_v13  ;;  %v9394_v36 = vmax.f32 %v9266_v18, 0.0  ;;  %v13838_v12 = vadd.f32 %v8558_v62, %v19598_v45  ;;  %13813 = vmatprep.mubr.msk.f32.mxu0 %vm838_vm1, %v8395_v11 }
 0x4eb   : > { %9524 = vst.msk [vmem:[%s19909_s20 + $0x78] sm:$0xff] %vm9508_vm3, %v9395_v24  ;;  %v9269_v44 = vadd.f32 %v13837_v6, %v19884_v49 }
 0x4ec   : > { %9523 = vst.msk [vmem:[%s19909_s20 + $0x70] sm:$0xff] %vm9508_vm3, %v9394_v36  ;;  %v9268_v13 = vadd.f32 %v13838_v12, %v19884_v49  ;;  %v13656_v41 = vpop.f32.mrb[18].mxu0 }
 0x4ed   : > { %13038 = vmatmul.mubr.msk.f32.gmra.mrb[124].mxu1 %vm838_vm1, %v19283_v30  ;;  %v9397_v45 = vmax.f32 %v9269_v44, 0.0  ;;  %v13839_v35 = vadd.f32 %v13656_v41, %v19608_v25  ;;  %v8568_v7 = vpop.f32.mrb[19].mxu0  ;;  %13814 = vmatmul.mubr.msk.f32.gmra.mrb[124].mxu0 %vm838_vm1, %v8397_v17 }
 0x4ee   : > { %13040 = vmatprep.mubr.msk.f32.mxu1 %vm838_vm1, %v19289_v61  ;;  %v9396_v2 = vmax.f32 %v9268_v13, 0.0  ;;  %v13840_v47 = vadd.f32 %v8568_v7, %v19610_v22  ;;  %13816 = vmatprep.mubr.msk.f32.mxu0 %vm838_vm1, %v8399_v46 }
 0x4ef   : > { %9526 = vst.msk [vmem:[%s19909_s20 + $0x88] sm:$0xff] %vm9508_vm3, %v9397_v45  ;;  %v9271_v30 = vadd.f32 %v13839_v35, %v19884_v49 }
 0x4f0   : > { %9525 = vst.msk [vmem:[%s19909_s20 + $0x80] sm:$0xff] %vm9508_vm3, %v9396_v2  ;;  %v9270_v25 = vadd.f32 %v13840_v47, %v19884_v49  ;;  %v13659_v27 = vpop.f32.mrb[20].mxu0 }
 0x4f1   : > { %13041 = vmatmul.mubr.msk.f32.gmra.mrb[126].mxu1 %vm838_vm1, %v19301_v55  ;;  %v9399_v61 = vmax.f32 %v9271_v30, 0.0  ;;  %v13841_v22 = vadd.f32 %v13659_v27, %v19620_v54  ;;  %v8578_v28 = vpop.f32.mrb[21].mxu0  ;;  %13817 = vmatmul.mubr.msk.f32.gmra.mrb[126].mxu0 %vm838_vm1, %v8401_v14 }
 0x4f2   : > { %v9398_v58 = vmax.f32 %v9270_v25, 0.0  ;;  %v13842_v31 = vadd.f32 %v8578_v28, %v19622_v33 }
 0x4f3   : > { %9528 = vst.msk [vmem:[%s19909_s20 + $0x98] sm:$0xff] %vm9508_vm3, %v9399_v61  ;;  %v9273_v51 = vadd.f32 %v13841_v22, %v19884_v49 }
 0x4f4   : > { %9527 = vst.msk [vmem:[%s19909_s20 + $0x90] sm:$0xff] %vm9508_vm3, %v9398_v58  ;;  %v9272_v5 = vadd.f32 %v13842_v31, %v19884_v49  ;;  %v13662_v55 = vpop.f32.mrb[22].mxu0 }
 0x4f5   : > { %v9401_v59 = vmax.f32 %v9273_v51, 0.0  ;;  %v13843_v54 = vadd.f32 %v13662_v55, %v19632_v63  ;;  %v8588_v9 = vpop.f32.mrb[23].mxu0 }
 0x4f6   : > { %v9400_v0 = vmax.f32 %v9272_v5, 0.0  ;;  %v13844_v32 = vadd.f32 %v8588_v9, %v19634_v38 }
 0x4f7   : > { %9530 = vst.msk [vmem:[%s19909_s20 + $0xa8] sm:$0xff] %vm9508_vm3, %v9401_v59  ;;  %v9275_v33 = vadd.f32 %v13843_v54, %v19884_v49 }
 0x4f8   : > { %9529 = vst.msk [vmem:[%s19909_s20 + $0xa0] sm:$0xff] %vm9508_vm3, %v9400_v0  ;;  %v9274_v11 = vadd.f32 %v13844_v32, %v19884_v49  ;;  %v13665_v18 = vpop.f32.mrb[24].mxu0 }
 0x4f9   : > { %v9403_v29 = vmax.f32 %v9275_v33, 0.0  ;;  %v13845_v15 = vadd.f32 %v13665_v18, %v19644_v16  ;;  %v8598_v63 = vpop.f32.mrb[25].mxu0 }
 0x4fa   : > { %v9402_v24 = vmax.f32 %v9274_v11, 0.0  ;;  %v13846_v6 = vadd.f32 %v8598_v63, %v19646_v23 }
 0x4fb   : > { %9532 = vst.msk [vmem:[%s19909_s20 + $0xb8] sm:$0xff] %vm9508_vm3, %v9403_v29  ;;  %v9277_v38 = vadd.f32 %v13845_v15, %v19884_v49 }
 0x4fc   : > { %9531 = vst.msk [vmem:[%s19909_s20 + $0xb0] sm:$0xff] %vm9508_vm3, %v9402_v24  ;;  %v9276_v62 = vadd.f32 %v13846_v6, %v19884_v49  ;;  %v13668_v20 = vpop.f32.mrb[26].mxu0 }
 0x4fd   : > { %v9405_v36 = vmax.f32 %v9277_v38, 0.0  ;;  %v13847_v12 = vadd.f32 %v13668_v20, %v19656_v40  ;;  %v8608_v16 = vpop.f32.mrb[27].mxu0 }
 0x4fe   : > { %v9404_v17 = vmax.f32 %v9276_v62, 0.0  ;;  %v13848_v43 = vadd.f32 %v8608_v16, %v19658_v42 }
 0x4ff   : > { %9534 = vst.msk [vmem:[%s19909_s20 + $0xc8] sm:$0xff] %vm9508_vm3, %v9405_v36  ;;  %v9279_v23 = vadd.f32 %v13847_v12, %v19884_v49 }
 0x500   : > { %9533 = vst.msk [vmem:[%s19909_s20 + $0xc0] sm:$0xff] %vm9508_vm3, %v9404_v17  ;;  %v9278_v44 = vadd.f32 %v13848_v43, %v19884_v49  ;;  %v13671_v46 = vpop.f32.mrb[28].mxu0 }
 0x501   : > { %v9407_v13 = vmax.f32 %v9279_v23, 0.0  ;;  %v13849_v41 = vadd.f32 %v13671_v46, %v19668_v56  ;;  %v8618_v40 = vpop.f32.mrb[29].mxu0 }
 0x502   : > { %v9406_v45 = vmax.f32 %v9278_v44, 0.0  ;;  %v13850_v35 = vadd.f32 %v8618_v40, %v19670_v48 }
 0x503   : > { %9536 = vst.msk [vmem:[%s19909_s20 + $0xd8] sm:$0xff] %vm9508_vm3, %v9407_v13  ;;  %v9281_v42 = vadd.f32 %v13849_v41, %v19884_v49 }
 0x504   : > { %9535 = vst.msk [vmem:[%s19909_s20 + $0xd0] sm:$0xff] %vm9508_vm3, %v9406_v45  ;;  %v9280_v7 = vadd.f32 %v13850_v35, %v19884_v49  ;;  %v13674_v2 = vpop.f32.mrb[30].mxu0 }
 0x505   : > { %v9409_v47 = vmax.f32 %v9281_v42, 0.0  ;;  %v13851_v14 = vadd.f32 %v13674_v2, %v19680_v34  ;;  %v8628_v56 = vpop.f32.mrb[31].mxu0 }
 0x506   : > { %v9408_v30 = vmax.f32 %v9280_v7, 0.0  ;;  %v13852_v25 = vadd.f32 %v8628_v56, %v19682_v1 }
 0x507   : > { %9538 = vst.msk [vmem:[%s19909_s20 + $0xe8] sm:$0xff] %vm9508_vm3, %v9409_v47  ;;  %v9283_v48 = vadd.f32 %v13851_v14, %v19884_v49 }
 0x508   : > { %9537 = vst.msk [vmem:[%s19909_s20 + $0xe0] sm:$0xff] %vm9508_vm3, %v9408_v30  ;;  %v9282_v27 = vadd.f32 %v13852_v25, %v19884_v49  ;;  %v13677_v61 = vpop.f32.mrb[32].mxu0  ;;  %v21856_v25 = vld [vmem:[#allocation238_spill] sm:$0xff] }
 0x509   : > { %v9411_v22 = vmax.f32 %v9283_v48, 0.0  ;;  %v13853_v28 = vadd.f32 %v13677_v61, %v19692_v21  ;;  %v8638_v34 = vpop.f32.mrb[33].mxu0  ;;  %v21857_v61 = vld [vmem:[#allocation93_spill] sm:$0xff] }
 0x50a   : > { %v9410_v58 = vmax.f32 %v9282_v27, 0.0  ;;  %v13854_v31 = vadd.f32 %v8638_v34, %v19694_v57 }
 0x50b   : > { %9540 = vst.msk [vmem:[%s19909_s20 + $0xf8] sm:$0xff] %vm9508_vm3, %v9411_v22  ;;  %v9285_v1 = vadd.f32 %v13853_v28, %v19884_v49 }
 0x50c   : > { %9539 = vst.msk [vmem:[%s19909_s20 + $0xf0] sm:$0xff] %vm9508_vm3, %v9410_v58  ;;  %v9284_v51 = vadd.f32 %v13854_v31, %v19884_v49  ;;  %v13680_v5 = vpop.f32.mrb[34].mxu0  ;;  %v21858_v31 = vld [vmem:[#allocation102_spill] sm:$0xff] }
 0x50d   : > { %v9413_v55 = vmax.f32 %v9285_v1, 0.0  ;;  %v13855_v59 = vadd.f32 %v13680_v5, %v19704_v4  ;;  %v8648_v21 = vpop.f32.mrb[35].mxu0 }
 0x50e   : > { %v9412_v54 = vmax.f32 %v9284_v51, 0.0  ;;  %v13856_v9 = vadd.f32 %v8648_v21, %v19706_v52 }
 0x50f   : > { %9542 = vst.msk [vmem:[%s19909_s20 + $0x108] sm:$0xff] %vm9508_vm3, %v9413_v55  ;;  %v9287_v57 = vadd.f32 %v13855_v59, %v19884_v49  ;;  %v21859_v55 = vld [vmem:[#allocation104_spill] sm:$0xff] }
 0x510   : > { %9541 = vst.msk [vmem:[%s19909_s20 + $0x100] sm:$0xff] %vm9508_vm3, %v9412_v54  ;;  %v9286_v0 = vadd.f32 %v13856_v9, %v19884_v49  ;;  %v13683_v32 = vpop.f32.mrb[36].mxu0 }
 0x511   : > { %v9415_v33 = vmax.f32 %v9287_v57, 0.0  ;;  %v13857_v11 = vadd.f32 %v13683_v32, %v19716_v8  ;;  %v8658_v4 = vpop.f32.mrb[37].mxu0 }
 0x512   : > { %v9414_v18 = vmax.f32 %v9286_v0, 0.0  ;;  %v13858_v29 = vadd.f32 %v8658_v4, %v19718_v26  ;;  %v21860_v0 = vld [vmem:[#allocation105_spill] sm:$0xff]  ;;  %v21861_v4 = vld [vmem:[#allocation106_spill] sm:$0xff] }
 0x513   : > { %9544 = vst.msk [vmem:[%s19909_s20 + $0x118] sm:$0xff] %vm9508_vm3, %v9415_v33  ;;  %v9289_v52 = vadd.f32 %v13857_v11, %v19884_v49 }
 0x514   : > { %9543 = vst.msk [vmem:[%s19909_s20 + $0x110] sm:$0xff] %vm9508_vm3, %v9414_v18  ;;  %v9288_v15 = vadd.f32 %v13858_v29, %v19884_v49  ;;  %v13686_v63 = vpop.f32.mrb[38].mxu0 }
 0x515   : > { %v9417_v24 = vmax.f32 %v9289_v52, 0.0  ;;  %v13859_v6 = vadd.f32 %v13686_v63, %v19728_v37  ;;  %v8668_v8 = vpop.f32.mrb[39].mxu0 }
 0x516   : > { %v9416_v38 = vmax.f32 %v9288_v15, 0.0  ;;  %v13860_v62 = vadd.f32 %v8668_v8, %v19730_v19 }
 0x517   : > { %9546 = vst.msk [vmem:[%s19909_s20 + $0x128] sm:$0xff] %vm9508_vm3, %v9417_v24  ;;  %v9291_v26 = vadd.f32 %v13859_v6, %v19884_v49  ;;  %v21862_v24 = vld [vmem:[#allocation108_spill] sm:$0xff] }
 0x518   : > { %9545 = vst.msk [vmem:[%s19909_s20 + $0x120] sm:$0xff] %vm9508_vm3, %v9416_v38  ;;  %v9290_v20 = vadd.f32 %v13860_v62, %v19884_v49  ;;  %v13689_v36 = vpop.f32.mrb[40].mxu0  ;;  %v21863_v62 = vld [vmem:[#allocation110_spill] sm:$0xff] }
 0x519   : > { %v9419_v12 = vmax.f32 %v9291_v26, 0.0  ;;  %v13861_v16 = vadd.f32 %v13689_v36, %v19740_v39  ;;  %v8678_v37 = vpop.f32.mrb[41].mxu0 }
 0x51a   : > { %v9418_v17 = vmax.f32 %v9290_v20, 0.0  ;;  %v13862_v43 = vadd.f32 %v8678_v37, %v19742_v50  ;;  %v21864_v37 = vld [vmem:[#allocation112_spill] sm:$0xff] }
 0x51b   : > { %9548 = vst.msk [vmem:[%s19909_s20 + $0x138] sm:$0xff] %vm9508_vm3, %v9419_v12  ;;  %v9293_v19 = vadd.f32 %v13861_v16, %v19884_v49 }
 0x51c   : > { %9547 = vst.msk [vmem:[%s19909_s20 + $0x130] sm:$0xff] %vm9508_vm3, %v9418_v17  ;;  %v9292_v23 = vadd.f32 %v13862_v43, %v19884_v49  ;;  %v13692_v44 = vpop.f32.mrb[42].mxu0 }
 0x51d   : > { %v9421_v46 = vmax.f32 %v9293_v19, 0.0  ;;  %v13863_v13 = vadd.f32 %v13692_v44, %v19752_v3  ;;  %v8688_v39 = vpop.f32.mrb[43].mxu0 }
 0x51e   : > { %v9420_v41 = vmax.f32 %v9292_v23, 0.0  ;;  %v13864_v40 = vadd.f32 %v8688_v39, %v19754_v10  ;;  %v21865_v23 = vld [vmem:[#allocation114_spill] sm:$0xff] }
 0x51f   : > { %9550 = vst.msk [vmem:[%s19909_s20 + $0x148] sm:$0xff] %vm9508_vm3, %v9421_v46  ;;  %v9295_v50 = vadd.f32 %v13863_v13, %v19884_v49 }
 0x520   : > { %9549 = vst.msk [vmem:[%s19909_s20 + $0x140] sm:$0xff] %vm9508_vm3, %v9420_v41  ;;  %v9294_v45 = vadd.f32 %v13864_v40, %v19884_v49  ;;  %v13695_v35 = vpop.f32.mrb[44].mxu0  ;;  %v21866_v40 = vld [vmem:[#allocation116_spill] sm:$0xff] }
 0x521   : > { %v9423_v42 = vmax.f32 %v9295_v50, 0.0  ;;  %v13865_v7 = vadd.f32 %v13695_v35, %v19764_v53  ;;  %v8698_v3 = vpop.f32.mrb[45].mxu0 }
 0x522   : > { %v9422_v2 = vmax.f32 %v9294_v45, 0.0  ;;  %v13866_v47 = vadd.f32 %v8698_v3, %v19766_v60 }
 0x523   : > { %9552 = vst.msk [vmem:[%s19909_s20 + $0x158] sm:$0xff] %vm9508_vm3, %v9423_v42  ;;  %v9297_v10 = vadd.f32 %v13865_v7, %v19884_v49  ;;  %v21867_v42 = vld [vmem:[#allocation118_spill] sm:$0xff] }
 0x524   : > { %9551 = vst.msk [vmem:[%s19909_s20 + $0x150] sm:$0xff] %vm9508_vm3, %v9422_v2  ;;  %v9296_v14 = vadd.f32 %v13866_v47, %v19884_v49  ;;  %v13698_v56 = vpop.f32.mrb[46].mxu0 }
 0x525   : > { %v9425_v30 = vmax.f32 %v9297_v10, 0.0  ;;  %v13867_v48 = vadd.f32 %v13698_v56, %v21856_v25  ;;  %v8708_v53 = vpop.f32.mrb[47].mxu0 }
 0x526   : > { %v9424_v27 = vmax.f32 %v9296_v14, 0.0  ;;  %v13868_v22 = vadd.f32 %v8708_v53, %v21857_v61  ;;  %v21868_v14 = vld [vmem:[#allocation120_spill] sm:$0xff] }
 0x527   : > { %9554 = vst.msk [vmem:[%s19909_s20 + $0x168] sm:$0xff] %vm9508_vm3, %v9425_v30  ;;  %v9299_v60 = vadd.f32 %v13867_v48, %v19884_v49  ;;  %v21869_v48 = vld [vmem:[#allocation122_spill] sm:$0xff] }
 0x528   : > { %9553 = vst.msk [vmem:[%s19909_s20 + $0x160] sm:$0xff] %vm9508_vm3, %v9424_v27  ;;  %v9298_v28 = vadd.f32 %v13868_v22, %v19884_v49  ;;  %v13701_v34 = vpop.f32.mrb[48].mxu0 }
 0x529   : > { %v9427_v58 = vmax.f32 %v9299_v60, 0.0  ;;  %v13869_v1 = vadd.f32 %v13701_v34, %v21858_v31  ;;  %v8718_v51 = vpop.f32.mrb[49].mxu0 }
 0x52a   : > { %v9426_v5 = vmax.f32 %v9298_v28, 0.0  ;;  %v13870_v59 = vadd.f32 %v8718_v51, %v21859_v55  ;;  %v21870_v28 = vld [vmem:[#allocation124_spill] sm:$0xff] }
 0x52b   : > { %9556 = vst.msk [vmem:[%s19909_s20 + $0x178] sm:$0xff] %vm9508_vm3, %v9427_v58  ;;  %v9301_v21 = vadd.f32 %v13869_v1, %v19884_v49  ;;  %v21871_v1 = vld [vmem:[#allocation126_spill] sm:$0xff] }
 0x52c   : > { %9555 = vst.msk [vmem:[%s19909_s20 + $0x170] sm:$0xff] %vm9508_vm3, %v9426_v5  ;;  %v9300_v54 = vadd.f32 %v13870_v59, %v19884_v49  ;;  %v13704_v9 = vpop.f32.mrb[50].mxu0 }
 0x52d   : > { %v9429_v57 = vmax.f32 %v9301_v21, 0.0  ;;  %v13871_v32 = vadd.f32 %v13704_v9, %v21860_v0  ;;  %v8728_v33 = vpop.f32.mrb[51].mxu0 }
 0x52e   : > { %v9428_v11 = vmax.f32 %v9300_v54, 0.0  ;;  %v13872_v18 = vadd.f32 %v8728_v33, %v21861_v4  ;;  %v21872_v54 = vld [vmem:[#allocation128_spill] sm:$0xff] }
 0x52f   : > { %9558 = vst.msk [vmem:[%s19909_s20 + $0x188] sm:$0xff] %vm9508_vm3, %v9429_v57  ;;  %v9303_v29 = vadd.f32 %v13871_v32, %v19884_v49  ;;  %v21873_v32 = vld [vmem:[#allocation130_spill] sm:$0xff] }
 0x530   : > { %9557 = vst.msk [vmem:[%s19909_s20 + $0x180] sm:$0xff] %vm9508_vm3, %v9428_v11  ;;  %v9302_v52 = vadd.f32 %v13872_v18, %v19884_v49  ;;  %v13707_v15 = vpop.f32.mrb[52].mxu0 }
 0x531   : > { %v9431_v63 = vmax.f32 %v9303_v29, 0.0  ;;  %v13873_v6 = vadd.f32 %v13707_v15, %v21862_v24  ;;  %v8738_v8 = vpop.f32.mrb[53].mxu0 }
 0x532   : > { %v9430_v38 = vmax.f32 %v9302_v52, 0.0  ;;  %v13874_v26 = vadd.f32 %v8738_v8, %v21863_v62 }
 0x533   : > { %9560 = vst.msk [vmem:[%s19909_s20 + $0x198] sm:$0xff] %vm9508_vm3, %v9431_v63  ;;  %v9305_v20 = vadd.f32 %v13873_v6, %v19884_v49 }
 0x534   : > { %9559 = vst.msk [vmem:[%s19909_s20 + $0x190] sm:$0xff] %vm9508_vm3, %v9430_v38  ;;  %v9304_v36 = vadd.f32 %v13874_v26, %v19884_v49  ;;  %v13710_v12 = vpop.f32.mrb[54].mxu0 }
 0x535   : > { %v9433_v16 = vmax.f32 %v9305_v20, 0.0  ;;  %v13875_v17 = vadd.f32 %v13710_v12, %v21864_v37  ;;  %v8748_v43 = vpop.f32.mrb[55].mxu0 }
 0x536   : > { %v9432_v19 = vmax.f32 %v9304_v36, 0.0  ;;  %v13876_v44 = vadd.f32 %v8748_v43, %v21865_v23 }
 0x537   : > { %9562 = vst.msk [vmem:[%s19909_s20 + $0x1a8] sm:$0xff] %vm9508_vm3, %v9433_v16  ;;  %v9307_v46 = vadd.f32 %v13875_v17, %v19884_v49 }
 0x538   : > { %9561 = vst.msk [vmem:[%s19909_s20 + $0x1a0] sm:$0xff] %vm9508_vm3, %v9432_v19  ;;  %v9306_v13 = vadd.f32 %v13876_v44, %v19884_v49  ;;  %v13713_v39 = vpop.f32.mrb[56].mxu0 }
 0x539   : > { %v9435_v41 = vmax.f32 %v9307_v46, 0.0  ;;  %v13877_v50 = vadd.f32 %v13713_v39, %v21866_v40  ;;  %v8758_v45 = vpop.f32.mrb[57].mxu0 }
 0x53a   : > { %v9434_v35 = vmax.f32 %v9306_v13, 0.0  ;;  %v13878_v7 = vadd.f32 %v8758_v45, %v21867_v42 }
 0x53b   : > { %9564 = vst.msk [vmem:[%s19909_s20 + $0x1b8] sm:$0xff] %vm9508_vm3, %v9435_v41  ;;  %v9309_v3 = vadd.f32 %v13877_v50, %v19884_v49 }
 0x53c   : > { %9563 = vst.msk [vmem:[%s19909_s20 + $0x1b0] sm:$0xff] %vm9508_vm3, %v9434_v35  ;;  %v9308_v2 = vadd.f32 %v13878_v7, %v19884_v49  ;;  %v13716_v47 = vpop.f32.mrb[58].mxu0 }
 0x53d   : > { %v9437_v10 = vmax.f32 %v9309_v3, 0.0  ;;  %v13879_v56 = vadd.f32 %v13716_v47, %v21868_v14  ;;  %v8768_v30 = vpop.f32.mrb[59].mxu0 }
 0x53e   : > { %v9436_v25 = vmax.f32 %v9308_v2, 0.0  ;;  %v13880_v53 = vadd.f32 %v8768_v30, %v21869_v48 }
 0x53f   : > { %9566 = vst.msk [vmem:[%s19909_s20 + $0x1c8] sm:$0xff] %vm9508_vm3, %v9437_v10  ;;  %v9311_v27 = vadd.f32 %v13879_v56, %v19884_v49 }
 0x540   : > { %9565 = vst.msk [vmem:[%s19909_s20 + $0x1c0] sm:$0xff] %vm9508_vm3, %v9436_v25  ;;  %v9310_v61 = vadd.f32 %v13880_v53, %v19884_v49  ;;  %v13719_v22 = vpop.f32.mrb[60].mxu0 }
 0x541   : > { %v9439_v60 = vmax.f32 %v9311_v27, 0.0  ;;  %v13881_v34 = vadd.f32 %v13719_v22, %v21870_v28  ;;  %v8778_v58 = vpop.f32.mrb[61].mxu0 }
 0x542   : > { %v9438_v31 = vmax.f32 %v9310_v61, 0.0  ;;  %v13882_v51 = vadd.f32 %v8778_v58, %v21871_v1 }
 0x543   : > { %9568 = vst.msk [vmem:[%s19909_s20 + $0x1d8] sm:$0xff] %vm9508_vm3, %v9439_v60  ;;  %v9313_v5 = vadd.f32 %v13881_v34, %v19884_v49 }
 0x544   : > { %9567 = vst.msk [vmem:[%s19909_s20 + $0x1d0] sm:$0xff] %vm9508_vm3, %v9438_v31  ;;  %v9312_v55 = vadd.f32 %v13882_v51, %v19884_v49  ;;  %v13722_v59 = vpop.f32.mrb[62].mxu0 }
 0x545   : > { %v9441_v21 = vmax.f32 %v9313_v5, 0.0  ;;  %v13883_v9 = vadd.f32 %v13722_v59, %v21872_v54  ;;  %v8788_v57 = vpop.f32.mrb[63].mxu0 }
 0x546   : > { %v9440_v0 = vmax.f32 %v9312_v55, 0.0  ;;  %v13884_v33 = vadd.f32 %v8788_v57, %v21873_v32 }
 0x547   : > { %9570 = vst.msk [vmem:[%s19909_s20 + $0x1e8] sm:$0xff] %vm9508_vm3, %v9441_v21  ;;  %v9315_v11 = vadd.f32 %v13883_v9, %v19884_v49 }
 0x548   : > { %v12949_v4 = vpop.f32.mrb[64].mxu1  ;;  %9569 = vst.msk [vmem:[%s19909_s20 + $0x1e0] sm:$0xff] %vm9508_vm3, %v9440_v0  ;;  %v9314_v18 = vadd.f32 %v13884_v33, %v19884_v49  ;;  %v13725_v29 = vpop.f32.mrb[64].mxu0 }
 0x549   : > { %v5394_v52 = vpop.f32.mrb[65].mxu1  ;;  %v9443_v15 = vmax.f32 %v9315_v11, 0.0  ;;  %v13885_v63 = vadd.f32 %v13725_v29, %v12949_v4  ;;  %v8798_v24 = vpop.f32.mrb[65].mxu0 }
 0x54a   : > { %v9442_v6 = vmax.f32 %v9314_v18, 0.0  ;;  %v13886_v8 = vadd.f32 %v8798_v24, %v5394_v52 }
 0x54b   : > { %9572 = vst.msk [vmem:[%s19909_s20 + $0x1f8] sm:$0xff] %vm9508_vm3, %v9443_v15  ;;  %v9317_v38 = vadd.f32 %v13885_v63, %v19884_v49 }
 0x54c   : > { %v12952_v62 = vpop.f32.mrb[66].mxu1  ;;  %9571 = vst.msk [vmem:[%s19909_s20 + $0x1f0] sm:$0xff] %vm9508_vm3, %v9442_v6  ;;  %v9316_v26 = vadd.f32 %v13886_v8, %v19884_v49  ;;  %v13728_v20 = vpop.f32.mrb[66].mxu0 }
 0x54d   : > { %v5404_v36 = vpop.f32.mrb[67].mxu1  ;;  %v9445_v12 = vmax.f32 %v9317_v38, 0.0  ;;  %v13887_v16 = vadd.f32 %v13728_v20, %v12952_v62  ;;  %v8808_v37 = vpop.f32.mrb[67].mxu0 }
 0x54e   : > { %v9444_v17 = vmax.f32 %v9316_v26, 0.0  ;;  %v13888_v43 = vadd.f32 %v8808_v37, %v5404_v36 }
 0x54f   : > { %9574 = vst.msk [vmem:[%s19909_s20 + $0x208] sm:$0xff] %vm9508_vm3, %v9445_v12  ;;  %v9319_v19 = vadd.f32 %v13887_v16, %v19884_v49 }
 0x550   : > { %v12955_v23 = vpop.f32.mrb[68].mxu1  ;;  %9573 = vst.msk [vmem:[%s19909_s20 + $0x200] sm:$0xff] %vm9508_vm3, %v9444_v17  ;;  %v9318_v44 = vadd.f32 %v13888_v43, %v19884_v49  ;;  %v13731_v46 = vpop.f32.mrb[68].mxu0 }
 0x551   : > { %v5414_v13 = vpop.f32.mrb[69].mxu1  ;;  %v9447_v39 = vmax.f32 %v9319_v19, 0.0  ;;  %v13889_v41 = vadd.f32 %v13731_v46, %v12955_v23  ;;  %v8818_v40 = vpop.f32.mrb[69].mxu0 }
 0x552   : > { %v9446_v50 = vmax.f32 %v9318_v44, 0.0  ;;  %v13890_v45 = vadd.f32 %v8818_v40, %v5414_v13 }
 0x553   : > { %9576 = vst.msk [vmem:[%s19909_s20 + $0x218] sm:$0xff] %vm9508_vm3, %v9447_v39  ;;  %v9321_v35 = vadd.f32 %v13889_v41, %v19884_v49 }
 0x554   : > { %v12958_v42 = vpop.f32.mrb[70].mxu1  ;;  %9575 = vst.msk [vmem:[%s19909_s20 + $0x210] sm:$0xff] %vm9508_vm3, %v9446_v50  ;;  %v9320_v7 = vadd.f32 %v13890_v45, %v19884_v49  ;;  %v13734_v3 = vpop.f32.mrb[70].mxu0 }
 0x555   : > { %v5424_v2 = vpop.f32.mrb[71].mxu1  ;;  %v9449_v47 = vmax.f32 %v9321_v35, 0.0  ;;  %v13891_v10 = vadd.f32 %v13734_v3, %v12958_v42  ;;  %v8828_v14 = vpop.f32.mrb[71].mxu0 }
 0x556   : > { %v9448_v56 = vmax.f32 %v9320_v7, 0.0  ;;  %v13892_v30 = vadd.f32 %v8828_v14, %v5424_v2 }
 0x557   : > { %9578 = vst.msk [vmem:[%s19909_s20 + $0x228] sm:$0xff] %vm9508_vm3, %v9449_v47  ;;  %v9323_v25 = vadd.f32 %v13891_v10, %v19884_v49 }
 0x558   : > { %v12961_v48 = vpop.f32.mrb[72].mxu1  ;;  %9577 = vst.msk [vmem:[%s19909_s20 + $0x220] sm:$0xff] %vm9508_vm3, %v9448_v56  ;;  %v9322_v53 = vadd.f32 %v13892_v30, %v19884_v49  ;;  %v13737_v27 = vpop.f32.mrb[72].mxu0 }
 0x559   : > { %v5434_v61 = vpop.f32.mrb[73].mxu1  ;;  %v9451_v22 = vmax.f32 %v9323_v25, 0.0  ;;  %v13893_v60 = vadd.f32 %v13737_v27, %v12961_v48  ;;  %v8838_v28 = vpop.f32.mrb[73].mxu0 }
 0x55a   : > { %v9450_v34 = vmax.f32 %v9322_v53, 0.0  ;;  %v13894_v58 = vadd.f32 %v8838_v28, %v5434_v61 }
 0x55b   : > { %9580 = vst.msk [vmem:[%s19909_s20 + $0x238] sm:$0xff] %vm9508_vm3, %v9451_v22  ;;  %v9325_v31 = vadd.f32 %v13893_v60, %v19884_v49 }
 0x55c   : > { %v12964_v1 = vpop.f32.mrb[74].mxu1  ;;  %9579 = vst.msk [vmem:[%s19909_s20 + $0x230] sm:$0xff] %vm9508_vm3, %v9450_v34  ;;  %v9324_v51 = vadd.f32 %v13894_v58, %v19884_v49  ;;  %v13740_v5 = vpop.f32.mrb[74].mxu0 }
 0x55d   : > { %v5444_v55 = vpop.f32.mrb[75].mxu1  ;;  %v9453_v59 = vmax.f32 %v9325_v31, 0.0  ;;  %v13895_v21 = vadd.f32 %v13740_v5, %v12964_v1  ;;  %v8848_v54 = vpop.f32.mrb[75].mxu0 }
 0x55e   : > { %v9452_v9 = vmax.f32 %v9324_v51, 0.0  ;;  %v13896_v57 = vadd.f32 %v8848_v54, %v5444_v55 }
 0x55f   : > { %9582 = vst.msk [vmem:[%s19909_s20 + $0x248] sm:$0xff] %vm9508_vm3, %v9453_v59  ;;  %v9327_v0 = vadd.f32 %v13895_v21, %v19884_v49 }
 0x560   : > { %v12967_v32 = vpop.f32.mrb[76].mxu1  ;;  %9581 = vst.msk [vmem:[%s19909_s20 + $0x240] sm:$0xff] %vm9508_vm3, %v9452_v9  ;;  %v9326_v33 = vadd.f32 %v13896_v57, %v19884_v49  ;;  %v13743_v11 = vpop.f32.mrb[76].mxu0  ;;  %v20301_v57 = vld [vmem:[#allocation7] ss:$0 sm:$0xff] }
 0x561   : > { %v5454_v4 = vpop.f32.mrb[77].mxu1  ;;  %v9455_v18 = vmax.f32 %v9327_v0, 0.0  ;;  %v13897_v29 = vadd.f32 %v13743_v11, %v12967_v32  ;;  %v8858_v52 = vpop.f32.mrb[77].mxu0 }
 0x562   : > { %v9454_v15 = vmax.f32 %v9326_v33, 0.0  ;;  %v13898_v63 = vadd.f32 %v8858_v52, %v5454_v4 }
 0x563   : > { %9584 = vst.msk [vmem:[%s19909_s20 + $0x258] sm:$0xff] %vm9508_vm3, %v9455_v18  ;;  %v9329_v24 = vadd.f32 %v13897_v29, %v19884_v49 }
 0x564   : > { %v12970_v6 = vpop.f32.mrb[78].mxu1  ;;  %9583 = vst.msk [vmem:[%s19909_s20 + $0x250] sm:$0xff] %vm9508_vm3, %v9454_v15  ;;  %v9328_v8 = vadd.f32 %v13898_v63, %v19884_v49  ;;  %v13746_v38 = vpop.f32.mrb[78].mxu0 }
 0x565   : > { %v5464_v62 = vpop.f32.mrb[79].mxu1  ;;  %v9457_v26 = vmax.f32 %v9329_v24, 0.0  ;;  %v13899_v20 = vadd.f32 %v13746_v38, %v12970_v6  ;;  %v8868_v36 = vpop.f32.mrb[79].mxu0 }
 0x566   : > { %v9456_v12 = vmax.f32 %v9328_v8, 0.0  ;;  %v13900_v16 = vadd.f32 %v8868_v36, %v5464_v62 }
 0x567   : > { %9586 = vst.msk [vmem:[%s19909_s20 + $0x268] sm:$0xff] %vm9508_vm3, %v9457_v26  ;;  %v9331_v37 = vadd.f32 %v13899_v20, %v19884_v49 }
 0x568   : > { %v12973_v17 = vpop.f32.mrb[80].mxu1  ;;  %9585 = vst.msk [vmem:[%s19909_s20 + $0x260] sm:$0xff] %vm9508_vm3, %v9456_v12  ;;  %v9330_v43 = vadd.f32 %v13900_v16, %v19884_v49  ;;  %v13749_v19 = vpop.f32.mrb[80].mxu0 }
 0x569   : > { %v5474_v23 = vpop.f32.mrb[81].mxu1  ;;  %v9459_v44 = vmax.f32 %v9331_v37, 0.0  ;;  %v13901_v46 = vadd.f32 %v13749_v19, %v12973_v17  ;;  %v8878_v13 = vpop.f32.mrb[81].mxu0 }
 0x56a   : > { %v9458_v39 = vmax.f32 %v9330_v43, 0.0  ;;  %v13902_v41 = vadd.f32 %v8878_v13, %v5474_v23 }
 0x56b   : > { %9588 = vst.msk [vmem:[%s19909_s20 + $0x278] sm:$0xff] %vm9508_vm3, %v9459_v44  ;;  %v9333_v40 = vadd.f32 %v13901_v46, %v19884_v49 }
 0x56c   : > { %v12976_v50 = vpop.f32.mrb[82].mxu1  ;;  %9587 = vst.msk [vmem:[%s19909_s20 + $0x270] sm:$0xff] %vm9508_vm3, %v9458_v39  ;;  %v9332_v45 = vadd.f32 %v13902_v41, %v19884_v49  ;;  %v13752_v35 = vpop.f32.mrb[82].mxu0 }
 0x56d   : > { %v5484_v42 = vpop.f32.mrb[83].mxu1  ;;  %v9461_v7 = vmax.f32 %v9333_v40, 0.0  ;;  %v13903_v3 = vadd.f32 %v13752_v35, %v12976_v50  ;;  %v8888_v2 = vpop.f32.mrb[83].mxu0 }
 0x56e   : > { %v9460_v47 = vmax.f32 %v9332_v45, 0.0  ;;  %v13904_v10 = vadd.f32 %v8888_v2, %v5484_v42 }
 0x56f   : > { %9590 = vst.msk [vmem:[%s19909_s20 + $0x288] sm:$0xff] %vm9508_vm3, %v9461_v7  ;;  %v9335_v14 = vadd.f32 %v13903_v3, %v19884_v49 }
 0x570   : > { %v12979_v56 = vpop.f32.mrb[84].mxu1  ;;  %9589 = vst.msk [vmem:[%s19909_s20 + $0x280] sm:$0xff] %vm9508_vm3, %v9460_v47  ;;  %v9334_v30 = vadd.f32 %v13904_v10, %v19884_v49  ;;  %v13755_v25 = vpop.f32.mrb[84].mxu0 }
 0x571   : > { %v5494_v48 = vpop.f32.mrb[85].mxu1  ;;  %v9463_v53 = vmax.f32 %v9335_v14, 0.0  ;;  %v13905_v27 = vadd.f32 %v13755_v25, %v12979_v56  ;;  %v8898_v61 = vpop.f32.mrb[85].mxu0 }
 0x572   : > { %v9462_v22 = vmax.f32 %v9334_v30, 0.0  ;;  %v13906_v60 = vadd.f32 %v8898_v61, %v5494_v48 }
 0x573   : > { %9592 = vst.msk [vmem:[%s19909_s20 + $0x298] sm:$0xff] %vm9508_vm3, %v9463_v53  ;;  %v9337_v28 = vadd.f32 %v13905_v27, %v19884_v49 }
 0x574   : > { %v12982_v34 = vpop.f32.mrb[86].mxu1  ;;  %9591 = vst.msk [vmem:[%s19909_s20 + $0x290] sm:$0xff] %vm9508_vm3, %v9462_v22  ;;  %v9336_v58 = vadd.f32 %v13906_v60, %v19884_v49  ;;  %v13758_v31 = vpop.f32.mrb[86].mxu0 }
 0x575   : > { %v5504_v1 = vpop.f32.mrb[87].mxu1  ;;  %v9465_v51 = vmax.f32 %v9337_v28, 0.0  ;;  %v13907_v5 = vadd.f32 %v13758_v31, %v12982_v34  ;;  %v8908_v55 = vpop.f32.mrb[87].mxu0 }
 0x576   : > { %v9464_v59 = vmax.f32 %v9336_v58, 0.0  ;;  %v13908_v21 = vadd.f32 %v8908_v55, %v5504_v1 }
 0x577   : > { %9594 = vst.msk [vmem:[%s19909_s20 + $0x2a8] sm:$0xff] %vm9508_vm3, %v9465_v51  ;;  %v9339_v54 = vadd.f32 %v13907_v5, %v19884_v49 }
 0x578   : > { %v12985_v9 = vpop.f32.mrb[88].mxu1  ;;  %9593 = vst.msk [vmem:[%s19909_s20 + $0x2a0] sm:$0xff] %vm9508_vm3, %v9464_v59  ;;  %v9338_v0 = vadd.f32 %v20301_v57, %v13908_v21  ;;  %v13761_v32 = vpop.f32.mrb[88].mxu0 }
 0x579   : > { %v5514_v33 = vpop.f32.mrb[89].mxu1  ;;  %v9467_v11 = vmax.f32 %v9339_v54, 0.0  ;;  %v13909_v4 = vadd.f32 %v13761_v32, %v12985_v9  ;;  %v8918_v18 = vpop.f32.mrb[89].mxu0 }
 0x57a   : > { %v9466_v29 = vmax.f32 %v9338_v0, 0.0  ;;  %v13910_v52 = vadd.f32 %v8918_v18, %v5514_v33 }
 0x57b   : > { %9596 = vst.msk [vmem:[%s19909_s20 + $0x2b8] sm:$0xff] %vm9508_vm3, %v9467_v11  ;;  %v9341_v49 = vadd.f32 %v20301_v57, %v13909_v4 }
 0x57c   : > { %v12988_v15 = vpop.f32.mrb[90].mxu1  ;;  %9595 = vst.msk [vmem:[%s19909_s20 + $0x2b0] sm:$0xff] %vm9508_vm3, %v9466_v29  ;;  %v9340_v63 = vadd.f32 %v20301_v57, %v13910_v52  ;;  %v13764_v24 = vpop.f32.mrb[90].mxu0 }
 0x57d   : > { %v5524_v6 = vpop.f32.mrb[91].mxu1  ;;  %v9469_v8 = vmax.f32 %v9341_v49, 0.0  ;;  %v13911_v38 = vadd.f32 %v13764_v24, %v12988_v15  ;;  %v8928_v62 = vpop.f32.mrb[91].mxu0 }
 0x57e   : > { %v9468_v26 = vmax.f32 %v9340_v63, 0.0  ;;  %v13912_v20 = vadd.f32 %v8928_v62, %v5524_v6 }
 0x57f   : > { %9598 = vst.msk [vmem:[%s19909_s20 + $0x2c8] sm:$0xff] %vm9508_vm3, %v9469_v8  ;;  %v9343_v36 = vadd.f32 %v20301_v57, %v13911_v38 }
 0x580   : > { %v12991_v12 = vpop.f32.mrb[92].mxu1  ;;  %9597 = vst.msk [vmem:[%s19909_s20 + $0x2c0] sm:$0xff] %vm9508_vm3, %v9468_v26  ;;  %v9342_v16 = vadd.f32 %v20301_v57, %v13912_v20  ;;  %v13767_v37 = vpop.f32.mrb[92].mxu0 }
 0x581   : > { %v5534_v17 = vpop.f32.mrb[93].mxu1  ;;  %v9471_v43 = vmax.f32 %v9343_v36, 0.0  ;;  %v13913_v19 = vadd.f32 %v13767_v37, %v12991_v12  ;;  %v8938_v23 = vpop.f32.mrb[93].mxu0 }
 0x582   : > { %v9470_v44 = vmax.f32 %v9342_v16, 0.0  ;;  %v13914_v46 = vadd.f32 %v8938_v23, %v5534_v17 }
 0x583   : > { %9600 = vst.msk [vmem:[%s19909_s20 + $0x2d8] sm:$0xff] %vm9508_vm3, %v9471_v43  ;;  %v9345_v13 = vadd.f32 %v20301_v57, %v13913_v19 }
 0x584   : > { %v12994_v39 = vpop.f32.mrb[94].mxu1  ;;  %9599 = vst.msk [vmem:[%s19909_s20 + $0x2d0] sm:$0xff] %vm9508_vm3, %v9470_v44  ;;  %v9344_v41 = vadd.f32 %v20301_v57, %v13914_v46  ;;  %v13770_v40 = vpop.f32.mrb[94].mxu0 }
 0x585   : > { %v5544_v50 = vpop.f32.mrb[95].mxu1  ;;  %v9473_v45 = vmax.f32 %v9345_v13, 0.0  ;;  %v13915_v35 = vadd.f32 %v13770_v40, %v12994_v39  ;;  %v8948_v42 = vpop.f32.mrb[95].mxu0 }
 0x586   : > { %v9472_v7 = vmax.f32 %v9344_v41, 0.0  ;;  %v13916_v3 = vadd.f32 %v8948_v42, %v5544_v50 }
 0x587   : > { %9602 = vst.msk [vmem:[%s19909_s20 + $0x2e8] sm:$0xff] %vm9508_vm3, %v9473_v45  ;;  %v9347_v2 = vadd.f32 %v20301_v57, %v13915_v35 }
 0x588   : > { %v12997_v47 = vpop.f32.mrb[96].mxu1  ;;  %9601 = vst.msk [vmem:[%s19909_s20 + $0x2e0] sm:$0xff] %vm9508_vm3, %v9472_v7  ;;  %v9346_v10 = vadd.f32 %v20301_v57, %v13916_v3  ;;  %v13773_v14 = vpop.f32.mrb[96].mxu0 }
 0x589   : > { %v5554_v56 = vpop.f32.mrb[97].mxu1  ;;  %v9475_v30 = vmax.f32 %v9347_v2, 0.0  ;;  %v13917_v25 = vadd.f32 %v13773_v14, %v12997_v47  ;;  %v8958_v48 = vpop.f32.mrb[97].mxu0 }
 0x58a   : > { %v9474_v53 = vmax.f32 %v9346_v10, 0.0  ;;  %v13918_v27 = vadd.f32 %v8958_v48, %v5554_v56 }
 0x58b   : > { %9604 = vst.msk [vmem:[%s19909_s20 + $0x2f8] sm:$0xff] %vm9508_vm3, %v9475_v30  ;;  %v9349_v61 = vadd.f32 %v20301_v57, %v13917_v25 }
 0x58c   : > { %v13000_v22 = vpop.f32.mrb[98].mxu1  ;;  %9603 = vst.msk [vmem:[%s19909_s20 + $0x2f0] sm:$0xff] %vm9508_vm3, %v9474_v53  ;;  %v9348_v60 = vadd.f32 %v20301_v57, %v13918_v27  ;;  %v13776_v28 = vpop.f32.mrb[98].mxu0 }
 0x58d   : > { %v5564_v34 = vpop.f32.mrb[99].mxu1  ;;  %v9477_v58 = vmax.f32 %v9349_v61, 0.0  ;;  %v13919_v31 = vadd.f32 %v13776_v28, %v13000_v22  ;;  %v8968_v1 = vpop.f32.mrb[99].mxu0 }
 0x58e   : > { %v9476_v51 = vmax.f32 %v9348_v60, 0.0  ;;  %v13920_v5 = vadd.f32 %v8968_v1, %v5564_v34 }
 0x58f   : > { %9606 = vst.msk [vmem:[%s19909_s20 + $0x308] sm:$0xff] %vm9508_vm3, %v9477_v58  ;;  %v9351_v55 = vadd.f32 %v20301_v57, %v13919_v31 }
 0x590   : > { %v13003_v59 = vpop.f32.mrb[100].mxu1  ;;  %9605 = vst.msk [vmem:[%s19909_s20 + $0x300] sm:$0xff] %vm9508_vm3, %v9476_v51  ;;  %v9350_v21 = vadd.f32 %v20301_v57, %v13920_v5  ;;  %v13779_v54 = vpop.f32.mrb[100].mxu0 }
 0x591   : > { %v5574_v9 = vpop.f32.mrb[101].mxu1  ;;  %v9479_v0 = vmax.f32 %v9351_v55, 0.0  ;;  %v13921_v32 = vadd.f32 %v13779_v54, %v13003_v59  ;;  %v8978_v33 = vpop.f32.mrb[101].mxu0 }
 0x592   : > { %v9478_v11 = vmax.f32 %v9350_v21, 0.0  ;;  %v13922_v4 = vadd.f32 %v8978_v33, %v5574_v9 }
 0x593   : > { %9608 = vst.msk [vmem:[%s19909_s20 + $0x318] sm:$0xff] %vm9508_vm3, %v9479_v0  ;;  %v9353_v18 = vadd.f32 %v20301_v57, %v13921_v32 }
 0x594   : > { %v13006_v29 = vpop.f32.mrb[102].mxu1  ;;  %9607 = vst.msk [vmem:[%s19909_s20 + $0x310] sm:$0xff] %vm9508_vm3, %v9478_v11  ;;  %v9352_v52 = vadd.f32 %v20301_v57, %v13922_v4  ;;  %v13782_v49 = vpop.f32.mrb[102].mxu0 }
 0x595   : > { %v5584_v15 = vpop.f32.mrb[103].mxu1  ;;  %v9481_v63 = vmax.f32 %v9353_v18, 0.0  ;;  %v13923_v24 = vadd.f32 %v13782_v49, %v13006_v29  ;;  %v8988_v6 = vpop.f32.mrb[103].mxu0 }
 0x596   : > { %v9480_v8 = vmax.f32 %v9352_v52, 0.0  ;;  %v13924_v38 = vadd.f32 %v8988_v6, %v5584_v15 }
 0x597   : > { %9610 = vst.msk [vmem:[%s19909_s20 + $0x328] sm:$0xff] %vm9508_vm3, %v9481_v63  ;;  %v9355_v62 = vadd.f32 %v20301_v57, %v13923_v24 }
 0x598   : > { %v13009_v26 = vpop.f32.mrb[104].mxu1  ;;  %9609 = vst.msk [vmem:[%s19909_s20 + $0x320] sm:$0xff] %vm9508_vm3, %v9480_v8  ;;  %v9354_v20 = vadd.f32 %v20301_v57, %v13924_v38  ;;  %v13785_v36 = vpop.f32.mrb[104].mxu0 }
 0x599   : > { %v5594_v12 = vpop.f32.mrb[105].mxu1  ;;  %v9483_v16 = vmax.f32 %v9355_v62, 0.0  ;;  %v13925_v37 = vadd.f32 %v13785_v36, %v13009_v26  ;;  %v8998_v17 = vpop.f32.mrb[105].mxu0 }
 0x59a   : > { %v9482_v43 = vmax.f32 %v9354_v20, 0.0  ;;  %v13926_v19 = vadd.f32 %v8998_v17, %v5594_v12 }
 0x59b   : > { %9612 = vst.msk [vmem:[%s19909_s20 + $0x338] sm:$0xff] %vm9508_vm3, %v9483_v16  ;;  %v9357_v23 = vadd.f32 %v20301_v57, %v13925_v37 }
 0x59c   : > { %v13012_v44 = vpop.f32.mrb[106].mxu1  ;;  %9611 = vst.msk [vmem:[%s19909_s20 + $0x330] sm:$0xff] %vm9508_vm3, %v9482_v43  ;;  %v9356_v46 = vadd.f32 %v20301_v57, %v13926_v19  ;;  %v13788_v13 = vpop.f32.mrb[106].mxu0 }
 0x59d   : > { %v5604_v39 = vpop.f32.mrb[107].mxu1  ;;  %v9485_v41 = vmax.f32 %v9357_v23, 0.0  ;;  %v13927_v40 = vadd.f32 %v13788_v13, %v13012_v44  ;;  %v9008_v50 = vpop.f32.mrb[107].mxu0 }
 0x59e   : > { %v9484_v45 = vmax.f32 %v9356_v46, 0.0  ;;  %v13928_v35 = vadd.f32 %v9008_v50, %v5604_v39 }
 0x59f   : > { %9614 = vst.msk [vmem:[%s19909_s20 + $0x348] sm:$0xff] %vm9508_vm3, %v9485_v41  ;;  %v9359_v42 = vadd.f32 %v20301_v57, %v13927_v40 }
 0x5a0   : > { %v13015_v7 = vpop.f32.mrb[108].mxu1  ;;  %9613 = vst.msk [vmem:[%s19909_s20 + $0x340] sm:$0xff] %vm9508_vm3, %v9484_v45  ;;  %v9358_v3 = vadd.f32 %v20301_v57, %v13928_v35  ;;  %v13791_v2 = vpop.f32.mrb[108].mxu0 }
 0x5a1   : > { %v5614_v47 = vpop.f32.mrb[109].mxu1  ;;  %v9487_v10 = vmax.f32 %v9359_v42, 0.0  ;;  %v13929_v14 = vadd.f32 %v13791_v2, %v13015_v7  ;;  %v9018_v56 = vpop.f32.mrb[109].mxu0 }
 0x5a2   : > { %v9486_v30 = vmax.f32 %v9358_v3, 0.0  ;;  %v13930_v25 = vadd.f32 %v9018_v56, %v5614_v47 }
 0x5a3   : > { %9616 = vst.msk [vmem:[%s19909_s20 + $0x358] sm:$0xff] %vm9508_vm3, %v9487_v10  ;;  %v9361_v48 = vadd.f32 %v20301_v57, %v13929_v14 }
 0x5a4   : > { %v13018_v53 = vpop.f32.mrb[110].mxu1  ;;  %9615 = vst.msk [vmem:[%s19909_s20 + $0x350] sm:$0xff] %vm9508_vm3, %v9486_v30  ;;  %v9360_v27 = vadd.f32 %v20301_v57, %v13930_v25  ;;  %v13794_v61 = vpop.f32.mrb[110].mxu0 }
 0x5a5   : > { %v5624_v22 = vpop.f32.mrb[111].mxu1  ;;  %v9489_v60 = vmax.f32 %v9361_v48, 0.0  ;;  %v13931_v28 = vadd.f32 %v13794_v61, %v13018_v53  ;;  %v9028_v34 = vpop.f32.mrb[111].mxu0 }
 0x5a6   : > { %v9488_v58 = vmax.f32 %v9360_v27, 0.0  ;;  %v13932_v31 = vadd.f32 %v9028_v34, %v5624_v22 }
 0x5a7   : > { %9618 = vst.msk [vmem:[%s19909_s20 + $0x368] sm:$0xff] %vm9508_vm3, %v9489_v60  ;;  %v9363_v1 = vadd.f32 %v20301_v57, %v13931_v28 }
 0x5a8   : > { %v13021_v51 = vpop.f32.mrb[112].mxu1  ;;  %9617 = vst.msk [vmem:[%s19909_s20 + $0x360] sm:$0xff] %vm9508_vm3, %v9488_v58  ;;  %v9362_v5 = vadd.f32 %v20301_v57, %v13932_v31  ;;  %v13797_v55 = vpop.f32.mrb[112].mxu0 }
 0x5a9   : > { %v5634_v59 = vpop.f32.mrb[113].mxu1  ;;  %v9491_v21 = vmax.f32 %v9363_v1, 0.0  ;;  %v13933_v54 = vadd.f32 %v13797_v55, %v13021_v51  ;;  %v9038_v9 = vpop.f32.mrb[113].mxu0 }
 0x5aa   : > { %v9490_v0 = vmax.f32 %v9362_v5, 0.0  ;;  %v13934_v32 = vadd.f32 %v9038_v9, %v5634_v59 }
 0x5ab   : > { %9620 = vst.msk [vmem:[%s19909_s20 + $0x378] sm:$0xff] %vm9508_vm3, %v9491_v21  ;;  %v9365_v33 = vadd.f32 %v20301_v57, %v13933_v54 }
 0x5ac   : > { %v13024_v11 = vpop.f32.mrb[114].mxu1  ;;  %9619 = vst.msk [vmem:[%s19909_s20 + $0x370] sm:$0xff] %vm9508_vm3, %v9490_v0  ;;  %v9364_v4 = vadd.f32 %v20301_v57, %v13934_v32  ;;  %v13800_v18 = vpop.f32.mrb[114].mxu0 }
 0x5ad   : > { %v5644_v29 = vpop.f32.mrb[115].mxu1  ;;  %v9493_v52 = vmax.f32 %v9365_v33, 0.0  ;;  %v13935_v49 = vadd.f32 %v13800_v18, %v13024_v11  ;;  %v9048_v15 = vpop.f32.mrb[115].mxu0 }
 0x5ae   : > { %v9492_v63 = vmax.f32 %v9364_v4, 0.0  ;;  %v13936_v24 = vadd.f32 %v9048_v15, %v5644_v29 }
 0x5af   : > { %9622 = vst.msk [vmem:[%s19909_s20 + $0x388] sm:$0xff] %vm9508_vm3, %v9493_v52  ;;  %v9367_v6 = vadd.f32 %v20301_v57, %v13935_v49 }
 0x5b0   : > { %v13027_v8 = vpop.f32.mrb[116].mxu1  ;;  %9621 = vst.msk [vmem:[%s19909_s20 + $0x380] sm:$0xff] %vm9508_vm3, %v9492_v63  ;;  %v9366_v38 = vadd.f32 %v20301_v57, %v13936_v24  ;;  %v13803_v62 = vpop.f32.mrb[116].mxu0 }
 0x5b1   : > { %v5654_v26 = vpop.f32.mrb[117].mxu1  ;;  %v9495_v20 = vmax.f32 %v9367_v6, 0.0  ;;  %v13937_v36 = vadd.f32 %v13803_v62, %v13027_v8  ;;  %v9058_v12 = vpop.f32.mrb[117].mxu0 }
 0x5b2   : > { %v9494_v16 = vmax.f32 %v9366_v38, 0.0  ;;  %v13938_v37 = vadd.f32 %v9058_v12, %v5654_v26 }
 0x5b3   : > { %9624 = vst.msk [vmem:[%s19909_s20 + $0x398] sm:$0xff] %vm9508_vm3, %v9495_v20  ;;  %v9369_v17 = vadd.f32 %v20301_v57, %v13937_v36 }
 0x5b4   : > { %v13030_v43 = vpop.f32.mrb[118].mxu1  ;;  %9623 = vst.msk [vmem:[%s19909_s20 + $0x390] sm:$0xff] %vm9508_vm3, %v9494_v16  ;;  %v9368_v19 = vadd.f32 %v20301_v57, %v13938_v37  ;;  %v13806_v23 = vpop.f32.mrb[118].mxu0 }
 0x5b5   : > { %v5664_v44 = vpop.f32.mrb[119].mxu1  ;;  %v9497_v46 = vmax.f32 %v9369_v17, 0.0  ;;  %v13939_v13 = vadd.f32 %v13806_v23, %v13030_v43  ;;  %v9068_v39 = vpop.f32.mrb[119].mxu0 }
 0x5b6   : > { %v9496_v41 = vmax.f32 %v9368_v19, 0.0  ;;  %v13940_v40 = vadd.f32 %v9068_v39, %v5664_v44 }
 0x5b7   : > { %9626 = vst.msk [vmem:[%s19909_s20 + $0x3a8] sm:$0xff] %vm9508_vm3, %v9497_v46  ;;  %v9371_v50 = vadd.f32 %v20301_v57, %v13939_v13 }
 0x5b8   : > { %v13033_v45 = vpop.f32.mrb[120].mxu1  ;;  %9625 = vst.msk [vmem:[%s19909_s20 + $0x3a0] sm:$0xff] %vm9508_vm3, %v9496_v41  ;;  %v9370_v35 = vadd.f32 %v20301_v57, %v13940_v40  ;;  %v13809_v42 = vpop.f32.mrb[120].mxu0 }
 0x5b9   : > { %v5674_v7 = vpop.f32.mrb[121].mxu1  ;;  %v9499_v3 = vmax.f32 %v9371_v50, 0.0  ;;  %v13941_v2 = vadd.f32 %v13809_v42, %v13033_v45  ;;  %v9078_v47 = vpop.f32.mrb[121].mxu0 }
 0x5ba   : > { %v9498_v10 = vmax.f32 %v9370_v35, 0.0  ;;  %v13942_v14 = vadd.f32 %v9078_v47, %v5674_v7 }
 0x5bb   : > { %9628 = vst.msk [vmem:[%s19909_s20 + $0x3b8] sm:$0xff] %vm9508_vm3, %v9499_v3  ;;  %v9373_v56 = vadd.f32 %v20301_v57, %v13941_v2 }
 0x5bc   : > { %v13036_v30 = vpop.f32.mrb[122].mxu1  ;;  %9627 = vst.msk [vmem:[%s19909_s20 + $0x3b0] sm:$0xff] %vm9508_vm3, %v9498_v10  ;;  %v9372_v25 = vadd.f32 %v20301_v57, %v13942_v14  ;;  %v13812_v48 = vpop.f32.mrb[122].mxu0 }
 0x5bd   : > { %v5684_v53 = vpop.f32.mrb[123].mxu1  ;;  %v9501_v27 = vmax.f32 %v9373_v56, 0.0  ;;  %v13943_v61 = vadd.f32 %v13812_v48, %v13036_v30  ;;  %v9088_v22 = vpop.f32.mrb[123].mxu0 }
 0x5be   : > { %v9500_v60 = vmax.f32 %v9372_v25, 0.0  ;;  %v13944_v28 = vadd.f32 %v9088_v22, %v5684_v53 }
 0x5bf   : > { %9630 = vst.msk [vmem:[%s19909_s20 + $0x3c8] sm:$0xff] %vm9508_vm3, %v9501_v27  ;;  %v9375_v34 = vadd.f32 %v20301_v57, %v13943_v61 }
 0x5c0   : > { %v13039_v58 = vpop.f32.mrb[124].mxu1  ;;  %9629 = vst.msk [vmem:[%s19909_s20 + $0x3c0] sm:$0xff] %vm9508_vm3, %v9500_v60  ;;  %v9374_v31 = vadd.f32 %v20301_v57, %v13944_v28  ;;  %v13815_v1 = vpop.f32.mrb[124].mxu0 }
 0x5c1   : > { %v5694_v51 = vpop.f32.mrb[125].mxu1  ;;  %v9503_v5 = vmax.f32 %v9375_v34, 0.0  ;;  %v13945_v55 = vadd.f32 %v13815_v1, %v13039_v58  ;;  %v9098_v59 = vpop.f32.mrb[125].mxu0 }
 0x5c2   : > { %v9502_v21 = vmax.f32 %v9374_v31, 0.0  ;;  %v13946_v54 = vadd.f32 %v9098_v59, %v5694_v51 }
 0x5c3   : > { %9632 = vst.msk [vmem:[%s19909_s20 + $0x3d8] sm:$0xff] %vm9508_vm3, %v9503_v5  ;;  %v9377_v9 = vadd.f32 %v20301_v57, %v13945_v55 }
 0x5c4   : > { %v13042_v0 = vpop.f32.mrb[126].mxu1  ;;  %9631 = vst.msk [vmem:[%s19909_s20 + $0x3d0] sm:$0xff] %vm9508_vm3, %v9502_v21  ;;  %v9376_v32 = vadd.f32 %v20301_v57, %v13946_v54  ;;  %v13818_v33 = vpop.f32.mrb[126].mxu0 }
 0x5c5   : > { %v5704_v11 = vpop.f32.mrb[127].mxu1  ;;  %v9505_v4 = vmax.f32 %v9377_v9, 0.0  ;;  %v13947_v18 = vadd.f32 %v13818_v33, %v13042_v0  ;;  %v9108_v29 = vpop.f32.mrb[127].mxu0 }
 0x5c6   : > { %v9504_v52 = vmax.f32 %v9376_v32, 0.0  ;;  %v13948_v49 = vadd.f32 %v9108_v29, %v5704_v11 }
 0x5c7   : > { %9634 = vst.msk [vmem:[%s19909_s20 + $0x3e8] sm:$0xff] %vm9508_vm3, %v9505_v4  ;;  %v9379_v15 = vadd.f32 %v20301_v57, %v13947_v18 }
 0x5c8   : > { %9633 = vst.msk [vmem:[%s19909_s20 + $0x3e0] sm:$0xff] %vm9508_vm3, %v9504_v52  ;;  %v9378_v63 = vadd.f32 %v20301_v57, %v13948_v49 }
 0x5c9   : > { %v9507_v24 = vmax.f32 %v9379_v15, 0.0 }
 0x5ca   : > { %v9506_v6 = vmax.f32 %v9378_v63, 0.0 }
 0x5cb   : > { %9636 = vst.msk [vmem:[%s19909_s20 + $0x3f8] sm:$0xff] %vm9508_vm3, %v9507_v24 }
 0x5cc   : > { %9635 = vst.msk [vmem:[%s19909_s20 + $0x3f0] sm:$0xff] %vm9508_vm3, %v9506_v6 }
 0x5cd   : > { %15269 = shalt.err (!%p15266_p1)
}
 0x5ce   : > { %s15270_s17 = scalar_lea.hbm %s20429_s22, 16384  ;;  %s15274_s4 = scalar_lea.hbm %s20482_s3, 32768 }
 0x5cf   : > { %p15271_p13 = scmp.ne.s32.totalorder %s20429_s22, %s15270_s17  ;;  %p15275_p4 = scmp.lt.u32.totalorder %s20429_s22, %s20482_s3 }
 0x5d0   : > { %p15276_p5 = scmp.lt.u32.totalorder %s15274_s4, %s15270_s17  ;;  %p15278_p11 = scmp.lt.u32.totalorder %s15270_s17, %s20429_s22 }
 0x5d1   : > { %p15272_p6 = pnand %p15271_p13, %p21874_p0 }
 0x5d2   : > { %p15277_p8 = por %p15276_p5, %p15275_p4 }
 0x5d3   : > { %p15273_p10 = pneg %p15272_p6 }
 0x5d4   : > { %p15279_p2 = por %p15278_p11, %p15277_p8 }
 0x5d6   : > { %p15280_p3 = pnand %p15279_p2, %p15273_p10 }
 0x5d8   : > { %15283 = shalt.err (!%p15280_p3)
}
 0x5d9   : > { %s15334_s18 = smov 128   ;;  %s15335_s20 = smov 8  }
 0x5da   : > { %14858 = dma.vmem_to_hbm [thread:$0]  (%p21874_p0), %s20431_s8, 16384, %s20429_s22, %s9638_s16, %s15334_s18, %s15334_s18, %s15335_s20  }
 0x5db PF: > { %s9666_s7 = sand.u32 1, %s15314_s12   ;;  %p21875_p7 = scmp.ne.s32.totalorder %s21013_s19, 0 }
 0x5dc   : > { %p21876_p9 = scmp.ge.s32.totalorder %s15326_s15, 2  ;;  %s9667_s21 = scalar_lea.sflag [#allocation4], %s9666_s7 }
 0x5de   : > { %p14872_p12 = pnand %p21876_p9, %p21875_p7 }
 0x5e0   : > { %15309 = dma.done.wait (!%p14872_p12), %s9667_s21, 16384  }
 0x5e1   : > { %15311 = vsyncadd (!%p14872_p12), %s9667_s21, 4294950912  ;;  %p17_p1 = scmp.ge.s32.totalorder %s15470_s5, 4   ;;  %s21877_s12 = smov %s15318_s13 }
 0x5e2   : > { %s21878_s13 = smov %s15322_s14  ;;  %s21879_s14 = smov %s15486_s10 }
 0x5e3   : > { %s21880_s15 = smov %s15470_s5  ;;  %19 = sbr.rel (!%p17_p1) target bundleno = 6 (0x6), region = 93 }
 0x5ea   :  { %9672 = vsyncpa [#allocation3], 1 }
 0x5eb   :  { %9674 = vsyncpa [#allocation3 + $0x1], 1 }
 0x5ec   :  { %9675 = vsyncpa [#allocation6], 1 }
 0x5ed   :  { %9676 = vsyncpa [#allocation4], 1 }
 0x5ee   :  { %9678 = vsyncpa [#allocation4 + $0x1], 1 }

</bundles_post_ra>
